<compile_context>
chip_gen: v7x
topology: tpu7x:2x2x1
jax: 0.10.0
libtpu: 0.0.40
codegen_flags: <defaults>
</compile_context>

<pallas_src>
import functools

import jax
import jax.numpy as jnp
from jax import lax
from jax.experimental import pallas as pl
from jax.experimental.pallas import tpu as pltpu


def _round_up(x, m):
    return ((x + m - 1) // m) * m


def _pick_row_tile(h, max_tile=32):
    """Row-block height: a divisor of H, preferring multiples of 8 with >=2 blocks."""
    divisors = [t for t in range(1, min(h, max_tile) + 1) if h % t == 0]
    pref = [t for t in divisors if t % 8 == 0 and h // t >= 2]
    if pref:
        return max(pref)
    pref = [t for t in divisors if t % 8 == 0]
    if pref:
        return max(pref)
    pref = [t for t in divisors if h // t >= 2]
    if pref:
        return max(pref)
    return max(divisors)


# ---------------------------------------------------------------------------
# Fused ASPP kernel: 1x1 branch + 3 dilated 3x3 branches + projection
# ---------------------------------------------------------------------------
def _aspp_fused_kernel(x_ref, w0_ref, w3_ref, wproj_ref, s_ref, b_ref,
                       sproj_ref, beff_ref, o_ref, *, TH, W, d_max, rates):
    # x_ref:     (1, Hp, Wp, CP)  bf16   full padded image (resident across t)
    # w0_ref:    (CP, CPo)        bf16   1x1-conv weight
    # w3_ref:    (27, CP, CPo)    bf16   3 dilations x 9 taps of the 3x3 convs
    # wproj_ref: (4, CPo, CPo)    bf16   projection weight chunk per branch
    # s_ref/b_ref: (4, CPo)       f32    folded-BN scale / bias per branch
    # sproj_ref: (1, CPo)         f32    projection folded-BN scale
    # beff_ref:  (1, 1, CPo)      f32    per-image bias (proj bias + pooled branch)
    # o_ref:     (1, TH, W, CPo)  f32
    cp = x_ref.shape[-1]
    cpo = w0_ref.shape[-1]
    m = TH * W
    r0 = pl.multiple_of(pl.program_id(1) * TH, TH)

    def tap(row_off, col_off):
        # (TH, W, CP) window of the padded image -> (TH*W, CP) MXU LHS.
        p = x_ref[0, pl.ds(r0 + row_off, TH), col_off:col_off + W, :]
        return p.reshape(m, cp)

    # branch 0: 1x1 conv + folded-BN + ReLU; fold straight into the projection.
    y = jnp.dot(tap(d_max, d_max), w0_ref[...],
                preferred_element_type=jnp.float32)
    br = jnp.maximum(y * s_ref[0:1] + b_ref[0:1], 0.0)
    proj = jnp.dot(br.astype(jnp.bfloat16), wproj_ref[0],
                   preferred_element_type=jnp.float32)

    # branches 1..3: dilated 3x3 conv + folded-BN + ReLU, register accumulation.
    for i, d in enumerate(rates):
        off = d_max - d
        acc = None
        for ky in range(3):
            for kx in range(3):
                w_tap = w3_ref[(i * 3 + ky) * 3 + kx]
                t = jnp.dot(tap(off + ky * d, off + kx * d), w_tap,
                            preferred_element_type=jnp.float32)
                acc = t if acc is None else acc + t
        br = jnp.maximum(acc * s_ref[i + 1:i + 2] + b_ref[i + 1:i + 2], 0.0)
        proj = proj + jnp.dot(br.astype(jnp.bfloat16), wproj_ref[i + 1],
                              preferred_element_type=jnp.float32)

    # projection epilogue: folded BN (scale) + per-image bias (includes the
    # pooled branch) + ReLU. Dropout(0.5) == identity in eval mode.
    out = jnp.maximum(proj * sproj_ref[...] + beff_ref[0], 0.0)
    o_ref[0] = out.reshape(TH, W, cpo)


def _aspp_pallas(xp, q, bias_eff, rates, H, W, TH, d_max):
    N, Hp, Wp, CP = xp.shape
    CPo = q["w0"].shape[1]
    T = H // TH
    kernel = functools.partial(_aspp_fused_kernel, TH=TH, W=W, d_max=d_max,
                               rates=rates)

    # Rough per-step VMEM footprint (pipeline double-buffers everything);
    # explicit per-call limit, clamped to a value that is safe on v5e/v6e/v7x.
    bytes_in = (Hp * Wp * CP * 2 + 28 * CP * CPo * 2 + 4 * CPo * CPo * 2
                + (8 * CPo + 2 * CPo + CPo) * 4)
    bytes_out = TH * W * CPo * 4
    vmem_limit = int(min(max(2 * (bytes_in + bytes_out) + (4 << 20), 16 << 20),
                         48 << 20))

    return pl.pallas_call(
        kernel,
        out_shape=jax.ShapeDtypeStruct((N, H, W, CPo), jnp.float32),
        grid=(N, T),
        in_specs=[
            pl.BlockSpec((1, Hp, Wp, CP), lambda n, t: (n, 0, 0, 0)),
            pl.BlockSpec((CP, CPo), lambda n, t: (0, 0)),
            pl.BlockSpec((27, CP, CPo), lambda n, t: (0, 0, 0)),
            pl.BlockSpec((4, CPo, CPo), lambda n, t: (0, 0, 0)),
            pl.BlockSpec((4, CPo), lambda n, t: (0, 0)),
            pl.BlockSpec((4, CPo), lambda n, t: (0, 0)),
            pl.BlockSpec((1, CPo), lambda n, t: (0, 0)),
            pl.BlockSpec((1, 1, CPo), lambda n, t: (n, 0, 0)),
        ],
        out_specs=pl.BlockSpec((1, TH, W, CPo), lambda n, t: (n, t, 0, 0)),
        compiler_params=pltpu.CompilerParams(
            dimension_semantics=("parallel", "parallel"),
            vmem_limit_bytes=vmem_limit),
    )(xp, q["w0"], q["w3"], q["wproj"], q["scale"], q["bias"],
      q["sproj"], bias_eff)


# ---------------------------------------------------------------------------
# Parameters (deterministic, synthetic), BN folding, channel padding / packing
# ---------------------------------------------------------------------------
def _fold_bn(gamma, beta, mean, var, eps=1e-5):
    s = gamma / jnp.sqrt(var + eps)
    return s, beta - mean * s


def init_params(key, in_channels, out_channels):
    keys = jax.random.split(key, 16)

    def make_bn(kk, C):
        k1, k2, k3, k4 = jax.random.split(kk, 4)
        gamma = 0.5 + jax.random.uniform(k1, (C,), jnp.float32)
        beta = 0.1 * jax.random.normal(k2, (C,), jnp.float32)
        mean = 0.1 * jax.random.normal(k3, (C,), jnp.float32)
        var = 0.5 + jax.random.uniform(k4, (C,), jnp.float32)
        return _fold_bn(gamma, beta, mean, var)

    p = {}
    p["w0"] = 0.1 * jax.random.normal(keys[0], (in_channels, out_channels), jnp.float32)
    p["s0"], p["b0"] = make_bn(keys[1], out_channels)
    for i in range(3):
        p[f"w{i+1}"] = 0.1 * jax.random.normal(
            keys[2 + 2 * i], (3, 3, in_channels, out_channels), jnp.float32)
        p[f"s{i+1}"], p[f"b{i+1}"] = make_bn(keys[3 + 2 * i], out_channels)
    p["wp"] = 0.1 * jax.random.normal(keys[8], (in_channels, out_channels), jnp.float32)
    p["sp"], p["bp"] = make_bn(keys[9], out_channels)
    p["wproj"] = 0.1 * jax.random.normal(
        keys[10], (5 * out_channels, out_channels), jnp.float32)
    p["sproj"], p["bproj"] = make_bn(keys[11], out_channels)
    return p


def prepare_kernel_params(p, in_channels, out_channels):
    """Pad channels to multiples of 128 (lane-dense), cast matmul weights to bf16."""
    CP = _round_up(in_channels, 128)
    CPo = _round_up(out_channels, 128)

    def pad2(a, r, c):
        return jnp.pad(a, ((0, r - a.shape[0]), (0, c - a.shape[1])))

    def padc(a):  # (C,) -> (1, CPo)
        return jnp.pad(a, (0, CPo - a.shape[0])).reshape(1, CPo)

    q = {}
    q["w0"] = pad2(p["w0"], CP, CPo).astype(jnp.bfloat16)
    taps = []
    for i in range(3):
        w = p[f"w{i+1}"]
        w = jnp.pad(w, ((0, 0), (0, 0), (0, CP - w.shape[2]), (0, CPo - w.shape[3])))
        taps.append(w.reshape(9, CP, CPo))
    q["w3"] = jnp.concatenate(taps, axis=0).astype(jnp.bfloat16)       # (27, CP, CPo)
    q["scale"] = jnp.concatenate([padc(p[f"s{i}"]) for i in range(4)], axis=0)
    q["bias"] = jnp.concatenate([padc(p[f"b{i}"]) for i in range(4)], axis=0)

    chunks = [p["wproj"][k * out_channels:(k + 1) * out_channels] for k in range(5)]
    q["wproj"] = jnp.stack(
        [pad2(c, CPo, CPo) for c in chunks[:4]]).astype(jnp.bfloat16)  # (4, CPo, CPo)
    q["wproj4"] = pad2(chunks[4], CPo, CPo)                            # f32, wrapper-side
    q["sproj"], q["bproj"] = padc(p["sproj"]), padc(p["bproj"])

    # pooling branch stays in f32 on the wrapper side (tiny)
    q["wp"] = pad2(p["wp"], CP, CPo)
    q["sp"], q["bp"] = padc(p["sp"]), padc(p["bp"])
    return q


# ---------------------------------------------------------------------------
# ASPP forward
# ---------------------------------------------------------------------------
def aspp_forward(x_nchw, q, rates, out_channels):
    N, Cin, H, W = x_nchw.shape
    CP, CPo = q["w0"].shape
    d_max = int(max(rates))
    TH = _pick_row_tile(H)

    x = jnp.transpose(x_nchw, (0, 2, 3, 1))                          # NHWC f32

    # Pooled branch (tiny): global mean -> 1x1 conv -> BN -> ReLU; folded into a
    # per-image effective projection bias so it is never broadcast over HxW.
    mean = jnp.pad(jnp.mean(x, axis=(1, 2)), ((0, 0), (0, CP - Cin)))  # (N, CP)
    pool = jnp.maximum(
        jnp.dot(mean, q["wp"], precision=lax.Precision.HIGHEST) * q["sp"] + q["bp"],
        0.0)                                                           # (N, CPo)
    bias_eff = q["bproj"] + q["sproj"] * jnp.dot(
        pool, q["wproj4"], precision=lax.Precision.HIGHEST)           # (N, CPo)
    bias_eff = bias_eff.reshape(N, 1, CPo)

    # Single HBM activation tensor: channel pad + spatial halo (d_max), bf16.
    xp = jnp.pad(x, ((0, 0), (d_max, d_max), (d_max, d_max),
                     (0, CP - Cin))).astype(jnp.bfloat16)

    out = _aspp_pallas(xp, q, bias_eff, tuple(int(r) for r in rates),
                       H, W, TH, d_max)
    out = out[..., :out_channels]
    return jnp.transpose(out, (0, 3, 1, 2))                           # back to NCHW


# ---------------------------------------------------------------------------
# Pure-JAX reference (correctness check only)
# ---------------------------------------------------------------------------
def aspp_reference(x_nchw, params, rates):
    x = jnp.transpose(x_nchw, (0, 2, 3, 1))
    dn = ("NHWC", "HWIO", "NHWC")

    def bnrelu(y, s, b):
        return jnp.maximum(y * s.reshape(1, 1, 1, -1) + b.reshape(1, 1, 1, -1), 0.0)

    outs = []
    w0 = params["w0"].reshape(1, 1, *params["w0"].shape)
    outs.append(bnrelu(
        lax.conv_general_dilated(x, w0, (1, 1), "VALID", dimension_numbers=dn),
        params["s0"], params["b0"]))
    for i, d in enumerate(rates):
        y = lax.conv_general_dilated(
            x, params[f"w{i+1}"], (1, 1), [(d, d), (d, d)],
            rhs_dilation=(d, d), dimension_numbers=dn)
        outs.append(bnrelu(y, params[f"s{i+1}"], params[f"b{i+1}"]))
    m = jnp.mean(x, axis=(1, 2), keepdims=True)
    wp = params["wp"].reshape(1, 1, *params["wp"].shape)
    yp = bnrelu(lax.conv_general_dilated(m, wp, (1, 1), "VALID", dimension_numbers=dn),
                params["sp"], params["bp"])
    outs.append(jnp.broadcast_to(yp, x.shape[:3] + (yp.shape[-1],)))
    cat = jnp.concatenate(outs, axis=-1)
    wpr = params["wproj"].reshape(1, 1, *params["wproj"].shape)
    out = bnrelu(lax.conv_general_dilated(cat, wpr, (1, 1), "VALID", dimension_numbers=dn),
                 params["sproj"], params["bproj"])
    return jnp.transpose(out, (0, 3, 1, 2))


if __name__ == "__main__":
    key = jax.random.PRNGKey(0)
    k_x, k_p = jax.random.split(key)

    N, Cin, H, W = 2, 8, 16, 16
    Cout = 8
    rates = (3, 5, 7)

    params = init_params(k_p, Cin, Cout)
    kparams = prepare_kernel_params(params, Cin, Cout)
    x = jax.random.normal(k_x, (N, Cin, H, W), jnp.float32)

    fwd = jax.jit(functools.partial(aspp_forward, rates=rates, out_channels=Cout))
    out = jax.block_until_ready(fwd(x, kparams))
    ref = jax.block_until_ready(aspp_reference(x, params, rates))

    assert out.shape == (N, Cout, H, W), out.shape
    err = float(jnp.max(jnp.abs(out - ref)))
    # bf16 matmuls with f32 accumulation -> looser tolerance than the pure-f32 path
    assert jnp.allclose(out, ref, rtol=5e-2, atol=5e-2), err
    print("KERNEL_OK")
</pallas_src>

<mosaic_0001>
module attributes {stable_mosaic.version = 11 : i64} {
  func.func @_aspp_fused_kernel(%arg0: i32, %arg1: i32, %arg2: memref<1x30x30x128xbf16, #tpu.memory_space<vmem>>, %arg3: memref<128x128xbf16, #tpu.memory_space<vmem>>, %arg4: memref<27x128x128xbf16, #tpu.memory_space<vmem>>, %arg5: memref<4x128x128xbf16, #tpu.memory_space<vmem>>, %arg6: memref<4x128xf32, #tpu.memory_space<vmem>>, %arg7: memref<4x128xf32, #tpu.memory_space<vmem>>, %arg8: memref<1x128xf32, #tpu.memory_space<vmem>>, %arg9: memref<1x1x128xf32, #tpu.memory_space<vmem>>, %arg10: memref<1x8x16x128xf32, #tpu.memory_space<vmem>>) attributes {dimension_semantics = [#tpu.dimension_semantics<parallel>, #tpu.dimension_semantics<parallel>], iteration_bounds = array<i64: 2, 2>, scalar_prefetch = 0 : i64, scratch_operands = 0 : i64, tpu.core_type = #tpu.core_type<tc>, window_params = [{transform_indices = @transform_0, window_bounds = array<i64: 1, 30, 30, 128>}, {pipeline_mode = #tpu.pipeline_mode<synchronous>, transform_indices = @transform_1, window_bounds = array<i64: 128, 128>}, {pipeline_mode = #tpu.pipeline_mode<synchronous>, transform_indices = @transform_2, window_bounds = array<i64: 27, 128, 128>}, {pipeline_mode = #tpu.pipeline_mode<synchronous>, transform_indices = @transform_3, window_bounds = array<i64: 4, 128, 128>}, {pipeline_mode = #tpu.pipeline_mode<synchronous>, transform_indices = @transform_4, window_bounds = array<i64: 4, 128>}, {pipeline_mode = #tpu.pipeline_mode<synchronous>, transform_indices = @transform_5, window_bounds = array<i64: 4, 128>}, {pipeline_mode = #tpu.pipeline_mode<synchronous>, transform_indices = @transform_6, window_bounds = array<i64: 1, 128>}, {transform_indices = @transform_7, window_bounds = array<i64: 1, 1, 128>}, {transform_indices = @transform_8, window_bounds = array<i64: 1, 8, 16, 128>}]} {
    %c8_i32 = arith.constant 8 : i32
    %0 = arith.muli %arg1, %c8_i32 : i32
    %1 = tpu.assume_multiple %0, 8 : i32
    %c7_i32 = arith.constant 7 : i32
    %2 = arith.addi %1, %c7_i32 : i32
    %c0 = arith.constant 0 : index
    %3 = arith.index_cast %2 : i32 to index
    %c7 = arith.constant 7 : index
    %c0_0 = arith.constant 0 : index
    %4 = vector.load %arg2[%c0, %3, %c7, %c0_0] : memref<1x30x30x128xbf16, #tpu.memory_space<vmem>>, vector<1x8x16x128xbf16>
    %5 = vector.shape_cast %4 : vector<1x8x16x128xbf16> to vector<8x16x128xbf16>
    %6 = vector.shape_cast %5 : vector<8x16x128xbf16> to vector<128x128xbf16>
    %c0_1 = arith.constant 0 : index
    %c0_2 = arith.constant 0 : index
    %7 = vector.load %arg3[%c0_1, %c0_2] : memref<128x128xbf16, #tpu.memory_space<vmem>>, vector<128x128xbf16>
    %cst = arith.constant dense<0.000000e+00> : vector<128x128xf32>
    %8 = tpu.matmul %6, %7, %cst {dimension_numbers = #tpu.dot_dimension_numbers<[1], [0], [0], [1], [0, 0, 1, 1], [], []>} : vector<128x128xbf16>, vector<128x128xbf16>, vector<128x128xf32> -> vector<128x128xf32>
    %c0_3 = arith.constant 0 : index
    %c0_4 = arith.constant 0 : index
    %9 = vector.load %arg6[%c0_3, %c0_4] : memref<4x128xf32, #tpu.memory_space<vmem>>, vector<1x128xf32>
    %10 = vector.broadcast %9 : vector<1x128xf32> to vector<128x128xf32>
    %11 = arith.mulf %8, %10 : vector<128x128xf32>
    %c0_5 = arith.constant 0 : index
    %c0_6 = arith.constant 0 : index
    %12 = vector.load %arg7[%c0_5, %c0_6] : memref<4x128xf32, #tpu.memory_space<vmem>>, vector<1x128xf32>
    %13 = vector.broadcast %12 : vector<1x128xf32> to vector<128x128xf32>
    %14 = arith.addf %11, %13 : vector<128x128xf32>
    %cst_7 = arith.constant 0.000000e+00 : f32
    %15 = vector.broadcast %cst_7 : f32 to vector<128x128xf32>
    %16 = arith.maximumf %14, %15 : vector<128x128xf32>
    %17 = arith.truncf %16 : vector<128x128xf32> to vector<128x128xbf16>
    %c0_8 = arith.constant 0 : index
    %c0_9 = arith.constant 0 : index
    %c0_10 = arith.constant 0 : index
    %18 = vector.load %arg5[%c0_8, %c0_9, %c0_10] : memref<4x128x128xbf16, #tpu.memory_space<vmem>>, vector<1x128x128xbf16>
    %19 = vector.shape_cast %18 : vector<1x128x128xbf16> to vector<128x128xbf16>
    %cst_11 = arith.constant dense<0.000000e+00> : vector<128x128xf32>
    %20 = tpu.matmul %17, %19, %cst_11 {dimension_numbers = #tpu.dot_dimension_numbers<[1], [0], [0], [1], [0, 0, 1, 1], [], []>} : vector<128x128xbf16>, vector<128x128xbf16>, vector<128x128xf32> -> vector<128x128xf32>
    %c0_12 = arith.constant 0 : index
    %c0_13 = arith.constant 0 : index
    %c0_14 = arith.constant 0 : index
    %21 = vector.load %arg4[%c0_12, %c0_13, %c0_14] : memref<27x128x128xbf16, #tpu.memory_space<vmem>>, vector<1x128x128xbf16>
    %22 = vector.shape_cast %21 : vector<1x128x128xbf16> to vector<128x128xbf16>
    %c4_i32 = arith.constant 4 : i32
    %23 = arith.addi %1, %c4_i32 : i32
    %c0_15 = arith.constant 0 : index
    %24 = arith.index_cast %23 : i32 to index
    %c4 = arith.constant 4 : index
    %c0_16 = arith.constant 0 : index
    %25 = vector.load %arg2[%c0_15, %24, %c4, %c0_16] : memref<1x30x30x128xbf16, #tpu.memory_space<vmem>>, vector<1x8x16x128xbf16>
    %26 = vector.shape_cast %25 : vector<1x8x16x128xbf16> to vector<8x16x128xbf16>
    %27 = vector.shape_cast %26 : vector<8x16x128xbf16> to vector<128x128xbf16>
    %cst_17 = arith.constant dense<0.000000e+00> : vector<128x128xf32>
    %28 = tpu.matmul %27, %22, %cst_17 {dimension_numbers = #tpu.dot_dimension_numbers<[1], [0], [0], [1], [0, 0, 1, 1], [], []>} : vector<128x128xbf16>, vector<128x128xbf16>, vector<128x128xf32> -> vector<128x128xf32>
    %c1 = arith.constant 1 : index
    %c0_18 = arith.constant 0 : index
    %c0_19 = arith.constant 0 : index
    %29 = vector.load %arg4[%c1, %c0_18, %c0_19] : memref<27x128x128xbf16, #tpu.memory_space<vmem>>, vector<1x128x128xbf16>
    %30 = vector.shape_cast %29 : vector<1x128x128xbf16> to vector<128x128xbf16>
    %c4_i32_20 = arith.constant 4 : i32
    %31 = arith.addi %1, %c4_i32_20 : i32
    %c0_21 = arith.constant 0 : index
    %32 = arith.index_cast %31 : i32 to index
    %c7_22 = arith.constant 7 : index
    %c0_23 = arith.constant 0 : index
    %33 = vector.load %arg2[%c0_21, %32, %c7_22, %c0_23] : memref<1x30x30x128xbf16, #tpu.memory_space<vmem>>, vector<1x8x16x128xbf16>
    %34 = vector.shape_cast %33 : vector<1x8x16x128xbf16> to vector<8x16x128xbf16>
    %35 = vector.shape_cast %34 : vector<8x16x128xbf16> to vector<128x128xbf16>
    %cst_24 = arith.constant dense<0.000000e+00> : vector<128x128xf32>
    %36 = tpu.matmul %35, %30, %cst_24 {dimension_numbers = #tpu.dot_dimension_numbers<[1], [0], [0], [1], [0, 0, 1, 1], [], []>} : vector<128x128xbf16>, vector<128x128xbf16>, vector<128x128xf32> -> vector<128x128xf32>
    %37 = arith.addf %28, %36 : vector<128x128xf32>
    %c2 = arith.constant 2 : index
    %c0_25 = arith.constant 0 : index
    %c0_26 = arith.constant 0 : index
    %38 = vector.load %arg4[%c2, %c0_25, %c0_26] : memref<27x128x128xbf16, #tpu.memory_space<vmem>>, vector<1x128x128xbf16>
    %39 = vector.shape_cast %38 : vector<1x128x128xbf16> to vector<128x128xbf16>
    %c4_i32_27 = arith.constant 4 : i32
    %40 = arith.addi %1, %c4_i32_27 : i32
    %c0_28 = arith.constant 0 : index
    %41 = arith.index_cast %40 : i32 to index
    %c10 = arith.constant 10 : index
    %c0_29 = arith.constant 0 : index
    %42 = vector.load %arg2[%c0_28, %41, %c10, %c0_29] : memref<1x30x30x128xbf16, #tpu.memory_space<vmem>>, vector<1x8x16x128xbf16>
    %43 = vector.shape_cast %42 : vector<1x8x16x128xbf16> to vector<8x16x128xbf16>
    %44 = vector.shape_cast %43 : vector<8x16x128xbf16> to vector<128x128xbf16>
    %cst_30 = arith.constant dense<0.000000e+00> : vector<128x128xf32>
    %45 = tpu.matmul %44, %39, %cst_30 {dimension_numbers = #tpu.dot_dimension_numbers<[1], [0], [0], [1], [0, 0, 1, 1], [], []>} : vector<128x128xbf16>, vector<128x128xbf16>, vector<128x128xf32> -> vector<128x128xf32>
    %46 = arith.addf %37, %45 : vector<128x128xf32>
    %c3 = arith.constant 3 : index
    %c0_31 = arith.constant 0 : index
    %c0_32 = arith.constant 0 : index
    %47 = vector.load %arg4[%c3, %c0_31, %c0_32] : memref<27x128x128xbf16, #tpu.memory_space<vmem>>, vector<1x128x128xbf16>
    %48 = vector.shape_cast %47 : vector<1x128x128xbf16> to vector<128x128xbf16>
    %c7_i32_33 = arith.constant 7 : i32
    %49 = arith.addi %1, %c7_i32_33 : i32
    %c0_34 = arith.constant 0 : index
    %50 = arith.index_cast %49 : i32 to index
    %c4_35 = arith.constant 4 : index
    %c0_36 = arith.constant 0 : index
    %51 = vector.load %arg2[%c0_34, %50, %c4_35, %c0_36] : memref<1x30x30x128xbf16, #tpu.memory_space<vmem>>, vector<1x8x16x128xbf16>
    %52 = vector.shape_cast %51 : vector<1x8x16x128xbf16> to vector<8x16x128xbf16>
    %53 = vector.shape_cast %52 : vector<8x16x128xbf16> to vector<128x128xbf16>
    %cst_37 = arith.constant dense<0.000000e+00> : vector<128x128xf32>
    %54 = tpu.matmul %53, %48, %cst_37 {dimension_numbers = #tpu.dot_dimension_numbers<[1], [0], [0], [1], [0, 0, 1, 1], [], []>} : vector<128x128xbf16>, vector<128x128xbf16>, vector<128x128xf32> -> vector<128x128xf32>
    %55 = arith.addf %46, %54 : vector<128x128xf32>
    %c4_38 = arith.constant 4 : index
    %c0_39 = arith.constant 0 : index
    %c0_40 = arith.constant 0 : index
    %56 = vector.load %arg4[%c4_38, %c0_39, %c0_40] : memref<27x128x128xbf16, #tpu.memory_space<vmem>>, vector<1x128x128xbf16>
    %57 = vector.shape_cast %56 : vector<1x128x128xbf16> to vector<128x128xbf16>
    %c7_i32_41 = arith.constant 7 : i32
    %58 = arith.addi %1, %c7_i32_41 : i32
    %c0_42 = arith.constant 0 : index
    %59 = arith.index_cast %58 : i32 to index
    %c7_43 = arith.constant 7 : index
    %c0_44 = arith.constant 0 : index
    %60 = vector.load %arg2[%c0_42, %59, %c7_43, %c0_44] : memref<1x30x30x128xbf16, #tpu.memory_space<vmem>>, vector<1x8x16x128xbf16>
    %61 = vector.shape_cast %60 : vector<1x8x16x128xbf16> to vector<8x16x128xbf16>
    %62 = vector.shape_cast %61 : vector<8x16x128xbf16> to vector<128x128xbf16>
    %cst_45 = arith.constant dense<0.000000e+00> : vector<128x128xf32>
    %63 = tpu.matmul %62, %57, %cst_45 {dimension_numbers = #tpu.dot_dimension_numbers<[1], [0], [0], [1], [0, 0, 1, 1], [], []>} : vector<128x128xbf16>, vector<128x128xbf16>, vector<128x128xf32> -> vector<128x128xf32>
    %64 = arith.addf %55, %63 : vector<128x128xf32>
    %c5 = arith.constant 5 : index
    %c0_46 = arith.constant 0 : index
    %c0_47 = arith.constant 0 : index
    %65 = vector.load %arg4[%c5, %c0_46, %c0_47] : memref<27x128x128xbf16, #tpu.memory_space<vmem>>, vector<1x128x128xbf16>
    %66 = vector.shape_cast %65 : vector<1x128x128xbf16> to vector<128x128xbf16>
    %c7_i32_48 = arith.constant 7 : i32
    %67 = arith.addi %1, %c7_i32_48 : i32
    %c0_49 = arith.constant 0 : index
    %68 = arith.index_cast %67 : i32 to index
    %c10_50 = arith.constant 10 : index
    %c0_51 = arith.constant 0 : index
    %69 = vector.load %arg2[%c0_49, %68, %c10_50, %c0_51] : memref<1x30x30x128xbf16, #tpu.memory_space<vmem>>, vector<1x8x16x128xbf16>
    %70 = vector.shape_cast %69 : vector<1x8x16x128xbf16> to vector<8x16x128xbf16>
    %71 = vector.shape_cast %70 : vector<8x16x128xbf16> to vector<128x128xbf16>
    %cst_52 = arith.constant dense<0.000000e+00> : vector<128x128xf32>
    %72 = tpu.matmul %71, %66, %cst_52 {dimension_numbers = #tpu.dot_dimension_numbers<[1], [0], [0], [1], [0, 0, 1, 1], [], []>} : vector<128x128xbf16>, vector<128x128xbf16>, vector<128x128xf32> -> vector<128x128xf32>
    %73 = arith.addf %64, %72 : vector<128x128xf32>
    %c6 = arith.constant 6 : index
    %c0_53 = arith.constant 0 : index
    %c0_54 = arith.constant 0 : index
    %74 = vector.load %arg4[%c6, %c0_53, %c0_54] : memref<27x128x128xbf16, #tpu.memory_space<vmem>>, vector<1x128x128xbf16>
    %75 = vector.shape_cast %74 : vector<1x128x128xbf16> to vector<128x128xbf16>
    %c10_i32 = arith.constant 10 : i32
    %76 = arith.addi %1, %c10_i32 : i32
    %c0_55 = arith.constant 0 : index
    %77 = arith.index_cast %76 : i32 to index
    %c4_56 = arith.constant 4 : index
    %c0_57 = arith.constant 0 : index
    %78 = vector.load %arg2[%c0_55, %77, %c4_56, %c0_57] : memref<1x30x30x128xbf16, #tpu.memory_space<vmem>>, vector<1x8x16x128xbf16>
    %79 = vector.shape_cast %78 : vector<1x8x16x128xbf16> to vector<8x16x128xbf16>
    %80 = vector.shape_cast %79 : vector<8x16x128xbf16> to vector<128x128xbf16>
    %cst_58 = arith.constant dense<0.000000e+00> : vector<128x128xf32>
    %81 = tpu.matmul %80, %75, %cst_58 {dimension_numbers = #tpu.dot_dimension_numbers<[1], [0], [0], [1], [0, 0, 1, 1], [], []>} : vector<128x128xbf16>, vector<128x128xbf16>, vector<128x128xf32> -> vector<128x128xf32>
    %82 = arith.addf %73, %81 : vector<128x128xf32>
    %c7_59 = arith.constant 7 : index
    %c0_60 = arith.constant 0 : index
    %c0_61 = arith.constant 0 : index
    %83 = vector.load %arg4[%c7_59, %c0_60, %c0_61] : memref<27x128x128xbf16, #tpu.memory_space<vmem>>, vector<1x128x128xbf16>
    %84 = vector.shape_cast %83 : vector<1x128x128xbf16> to vector<128x128xbf16>
    %c10_i32_62 = arith.constant 10 : i32
    %85 = arith.addi %1, %c10_i32_62 : i32
    %c0_63 = arith.constant 0 : index
    %86 = arith.index_cast %85 : i32 to index
    %c7_64 = arith.constant 7 : index
    %c0_65 = arith.constant 0 : index
    %87 = vector.load %arg2[%c0_63, %86, %c7_64, %c0_65] : memref<1x30x30x128xbf16, #tpu.memory_space<vmem>>, vector<1x8x16x128xbf16>
    %88 = vector.shape_cast %87 : vector<1x8x16x128xbf16> to vector<8x16x128xbf16>
    %89 = vector.shape_cast %88 : vector<8x16x128xbf16> to vector<128x128xbf16>
    %cst_66 = arith.constant dense<0.000000e+00> : vector<128x128xf32>
    %90 = tpu.matmul %89, %84, %cst_66 {dimension_numbers = #tpu.dot_dimension_numbers<[1], [0], [0], [1], [0, 0, 1, 1], [], []>} : vector<128x128xbf16>, vector<128x128xbf16>, vector<128x128xf32> -> vector<128x128xf32>
    %91 = arith.addf %82, %90 : vector<128x128xf32>
    %c8 = arith.constant 8 : index
    %c0_67 = arith.constant 0 : index
    %c0_68 = arith.constant 0 : index
    %92 = vector.load %arg4[%c8, %c0_67, %c0_68] : memref<27x128x128xbf16, #tpu.memory_space<vmem>>, vector<1x128x128xbf16>
    %93 = vector.shape_cast %92 : vector<1x128x128xbf16> to vector<128x128xbf16>
    %c10_i32_69 = arith.constant 10 : i32
    %94 = arith.addi %1, %c10_i32_69 : i32
    %c0_70 = arith.constant 0 : index
    %95 = arith.index_cast %94 : i32 to index
    %c10_71 = arith.constant 10 : index
    %c0_72 = arith.constant 0 : index
    %96 = vector.load %arg2[%c0_70, %95, %c10_71, %c0_72] : memref<1x30x30x128xbf16, #tpu.memory_space<vmem>>, vector<1x8x16x128xbf16>
    %97 = vector.shape_cast %96 : vector<1x8x16x128xbf16> to vector<8x16x128xbf16>
    %98 = vector.shape_cast %97 : vector<8x16x128xbf16> to vector<128x128xbf16>
    %cst_73 = arith.constant dense<0.000000e+00> : vector<128x128xf32>
    %99 = tpu.matmul %98, %93, %cst_73 {dimension_numbers = #tpu.dot_dimension_numbers<[1], [0], [0], [1], [0, 0, 1, 1], [], []>} : vector<128x128xbf16>, vector<128x128xbf16>, vector<128x128xf32> -> vector<128x128xf32>
    %100 = arith.addf %91, %99 : vector<128x128xf32>
    %c1_74 = arith.constant 1 : index
    %c0_75 = arith.constant 0 : index
    %101 = vector.load %arg6[%c1_74, %c0_75] : memref<4x128xf32, #tpu.memory_space<vmem>>, vector<1x128xf32>
    %102 = vector.broadcast %101 : vector<1x128xf32> to vector<128x128xf32>
    %103 = arith.mulf %100, %102 : vector<128x128xf32>
    %c1_76 = arith.constant 1 : index
    %c0_77 = arith.constant 0 : index
    %104 = vector.load %arg7[%c1_76, %c0_77] : memref<4x128xf32, #tpu.memory_space<vmem>>, vector<1x128xf32>
    %105 = vector.broadcast %104 : vector<1x128xf32> to vector<128x128xf32>
    %106 = arith.addf %103, %105 : vector<128x128xf32>
    %cst_78 = arith.constant 0.000000e+00 : f32
    %107 = vector.broadcast %cst_78 : f32 to vector<128x128xf32>
    %108 = arith.maximumf %106, %107 : vector<128x128xf32>
    %109 = arith.truncf %108 : vector<128x128xf32> to vector<128x128xbf16>
    %c1_79 = arith.constant 1 : index
    %c0_80 = arith.constant 0 : index
    %c0_81 = arith.constant 0 : index
    %110 = vector.load %arg5[%c1_79, %c0_80, %c0_81] : memref<4x128x128xbf16, #tpu.memory_space<vmem>>, vector<1x128x128xbf16>
    %111 = vector.shape_cast %110 : vector<1x128x128xbf16> to vector<128x128xbf16>
    %cst_82 = arith.constant dense<0.000000e+00> : vector<128x128xf32>
    %112 = tpu.matmul %109, %111, %cst_82 {dimension_numbers = #tpu.dot_dimension_numbers<[1], [0], [0], [1], [0, 0, 1, 1], [], []>} : vector<128x128xbf16>, vector<128x128xbf16>, vector<128x128xf32> -> vector<128x128xf32>
    %113 = arith.addf %20, %112 : vector<128x128xf32>
    %c9 = arith.constant 9 : index
    %c0_83 = arith.constant 0 : index
    %c0_84 = arith.constant 0 : index
    %114 = vector.load %arg4[%c9, %c0_83, %c0_84] : memref<27x128x128xbf16, #tpu.memory_space<vmem>>, vector<1x128x128xbf16>
    %115 = vector.shape_cast %114 : vector<1x128x128xbf16> to vector<128x128xbf16>
    %c2_i32 = arith.constant 2 : i32
    %116 = arith.addi %1, %c2_i32 : i32
    %c0_85 = arith.constant 0 : index
    %117 = arith.index_cast %116 : i32 to index
    %c2_86 = arith.constant 2 : index
    %c0_87 = arith.constant 0 : index
    %118 = vector.load %arg2[%c0_85, %117, %c2_86, %c0_87] : memref<1x30x30x128xbf16, #tpu.memory_space<vmem>>, vector<1x8x16x128xbf16>
    %119 = vector.shape_cast %118 : vector<1x8x16x128xbf16> to vector<8x16x128xbf16>
    %120 = vector.shape_cast %119 : vector<8x16x128xbf16> to vector<128x128xbf16>
    %cst_88 = arith.constant dense<0.000000e+00> : vector<128x128xf32>
    %121 = tpu.matmul %120, %115, %cst_88 {dimension_numbers = #tpu.dot_dimension_numbers<[1], [0], [0], [1], [0, 0, 1, 1], [], []>} : vector<128x128xbf16>, vector<128x128xbf16>, vector<128x128xf32> -> vector<128x128xf32>
    %c10_89 = arith.constant 10 : index
    %c0_90 = arith.constant 0 : index
    %c0_91 = arith.constant 0 : index
    %122 = vector.load %arg4[%c10_89, %c0_90, %c0_91] : memref<27x128x128xbf16, #tpu.memory_space<vmem>>, vector<1x128x128xbf16>
    %123 = vector.shape_cast %122 : vector<1x128x128xbf16> to vector<128x128xbf16>
    %c2_i32_92 = arith.constant 2 : i32
    %124 = arith.addi %1, %c2_i32_92 : i32
    %c0_93 = arith.constant 0 : index
    %125 = arith.index_cast %124 : i32 to index
    %c7_94 = arith.constant 7 : index
    %c0_95 = arith.constant 0 : index
    %126 = vector.load %arg2[%c0_93, %125, %c7_94, %c0_95] : memref<1x30x30x128xbf16, #tpu.memory_space<vmem>>, vector<1x8x16x128xbf16>
    %127 = vector.shape_cast %126 : vector<1x8x16x128xbf16> to vector<8x16x128xbf16>
    %128 = vector.shape_cast %127 : vector<8x16x128xbf16> to vector<128x128xbf16>
    %cst_96 = arith.constant dense<0.000000e+00> : vector<128x128xf32>
    %129 = tpu.matmul %128, %123, %cst_96 {dimension_numbers = #tpu.dot_dimension_numbers<[1], [0], [0], [1], [0, 0, 1, 1], [], []>} : vector<128x128xbf16>, vector<128x128xbf16>, vector<128x128xf32> -> vector<128x128xf32>
    %130 = arith.addf %121, %129 : vector<128x128xf32>
    %c11 = arith.constant 11 : index
    %c0_97 = arith.constant 0 : index
    %c0_98 = arith.constant 0 : index
    %131 = vector.load %arg4[%c11, %c0_97, %c0_98] : memref<27x128x128xbf16, #tpu.memory_space<vmem>>, vector<1x128x128xbf16>
    %132 = vector.shape_cast %131 : vector<1x128x128xbf16> to vector<128x128xbf16>
    %c2_i32_99 = arith.constant 2 : i32
    %133 = arith.addi %1, %c2_i32_99 : i32
    %c0_100 = arith.constant 0 : index
    %134 = arith.index_cast %133 : i32 to index
    %c12 = arith.constant 12 : index
    %c0_101 = arith.constant 0 : index
    %135 = vector.load %arg2[%c0_100, %134, %c12, %c0_101] : memref<1x30x30x128xbf16, #tpu.memory_space<vmem>>, vector<1x8x16x128xbf16>
    %136 = vector.shape_cast %135 : vector<1x8x16x128xbf16> to vector<8x16x128xbf16>
    %137 = vector.shape_cast %136 : vector<8x16x128xbf16> to vector<128x128xbf16>
    %cst_102 = arith.constant dense<0.000000e+00> : vector<128x128xf32>
    %138 = tpu.matmul %137, %132, %cst_102 {dimension_numbers = #tpu.dot_dimension_numbers<[1], [0], [0], [1], [0, 0, 1, 1], [], []>} : vector<128x128xbf16>, vector<128x128xbf16>, vector<128x128xf32> -> vector<128x128xf32>
    %139 = arith.addf %130, %138 : vector<128x128xf32>
    %c12_103 = arith.constant 12 : index
    %c0_104 = arith.constant 0 : index
    %c0_105 = arith.constant 0 : index
    %140 = vector.load %arg4[%c12_103, %c0_104, %c0_105] : memref<27x128x128xbf16, #tpu.memory_space<vmem>>, vector<1x128x128xbf16>
    %141 = vector.shape_cast %140 : vector<1x128x128xbf16> to vector<128x128xbf16>
    %c7_i32_106 = arith.constant 7 : i32
    %142 = arith.addi %1, %c7_i32_106 : i32
    %c0_107 = arith.constant 0 : index
    %143 = arith.index_cast %142 : i32 to index
    %c2_108 = arith.constant 2 : index
    %c0_109 = arith.constant 0 : index
    %144 = vector.load %arg2[%c0_107, %143, %c2_108, %c0_109] : memref<1x30x30x128xbf16, #tpu.memory_space<vmem>>, vector<1x8x16x128xbf16>
    %145 = vector.shape_cast %144 : vector<1x8x16x128xbf16> to vector<8x16x128xbf16>
    %146 = vector.shape_cast %145 : vector<8x16x128xbf16> to vector<128x128xbf16>
    %cst_110 = arith.constant dense<0.000000e+00> : vector<128x128xf32>
    %147 = tpu.matmul %146, %141, %cst_110 {dimension_numbers = #tpu.dot_dimension_numbers<[1], [0], [0], [1], [0, 0, 1, 1], [], []>} : vector<128x128xbf16>, vector<128x128xbf16>, vector<128x128xf32> -> vector<128x128xf32>
    %148 = arith.addf %139, %147 : vector<128x128xf32>
    %c13 = arith.constant 13 : index
    %c0_111 = arith.constant 0 : index
    %c0_112 = arith.constant 0 : index
    %149 = vector.load %arg4[%c13, %c0_111, %c0_112] : memref<27x128x128xbf16, #tpu.memory_space<vmem>>, vector<1x128x128xbf16>
    %150 = vector.shape_cast %149 : vector<1x128x128xbf16> to vector<128x128xbf16>
    %c7_i32_113 = arith.constant 7 : i32
    %151 = arith.addi %1, %c7_i32_113 : i32
    %c0_114 = arith.constant 0 : index
    %152 = arith.index_cast %151 : i32 to index
    %c7_115 = arith.constant 7 : index
    %c0_116 = arith.constant 0 : index
    %153 = vector.load %arg2[%c0_114, %152, %c7_115, %c0_116] : memref<1x30x30x128xbf16, #tpu.memory_space<vmem>>, vector<1x8x16x128xbf16>
    %154 = vector.shape_cast %153 : vector<1x8x16x128xbf16> to vector<8x16x128xbf16>
    %155 = vector.shape_cast %154 : vector<8x16x128xbf16> to vector<128x128xbf16>
    %cst_117 = arith.constant dense<0.000000e+00> : vector<128x128xf32>
    %156 = tpu.matmul %155, %150, %cst_117 {dimension_numbers = #tpu.dot_dimension_numbers<[1], [0], [0], [1], [0, 0, 1, 1], [], []>} : vector<128x128xbf16>, vector<128x128xbf16>, vector<128x128xf32> -> vector<128x128xf32>
    %157 = arith.addf %148, %156 : vector<128x128xf32>
    %c14 = arith.constant 14 : index
    %c0_118 = arith.constant 0 : index
    %c0_119 = arith.constant 0 : index
    %158 = vector.load %arg4[%c14, %c0_118, %c0_119] : memref<27x128x128xbf16, #tpu.memory_space<vmem>>, vector<1x128x128xbf16>
    %159 = vector.shape_cast %158 : vector<1x128x128xbf16> to vector<128x128xbf16>
    %c7_i32_120 = arith.constant 7 : i32
    %160 = arith.addi %1, %c7_i32_120 : i32
    %c0_121 = arith.constant 0 : index
    %161 = arith.index_cast %160 : i32 to index
    %c12_122 = arith.constant 12 : index
    %c0_123 = arith.constant 0 : index
    %162 = vector.load %arg2[%c0_121, %161, %c12_122, %c0_123] : memref<1x30x30x128xbf16, #tpu.memory_space<vmem>>, vector<1x8x16x128xbf16>
    %163 = vector.shape_cast %162 : vector<1x8x16x128xbf16> to vector<8x16x128xbf16>
    %164 = vector.shape_cast %163 : vector<8x16x128xbf16> to vector<128x128xbf16>
    %cst_124 = arith.constant dense<0.000000e+00> : vector<128x128xf32>
    %165 = tpu.matmul %164, %159, %cst_124 {dimension_numbers = #tpu.dot_dimension_numbers<[1], [0], [0], [1], [0, 0, 1, 1], [], []>} : vector<128x128xbf16>, vector<128x128xbf16>, vector<128x128xf32> -> vector<128x128xf32>
    %166 = arith.addf %157, %165 : vector<128x128xf32>
    %c15 = arith.constant 15 : index
    %c0_125 = arith.constant 0 : index
    %c0_126 = arith.constant 0 : index
    %167 = vector.load %arg4[%c15, %c0_125, %c0_126] : memref<27x128x128xbf16, #tpu.memory_space<vmem>>, vector<1x128x128xbf16>
    %168 = vector.shape_cast %167 : vector<1x128x128xbf16> to vector<128x128xbf16>
    %c12_i32 = arith.constant 12 : i32
    %169 = arith.addi %1, %c12_i32 : i32
    %c0_127 = arith.constant 0 : index
    %170 = arith.index_cast %169 : i32 to index
    %c2_128 = arith.constant 2 : index
    %c0_129 = arith.constant 0 : index
    %171 = vector.load %arg2[%c0_127, %170, %c2_128, %c0_129] : memref<1x30x30x128xbf16, #tpu.memory_space<vmem>>, vector<1x8x16x128xbf16>
    %172 = vector.shape_cast %171 : vector<1x8x16x128xbf16> to vector<8x16x128xbf16>
    %173 = vector.shape_cast %172 : vector<8x16x128xbf16> to vector<128x128xbf16>
    %cst_130 = arith.constant dense<0.000000e+00> : vector<128x128xf32>
    %174 = tpu.matmul %173, %168, %cst_130 {dimension_numbers = #tpu.dot_dimension_numbers<[1], [0], [0], [1], [0, 0, 1, 1], [], []>} : vector<128x128xbf16>, vector<128x128xbf16>, vector<128x128xf32> -> vector<128x128xf32>
    %175 = arith.addf %166, %174 : vector<128x128xf32>
    %c16 = arith.constant 16 : index
    %c0_131 = arith.constant 0 : index
    %c0_132 = arith.constant 0 : index
    %176 = vector.load %arg4[%c16, %c0_131, %c0_132] : memref<27x128x128xbf16, #tpu.memory_space<vmem>>, vector<1x128x128xbf16>
    %177 = vector.shape_cast %176 : vector<1x128x128xbf16> to vector<128x128xbf16>
    %c12_i32_133 = arith.constant 12 : i32
    %178 = arith.addi %1, %c12_i32_133 : i32
    %c0_134 = arith.constant 0 : index
    %179 = arith.index_cast %178 : i32 to index
    %c7_135 = arith.constant 7 : index
    %c0_136 = arith.constant 0 : index
    %180 = vector.load %arg2[%c0_134, %179, %c7_135, %c0_136] : memref<1x30x30x128xbf16, #tpu.memory_space<vmem>>, vector<1x8x16x128xbf16>
    %181 = vector.shape_cast %180 : vector<1x8x16x128xbf16> to vector<8x16x128xbf16>
    %182 = vector.shape_cast %181 : vector<8x16x128xbf16> to vector<128x128xbf16>
    %cst_137 = arith.constant dense<0.000000e+00> : vector<128x128xf32>
    %183 = tpu.matmul %182, %177, %cst_137 {dimension_numbers = #tpu.dot_dimension_numbers<[1], [0], [0], [1], [0, 0, 1, 1], [], []>} : vector<128x128xbf16>, vector<128x128xbf16>, vector<128x128xf32> -> vector<128x128xf32>
    %184 = arith.addf %175, %183 : vector<128x128xf32>
    %c17 = arith.constant 17 : index
    %c0_138 = arith.constant 0 : index
    %c0_139 = arith.constant 0 : index
    %185 = vector.load %arg4[%c17, %c0_138, %c0_139] : memref<27x128x128xbf16, #tpu.memory_space<vmem>>, vector<1x128x128xbf16>
    %186 = vector.shape_cast %185 : vector<1x128x128xbf16> to vector<128x128xbf16>
    %c12_i32_140 = arith.constant 12 : i32
    %187 = arith.addi %1, %c12_i32_140 : i32
    %c0_141 = arith.constant 0 : index
    %188 = arith.index_cast %187 : i32 to index
    %c12_142 = arith.constant 12 : index
    %c0_143 = arith.constant 0 : index
    %189 = vector.load %arg2[%c0_141, %188, %c12_142, %c0_143] : memref<1x30x30x128xbf16, #tpu.memory_space<vmem>>, vector<1x8x16x128xbf16>
    %190 = vector.shape_cast %189 : vector<1x8x16x128xbf16> to vector<8x16x128xbf16>
    %191 = vector.shape_cast %190 : vector<8x16x128xbf16> to vector<128x128xbf16>
    %cst_144 = arith.constant dense<0.000000e+00> : vector<128x128xf32>
    %192 = tpu.matmul %191, %186, %cst_144 {dimension_numbers = #tpu.dot_dimension_numbers<[1], [0], [0], [1], [0, 0, 1, 1], [], []>} : vector<128x128xbf16>, vector<128x128xbf16>, vector<128x128xf32> -> vector<128x128xf32>
    %193 = arith.addf %184, %192 : vector<128x128xf32>
    %c2_145 = arith.constant 2 : index
    %c0_146 = arith.constant 0 : index
    %194 = vector.load %arg6[%c2_145, %c0_146] : memref<4x128xf32, #tpu.memory_space<vmem>>, vector<1x128xf32>
    %195 = vector.broadcast %194 : vector<1x128xf32> to vector<128x128xf32>
    %196 = arith.mulf %193, %195 : vector<128x128xf32>
    %c2_147 = arith.constant 2 : index
    %c0_148 = arith.constant 0 : index
    %197 = vector.load %arg7[%c2_147, %c0_148] : memref<4x128xf32, #tpu.memory_space<vmem>>, vector<1x128xf32>
    %198 = vector.broadcast %197 : vector<1x128xf32> to vector<128x128xf32>
    %199 = arith.addf %196, %198 : vector<128x128xf32>
    %cst_149 = arith.constant 0.000000e+00 : f32
    %200 = vector.broadcast %cst_149 : f32 to vector<128x128xf32>
    %201 = arith.maximumf %199, %200 : vector<128x128xf32>
    %202 = arith.truncf %201 : vector<128x128xf32> to vector<128x128xbf16>
    %c2_150 = arith.constant 2 : index
    %c0_151 = arith.constant 0 : index
    %c0_152 = arith.constant 0 : index
    %203 = vector.load %arg5[%c2_150, %c0_151, %c0_152] : memref<4x128x128xbf16, #tpu.memory_space<vmem>>, vector<1x128x128xbf16>
    %204 = vector.shape_cast %203 : vector<1x128x128xbf16> to vector<128x128xbf16>
    %cst_153 = arith.constant dense<0.000000e+00> : vector<128x128xf32>
    %205 = tpu.matmul %202, %204, %cst_153 {dimension_numbers = #tpu.dot_dimension_numbers<[1], [0], [0], [1], [0, 0, 1, 1], [], []>} : vector<128x128xbf16>, vector<128x128xbf16>, vector<128x128xf32> -> vector<128x128xf32>
    %206 = arith.addf %113, %205 : vector<128x128xf32>
    %c18 = arith.constant 18 : index
    %c0_154 = arith.constant 0 : index
    %c0_155 = arith.constant 0 : index
    %207 = vector.load %arg4[%c18, %c0_154, %c0_155] : memref<27x128x128xbf16, #tpu.memory_space<vmem>>, vector<1x128x128xbf16>
    %208 = vector.shape_cast %207 : vector<1x128x128xbf16> to vector<128x128xbf16>
    %c0_i32 = arith.constant 0 : i32
    %209 = arith.addi %1, %c0_i32 : i32
    %c0_156 = arith.constant 0 : index
    %210 = arith.index_cast %209 : i32 to index
    %c0_157 = arith.constant 0 : index
    %c0_158 = arith.constant 0 : index
    %211 = vector.load %arg2[%c0_156, %210, %c0_157, %c0_158] : memref<1x30x30x128xbf16, #tpu.memory_space<vmem>>, vector<1x8x16x128xbf16>
    %212 = vector.shape_cast %211 : vector<1x8x16x128xbf16> to vector<8x16x128xbf16>
    %213 = vector.shape_cast %212 : vector<8x16x128xbf16> to vector<128x128xbf16>
    %cst_159 = arith.constant dense<0.000000e+00> : vector<128x128xf32>
    %214 = tpu.matmul %213, %208, %cst_159 {dimension_numbers = #tpu.dot_dimension_numbers<[1], [0], [0], [1], [0, 0, 1, 1], [], []>} : vector<128x128xbf16>, vector<128x128xbf16>, vector<128x128xf32> -> vector<128x128xf32>
    %c19 = arith.constant 19 : index
    %c0_160 = arith.constant 0 : index
    %c0_161 = arith.constant 0 : index
    %215 = vector.load %arg4[%c19, %c0_160, %c0_161] : memref<27x128x128xbf16, #tpu.memory_space<vmem>>, vector<1x128x128xbf16>
    %216 = vector.shape_cast %215 : vector<1x128x128xbf16> to vector<128x128xbf16>
    %c0_i32_162 = arith.constant 0 : i32
    %217 = arith.addi %1, %c0_i32_162 : i32
    %c0_163 = arith.constant 0 : index
    %218 = arith.index_cast %217 : i32 to index
    %c7_164 = arith.constant 7 : index
    %c0_165 = arith.constant 0 : index
    %219 = vector.load %arg2[%c0_163, %218, %c7_164, %c0_165] : memref<1x30x30x128xbf16, #tpu.memory_space<vmem>>, vector<1x8x16x128xbf16>
    %220 = vector.shape_cast %219 : vector<1x8x16x128xbf16> to vector<8x16x128xbf16>
    %221 = vector.shape_cast %220 : vector<8x16x128xbf16> to vector<128x128xbf16>
    %cst_166 = arith.constant dense<0.000000e+00> : vector<128x128xf32>
    %222 = tpu.matmul %221, %216, %cst_166 {dimension_numbers = #tpu.dot_dimension_numbers<[1], [0], [0], [1], [0, 0, 1, 1], [], []>} : vector<128x128xbf16>, vector<128x128xbf16>, vector<128x128xf32> -> vector<128x128xf32>
    %223 = arith.addf %214, %222 : vector<128x128xf32>
    %c20 = arith.constant 20 : index
    %c0_167 = arith.constant 0 : index
    %c0_168 = arith.constant 0 : index
    %224 = vector.load %arg4[%c20, %c0_167, %c0_168] : memref<27x128x128xbf16, #tpu.memory_space<vmem>>, vector<1x128x128xbf16>
    %225 = vector.shape_cast %224 : vector<1x128x128xbf16> to vector<128x128xbf16>
    %c0_i32_169 = arith.constant 0 : i32
    %226 = arith.addi %1, %c0_i32_169 : i32
    %c0_170 = arith.constant 0 : index
    %227 = arith.index_cast %226 : i32 to index
    %c14_171 = arith.constant 14 : index
    %c0_172 = arith.constant 0 : index
    %228 = vector.load %arg2[%c0_170, %227, %c14_171, %c0_172] : memref<1x30x30x128xbf16, #tpu.memory_space<vmem>>, vector<1x8x16x128xbf16>
    %229 = vector.shape_cast %228 : vector<1x8x16x128xbf16> to vector<8x16x128xbf16>
    %230 = vector.shape_cast %229 : vector<8x16x128xbf16> to vector<128x128xbf16>
    %cst_173 = arith.constant dense<0.000000e+00> : vector<128x128xf32>
    %231 = tpu.matmul %230, %225, %cst_173 {dimension_numbers = #tpu.dot_dimension_numbers<[1], [0], [0], [1], [0, 0, 1, 1], [], []>} : vector<128x128xbf16>, vector<128x128xbf16>, vector<128x128xf32> -> vector<128x128xf32>
    %232 = arith.addf %223, %231 : vector<128x128xf32>
    %c21 = arith.constant 21 : index
    %c0_174 = arith.constant 0 : index
    %c0_175 = arith.constant 0 : index
    %233 = vector.load %arg4[%c21, %c0_174, %c0_175] : memref<27x128x128xbf16, #tpu.memory_space<vmem>>, vector<1x128x128xbf16>
    %234 = vector.shape_cast %233 : vector<1x128x128xbf16> to vector<128x128xbf16>
    %c7_i32_176 = arith.constant 7 : i32
    %235 = arith.addi %1, %c7_i32_176 : i32
    %c0_177 = arith.constant 0 : index
    %236 = arith.index_cast %235 : i32 to index
    %c0_178 = arith.constant 0 : index
    %c0_179 = arith.constant 0 : index
    %237 = vector.load %arg2[%c0_177, %236, %c0_178, %c0_179] : memref<1x30x30x128xbf16, #tpu.memory_space<vmem>>, vector<1x8x16x128xbf16>
    %238 = vector.shape_cast %237 : vector<1x8x16x128xbf16> to vector<8x16x128xbf16>
    %239 = vector.shape_cast %238 : vector<8x16x128xbf16> to vector<128x128xbf16>
    %cst_180 = arith.constant dense<0.000000e+00> : vector<128x128xf32>
    %240 = tpu.matmul %239, %234, %cst_180 {dimension_numbers = #tpu.dot_dimension_numbers<[1], [0], [0], [1], [0, 0, 1, 1], [], []>} : vector<128x128xbf16>, vector<128x128xbf16>, vector<128x128xf32> -> vector<128x128xf32>
    %241 = arith.addf %232, %240 : vector<128x128xf32>
    %c22 = arith.constant 22 : index
    %c0_181 = arith.constant 0 : index
    %c0_182 = arith.constant 0 : index
    %242 = vector.load %arg4[%c22, %c0_181, %c0_182] : memref<27x128x128xbf16, #tpu.memory_space<vmem>>, vector<1x128x128xbf16>
    %243 = vector.shape_cast %242 : vector<1x128x128xbf16> to vector<128x128xbf16>
    %c7_i32_183 = arith.constant 7 : i32
    %244 = arith.addi %1, %c7_i32_183 : i32
    %c0_184 = arith.constant 0 : index
    %245 = arith.index_cast %244 : i32 to index
    %c7_185 = arith.constant 7 : index
    %c0_186 = arith.constant 0 : index
    %246 = vector.load %arg2[%c0_184, %245, %c7_185, %c0_186] : memref<1x30x30x128xbf16, #tpu.memory_space<vmem>>, vector<1x8x16x128xbf16>
    %247 = vector.shape_cast %246 : vector<1x8x16x128xbf16> to vector<8x16x128xbf16>
    %248 = vector.shape_cast %247 : vector<8x16x128xbf16> to vector<128x128xbf16>
    %cst_187 = arith.constant dense<0.000000e+00> : vector<128x128xf32>
    %249 = tpu.matmul %248, %243, %cst_187 {dimension_numbers = #tpu.dot_dimension_numbers<[1], [0], [0], [1], [0, 0, 1, 1], [], []>} : vector<128x128xbf16>, vector<128x128xbf16>, vector<128x128xf32> -> vector<128x128xf32>
    %250 = arith.addf %241, %249 : vector<128x128xf32>
    %c23 = arith.constant 23 : index
    %c0_188 = arith.constant 0 : index
    %c0_189 = arith.constant 0 : index
    %251 = vector.load %arg4[%c23, %c0_188, %c0_189] : memref<27x128x128xbf16, #tpu.memory_space<vmem>>, vector<1x128x128xbf16>
    %252 = vector.shape_cast %251 : vector<1x128x128xbf16> to vector<128x128xbf16>
    %c7_i32_190 = arith.constant 7 : i32
    %253 = arith.addi %1, %c7_i32_190 : i32
    %c0_191 = arith.constant 0 : index
    %254 = arith.index_cast %253 : i32 to index
    %c14_192 = arith.constant 14 : index
    %c0_193 = arith.constant 0 : index
    %255 = vector.load %arg2[%c0_191, %254, %c14_192, %c0_193] : memref<1x30x30x128xbf16, #tpu.memory_space<vmem>>, vector<1x8x16x128xbf16>
    %256 = vector.shape_cast %255 : vector<1x8x16x128xbf16> to vector<8x16x128xbf16>
    %257 = vector.shape_cast %256 : vector<8x16x128xbf16> to vector<128x128xbf16>
    %cst_194 = arith.constant dense<0.000000e+00> : vector<128x128xf32>
    %258 = tpu.matmul %257, %252, %cst_194 {dimension_numbers = #tpu.dot_dimension_numbers<[1], [0], [0], [1], [0, 0, 1, 1], [], []>} : vector<128x128xbf16>, vector<128x128xbf16>, vector<128x128xf32> -> vector<128x128xf32>
    %259 = arith.addf %250, %258 : vector<128x128xf32>
    %c24 = arith.constant 24 : index
    %c0_195 = arith.constant 0 : index
    %c0_196 = arith.constant 0 : index
    %260 = vector.load %arg4[%c24, %c0_195, %c0_196] : memref<27x128x128xbf16, #tpu.memory_space<vmem>>, vector<1x128x128xbf16>
    %261 = vector.shape_cast %260 : vector<1x128x128xbf16> to vector<128x128xbf16>
    %c14_i32 = arith.constant 14 : i32
    %262 = arith.addi %1, %c14_i32 : i32
    %c0_197 = arith.constant 0 : index
    %263 = arith.index_cast %262 : i32 to index
    %c0_198 = arith.constant 0 : index
    %c0_199 = arith.constant 0 : index
    %264 = vector.load %arg2[%c0_197, %263, %c0_198, %c0_199] : memref<1x30x30x128xbf16, #tpu.memory_space<vmem>>, vector<1x8x16x128xbf16>
    %265 = vector.shape_cast %264 : vector<1x8x16x128xbf16> to vector<8x16x128xbf16>
    %266 = vector.shape_cast %265 : vector<8x16x128xbf16> to vector<128x128xbf16>
    %cst_200 = arith.constant dense<0.000000e+00> : vector<128x128xf32>
    %267 = tpu.matmul %266, %261, %cst_200 {dimension_numbers = #tpu.dot_dimension_numbers<[1], [0], [0], [1], [0, 0, 1, 1], [], []>} : vector<128x128xbf16>, vector<128x128xbf16>, vector<128x128xf32> -> vector<128x128xf32>
    %268 = arith.addf %259, %267 : vector<128x128xf32>
    %c25 = arith.constant 25 : index
    %c0_201 = arith.constant 0 : index
    %c0_202 = arith.constant 0 : index
    %269 = vector.load %arg4[%c25, %c0_201, %c0_202] : memref<27x128x128xbf16, #tpu.memory_space<vmem>>, vector<1x128x128xbf16>
    %270 = vector.shape_cast %269 : vector<1x128x128xbf16> to vector<128x128xbf16>
    %c14_i32_203 = arith.constant 14 : i32
    %271 = arith.addi %1, %c14_i32_203 : i32
    %c0_204 = arith.constant 0 : index
    %272 = arith.index_cast %271 : i32 to index
    %c7_205 = arith.constant 7 : index
    %c0_206 = arith.constant 0 : index
    %273 = vector.load %arg2[%c0_204, %272, %c7_205, %c0_206] : memref<1x30x30x128xbf16, #tpu.memory_space<vmem>>, vector<1x8x16x128xbf16>
    %274 = vector.shape_cast %273 : vector<1x8x16x128xbf16> to vector<8x16x128xbf16>
    %275 = vector.shape_cast %274 : vector<8x16x128xbf16> to vector<128x128xbf16>
    %cst_207 = arith.constant dense<0.000000e+00> : vector<128x128xf32>
    %276 = tpu.matmul %275, %270, %cst_207 {dimension_numbers = #tpu.dot_dimension_numbers<[1], [0], [0], [1], [0, 0, 1, 1], [], []>} : vector<128x128xbf16>, vector<128x128xbf16>, vector<128x128xf32> -> vector<128x128xf32>
    %277 = arith.addf %268, %276 : vector<128x128xf32>
    %c26 = arith.constant 26 : index
    %c0_208 = arith.constant 0 : index
    %c0_209 = arith.constant 0 : index
    %278 = vector.load %arg4[%c26, %c0_208, %c0_209] : memref<27x128x128xbf16, #tpu.memory_space<vmem>>, vector<1x128x128xbf16>
    %279 = vector.shape_cast %278 : vector<1x128x128xbf16> to vector<128x128xbf16>
    %c14_i32_210 = arith.constant 14 : i32
    %280 = arith.addi %1, %c14_i32_210 : i32
    %c0_211 = arith.constant 0 : index
    %281 = arith.index_cast %280 : i32 to index
    %c14_212 = arith.constant 14 : index
    %c0_213 = arith.constant 0 : index
    %282 = vector.load %arg2[%c0_211, %281, %c14_212, %c0_213] : memref<1x30x30x128xbf16, #tpu.memory_space<vmem>>, vector<1x8x16x128xbf16>
    %283 = vector.shape_cast %282 : vector<1x8x16x128xbf16> to vector<8x16x128xbf16>
    %284 = vector.shape_cast %283 : vector<8x16x128xbf16> to vector<128x128xbf16>
    %cst_214 = arith.constant dense<0.000000e+00> : vector<128x128xf32>
    %285 = tpu.matmul %284, %279, %cst_214 {dimension_numbers = #tpu.dot_dimension_numbers<[1], [0], [0], [1], [0, 0, 1, 1], [], []>} : vector<128x128xbf16>, vector<128x128xbf16>, vector<128x128xf32> -> vector<128x128xf32>
    %286 = arith.addf %277, %285 : vector<128x128xf32>
    %c3_215 = arith.constant 3 : index
    %c0_216 = arith.constant 0 : index
    %287 = vector.load %arg6[%c3_215, %c0_216] : memref<4x128xf32, #tpu.memory_space<vmem>>, vector<1x128xf32>
    %288 = vector.broadcast %287 : vector<1x128xf32> to vector<128x128xf32>
    %289 = arith.mulf %286, %288 : vector<128x128xf32>
    %c3_217 = arith.constant 3 : index
    %c0_218 = arith.constant 0 : index
    %290 = vector.load %arg7[%c3_217, %c0_218] : memref<4x128xf32, #tpu.memory_space<vmem>>, vector<1x128xf32>
    %291 = vector.broadcast %290 : vector<1x128xf32> to vector<128x128xf32>
    %292 = arith.addf %289, %291 : vector<128x128xf32>
    %cst_219 = arith.constant 0.000000e+00 : f32
    %293 = vector.broadcast %cst_219 : f32 to vector<128x128xf32>
    %294 = arith.maximumf %292, %293 : vector<128x128xf32>
    %295 = arith.truncf %294 : vector<128x128xf32> to vector<128x128xbf16>
    %c3_220 = arith.constant 3 : index
    %c0_221 = arith.constant 0 : index
    %c0_222 = arith.constant 0 : index
    %296 = vector.load %arg5[%c3_220, %c0_221, %c0_222] : memref<4x128x128xbf16, #tpu.memory_space<vmem>>, vector<1x128x128xbf16>
    %297 = vector.shape_cast %296 : vector<1x128x128xbf16> to vector<128x128xbf16>
    %cst_223 = arith.constant dense<0.000000e+00> : vector<128x128xf32>
    %298 = tpu.matmul %295, %297, %cst_223 {dimension_numbers = #tpu.dot_dimension_numbers<[1], [0], [0], [1], [0, 0, 1, 1], [], []>} : vector<128x128xbf16>, vector<128x128xbf16>, vector<128x128xf32> -> vector<128x128xf32>
    %299 = arith.addf %206, %298 : vector<128x128xf32>
    %c0_224 = arith.constant 0 : index
    %c0_225 = arith.constant 0 : index
    %300 = vector.load %arg8[%c0_224, %c0_225] : memref<1x128xf32, #tpu.memory_space<vmem>>, vector<1x128xf32>
    %301 = vector.broadcast %300 : vector<1x128xf32> to vector<128x128xf32>
    %302 = arith.mulf %299, %301 : vector<128x128xf32>
    %c0_226 = arith.constant 0 : index
    %c0_227 = arith.constant 0 : index
    %c0_228 = arith.constant 0 : index
    %303 = vector.load %arg9[%c0_226, %c0_227, %c0_228] : memref<1x1x128xf32, #tpu.memory_space<vmem>>, vector<1x1x128xf32>
    %304 = vector.shape_cast %303 : vector<1x1x128xf32> to vector<1x128xf32>
    %305 = vector.broadcast %304 : vector<1x128xf32> to vector<128x128xf32>
    %306 = arith.addf %302, %305 : vector<128x128xf32>
    %cst_229 = arith.constant 0.000000e+00 : f32
    %307 = vector.broadcast %cst_229 : f32 to vector<128x128xf32>
    %308 = arith.maximumf %306, %307 : vector<128x128xf32>
    %309 = vector.shape_cast %308 : vector<128x128xf32> to vector<8x16x128xf32>
    %c0_230 = arith.constant 0 : index
    %c0_231 = arith.constant 0 : index
    %c0_232 = arith.constant 0 : index
    %c0_233 = arith.constant 0 : index
    %310 = vector.load %arg10[%c0_230, %c0_231, %c0_232, %c0_233] : memref<1x8x16x128xf32, #tpu.memory_space<vmem>>, vector<1x8x16x128xf32>
    %311 = vector.shape_cast %310 : vector<1x8x16x128xf32> to vector<8x16x128xf32>
    %312 = vector.shape_cast %309 : vector<8x16x128xf32> to vector<1x8x16x128xf32>
    tpu.vector_store %arg10[%c0_230, %c0_231, %c0_232, %c0_233], %312 {strides = array<i32>} : memref<1x8x16x128xf32, #tpu.memory_space<vmem>>, vector<1x8x16x128xf32>,
    return
  }
  func.func @transform_0(%arg0: i32, %arg1: i32) -> (i32, i32, i32, i32) {
    %c0_i32 = arith.constant 0 : i32
    %c0_i32_0 = arith.constant 0 : i32
    %c0_i32_1 = arith.constant 0 : i32
    %c0_i32_2 = arith.constant 0 : i32
    return %arg0, %c0_i32, %c0_i32_0, %c0_i32_1 : i32, i32, i32, i32
  }
  func.func @transform_1(%arg0: i32, %arg1: i32) -> (i32, i32) {
    %c0_i32 = arith.constant 0 : i32
    %c0_i32_0 = arith.constant 0 : i32
    %c0_i32_1 = arith.constant 0 : i32
    return %c0_i32, %c0_i32_0 : i32, i32
  }
  func.func @transform_2(%arg0: i32, %arg1: i32) -> (i32, i32, i32) {
    %c0_i32 = arith.constant 0 : i32
    %c0_i32_0 = arith.constant 0 : i32
    %c0_i32_1 = arith.constant 0 : i32
    %c0_i32_2 = arith.constant 0 : i32
    return %c0_i32, %c0_i32_0, %c0_i32_1 : i32, i32, i32
  }
  func.func @transform_3(%arg0: i32, %arg1: i32) -> (i32, i32, i32) {
    %c0_i32 = arith.constant 0 : i32
    %c0_i32_0 = arith.constant 0 : i32
    %c0_i32_1 = arith.constant 0 : i32
    %c0_i32_2 = arith.constant 0 : i32
    return %c0_i32, %c0_i32_0, %c0_i32_1 : i32, i32, i32
  }
  func.func @transform_4(%arg0: i32, %arg1: i32) -> (i32, i32) {
    %c0_i32 = arith.constant 0 : i32
    %c0_i32_0 = arith.constant 0 : i32
    %c0_i32_1 = arith.constant 0 : i32
    return %c0_i32, %c0_i32_0 : i32, i32
  }
  func.func @transform_5(%arg0: i32, %arg1: i32) -> (i32, i32) {
    %c0_i32 = arith.constant 0 : i32
    %c0_i32_0 = arith.constant 0 : i32
    %c0_i32_1 = arith.constant 0 : i32
    return %c0_i32, %c0_i32_0 : i32, i32
  }
  func.func @transform_6(%arg0: i32, %arg1: i32) -> (i32, i32) {
    %c0_i32 = arith.constant 0 : i32
    %c0_i32_0 = arith.constant 0 : i32
    %c0_i32_1 = arith.constant 0 : i32
    return %c0_i32, %c0_i32_0 : i32, i32
  }
  func.func @transform_7(%arg0: i32, %arg1: i32) -> (i32, i32, i32) {
    %c0_i32 = arith.constant 0 : i32
    %c0_i32_0 = arith.constant 0 : i32
    %c0_i32_1 = arith.constant 0 : i32
    return %arg0, %c0_i32, %c0_i32_0 : i32, i32, i32
  }
  func.func @transform_8(%arg0: i32, %arg1: i32) -> (i32, i32, i32, i32) {
    %c0_i32 = arith.constant 0 : i32
    %c0_i32_0 = arith.constant 0 : i32
    %c0_i32_1 = arith.constant 0 : i32
    return %arg0, %arg1, %c0_i32, %c0_i32_0 : i32, i32, i32, i32
  }
}

</mosaic_0001>

<bundles_post_ra>
// kernel: aspp_forward.1
= control target key start
LH: loop header
LB: loop body
LE: loop exit
PB: predicated region body
PF: predicated region fallthrough
CT: control target
= control target key end

     0   :  { %s14153_s27 = smov 0   ;;  %s14155_s28 = smov 0   ;;  %s17904_s0 = inlined_call_operand.vmem [shape: bf16[2,30,30,128], index: 0, kind: input, shape index: {}]   ;;  %s17905_s1 = inlined_call_operand.vmem [shape: bf16[128,128], index: 1, kind: input, shape index: {}]   ;;  %s17906_s2 = inlined_call_operand.vmem [shape: bf16[27,128,128], index: 2, kind: input, shape index: {}]   ;;  %s17907_s3 = inlined_call_operand.vmem [shape: bf16[4,128,128], index: 3, kind: input, shape index: {}]   ;;  %s17908_s4 = inlined_call_operand.vmem [shape: f32[4,128], index: 4, kind: input, shape index: {}]   ;;  %s17909_s5 = inlined_call_operand.vmem [shape: f32[4,128], index: 5, kind: input, shape index: {}]   ;;  %s17910_s6 = inlined_call_operand.vmem [shape: f32[1,128], index: 6, kind: input, shape index: {}]   ;;  %s17911_s7 = inlined_call_operand.vmem [shape: f32[2,1,128], index: 7, kind: input, shape index: {}]   ;;  %s17912_s8 = inlined_call_operand.vmem [shape: f32[2,16,16,128], index: 8, kind: output, shape index: {}]  }
   0x1   :  { %s14157_s29 = smov 0   ;;  %s14159_s30 = smov 0  }
   0x2   :  { %s14161_s9 = smov 0  }
   0x3 LB: > { %s27_s10 = sadd.s32 1, %s14098_s29  ;;  %s30_s11 = sadd.s32 1, %s14102_s30  ;;  %s14106_s9 = sphi %s14161_s9, %s18_s9   ;;  %s14102_s30 = sphi %s14159_s30, %s18043_s30   ;;  %s14098_s29 = sphi %s14157_s29, %s18042_s29   ;;  %s14094_s28 = sphi %s14155_s28, %s18041_s28   ;;  %s14090_s27 = sphi %s14153_s27, %s18040_s27  }
   0x4   : > { %p28_p0 = scmp.ge.s32.totalorder %s27_s10, 2  ;;  %p10166_p1 = scmp.ge.s32.totalorder %s14106_s9, 1 }
   0x5   : > { %p284_p2 = scmp.lt.s32.totalorder %s14106_s9, 5 }
   0x6   : > { %s18045_s10 = smov (%p28_p0, %s27_s10), 0  ;;  %s18047_s11 = smov (!%p28_p0, %s30_s11), %s14102_s30 }
   0x7   : > { %p285_p3 = pnand %p10166_p1, %p284_p2  ;;  %p32_p4 = scmp.ge.s32.totalorder %s18047_s11, 2 }
   0x9   : > { %s18049_s11 = smov (%p32_p4, %s18047_s11), 0  ;;  %288 = sbr.rel (%p285_p3) target bundleno = 1289 (0x509), region = 52 }
  0x10   : > { %v13760_v0 = vld [vmem:[%s17906_s2 + $0x80] sm:$0xff]   ;;  %p326_p5 = scmp.lt.s32.totalorder %s14094_s28, 1  ;;  %v13761_v1 = vld [vmem:[%s17906_s2 + $0x88] sm:$0xff]   ;;  %s11743_s16 = sshll.u32 %s14090_s27, 7  ;;  %v13762_v2 = vld [vmem:[%s17906_s2 + $0x90] sm:$0xff]   ;;  %vm1584_vm0 = vcmask 1042432  }
  0x11   : > { %12359 = vmatprep.subr.bf16.mxu1 %v13760_v0  ;;  %vm1585_vm1 = vcmask 1046532   ;;  %v13763_v3 = vld [vmem:[%s17906_s2 + $0x98] sm:$0xff]   ;;  %v17937_v7 = vmov 0  ;;  %v13764_v11 = vld [vmem:[%s17906_s2 + $0xa0] sm:$0xff]   ;;  %v13765_v16 = vld [vmem:[%s17906_s2 + $0xa8] sm:$0xff]   ;;  %vm897_vm3 = vcmask 1041408  }
  0x12   : > { %s18051_s28 = smov (!%p326_p5, %s14094_s28), 1  ;;  %12360 = vmatpush3.bf16.msra.mxu1 %v13760_v0  ;;  %vm14209_vm2 = vmor %vm1584_vm0, %vm1585_vm1  ;;  %v13766_v21 = vld [vmem:[%s17906_s2 + $0xb0] sm:$0xff]   ;;  %v13767_v30 = vld [vmem:[%s17906_s2 + $0xb8] sm:$0xff]   ;;  %vm898_vm4 = vcmask 1045508   ;;  %vm375_vm6 = vsmask.f32 256 }
  0x13   : > { %12361 = vmatprep.subr.bf16.mxu1 %v13761_v1  ;;  %s13719_s19 = smul.u32 480, %s18051_s28  ;;  %v17938_v7 = vsel %vm14209_vm2, 4294967295, %v17937_v7  ;;  %v13768_v42 = vld [vmem:[%s17906_s2 + $0xc0] sm:$0xff]   ;;  %v13769_v49 = vld [vmem:[%s17906_s2 + $0xc8] sm:$0xff]   ;;  %v13770_v58 = vld [vmem:[%s17906_s2 + $0xd0] sm:$0xff]   ;;  %vm7775_vm9 = vcmask 1040384   ;;  %s333_s15 = scalar_lea.vmem %s17911_s7, %s18051_s28 }
  0x14   : > { %17939 = vst [vmem:[#allocation2_spill] sm:$0xff] %v17938_v7  ;;  %vm14337_vm5 = vmor %vm897_vm3, %vm898_vm4  ;;  %vm376_vm7 = vsmask.f32 4368  ;;  %vm7776_vm10 = vcmask 1044484   ;;  %s10168_s26 = sshll.u32 %s14090_s27, 3  ;;  %s10170_s13 = sshll.u32 %s18051_s28, 5 }
  0x15   : > { %s330_s22 = scalar_lea.vmem %s17904_s0, %s13719_s19  ;;  %vm14373_vm8 = vmor %vm375_vm6, %vm376_vm7  ;;  %p337_p6 = scmp.lt.s32.totalorder %s10168_s26, 15 }
  0x16   : > { %12362 = vmatpush3.bf16.msra.mxu1 %v13761_v1  ;;  %s14204_s25 = scalar_lea.vmem %s330_s22, %s11743_s16  ;;  %vm15860_vm11 = vmor %vm7775_vm9, %vm7776_vm10 }
  0x17   : > { %12363 = vmatprep.subr.bf16.mxu1 %v13762_v2  ;;  %v10347_v4 = vld [vmem:[%s14204_s25 + $0x44] sm:$0xe]  ;;  %v10348_v5 = vld [vmem:[%s14204_s25 + $0x48] sm:$0xf]  ;;  %v10349_v6 = vld [vmem:[%s14204_s25 + $0x4c] sm:$0x1] }
  0x18   : > { %v10371_v8 = vrot.slane %v10347_v4, 9  ;;  %v1589_v9 = vrot.slane %v10348_v5, 5  ;;  %v1592_v10 = vrot.slane %v10349_v6, 5  ;;  %v10351_v17 = vld [vmem:[%s14204_s25 + $0x58] sm:$0xf]  ;;  %v13929_v7 = vld [vmem:[%s14204_s25 + $0xf0] sm:$0xff]  }
  0x19   : > { %v10354_v18 = vld [vmem:[%s14204_s25 + $0x68] sm:$0xf]  ;;  %v10350_v19 = vld [vmem:[%s14204_s25 + $0x54] sm:$0xe]  ;;  %v1596_v20 = vrot.slane %v10351_v17, 5  ;;  %s18053_s26 = smov (!%p337_p6, %s10168_s26), 15 }
  0x1a   : > { %12364 = vmatpush3.bf16.msra.mxu1 %v13762_v2  ;;  %v1590_v12 = vsel %vm14209_vm2, %v10371_v8, %v1589_v9  ;;  %v1591_v13 = vrot.slane %v1589_v9, 4  ;;  %v10352_v22 = vld [vmem:[%s14204_s25 + $0x5c] sm:$0x1]  ;;  %v10353_v23 = vld [vmem:[%s14204_s25 + $0x64] sm:$0xe]  ;;  %v1603_v24 = vrot.slane %v10354_v18, 5 }
  0x1b   : > { %12365 = vmatprep.subr.bf16.mxu1 %v13763_v3  ;;  %v10355_v25 = vld [vmem:[%s14204_s25 + $0x6c] sm:$0x1]  ;;  %v10357_v26 = vld [vmem:[%s14204_s25 + $0x78] sm:$0xf]  ;;  %v10372_v27 = vrot.slane %v10350_v19, 9  ;;  %v1598_v28 = vrot.slane %v1596_v20, 4 }
  0x1c   : > { %v1593_v14 = vsel %vm14209_vm2, %v1591_v13, %v1592_v10  ;;  %v1599_v29 = vrot.slane %v10352_v22, 5  ;;  %v10373_v31 = vrot.slane %v10353_v23, 9  ;;  %v1605_v32 = vrot.slane %v1603_v24, 4  ;;  %v10360_v34 = vld [vmem:[%s14204_s25 + $0x88] sm:$0xf]  ;;  %v13771_v9 = vld [vmem:[%s17906_s2 + $0xd8] sm:$0xff]  }
  0x1d   : > { %v10379_v15 = vcombine.low %v1590_v12, %v1593_v14  ;;  %v1606_v33 = vrot.slane %v10355_v25, 5  ;;  %v10356_v35 = vld [vmem:[%s14204_s25 + $0x74] sm:$0xe]  ;;  %v10358_v36 = vld [vmem:[%s14204_s25 + $0x7c] sm:$0x1]  ;;  %v1610_v37 = vrot.slane %v10357_v26, 5  ;;  %v1597_v39 = vsel %vm14209_vm2, %v10372_v27, %v1596_v20 }
  0x1e   : > { %12366 = vmatpush3.bf16.msra.mxu1 %v13763_v3  ;;  %v10359_v38 = vld [vmem:[%s14204_s25 + $0x84] sm:$0xe]  ;;  %v1600_v40 = vsel %vm14209_vm2, %v1598_v28, %v1599_v29  ;;  %v1617_v41 = vrot.slane %v10360_v34, 5  ;;  %v1604_v43 = vsel %vm14209_vm2, %v10373_v31, %v1603_v24  ;;  %v10361_v45 = vld [vmem:[%s14204_s25 + $0x8c] sm:$0x1]  ;;  %v10374_v46 = vrot.slane %v10356_v35, 9 }
  0x1f   : > { %12367 = vmatprep.subr.bf16.mxu1 %v13764_v11  ;;  %12375 = vmatprep.mubr.bf16.mxu1 %v10379_v15  ;;  %v1607_v44 = vsel %vm14209_vm2, %v1605_v32, %v1606_v33  ;;  %v1613_v47 = vrot.slane %v10358_v36, 5  ;;  %v10380_v48 = vcombine.low %v1597_v39, %v1600_v40  ;;  %v1612_v50 = vrot.slane %v1610_v37, 4  ;;  %v10362_v52 = vld [vmem:[%s14204_s25 + $0x94] sm:$0xe]  ;;  %v10363_v53 = vld [vmem:[%s14204_s25 + $0x98] sm:$0xf] }
  0x20   : > { %v10375_v51 = vrot.slane %v10359_v38, 9  ;;  %v10381_v54 = vcombine.low %v1604_v43, %v1607_v44  ;;  %v1619_v55 = vrot.slane %v1617_v41, 4  ;;  %v1620_v56 = vrot.slane %v10361_v45, 5  ;;  %v10366_v57 = vld [vmem:[%s14204_s25 + $0xa8] sm:$0xf]  ;;  %v13772_v33 = vld [vmem:[%s17906_s2 + $0xe0] sm:$0xff]  }
  0x21   : > { %v10364_v59 = vld [vmem:[%s14204_s25 + $0x9c] sm:$0x1]  ;;  %v1624_v60 = vrot.slane %v10363_v53, 5  ;;  %v1611_v61 = vsel %vm14209_vm2, %v10374_v46, %v1610_v37  ;;  %v1614_v62 = vsel %vm14209_vm2, %v1612_v50, %v1613_v47  ;;  %v10376_v63 = vrot.slane %v10362_v52, 9  ;;  %v10365_v0 = vld [vmem:[%s14204_s25 + $0xa4] sm:$0xe] }
  0x22   : > { %12368 = vmatpush3.bf16.msra.mxu1 %v13764_v11  ;;  %v10367_v1 = vld [vmem:[%s14204_s25 + $0xac] sm:$0x1]  ;;  %v1631_v2 = vrot.slane %v10366_v57, 5  ;;  %v1618_v3 = vsel %vm14209_vm2, %v10375_v51, %v1617_v41  ;;  %v1621_v4 = vsel %vm14209_vm2, %v1619_v55, %v1620_v56  ;;  %v10369_v5 = vld [vmem:[%s14204_s25 + $0xb8] sm:$0xf]  ;;  %v10382_v8 = vcombine.low %v1611_v61, %v1614_v62  ;;  %s10169_s12 = sshll.u32 %s18053_s26, 1 }
  0x23   : > { %12369 = vmatprep.subr.bf16.mxu1 %v13765_v16  ;;  %v14274_v6 = vld [vmem:[%s14204_s25 + $0x74] sm:$0xf]  ;;  %v1626_v10 = vrot.slane %v1624_v60, 4  ;;  %v1627_v11 = vrot.slane %v10364_v59, 5  ;;  %v10377_v12 = vrot.slane %v10365_v0, 9  ;;  %v10383_v14 = vcombine.low %v1618_v3, %v1621_v4  ;;  %v13773_v43 = vld [vmem:[%s17906_s2 + $0xe8] sm:$0xff]   ;;  %s341_s16 = sadd.s32 %s10170_s13, %s10169_s12 }
  0x24   : > { %v14280_v13 = vld [vmem:[%s14204_s25 + $0x84] sm:$0xf]  ;;  %v1633_v15 = vrot.slane %v1631_v2, 4  ;;  %v10368_v17 = vld [vmem:[%s14204_s25 + $0xb4] sm:$0xe]  ;;  %v1638_v19 = vrot.slane %v10369_v5, 5  ;;  %v1625_v24 = vsel %vm14209_vm2, %v10376_v63, %v1624_v60 }
  0x25   : > { %v10370_v18 = vld [vmem:[%s14204_s25 + $0xbc] sm:$0x1]  ;;  %v10411_v20 = vld [vmem:[%s14204_s25 + $0x70] sm:$0xc]  ;;  %v1895_v22 = vrot.slane %v14274_v6, 6  ;;  %v1902_v23 = vrot.slane %v14280_v13, 6  ;;  %v1628_v25 = vsel %vm14209_vm2, %v1626_v10, %v1627_v11  ;;  %v1632_v27 = vsel %vm14209_vm2, %v10377_v12, %v1631_v2 }
  0x26   : > { %12370 = vmatpush3.bf16.msra.mxu1 %v13765_v16  ;;  %v1634_v16 = vrot.slane %v10367_v1, 5  ;;  %v14293_v26 = vld [vmem:[%s14204_s25 + $0x80] sm:$0xc]  ;;  %v10378_v29 = vrot.slane %v10368_v17, 9  ;;  %v14300_v31 = vld [vmem:[%s14204_s25 + $0x88] sm:$0x3] }
  0x27   : > { %12371 = vmatprep.subr.bf16.mxu1 %v13766_v21  ;;  %v14303_v32 = vld [vmem:[%s14204_s25 + $0x94] sm:$0xf]  ;;  %v1640_v34 = vrot.slane %v1638_v19, 4  ;;  %v10427_v35 = vrot.slane %v10411_v20, 10  ;;  %v1897_v36 = vrot.slane %v1895_v22, 4  ;;  %v10428_v38 = vrot.slane %v14293_v26, 10 }
  0x28   : > { %v1635_v28 = vsel %vm14209_vm2, %v1633_v15, %v1634_v16  ;;  %v14311_v39 = vrot.slane %v1902_v23, 4  ;;  %v14314_v40 = vld [vmem:[%s14204_s25 + $0x90] sm:$0xc]  ;;  %v14317_v41 = vld [vmem:[%s14204_s25 + $0x98] sm:$0x3]  ;;  %v1905_v44 = vrot.slane %v14300_v31, 6  ;;  %v1639_v50 = vsel %vm14209_vm2, %v10378_v29, %v1638_v19 }
  0x29   : > { %v1909_v45 = vrot.slane %v14303_v32, 6  ;;  %v10385_v46 = vcombine.low %v1632_v27, %v1635_v28  ;;  %v14325_v47 = vld [vmem:[%s14204_s25 + $0xa4] sm:$0xf]  ;;  %v17940_v52 = vmov 0  ;;  %v10429_v53 = vrot.slane %v14314_v40, 10  ;;  %v13774_v59 = vld [vmem:[%s17906_s2 + $0xf0] sm:$0xff]  }
  0x2a   : > { %12372 = vmatpush3.bf16.msra.mxu1 %v13766_v21  ;;  %v10412_v21 = vld [vmem:[%s14204_s25 + $0x78] sm:$0x3]  ;;  %v17941_v52 = vsel %vm14337_vm5, 4294967295, %v17940_v52  ;;  %v10175_v55 = vld [vmem:[%s14204_s25 + $0x70] sm:$0x8]  ;;  %v1916_v60 = vrot.slane %v14325_v47, 6  ;;  %v1896_v0 = vsel %vm14337_vm5, %v10427_v35, %v1895_v22 }
  0x2b   : > { %12373 = vmatprep.subr.bf16.mxu1 %v13767_v30  ;;  %v1898_v37 = vrot.slane %v10412_v21, 6  ;;  %17942 = vst [vmem:[#allocation3_spill] sm:$0xff] %v17941_v52  ;;  %v10177_v56 = vld [vmem:[%s14204_s25 + $0x78] sm:$0xf]  ;;  %v379_v57 = vshrl.u32 %v10175_v55, 16  ;;  %v387_v61 = vshll.u32 %v14274_v6, 16  ;;  %v1910_v31 = vsel %vm14337_vm5, %v10429_v53, %v1909_v45 }
  0x2c   : > { %v393_v62 = vshrl.u32 %v10177_v56, 16  ;;  %v396_v63 = vshll.u32 %v10177_v56, 16  ;;  %v1911_v2 = vrot.slane %v1909_v45, 4  ;;  %v14357_v3 = vld [vmem:[%s14204_s25 + $0xa0] sm:$0xc]  ;;  %v13775_v16 = vld [vmem:[%s17906_s2 + $0xf8] sm:$0xff]  }
  0x2d   : > { %v1899_v1 = vsel %vm14337_vm5, %v1897_v36, %v1898_v37  ;;  %v14360_v4 = vld [vmem:[%s14204_s25 + $0xb4] sm:$0xf]  ;;  %v10199_v5 = vrot.slane %v379_v57, 11  ;;  %v14381_v17 = vld [vmem:[%s14204_s25 + $0xc4] sm:$0xf]  ;;  %v13786_v21 = vld [vmem:[%s17905_s1 + $0x8] sm:$0xff]  }
  0x2e   : > { %12374 = vmatpush3.bf16.msra.mxu1 %v13767_v30  ;;  %v1641_v30 = vrot.slane %v10370_v18, 5  ;;  %v10435_v18 = vcombine.low %v1896_v0, %v1899_v1  ;;  %v1923_v19 = vrot.slane %v14360_v4, 6  ;;  %v14388_v22 = vld [vmem:[%s14204_s25 + $0xc0] sm:$0xc]  ;;  %v10430_v26 = vrot.slane %v14357_v3, 10  ;;  %v13777_v53 = vld [vmem:[%s17906_s2 + $0x108] sm:$0xff]  }
  0x2f   : > { %12391 = vmatprep.subr.bf16.mxu1 %v13768_v42  ;;  %v14398_v27 = vld [vmem:[%s14204_s25 + $0xc8] sm:$0x3]  ;;  %v1930_v28 = vrot.slane %v14381_v17, 6  ;;  %v14415_v37 = vld [vmem:[%s14204_s25 + $0xd0] sm:$0xc]  ;;  %v406_v55 = vshrl.u32 %v14280_v13, 16 }
  0x30   : > { %v1642_v51 = vsel %vm14209_vm2, %v1640_v34, %v1641_v30  ;;  %v13788_v30 = vld [vmem:[%s17905_s1 + $0x10] sm:$0xff]   ;;  %v14472_v1 = vld [vmem:[%s14204_s25 + $0xe4] sm:$0xf]  ;;  %s10171_s19 = sshll.u32 %s341_s16, 3 }
  0x31   : > { %12376 = vmatmul.mubr.bf16.vlgmr.msra.gmra.mrb[0].mxu1 %v10380_v48  ;;  %v13784_v48 = vld [vmem:[%s17905_s1] sm:$0xff]   ;;  %v10386_v15 = vcombine.low %v1639_v50, %v1642_v51  ;;  %v13790_v50 = vld [vmem:[%s17905_s1 + $0x18] sm:$0xff]   ;;  %v1932_v40 = vrot.slane %v1930_v28, 4  ;;  %s17843_s20 = scalar_lea.vmem %s17912_s8, %s10171_s19 }
  0x32   : > { %12392 = vmatpush3.bf16.msra.mxu1 %v13768_v42  ;;  %12379 = vmatprep.mubr.bf16.mxu1 %v10381_v54  ;;  %v10384_v42 = vcombine.low %v1625_v24, %v1628_v25  ;;  %v1912_v54 = vrot.slane %v14317_v41, 6  ;;  %v1903_v25 = vsel %vm14337_vm5, %v10428_v38, %v1902_v23  ;;  %v13776_v23 = vld [vmem:[%s17906_s2 + $0x100] sm:$0xff]   ;;  %v1906_v38 = vsel %vm14337_vm5, %v14311_v39, %v1905_v44  ;;  %v14448_v51 = vld [vmem:[%s14204_s25 + $0xd8] sm:$0x3] }
  0x33   : > { %12393 = vmatprep.subr.bf16.mxu1 %v13769_v49  ;;  %12263 = vmatprep.subr.bf16.mxu0 %v13784_v48  ;;  %v1933_v44 = vrot.slane %v14398_v27, 6  ;;  %v10433_v41 = vrot.slane %v14415_v37, 10  ;;  %v10436_v45 = vcombine.low %v1903_v25, %v1906_v38  ;;  %v1940_v0 = vrot.slane %v14448_v51, 6  ;;  %v11225_v10 = vld [vmem:[%s14204_s25 + $0xe4] sm:$0xc] }
  0x34   : > { %12264 = vmatpush3.bf16.msra.mxu0 %v13784_v48  ;;  %v10180_v48 = vld [vmem:[%s14204_s25 + $0x88] sm:$0xf]  ;;  %v1913_v39 = vsel %vm14337_vm5, %v1911_v2, %v1912_v54  ;;  %v10178_v54 = vld [vmem:[%s14204_s25 + $0x80] sm:$0x8]  ;;  %v431_v38 = vshll.u32 %v14303_v32, 16 }
  0x35   : > { %12265 = vmatprep.subr.bf16.mxu0 %v13786_v21  ;;  %v415_v56 = vshrl.u32 %v10180_v48, 16  ;;  %v10437_v57 = vcombine.low %v1910_v31, %v1913_v39  ;;  %v14475_v2 = vld [vmem:[%s14204_s25 + $0xe8] sm:$0x3]  ;;  %v401_v3 = vshrl.u32 %v10178_v54, 16  ;;  %v450_v39 = vshrl.u32 %v14325_v47, 16 }
  0x36   : > { %12394 = vmatpush3.bf16.msra.mxu1 %v13769_v49  ;;  %v384_v49 = vshrl.u32 %v14274_v6, 16  ;;  %v14363_v6 = vld [vmem:[%s14204_s25 + $0xa8] sm:$0x3]  ;;  %v10187_v54 = vld [vmem:[%s14204_s25 + $0xb0] sm:$0x8] }
  0x37   : > { %12395 = vmatprep.subr.bf16.mxu1 %v13770_v58  ;;  %v1919_v34 = vrot.slane %v14363_v6, 6  ;;  %v408_v6 = vrot.slane %v406_v55, 7  ;;  %v14498_v25 = vrot.slane %v401_v3, 11  ;;  %v13798_v3 = vld [vmem:[%s17905_s1 + $0x38] sm:$0xff]  }
  0x38   : > { %12266 = vmatpush3.bf16.msra.mxu0 %v13786_v21  ;;  %v1947_v21 = vrot.slane %v14475_v2, 6  ;;  %v13800_v2 = vld [vmem:[%s17906_s2 + $0x40] sm:$0xff]  }
  0x39   : > { %12380 = vmatmul.mubr.bf16.gmra.mrb[4].mxu1 %v10382_v8  ;;  %v14366_v8 = vld [vmem:[%s14204_s25 + $0xb0] sm:$0xc]  ;;  %12267 = vmatprep.subr.bf16.mxu0 %v13788_v30 }
  0x3a   : > { %12396 = vmatpush3.bf16.msra.mxu1 %v13770_v58  ;;  %12383 = vmatprep.mubr.bf16.mxu1 %v10383_v14  ;;  %v386_v58 = vrot.slane %v384_v49, 7  ;;  %v395_v14 = vrot.slane %v393_v62, 7  ;;  %v10431_v35 = vrot.slane %v14366_v8, 10  ;;  %v14440_v49 = vld [vmem:[%s14204_s25 + $0xd4] sm:$0xf]  ;;  %v1917_v62 = vsel %vm14337_vm5, %v10430_v26, %v1916_v60 }
  0x3b   : > { %12397 = vmatprep.subr.bf16.mxu1 %v13771_v9  ;;  %v409_v8 = vshll.u32 %v14280_v13, 16 }
  0x3c   : > { %v389_v11 = vor.u32 %v387_v61, %v386_v58  ;;  %v391_v12 = vrot.slane %v386_v58, 4  ;;  %v398_v20 = vor.u32 %v396_v63, %v395_v14  ;;  %12268 = vmatpush3.bf16.msra.mxu0 %v13788_v30  ;;  %v1937_v58 = vrot.slane %v14440_v49, 6  ;;  %v13792_v61 = vld [vmem:[%s17905_s1 + $0x20] sm:$0xff]  }
  0x3d   : > { %12269 = vmatprep.subr.bf16.mxu0 %v13790_v50  ;;  %v411_v30 = vor.u32 %v409_v8, %v408_v6  ;;  %v467_v8 = vshrl.u32 %v10187_v54, 16 }
  0x3e   : > { %12398 = vmatpush3.bf16.msra.mxu1 %v13771_v9  ;;  %v14369_v9 = vld [vmem:[%s14204_s25 + $0xb8] sm:$0x3]  ;;  %v390_v24 = vsel %vm14373_vm8, %v10199_v5, %v389_v11  ;;  %v399_v29 = vsel %vm14373_vm8, %v391_v12, %v398_v20  ;;  %v13778_v5 = vld [vmem:[%s17906_s2 + $0x110] sm:$0xff]   ;;  %v1924_v12 = vsel %vm14337_vm5, %v10431_v35, %v1923_v19  ;;  %v1944_v20 = vrot.slane %v14472_v1, 6  ;;  %v14505_v35 = vld [vmem:[%s14204_s25 + $0xa8] sm:$0xf] }
  0x3f   : > { %12399 = vmatprep.subr.bf16.mxu1 %v13772_v33  ;;  %v1926_v36 = vrot.slane %v14369_v9, 6  ;;  %v418_v9 = vshll.u32 %v10180_v48, 16  ;;  %v14482_v11 = vld [vmem:[%s14204_s25 + $0x98] sm:$0xf]  ;;  %v1934_v48 = vsel %vm14337_vm5, %v1932_v40, %v1933_v44  ;;  %v14520_v31 = vsel %vm14337_vm5, %v10433_v41, %v1937_v58  ;;  %v13780_v44 = vld [vmem:[%s17906_s2 + $0x120] sm:$0xff]  }
  0x40   : > { %12270 = vmatpush3.bf16.msra.mxu0 %v13790_v50  ;;  %v437_v26 = vshrl.u32 %v14482_v11, 16  ;;  %v1946_v50 = vrot.slane %v1944_v20, 4  ;;  %v459_v27 = vshrl.u32 %v14505_v35, 16  ;;  %v412_v41 = vsel %vm14373_vm8, %v14498_v25, %v411_v30 }
  0x41   : > { %12384 = vmatmul.mubr.bf16.gmra.mrb[8].mxu1 %v10384_v42  ;;  %v1925_v42 = vrot.slane %v1923_v19, 4  ;;  %12271 = vmatprep.subr.bf16.mxu0 %v13792_v61  ;;  %v13794_v19 = vld [vmem:[%s17905_s1 + $0x28] sm:$0xff]  }
  0x42   : > { %12400 = vmatpush3.bf16.msra.mxu1 %v13772_v33  ;;  %12387 = vmatprep.mubr.bf16.mxu1 %v10385_v46  ;;  %v1918_v33 = vrot.slane %v1916_v60, 4  ;;  %v14425_v46 = vcombine.low %v390_v24, %v399_v29  ;;  %v417_v60 = vrot.slane %v415_v56, 7  ;;  %v13779_v29 = vld [vmem:[%s17906_s2 + $0x118] sm:$0xff]   ;;  %v439_v51 = vrot.slane %v437_v26, 7 }
  0x43   : > { %12401 = vmatprep.subr.bf16.mxu1 %v13773_v43  ;;  %v1927_v13 = vsel %vm14337_vm5, %v1925_v42, %v1926_v36 }
  0x44   : > { %17945 = vst [vmem:[#allocation4_spill] sm:$0xff] %v14425_v46  ;;  %12279 = vmatprep.mubr.bf16.mxu0 %v14425_v46  ;;  %v1920_v63 = vsel %vm14337_vm5, %v1918_v33, %v1919_v34  ;;  %v420_v33 = vor.u32 %v418_v9, %v417_v60  ;;  %12272 = vmatpush3.bf16.msra.mxu0 %v13792_v61  ;;  %v13781_v9 = vld [vmem:[%s17906_s2 + $0x128] sm:$0xff]  }
  0x45   : > { %v10438_v24 = vcombine.low %v1917_v62, %v1920_v63  ;;  %v10439_v36 = vcombine.low %v1924_v12, %v1927_v13  ;;  %12273 = vmatprep.subr.bf16.mxu0 %v13794_v19  ;;  %v452_v62 = vrot.slane %v450_v39, 7  ;;  %v462_v63 = vshll.u32 %v14505_v35, 16  ;;  %v10190_v12 = vld [vmem:[%s14204_s25 + $0xc0] sm:$0x8]  ;;  %v10195_v35 = vld [vmem:[%s14204_s25 + $0xd8] sm:$0xf] }
  0x46   : > { %12402 = vmatpush3.bf16.msra.mxu1 %v13773_v43  ;;  %v10432_v43 = vrot.slane %v14388_v22, 10  ;;  %v13796_v22 = vld [vmem:[%s17905_s1 + $0x30] sm:$0xff]   ;;  %v494_v13 = vshrl.u32 %v14381_v17, 16  ;;  %v489_v26 = vshrl.u32 %v10190_v12, 16 }
  0x47   : > { %12403 = vmatprep.subr.bf16.mxu1 %v13774_v59  ;;  %v457_v25 = vrot.slane %v452_v62, 4 }
  0x48   : > { %v1931_v42 = vsel %vm14337_vm5, %v10432_v43, %v1930_v28  ;;  %v440_v28 = vshll.u32 %v14482_v11, 16  ;;  %v14530_v43 = vld [vmem:[%s14204_s25 + $0xb8] sm:$0xf]  ;;  %12274 = vmatpush3.bf16.msra.mxu0 %v13794_v19  ;;  %v14575_v19 = vld [vmem:[%s14204_s25 + $0xc8] sm:$0xf] }
  0x49   : > { %12388 = vmatmul.mubr.bf16.gmra.mrb[12].mxu1 %v10386_v15  ;;  %v10181_v15 = vld [vmem:[%s14204_s25 + $0x90] sm:$0x8]  ;;  %12275 = vmatprep.subr.bf16.mxu0 %v13796_v22  ;;  %v10440_v60 = vcombine.low %v1931_v42, %v1934_v48  ;;  %v14590_v42 = vrot.slane %v494_v13, 7  ;;  %v503_v48 = vshrl.u32 %v14575_v19, 16 }
  0x4a   : > { %12404 = vmatpush3.bf16.msra.mxu1 %v13774_v59  ;;  %12407 = vmatprep.mubr.bf16.mxu1 %v10435_v18  ;;  %v14459_v59 = vld [vmem:[%s14204_s25 + $0xe0] sm:$0xc]  ;;  %v1939_v18 = vrot.slane %v1937_v58, 4  ;;  %v423_v34 = vshrl.u32 %v10181_v15, 16  ;;  %v472_v58 = vshrl.u32 %v14360_v4, 16 }
  0x4b   : > { %12405 = vmatprep.subr.bf16.mxu1 %v13775_v16  ;;  %v10434_v14 = vrot.slane %v14459_v59, 10  ;;  %v501_v54 = vrot.slane %v14590_v42, 4 }
  0x4c   : > { %v1941_v40 = vsel %vm14337_vm5, %v1939_v18, %v1940_v0  ;;  %v481_v0 = vshrl.u32 %v14530_v43, 16  ;;  %12276 = vmatpush3.bf16.msra.mxu0 %v13796_v22  ;;  %v10196_v22 = vld [vmem:[%s14204_s25 + $0xe0] sm:$0x8] }
  0x4d   : > { %v14558_v11 = vsel %vm14337_vm5, %v10434_v14, %v1944_v20  ;;  %v10441_v15 = vcombine.low %v14520_v31, %v1941_v40  ;;  %12277 = vmatprep.subr.bf16.mxu0 %v13798_v3  ;;  %v484_v20 = vshll.u32 %v14530_v43, 16  ;;  %v13802_v31 = vld [vmem:[%s17906_s2 + $0x48] sm:$0xff]   ;;  %v538_v40 = vshrl.u32 %v14472_v1, 16 }
  0x4e   : > { %12406 = vmatpush3.bf16.msra.mxu1 %v13775_v16  ;;  %v428_v16 = vshrl.u32 %v14303_v32, 16  ;;  %v10184_v32 = vld [vmem:[%s14204_s25 + $0xa0] sm:$0x8]  ;;  %v483_v18 = vrot.slane %v481_v0, 7 }
  0x4f   : > { %12423 = vmatprep.subr.bf16.mxu1 %v13776_v23  ;;  %v445_v56 = vshrl.u32 %v10184_v32, 16 }
  0x50   : > { %v430_v37 = vrot.slane %v428_v16, 7  ;;  %v474_v16 = vrot.slane %v472_v58, 7  ;;  %12278 = vmatpush3.bf16.msra.mxu0 %v13798_v3  ;;  %v486_v39 = vor.u32 %v484_v20, %v483_v18  ;;  %v505_v58 = vrot.slane %v503_v48, 7  ;;  %v13787_v18 = vld [vmem:[%s17906_s2 + $0x148] sm:$0xff]   ;;  %v14694_v48 = vld [vmem:[%s14204_s25 + $0x9c] sm:$0x1] }
  0x51   : > { %12408 = vmatmul.mubr.bf16.vlgmr.msra.gmra.mrb[0].mxu1 %v10436_v45  ;;  %v14571_v14 = vrot.slane %v445_v56, 11  ;;  %12295 = vmatprep.subr.bf16.mxu0 %v13800_v2  ;;  %v13783_v56 = vld [vmem:[%s17906_s2 + $0x138] sm:$0xff]   ;;  %v528_v3 = vshll.u32 %v10195_v35, 16 }
  0x52   : > { %12424 = vmatpush3.bf16.msra.mxu1 %v13776_v23  ;;  %12411 = vmatprep.mubr.bf16.mxu1 %v10437_v57  ;;  %v413_v23 = vrot.slane %v408_v6, 4  ;;  %v435_v55 = vrot.slane %v430_v37, 4  ;;  %v453_v57 = vshll.u32 %v14325_v47, 16  ;;  %v433_v61 = vor.u32 %v431_v38, %v430_v37 }
  0x53   : > { %12425 = vmatprep.subr.bf16.mxu1 %v13777_v53  ;;  %v461_v6 = vrot.slane %v459_v27, 7  ;;  %v475_v47 = vshll.u32 %v14360_v4, 16  ;;  %v14566_v4 = vsel %vm14337_vm5, %v1946_v50, %v1947_v21  ;;  %v479_v38 = vrot.slane %v474_v16, 4 }
  0x54   : > { %v421_v45 = vsel %vm14373_vm8, %v413_v23, %v420_v33  ;;  %v455_v30 = vor.u32 %v453_v57, %v452_v62  ;;  %v10203_v33 = vrot.slane %v467_v8, 11  ;;  %v10442_v50 = vcombine.low %v14558_v11, %v14566_v4  ;;  %v14647_v4 = vld [vmem:[%s14204_s25 + $0x78] sm:$0xf] }
  0x55   : > { %v14569_v59 = vcombine.low %v412_v41, %v421_v45  ;;  %v464_v23 = vor.u32 %v462_v63, %v461_v6  ;;  %v477_v37 = vor.u32 %v475_v47, %v474_v16  ;;  %v14613_v45 = vrot.slane %v489_v26, 11  ;;  %v13785_v6 = vld [vmem:[%s17906_s2 + $0x140] sm:$0xff]  }
  0x56   : > { %12426 = vmatpush3.bf16.msra.mxu1 %v13777_v53  ;;  %v10201_v53 = vrot.slane %v423_v34, 11  ;;  %v10193_v34 = vld [vmem:[%s14204_s25 + $0xd0] sm:$0x8]  ;;  %v456_v27 = vsel %vm14373_vm8, %v14571_v14, %v455_v30  ;;  %v487_v57 = vsel %vm14373_vm8, %v479_v38, %v486_v39  ;;  %v519_v62 = vshll.u32 %v14440_v49, 16  ;;  %v14651_v14 = vld [vmem:[%s14204_s25 + $0x88] sm:$0xf] }
  0x57   : > { %12427 = vmatprep.subr.bf16.mxu1 %v13778_v5  ;;  %17946 = vst [vmem:[#allocation5_spill] sm:$0xff] %v14569_v59  ;;  %12280 = vmatmul.mubr.bf16.vlgmr.msra.gmra.mrb[0].mxu0 %v14569_v59  ;;  %v465_v43 = vsel %vm14373_vm8, %v457_v25, %v464_v23  ;;  %v478_v41 = vsel %vm14373_vm8, %v10203_v33, %v477_v37  ;;  %v14634_v47 = vrot.slane %v538_v40, 7  ;;  %v10491_v25 = vld [vmem:[%s14204_s25 + $0x74] sm:$0xe]  ;;  %v2387_v26 = vrot.slane %v14647_v4, 5  ;;  %v13814_v4 = vld [vmem:[%s17906_s2 + $0x78] sm:$0xff]  }
  0x58   : > { %v434_v21 = vsel %vm14373_vm8, %v10201_v53, %v433_v61  ;;  %12296 = vmatpush3.bf16.msra.mxu0 %v13800_v2  ;;  %v497_v53 = vshll.u32 %v14381_v17, 16  ;;  %v506_v61 = vshll.u32 %v14575_v19, 16  ;;  %v13804_v17 = vld [vmem:[%s17906_s2 + $0x50] sm:$0xff]   ;;  %v14643_v11 = vcombine.low %v478_v41, %v487_v57  ;;  %v14671_v30 = vld [vmem:[%s14204_s25 + $0x7c] sm:$0x1] }
  0x59   : > { %12412 = vmatmul.mubr.bf16.gmra.mrb[4].mxu1 %v10438_v24  ;;  %12297 = vmatprep.subr.bf16.mxu0 %v13802_v31  ;;  %v541_v19 = vshll.u32 %v14472_v1, 16  ;;  %v545_v2 = vrot.slane %v14634_v47, 4  ;;  %v14674_v23 = vld [vmem:[%s14204_s25 + $0x84] sm:$0xe]  ;;  %v14677_v33 = vld [vmem:[%s14204_s25 + $0x8c] sm:$0x1] }
  0x5a   : > { %12428 = vmatpush3.bf16.msra.mxu1 %v13778_v5  ;;  %12415 = vmatprep.mubr.bf16.mxu1 %v10439_v36  ;;  %v442_v5 = vor.u32 %v440_v28, %v439_v51  ;;  %v516_v36 = vshrl.u32 %v14440_v49, 16  ;;  %v511_v51 = vshrl.u32 %v10193_v34, 16  ;;  %v525_v28 = vshrl.u32 %v10195_v35, 16  ;;  %17949 = vst [vmem:[#allocation8_spill] sm:$0xff] %v14643_v11  ;;  %v14681_v35 = vld [vmem:[%s14204_s25 + $0x98] sm:$0xf] }
  0x5b   : > { %12429 = vmatprep.subr.bf16.mxu1 %v13779_v29  ;;  %v499_v12 = vor.u32 %v497_v53, %v14590_v42  ;;  %v2394_v34 = vrot.slane %v14651_v14, 5  ;;  %v14691_v42 = vld [vmem:[%s14204_s25 + $0x94] sm:$0xe]  ;;  %v10515_v40 = vrot.slane %v10491_v25, 9  ;;  %v14717_v41 = vld [vmem:[%s14204_s25 + $0xac] sm:$0x1] }
  0x5c   : > { %v443_v24 = vsel %vm14373_vm8, %v435_v55, %v442_v5  ;;  %v14618_v55 = vld [vmem:[%s14204_s25 + $0xe8] sm:$0xf]  ;;  %v10205_v63 = vrot.slane %v511_v51, 11  ;;  %v527_v0 = vrot.slane %v525_v28, 7  ;;  %v533_v5 = vshrl.u32 %v10196_v22, 16  ;;  %12298 = vmatpush3.bf16.msra.mxu0 %v13802_v31  ;;  %v13789_v39 = vld [vmem:[%s17906_s2 + $0x150] sm:$0xff]  }
  0x5d   : > { %v14596_v32 = vcombine.low %v434_v21, %v443_v24  ;;  %v547_v49 = vshrl.u32 %v14618_v55, 16  ;;  %12299 = vmatprep.subr.bf16.mxu0 %v13804_v17  ;;  %v550_v24 = vshll.u32 %v14618_v55, 16  ;;  %v500_v1 = vsel %vm14373_vm8, %v14613_v45, %v499_v12  ;;  %v14697_v31 = vld [vmem:[%s14204_s25 + $0xa8] sm:$0xf]  ;;  %v14704_v22 = vld [vmem:[%s14204_s25 + $0xa4] sm:$0xe] }
  0x5e   : > { %12430 = vmatpush3.bf16.msra.mxu1 %v13779_v29  ;;  %v13782_v29 = vld [vmem:[%s17906_s2 + $0x130] sm:$0xff]   ;;  %v530_v13 = vor.u32 %v528_v3, %v527_v0  ;;  %v14657_v20 = vrot.slane %v533_v5, 11  ;;  %v543_v51 = vor.u32 %v541_v19, %v14634_v47  ;;  %v2401_v28 = vrot.slane %v14681_v35, 5  ;;  %v13791_v57 = vld [vmem:[%s17906_s2 + $0x158] sm:$0xff]   ;;  %v10275_v19 = vld [vmem:[%s14204_s25 + $0x40] sm:$0x8] }
  0x5f   : > { %12431 = vmatprep.subr.bf16.mxu1 %v13780_v44  ;;  %17947 = vst [vmem:[#allocation6_spill] sm:$0xff] %v14596_v32  ;;  %12283 = vmatprep.mubr.bf16.mxu0 %v14596_v32  ;;  %v549_v21 = vrot.slane %v547_v49, 7  ;;  %v2408_v45 = vrot.slane %v14697_v31, 5  ;;  %v2389_v53 = vrot.slane %v2387_v26, 4  ;;  %v10516_v55 = vrot.slane %v14674_v23, 9  ;;  %v13812_v47 = vld [vmem:[%s17906_s2 + $0x70] sm:$0xff]  }
  0x60   : > { %12300 = vmatpush3.bf16.msra.mxu0 %v13804_v17  ;;  %v10518_v17 = vrot.slane %v14704_v22, 9  ;;  %v2411_v0 = vrot.slane %v14717_v41, 5  ;;  %v14739_v3 = vld [vmem:[%s14204_s25 + $0xb4] sm:$0xe]  ;;  %v544_v5 = vsel %vm14373_vm8, %v14657_v20, %v543_v51  ;;  %v14754_v49 = vld [vmem:[%s14204_s25 + $0xb8] sm:$0xf]  ;;  %v14764_v12 = vsel %vm14209_vm2, %v10515_v40, %v2387_v26 }
  0x61   : > { %12416 = vmatmul.mubr.bf16.gmra.mrb[8].mxu1 %v10440_v60  ;;  %v13806_v60 = vld [vmem:[%s17906_s2 + $0x58] sm:$0xff]   ;;  %v14781_v20 = vld [vmem:[%s14204_s25 + $0xc8] sm:$0xf]  ;;  %v2415_v25 = vrot.slane %v14754_v49, 5  ;;  %v990_v26 = vshrl.u32 %v10275_v19, 16  ;;  %v14795_v23 = vsel %vm14209_vm2, %v10516_v55, %v2394_v34 }
  0x62   : > { %12432 = vmatpush3.bf16.msra.mxu1 %v13780_v44  ;;  %12419 = vmatprep.mubr.bf16.mxu1 %v10441_v15  ;;  %v14607_v44 = vrot.slane %v516_v36, 7  ;;  %v508_v15 = vor.u32 %v506_v61, %v505_v58  ;;  %v13808_v36 = vld [vmem:[%s17906_s2 + $0x60] sm:$0xff]   ;;  %v2396_v58 = vrot.slane %v2394_v34, 4  ;;  %v10517_v61 = vrot.slane %v14691_v42, 9  ;;  %v10278_v51 = vld [vmem:[%s14204_s25 + $0x58] sm:$0xf] }
  0x63   : > { %12433 = vmatprep.subr.bf16.mxu1 %v13781_v9  ;;  %12301 = vmatprep.subr.bf16.mxu0 %v13806_v60  ;;  %v14812_v14 = vld [vmem:[%s14204_s25 + $0xcc] sm:$0x1]  ;;  %v10291_v34 = vrot.slane %v990_v26, 11  ;;  %v14827_v26 = vld [vmem:[%s14204_s25 + $0xd8] sm:$0xf] }
  0x64   : > { %v523_v8 = vrot.slane %v14607_v44, 4  ;;  %v521_v16 = vor.u32 %v519_v62, %v14607_v44  ;;  %12302 = vmatpush3.bf16.msra.mxu0 %v13806_v60  ;;  %v552_v44 = vor.u32 %v550_v24, %v549_v21  ;;  %v2404_v62 = vrot.slane %v14694_v48, 5  ;;  %v14760_v60 = vld [vmem:[%s17906_s2 + $0x160] sm:$0xff]   ;;  %v13799_v35 = vld [vmem:[%s17906_s2 + $0x178] sm:$0xff]   ;;  %v13818_v48 = vld [vmem:[%s17906_s2 + $0x8] sm:$0xff]  }
  0x65   : > { %12303 = vmatprep.subr.bf16.mxu0 %v13808_v36  ;;  %v10281_v41 = vld [vmem:[%s14204_s25 + $0x70] sm:$0x8] }
  0x66   : > { %12434 = vmatpush3.bf16.msra.mxu1 %v13781_v9  ;;  %v14641_v9 = vcombine.low %v456_v27, %v465_v43  ;;  %v522_v37 = vsel %vm14373_vm8, %v10205_v63, %v521_v16  ;;  %v531_v38 = vsel %vm14373_vm8, %v523_v8, %v530_v13  ;;  %v13810_v27 = vld [vmem:[%s17906_s2 + $0x68] sm:$0xff]   ;;  %v14735_v63 = vrot.slane %v2401_v28, 4  ;;  %v14771_v16 = vld [vmem:[%s14204_s25 + $0x44] sm:$0xf] }
  0x67   : > { %12435 = vmatprep.subr.bf16.mxu1 %v13782_v29  ;;  %v14714_v43 = vcombine.low %v522_v37, %v531_v38  ;;  %v14748_v8 = vrot.slane %v2408_v45, 4  ;;  %v995_v21 = vshrl.u32 %v14771_v16, 16  ;;  %v998_v24 = vshll.u32 %v14771_v16, 16  ;;  %v14805_v37 = vld [vmem:[%s14204_s25 + $0xc4] sm:$0xe] }
  0x68   : > { %17948 = vst [vmem:[#allocation7_spill] sm:$0xff] %v14641_v9  ;;  %12284 = vmatmul.mubr.bf16.gmra.mrb[4].mxu0 %v14641_v9 }
  0x69   : > { %12420 = vmatmul.mubr.bf16.gmra.mrb[12].mxu1 %v10442_v50  ;;  %12287 = vmatprep.mubr.bf16.mxu0 %v14643_v11  ;;  %17951 = vst [vmem:[#allocation10_spill] sm:$0xff] %v14714_v43  ;;  %v997_v38 = vrot.slane %v995_v21, 7  ;;  %v1029_v21 = vshll.u32 %v10278_v51, 16 }
  0x6a   : > { %12436 = vmatpush3.bf16.msra.mxu1 %v13782_v29  ;;  %12439 = vmatprep.mubr.bf16.mxu1 %v14425_v46  ;;  %v509_v29 = vsel %vm14373_vm8, %v501_v54, %v508_v15  ;;  %v2390_v54 = vrot.slane %v14671_v30, 5  ;;  %v10519_v15 = vrot.slane %v14739_v3, 9  ;;  %v14789_v30 = vld [vmem:[%s14204_s25 + $0x54] sm:$0xf] }
  0x6b   : > { %12437 = vmatprep.subr.bf16.mxu1 %v13783_v56  ;;  %v14707_v50 = vcombine.low %v500_v1, %v509_v29  ;;  %12304 = vmatpush3.bf16.msra.mxu0 %v13808_v36  ;;  %v14802_v36 = vld [vmem:[%s14204_s25 + $0xbc] sm:$0x1]  ;;  %v1000_v55 = vor.u32 %v998_v24, %v997_v38 }
  0x6c   : > { %12305 = vmatprep.subr.bf16.mxu0 %v13810_v27  ;;  %v14830_v24 = vld [vmem:[%s14204_s25 + $0xdc] sm:$0x1] }
  0x6d   : > { %17950 = vst [vmem:[#allocation9_spill] sm:$0xff] %v14707_v50 }
  0x6e   : > { %12438 = vmatpush3.bf16.msra.mxu1 %v13783_v56  ;;  %v2397_v56 = vrot.slane %v14677_v33, 5 }
  0x6f   : > { %12455 = vmatprep.subr.bf16.mxu1 %v13785_v6  ;;  %12306 = vmatpush3.bf16.msra.mxu0 %v13810_v27  ;;  %v1017_v27 = vshrl.u32 %v14789_v30, 16 }
  0x70   : > { %12288 = vmatmul.mubr.bf16.gmra.mrb[8].mxu0 %v14707_v50  ;;  %12307 = vmatprep.subr.bf16.mxu0 %v13812_v47  ;;  %v14799_v33 = vsel %vm14209_vm2, %v2396_v58, %v2397_v56  ;;  %v1002_v56 = vrot.slane %v997_v38, 4 }
  0x71   : > { %12440 = vmatmul.mubr.bf16.vlgmr.msra.gmra.mrb[0].mxu1 %v14569_v59  ;;  %12291 = vmatprep.mubr.bf16.mxu0 %v14714_v43  ;;  %v1019_v58 = vrot.slane %v1017_v27, 7 }
  0x72   : > { %12456 = vmatpush3.bf16.msra.mxu1 %v13785_v6  ;;  %12443 = vmatprep.mubr.bf16.mxu1 %v14596_v32  ;;  %v553_v6 = vsel %vm14373_vm8, %v545_v2, %v552_v44  ;;  %v10276_v2 = vld [vmem:[%s14204_s25 + $0x48] sm:$0xf] }
  0x73   : > { %12457 = vmatprep.subr.bf16.mxu1 %v13787_v18  ;;  %v14774_v13 = vcombine.low %v544_v5, %v553_v6  ;;  %v1004_v1 = vshrl.u32 %v10276_v2, 16  ;;  %v1007_v29 = vshll.u32 %v10276_v2, 16  ;;  %12308 = vmatpush3.bf16.msra.mxu0 %v13812_v47  ;;  %v1026_v5 = vshrl.u32 %v10278_v51, 16  ;;  %v14821_v47 = vld [vmem:[%s14204_s25 + $0xd4] sm:$0xe] }
  0x74   : > { %12309 = vmatprep.subr.bf16.mxu0 %v13814_v4  ;;  %v17913_v6 = vrot.slane %v14781_v20, 5  ;;  %v2418_v51 = vrot.slane %v14802_v36, 5 }
  0x75   : > { %17952 = vst [vmem:[#allocation11_spill] sm:$0xff] %v14774_v13  ;;  %v1006_v44 = vrot.slane %v1004_v1, 7  ;;  %v1001_v1 = vsel %vm14373_vm8, %v10291_v34, %v1000_v55  ;;  %v1028_v27 = vrot.slane %v1026_v5, 7  ;;  %v13797_v34 = vld [vmem:[%s17906_s2 + $0x170] sm:$0xff]   ;;  %v14850_v55 = vld [vmem:[%s14204_s25 + $0xe8] sm:$0xf] }
  0x76   : > { %12458 = vmatpush3.bf16.msra.mxu1 %v13787_v18  ;;  %v14778_v18 = vsel %vm14209_vm2, %v2389_v53, %v2390_v54  ;;  %v1020_v53 = vshll.u32 %v14789_v30, 16  ;;  %v13795_v54 = vld [vmem:[%s17906_s2 + $0x168] sm:$0xff]  }
  0x77   : > { %12459 = vmatprep.subr.bf16.mxu1 %v13789_v39  ;;  %v1009_v19 = vor.u32 %v1007_v29, %v1006_v44  ;;  %v14837_v29 = vrot.slane %v2415_v25, 4  ;;  %12310 = vmatpush3.bf16.msra.mxu0 %v13814_v4  ;;  %v1031_v4 = vor.u32 %v1029_v21, %v1028_v27  ;;  %v14874_v21 = vsel %vm14209_vm2, %v14735_v63, %v2404_v62  ;;  %v14888_v62 = vld [vmem:[%s14204_s25 + $0x64] sm:$0xf]  ;;  %v14955_v44 = vld [vmem:[%s14204_s25 + $0xa8] sm:$0x3] }
  0x78   : > { %12292 = vmatmul.mubr.bf16.gmra.mrb[12].mxu0 %v14774_v13  ;;  %v1022_v38 = vor.u32 %v1020_v53, %v1019_v58  ;;  %v10523_v42 = vcombine.low %v14764_v12, %v14778_v18  ;;  %v10524_v63 = vcombine.low %v14795_v23, %v14799_v33  ;;  %v14898_v12 = vsel %vm14209_vm2, %v10518_v17, %v2408_v45  ;;  %v10279_v18 = vld [vmem:[%s14204_s25 + $0x60] sm:$0x8]  ;;  %v13820_v45 = vld [vmem:[%s17906_s2 + $0x10] sm:$0xff]  }
  0x79   : > { %12444 = vmatmul.mubr.bf16.gmra.mrb[4].mxu1 %v14641_v9  ;;  %v1034_v22 = vshrl.u32 %v10279_v18, 16  ;;  %v14917_v17 = vsel %vm14209_vm2, %v14748_v8, %v2411_v0  ;;  %v10282_v18 = vld [vmem:[%s14204_s25 + $0x78] sm:$0xf]  ;;  %v1056_v8 = vshrl.u32 %v10281_v41, 16  ;;  %v17953_v33 = vrot.slane %v14781_v20, 5 }
  0x7a   : > { %12460 = vmatpush3.bf16.msra.mxu1 %v13789_v39  ;;  %12447 = vmatprep.mubr.bf16.mxu1 %v14643_v11  ;;  %v10277_v39 = vld [vmem:[%s14204_s25 + $0x50] sm:$0x8]  ;;  %v1070_v53 = vshrl.u32 %v10282_v18, 16 }
  0x7b   : > { %12461 = vmatprep.subr.bf16.mxu1 %v13791_v57  ;;  %v1012_v40 = vshrl.u32 %v10277_v39, 16  ;;  %v1024_v39 = vrot.slane %v1019_v58, 4  ;;  %v10293_v0 = vrot.slane %v1034_v22, 11  ;;  %v14946_v22 = vsel %vm14209_vm2, %v14837_v29, %v2418_v51 }
  0x7c   : > { %v10294_v41 = vrot.slane %v1056_v8, 11  ;;  %v1072_v29 = vrot.slane %v1070_v53, 7  ;;  %v13803_v53 = vld [vmem:[%s17906_s2 + $0x188] sm:$0xff]  }
  0x7d   : > { %v10292_v2 = vrot.slane %v1012_v40, 11  ;;  %v1010_v40 = vsel %vm14373_vm8, %v1002_v56, %v1009_v19  ;;  %v2429_v19 = vrot.slane %v14827_v26, 5  ;;  %v1073_v56 = vshll.u32 %v10282_v18, 16  ;;  %v10286_v26 = vld [vmem:[%s14204_s25 + $0x98] sm:$0xf] }
  0x7e   : > { %12462 = vmatpush3.bf16.msra.mxu1 %v13791_v57  ;;  %v13816_v57 = vld [vmem:[%s17906_s2] sm:$0xff]   ;;  %v10299_v58 = vcombine.low %v1001_v1, %v1010_v40  ;;  %v1032_v1 = vsel %vm14373_vm8, %v1024_v39, %v1031_v4  ;;  %v1039_v39 = vshrl.u32 %v14888_v62, 16 }
  0x7f   : > { %12463 = vmatprep.subr.bf16.mxu1 %v14760_v60  ;;  %v1023_v5 = vsel %vm14373_vm8, %v10292_v2, %v1022_v38  ;;  %12327 = vmatprep.subr.bf16.mxu0 %v13816_v57  ;;  %v14867_v2 = vsel %vm14209_vm2, %v10517_v61, %v2401_v28  ;;  %v2436_v28 = vrot.slane %v14850_v55, 5  ;;  %v10280_v38 = vld [vmem:[%s14204_s25 + $0x68] sm:$0xf]  ;;  %v14928_v4 = vld [vmem:[%s14204_s25 + $0xe4] sm:$0xe]  ;;  %v2431_v51 = vrot.slane %v2429_v19, 4 }
  0x80   : > { %12311 = vmatprep.mubr.bf16.mxu0 %v10299_v58  ;;  %v10300_v61 = vcombine.low %v1023_v5, %v1032_v1  ;;  %v10525_v31 = vcombine.low %v14867_v2, %v14874_v21  ;;  %v1048_v27 = vshrl.u32 %v10280_v38, 16  ;;  %v1051_v40 = vshll.u32 %v10280_v38, 16  ;;  %v14907_v58 = vld [vmem:[%s14204_s25 + $0x74] sm:$0xf]  ;;  %v14931_v1 = vld [vmem:[%s14204_s25 + $0xec] sm:$0x1] }
  0x81   : > { %12448 = vmatmul.mubr.bf16.gmra.mrb[8].mxu1 %v14707_v50  ;;  %v14925_v5 = vsel %vm14209_vm2, %v10519_v15, %v2415_v25  ;;  %v1061_v38 = vshrl.u32 %v14907_v58, 16  ;;  %v1064_v49 = vshll.u32 %v14907_v58, 16  ;;  %v13801_v15 = vld [vmem:[%s17906_s2 + $0x180] sm:$0xff]   ;;  %v17955_v21 = vrot.slane %v14812_v14, 5 }
  0x82   : > { %12464 = vmatpush3.bf16.msra.mxu1 %v14760_v60  ;;  %12451 = vmatprep.mubr.bf16.mxu1 %v14714_v43  ;;  %v14856_v60 = vrot.slane %v17913_v6, 4  ;;  %v1050_v3 = vrot.slane %v1048_v27, 7  ;;  %v14949_v27 = vld [vmem:[%s14204_s25 + $0xa0] sm:$0xc]  ;;  %v10522_v6 = vrot.slane %v14928_v4, 9  ;;  %v10527_v23 = vcombine.low %v14925_v5, %v14946_v22 }
  0x83   : > { %12465 = vmatprep.subr.bf16.mxu1 %v13795_v54  ;;  %12312 = vmatmul.mubr.bf16.vlgmr.msra.gmra.mrb[16].mxu0 %v10300_v61  ;;  %v1041_v61 = vrot.slane %v1039_v39, 7  ;;  %v1063_v39 = vrot.slane %v1061_v38, 7  ;;  %v15029_v22 = vld [vmem:[%s14204_s25 + $0x94] sm:$0xf] }
  0x84   : > { %12328 = vmatpush3.bf16.msra.mxu0 %v13816_v57  ;;  %v15026_v20 = vsel %vm14209_vm2, %v14856_v60, %v17955_v21  ;;  %v17957_v60 = vrot.slane %v14830_v24, 5  ;;  %v1108_v24 = vshll.u32 %v15029_v22, 16 }
  0x85   : > { %12329 = vmatprep.subr.bf16.mxu0 %v13818_v48  ;;  %v1046_v57 = vrot.slane %v1041_v61, 4  ;;  %v1068_v38 = vrot.slane %v1063_v39, 4 }
  0x86   : > { %12466 = vmatpush3.bf16.msra.mxu1 %v13795_v54  ;;  %v1042_v54 = vshll.u32 %v14888_v62, 16 }
  0x87   : > { %12467 = vmatprep.subr.bf16.mxu1 %v13797_v34 }
  0x88   : > { %v1044_v25 = vor.u32 %v1042_v54, %v1041_v61  ;;  %v14958_v54 = vld [vmem:[%s14204_s25 + $0xb0] sm:$0xc]  ;;  %12330 = vmatpush3.bf16.msra.mxu0 %v13818_v48  ;;  %v1066_v61 = vor.u32 %v1064_v49, %v1063_v39  ;;  %v13822_v48 = vld [vmem:[%s17906_s2 + $0x18] sm:$0xff]   ;;  %v15067_v39 = vld [vmem:[%s14204_s25 + $0xc8] sm:$0x3] }
  0x89   : > { %12452 = vmatmul.mubr.bf16.gmra.mrb[12].mxu1 %v14774_v13  ;;  %12331 = vmatprep.subr.bf16.mxu0 %v13820_v45 }
  0x8a   : > { %12468 = vmatpush3.bf16.msra.mxu1 %v13797_v34  ;;  %12471 = vmatprep.mubr.bf16.mxu1 %v10523_v42  ;;  %v14952_v34 = vld [vmem:[%s14204_s25 + $0xa4] sm:$0xf]  ;;  %v1053_v42 = vor.u32 %v1051_v40, %v1050_v3  ;;  %v1045_v36 = vsel %vm14373_vm8, %v10293_v0, %v1044_v25  ;;  %v14976_v0 = vrot.slane %v2436_v28, 4  ;;  %v14979_v3 = vld [vmem:[%s14204_s25 + $0xb4] sm:$0xf]  ;;  %v1067_v49 = vsel %vm14373_vm8, %v10294_v41, %v1066_v61 }
  0x8b   : > { %12469 = vmatprep.subr.bf16.mxu1 %v13799_v35  ;;  %v1075_v25 = vor.u32 %v1073_v56, %v1072_v29  ;;  %v10526_v56 = vcombine.low %v14898_v12, %v14917_v17  ;;  %v13805_v41 = vld [vmem:[%s17906_s2 + $0x190] sm:$0xff]   ;;  %v2712_v61 = vrot.slane %v14979_v3, 6  ;;  %v10283_v17 = vld [vmem:[%s14204_s25 + $0x80] sm:$0x8] }
  0x8c   : > { %v1054_v18 = vsel %vm14373_vm8, %v1046_v57, %v1053_v42  ;;  %12332 = vmatpush3.bf16.msra.mxu0 %v13820_v45  ;;  %v13824_v45 = vld [vmem:[%s17906_s2 + $0x20] sm:$0xff]   ;;  %v1117_v42 = vshll.u32 %v10286_v26, 16 }
  0x8d   : > { %v10301_v8 = vcombine.low %v1045_v36, %v1054_v18  ;;  %v1076_v36 = vsel %vm14373_vm8, %v1068_v38, %v1075_v25  ;;  %12333 = vmatprep.subr.bf16.mxu0 %v13822_v48  ;;  %v14999_v18 = vld [vmem:[%s14204_s25 + $0x84] sm:$0xf]  ;;  %v10284_v38 = vld [vmem:[%s14204_s25 + $0x88] sm:$0xf]  ;;  %v15046_v25 = vsel %vm14209_vm2, %v2431_v51, %v17957_v60  ;;  %v1114_v60 = vshrl.u32 %v10286_v26, 16 }
  0x8e   : > { %12470 = vmatpush3.bf16.msra.mxu1 %v13799_v35  ;;  %v17914_v35 = vrot.slane %v14952_v34, 6  ;;  %v10302_v29 = vcombine.low %v1067_v49, %v1076_v36  ;;  %v1086_v2 = vshll.u32 %v14999_v18, 16  ;;  %v1095_v5 = vshll.u32 %v10284_v38, 16  ;;  %v15049_v36 = vld [vmem:[%s14204_s25 + $0xb8] sm:$0x3] }
  0x8f   : > { %12487 = vmatprep.subr.bf16.mxu1 %v13801_v15  ;;  %12315 = vmatprep.mubr.bf16.mxu0 %v10301_v8  ;;  %v13826_v8 = vld [vmem:[%s17906_s2 + $0x28] sm:$0xff]   ;;  %v17956_v49 = vrot.slane %v14821_v47, 9  ;;  %v1105_v47 = vshrl.u32 %v15029_v22, 16  ;;  %v1116_v57 = vrot.slane %v1114_v60, 7  ;;  %v2715_v40 = vrot.slane %v15049_v36, 6 }
  0x90   : > { %12316 = vmatmul.mubr.bf16.gmra.mrb[20].mxu0 %v10302_v29  ;;  %v15052_v29 = vld [vmem:[%s14204_s25 + $0xc4] sm:$0xf] }
  0x91   : > { %12472 = vmatmul.mubr.bf16.vlgmr.msra.gmra.mrb[0].mxu1 %v10524_v63  ;;  %v17954_v63 = vrot.slane %v14805_v37, 9  ;;  %v1078_v37 = vshrl.u32 %v10283_v17, 16  ;;  %v15040_v14 = vsel %vm14209_vm2, %v17956_v49, %v2429_v19  ;;  %12334 = vmatpush3.bf16.msra.mxu0 %v13822_v48  ;;  %v1107_v49 = vrot.slane %v1105_v47, 7  ;;  %v13807_v48 = vld [vmem:[%s17906_s2 + $0x198] sm:$0xff]  }
  0x92   : > { %12488 = vmatpush3.bf16.msra.mxu1 %v13801_v15  ;;  %12475 = vmatprep.mubr.bf16.mxu1 %v10525_v31  ;;  %v1083_v15 = vshrl.u32 %v14999_v18, 16  ;;  %v1092_v31 = vshrl.u32 %v10284_v38, 16 }
  0x93   : > { %v15015_v12 = vsel %vm14209_vm2, %v17954_v63, %v17953_v33  ;;  %12489 = vmatprep.subr.bf16.mxu1 %v13803_v53  ;;  %v10285_v63 = vld [vmem:[%s14204_s25 + $0x90] sm:$0x8]  ;;  %v10295_v17 = vrot.slane %v1078_v37, 11  ;;  %12335 = vmatprep.subr.bf16.mxu0 %v13824_v45  ;;  %v15064_v37 = vld [vmem:[%s14204_s25 + $0xc0] sm:$0xc]  ;;  %v1112_v47 = vrot.slane %v1107_v49, 4 }
  0x94   : > { %v1085_v33 = vrot.slane %v1083_v15, 7  ;;  %v1094_v19 = vrot.slane %v1092_v31, 7  ;;  %v1100_v38 = vshrl.u32 %v10285_v63, 16  ;;  %v2707_v15 = vrot.slane %v17914_v35, 4 }
  0x95   : > { %12336 = vmatpush3.bf16.msra.mxu0 %v13824_v45  ;;  %v2714_v35 = vrot.slane %v2712_v61, 4  ;;  %v10528_v4 = vcombine.low %v15015_v12, %v15026_v20  ;;  %v17961_v20 = vrot.slane %v14955_v44, 6 }
  0x96   : > { %12490 = vmatpush3.bf16.msra.mxu1 %v13803_v53  ;;  %v1088_v51 = vor.u32 %v1086_v2, %v1085_v33  ;;  %v1090_v21 = vrot.slane %v1085_v33, 4  ;;  %v1097_v31 = vor.u32 %v1095_v5, %v1094_v19  ;;  %v10296_v63 = vrot.slane %v1100_v38, 11  ;;  %v15070_v53 = vld [vmem:[%s14204_s25 + $0xd0] sm:$0xc]  ;;  %12337 = vmatprep.subr.bf16.mxu0 %v13826_v8 }
  0x97   : > { %12491 = vmatprep.subr.bf16.mxu1 %v13805_v41  ;;  %v1110_v33 = vor.u32 %v1108_v24, %v1107_v49  ;;  %v17915_v5 = vrot.slane %v15052_v29, 6  ;;  %v1119_v38 = vor.u32 %v1117_v42, %v1116_v57  ;;  %v15106_v57 = vld [vmem:[%s14204_s25 + $0xd4] sm:$0xf]  ;;  %v17960_v42 = vrot.slane %v14949_v27, 10  ;;  %v13830_v27 = vld [vmem:[%s17906_s2 + $0x38] sm:$0xff]  }
  0x98   : > { %v1089_v2 = vsel %vm14373_vm8, %v10295_v17, %v1088_v51  ;;  %v1098_v26 = vsel %vm14373_vm8, %v1090_v21, %v1097_v31  ;;  %v13828_v17 = vld [vmem:[%s17906_s2 + $0x30] sm:$0xff]   ;;  %v15139_v21 = vld [vmem:[%s14204_s25 + $0xa4] sm:$0xf]  ;;  %v17962_v49 = vrot.slane %v14958_v54, 10  ;;  %v10287_v31 = vld [vmem:[%s14204_s25 + $0xa0] sm:$0x8] }
  0x99   : > { %12476 = vmatmul.mubr.bf16.gmra.mrb[4].mxu1 %v10526_v56  ;;  %v13809_v56 = vld [vmem:[%s17906_s2 + $0x1a0] sm:$0xff]   ;;  %v10303_v36 = vcombine.low %v1089_v2, %v1098_v26  ;;  %v1111_v19 = vsel %vm14373_vm8, %v10296_v63, %v1110_v33  ;;  %12338 = vmatpush3.bf16.msra.mxu0 %v13826_v8  ;;  %v15136_v8 = vrot.slane %v17915_v5, 4  ;;  %v10288_v63 = vld [vmem:[%s14204_s25 + $0xa8] sm:$0xf]  ;;  %v1130_v2 = vshll.u32 %v15139_v21, 16 }
  0x9a   : > { %12492 = vmatpush3.bf16.msra.mxu1 %v13805_v41  ;;  %12479 = vmatprep.mubr.bf16.mxu1 %v10527_v23  ;;  %v15095_v41 = vsel %vm14209_vm2, %v10522_v6, %v2436_v28  ;;  %v17958_v23 = vrot.slane %v14931_v1, 5  ;;  %v10529_v6 = vcombine.low %v15040_v14, %v15046_v25  ;;  %v1120_v28 = vsel %vm14373_vm8, %v1112_v47, %v1119_v38  ;;  %v15118_v1 = vld [vmem:[%s17906_s2 + $0x1a8] sm:$0xff]   ;;  %v15163_v26 = vld [vmem:[%s14204_s25 + $0xb4] sm:$0xf]  ;;  %v15172_v38 = vld [vmem:[%s14204_s25 + $0xd8] sm:$0x3] }
  0x9b   : > { %12493 = vmatprep.subr.bf16.mxu1 %v13807_v48  ;;  %12319 = vmatprep.mubr.bf16.mxu0 %v10303_v36  ;;  %v15132_v14 = vsel %vm14337_vm5, %v2707_v15, %v17961_v20  ;;  %v10304_v25 = vcombine.low %v1111_v19, %v1120_v28  ;;  %v15152_v60 = vsel %vm14337_vm5, %v17962_v49, %v2712_v61  ;;  %v15155_v15 = vld [vmem:[%s14204_s25 + $0xe4] sm:$0xf]  ;;  %v2726_v33 = vrot.slane %v15106_v57, 6  ;;  %v15193_v51 = vld [vmem:[%s14204_s25 + $0xf4] sm:$0xf] }
  0x9c   : > { %v15102_v24 = vsel %vm14209_vm2, %v14976_v0, %v17958_v23  ;;  %v17959_v0 = vrot.slane %v14952_v34, 6  ;;  %12339 = vmatprep.subr.bf16.mxu0 %v13828_v17  ;;  %v1122_v54 = vshrl.u32 %v10287_v31, 16  ;;  %v1136_v47 = vshrl.u32 %v10288_v63, 16  ;;  %v15175_v23 = vld [vmem:[%s14204_s25 + $0xe0] sm:$0xc] }
  0x9d   : > { %v10530_v44 = vcombine.low %v15095_v41, %v15102_v24  ;;  %12320 = vmatmul.mubr.bf16.gmra.mrb[24].mxu0 %v10304_v25  ;;  %v1139_v61 = vshll.u32 %v10288_v63, 16  ;;  %v15169_v19 = vsel %vm14337_vm5, %v2714_v35, %v2715_v40  ;;  %v1149_v20 = vshrl.u32 %v15163_v26, 16  ;;  %v15181_v25 = vld [vmem:[%s14204_s25 + $0xe8] sm:$0x3]  ;;  %v15241_v24 = vld [vmem:[%s14204_s25 + $0x114] sm:$0xf] }
  0x9e   : > { %v15126_v12 = vsel %vm14337_vm5, %v17960_v42, %v17959_v0  ;;  %12494 = vmatpush3.bf16.msra.mxu1 %v13807_v48  ;;  %v1127_v48 = vshrl.u32 %v15139_v21, 16  ;;  %v10289_v0 = vld [vmem:[%s14204_s25 + $0xb0] sm:$0x8]  ;;  %v10290_v42 = vld [vmem:[%s14204_s25 + $0xb8] sm:$0xf]  ;;  %12340 = vmatpush3.bf16.msra.mxu0 %v13828_v17  ;;  %v10297_v49 = vrot.slane %v1122_v54, 11 }
  0x9f   : > { %12495 = vmatprep.subr.bf16.mxu1 %v13809_v56  ;;  %v10589_v36 = vcombine.low %v15126_v12, %v15132_v14  ;;  %v1138_v12 = vrot.slane %v1136_v47, 7  ;;  %v1144_v14 = vshrl.u32 %v10289_v0, 16  ;;  %v1152_v40 = vshll.u32 %v15163_v26, 16  ;;  %12341 = vmatprep.subr.bf16.mxu0 %v13830_v27  ;;  %v13813_v17 = vld [vmem:[%s17906_s2 + $0x1b0] sm:$0xff]  }
  0xa0   : > { %v1129_v28 = vrot.slane %v1127_v48, 7  ;;  %v1151_v63 = vrot.slane %v1149_v20, 7  ;;  %v1158_v48 = vshrl.u32 %v10290_v42, 16  ;;  %v15190_v54 = vld [vmem:[%s14204_s25 + $0xf0] sm:$0xc]  ;;  %v1161_v55 = vshll.u32 %v10290_v42, 16 }
  0xa1   : > { %12480 = vmatmul.mubr.bf16.gmra.mrb[8].mxu1 %v10528_v4  ;;  %v2733_v4 = vrot.slane %v15155_v15, 6  ;;  %v1141_v47 = vor.u32 %v1139_v61, %v1138_v12  ;;  %v10298_v0 = vrot.slane %v1144_v14, 11  ;;  %v2728_v45 = vrot.slane %v2726_v33, 4 }
  0xa2   : > { %12496 = vmatpush3.bf16.msra.mxu1 %v13809_v56  ;;  %12483 = vmatprep.mubr.bf16.mxu1 %v10529_v6  ;;  %v1132_v35 = vor.u32 %v1130_v2, %v1129_v28  ;;  %v1134_v31 = vrot.slane %v1129_v28, 4  ;;  %v15196_v56 = vld [vmem:[%s14204_s25 + $0xf8] sm:$0x3]  ;;  %v1154_v2 = vor.u32 %v1152_v40, %v1151_v63  ;;  %v1156_v28 = vrot.slane %v1151_v63, 4 }
  0xa3   : > { %12497 = vmatprep.subr.bf16.mxu1 %v15118_v1  ;;  %v1160_v20 = vrot.slane %v1158_v48, 7  ;;  %12342 = vmatpush3.bf16.msra.mxu0 %v13830_v27  ;;  %v2729_v5 = vrot.slane %v15172_v38, 6  ;;  %v10585_v61 = vrot.slane %v15175_v23, 10  ;;  %v2736_v12 = vrot.slane %v15181_v25, 6 }
  0xa4   : > { %v1133_v6 = vsel %vm14373_vm8, %v10297_v49, %v1132_v35  ;;  %v1142_v42 = vsel %vm14373_vm8, %v1134_v31, %v1141_v47  ;;  %v13815_v49 = vld [vmem:[%s17906_s2 + $0x1b8] sm:$0xff]   ;;  %v1155_v14 = vsel %vm14373_vm8, %v10298_v0, %v1154_v2  ;;  %v2735_v23 = vrot.slane %v2733_v4, 4  ;;  %v15221_v31 = vld [vmem:[%s14204_s25 + $0x104] sm:$0xf] }
  0xa5   : > { %v10305_v27 = vcombine.low %v1133_v6, %v1142_v42  ;;  %v1163_v38 = vor.u32 %v1161_v55, %v1160_v20  ;;  %v10586_v40 = vrot.slane %v15190_v54, 10  ;;  %v2743_v35 = vrot.slane %v15196_v56, 6  ;;  %v13817_v55 = vld [vmem:[%s17906_s2 + $0x1c0] sm:$0xff]   ;;  %v10232_v20 = vld [vmem:[%s14204_s25 + $0x58] sm:$0x3] }
  0xa6   : > { %12498 = vmatpush3.bf16.msra.mxu1 %v15118_v1  ;;  %v2740_v1 = vrot.slane %v15193_v51, 6  ;;  %v17963_v63 = vrot.slane %v15052_v29, 6  ;;  %v17964_v48 = vrot.slane %v15064_v37, 10  ;;  %v17965_v47 = vrot.slane %v15067_v39, 6 }
  0xa7   : > { %12499 = vmatprep.subr.bf16.mxu1 %v13813_v17  ;;  %12323 = vmatprep.mubr.bf16.mxu0 %v10305_v27  ;;  %v1164_v25 = vsel %vm14373_vm8, %v1156_v28, %v1163_v38  ;;  %v10590_v37 = vcombine.low %v15152_v60, %v15169_v19  ;;  %v17966_v39 = vrot.slane %v15070_v53, 10  ;;  %v902_v2 = vrot.slane %v14771_v16, 6  ;;  %v10575_v53 = vld [vmem:[%s14204_s25 + $0x100] sm:$0xc]  ;;  %v15261_v27 = vld [vmem:[%s14204_s25 + $0x108] sm:$0x3] }
  0xa8   : > { %v2720_v54 = vsel %vm14337_vm5, %v17964_v48, %v17963_v63  ;;  %v2723_v0 = vsel %vm14337_vm5, %v15136_v8, %v17965_v47  ;;  %v10306_v41 = vcombine.low %v1155_v14, %v1164_v25  ;;  %v10229_v8 = vld [vmem:[%s14204_s25 + $0x48] sm:$0x3]  ;;  %v909_v19 = vrot.slane %v14789_v30, 6  ;;  %v15267_v25 = vld [vmem:[%s14204_s25 + $0x110] sm:$0xc] }
  0xa9   : > { %12484 = vmatmul.mubr.bf16.gmra.mrb[12].mxu1 %v10530_v44  ;;  %v10227_v44 = vld [vmem:[%s14204_s25 + $0x40] sm:$0xc]  ;;  %v15252_v56 = vsel %vm14337_vm5, %v17966_v39, %v2726_v33  ;;  %v905_v28 = vrot.slane %v10229_v8, 6  ;;  %v10591_v42 = vcombine.low %v2720_v54, %v2723_v0  ;;  %v904_v16 = vrot.slane %v902_v2, 4  ;;  %v13819_v54 = vld [vmem:[%s17906_s2 + $0x1c8] sm:$0xff]  }
  0xaa   : > { %12500 = vmatpush3.bf16.msra.mxu1 %v13813_v17  ;;  %12503 = vmatprep.mubr.bf16.mxu1 %v10589_v36  ;;  %v10251_v6 = vrot.slane %v10227_v44, 10  ;;  %v10230_v17 = vld [vmem:[%s14204_s25 + $0x50] sm:$0xc]  ;;  %v2742_v36 = vrot.slane %v2740_v1, 4  ;;  %v912_v14 = vrot.slane %v10232_v20, 6  ;;  %v2747_v38 = vrot.slane %v15221_v31, 6 }
  0xab   : > { %12501 = vmatprep.subr.bf16.mxu1 %v13815_v49  ;;  %12324 = vmatmul.mubr.bf16.gmra.mrb[28].mxu0 %v10306_v41  ;;  %v10252_v60 = vrot.slane %v10230_v17, 10  ;;  %v2754_v63 = vrot.slane %v15241_v24, 6  ;;  %v911_v48 = vrot.slane %v909_v19, 4  ;;  %v15277_v47 = vsel %vm14337_vm5, %v2728_v45, %v2729_v5  ;;  %v15290_v44 = vld [vmem:[%s14204_s25 + $0x118] sm:$0x3] }
  0xac   : > { %v903_v33 = vsel %vm14337_vm5, %v10251_v6, %v902_v2  ;;  %v15283_v0 = vsel %vm14337_vm5, %v10585_v61, %v2733_v4  ;;  %v15287_v41 = vsel %vm14337_vm5, %v2735_v23, %v2736_v12  ;;  %v15295_v39 = vld [vmem:[%s14204_s25 + $0xa0] sm:$0x8]  ;;  %v15299_v5 = vsel %vm14337_vm5, %v10586_v40, %v2740_v1  ;;  %v15308_v12 = vld [vmem:[%s14204_s25 + $0xa8] sm:$0xf]  ;;  %v13821_v40 = vld [vmem:[%s17906_s2 + $0x1d0] sm:$0xff]  }
  0xad   : > { %v910_v30 = vsel %vm14337_vm5, %v10252_v60, %v909_v19  ;;  %v15303_v45 = vsel %vm14337_vm5, %v2742_v36, %v2743_v35  ;;  %v913_v61 = vsel %vm14337_vm5, %v911_v48, %v912_v14  ;;  %v10587_v23 = vrot.slane %v10575_v53, 10  ;;  %v10623_v19 = vld [vmem:[%s14204_s25 + $0xb0] sm:$0x8]  ;;  %v15327_v53 = vld [vmem:[%s14204_s25 + $0xb8] sm:$0xf] }
  0xae   : > { %12502 = vmatpush3.bf16.msra.mxu1 %v13815_v49  ;;  %v906_v49 = vsel %vm14337_vm5, %v904_v16, %v905_v28  ;;  %v2750_v8 = vrot.slane %v15261_v27, 6  ;;  %v10588_v6 = vrot.slane %v15267_v25, 10  ;;  %v10316_v2 = vcombine.low %v910_v30, %v913_v61  ;;  %v10233_v27 = vld [vmem:[%s14204_s25 + $0x60] sm:$0xc] }
  0xaf   : > { %12519 = vmatprep.subr.bf16.mxu1 %v13817_v55  ;;  %v10315_v4 = vcombine.low %v903_v33, %v906_v49  ;;  %v2749_v1 = vrot.slane %v2747_v38, 4  ;;  %v2756_v35 = vrot.slane %v2754_v63, 4  ;;  %v2757_v17 = vrot.slane %v15290_v44, 6 }
  0xb0   : > { %v2991_v36 = vshrl.u32 %v14952_v34, 16  ;;  %v10592_v28 = vcombine.low %v15252_v56, %v15277_v47  ;;  %v2986_v20 = vshrl.u32 %v15295_v39, 16  ;;  %v3000_v60 = vshrl.u32 %v15308_v12, 16  ;;  %v10235_v56 = vld [vmem:[%s14204_s25 + $0x68] sm:$0x3] }
  0xb1   : > { %12504 = vmatmul.mubr.bf16.vlgmr.msra.gmra.mrb[0].mxu1 %v10590_v37  ;;  %12343 = vmatprep.mubr.bf16.mxu0 %v10315_v4  ;;  %v10593_v37 = vcombine.low %v15283_v0, %v15287_v41  ;;  %v10253_v33 = vrot.slane %v10233_v27, 10  ;;  %v916_v16 = vrot.slane %v14888_v62, 6  ;;  %v10594_v14 = vcombine.low %v15299_v5, %v15303_v45  ;;  %v10236_v47 = vld [vmem:[%s14204_s25 + $0x70] sm:$0xc]  ;;  %v10238_v0 = vld [vmem:[%s14204_s25 + $0x78] sm:$0x3] }
  0xb2   : > { %12520 = vmatpush3.bf16.msra.mxu1 %v13817_v55  ;;  %12507 = vmatprep.mubr.bf16.mxu1 %v10591_v42  ;;  %v2994_v55 = vshll.u32 %v14952_v34, 16  ;;  %v3003_v42 = vshll.u32 %v15308_v12, 16  ;;  %v15338_v25 = vsel %vm14337_vm5, %v10587_v23, %v2747_v38  ;;  %v3013_v30 = vshrl.u32 %v14979_v3, 16  ;;  %v13823_v38 = vld [vmem:[%s17906_s2 + $0x1d8] sm:$0xff]  }
  0xb3   : > { %12521 = vmatprep.subr.bf16.mxu1 %v13819_v54  ;;  %12344 = vmatmul.mubr.bf16.vlgmr.msra.gmra.mrb[16].mxu0 %v10316_v2  ;;  %v919_v48 = vrot.slane %v10235_v56, 6  ;;  %v15343_v34 = vrot.slane %v2991_v36, 7  ;;  %v3022_v41 = vshrl.u32 %v15327_v53, 16  ;;  %v917_v62 = vsel %vm14337_vm5, %v10253_v33, %v916_v16  ;;  %v15360_v36 = vld [vmem:[%s14204_s25 + $0xc8] sm:$0xf] }
  0xb4   : > { %v918_v44 = vrot.slane %v916_v16, 4  ;;  %v3002_v49 = vrot.slane %v3000_v60, 7  ;;  %v10254_v39 = vrot.slane %v10236_v47, 10  ;;  %v923_v4 = vrot.slane %v14907_v58, 6 }
  0xb5   : > { %v926_v61 = vrot.slane %v10238_v0, 6  ;;  %v15354_v12 = vsel %vm14337_vm5, %v2749_v1, %v2750_v8  ;;  %v3008_v23 = vshrl.u32 %v10623_v19, 16  ;;  %v3016_v2 = vshll.u32 %v14979_v3, 16  ;;  %v10241_v0 = vld [vmem:[%s14204_s25 + $0x88] sm:$0x3] }
  0xb6   : > { %12522 = vmatpush3.bf16.msra.mxu1 %v13819_v54  ;;  %v920_v54 = vsel %vm14337_vm5, %v918_v44, %v919_v48  ;;  %v15362_v27 = vrot.slane %v3013_v30, 7  ;;  %v924_v58 = vsel %vm14337_vm5, %v10254_v39, %v923_v4  ;;  %v925_v56 = vrot.slane %v923_v4, 4 }
  0xb7   : > { %12523 = vmatprep.subr.bf16.mxu1 %v13821_v40  ;;  %v10317_v60 = vcombine.low %v917_v62, %v920_v54  ;;  %v15370_v3 = vsel %vm14337_vm5, %v10588_v6, %v2754_v63  ;;  %v3024_v8 = vrot.slane %v3022_v41, 7  ;;  %v3025_v1 = vshll.u32 %v15327_v53, 16  ;;  %v10625_v6 = vld [vmem:[%s14204_s25 + $0xc0] sm:$0x8]  ;;  %v10242_v41 = vld [vmem:[%s14204_s25 + $0x90] sm:$0xc] }
  0xb8   : > { %v3035_v19 = vshrl.u32 %v15052_v29, 16  ;;  %v10595_v33 = vcombine.low %v15338_v25, %v15354_v12  ;;  %v15378_v16 = vsel %vm14337_vm5, %v2756_v35, %v2757_v17  ;;  %v927_v63 = vsel %vm14337_vm5, %v925_v56, %v926_v61  ;;  %v10239_v53 = vld [vmem:[%s14204_s25 + $0x80] sm:$0xc]  ;;  %v15414_v54 = vld [vmem:[%s14204_s25 + $0xd8] sm:$0xf] }
  0xb9   : > { %12508 = vmatmul.mubr.bf16.gmra.mrb[4].mxu1 %v10592_v28  ;;  %v15380_v28 = vrot.slane %v2986_v20, 11  ;;  %v2998_v35 = vrot.slane %v15343_v34, 4  ;;  %12347 = vmatprep.mubr.bf16.mxu0 %v10317_v60  ;;  %v10318_v17 = vcombine.low %v924_v58, %v927_v63  ;;  %v3044_v20 = vshrl.u32 %v15360_v36, 16  ;;  %v15447_v63 = vld [vmem:[%s14204_s25 + $0xe8] sm:$0xf] }
  0xba   : > { %12524 = vmatpush3.bf16.msra.mxu1 %v13821_v40  ;;  %12511 = vmatprep.mubr.bf16.mxu1 %v10593_v37  ;;  %v13825_v40 = vld [vmem:[%s17906_s2 + $0x1e0] sm:$0xff]   ;;  %v15390_v37 = vor.u32 %v2994_v55, %v15343_v34  ;;  %v3005_v25 = vor.u32 %v3003_v42, %v3002_v49  ;;  %v15394_v30 = vrot.slane %v3008_v23, 11  ;;  %v15397_v48 = vor.u32 %v3016_v2, %v15362_v27  ;;  %v13827_v55 = vld [vmem:[%s17906_s2 + $0x1e8] sm:$0xff]   ;;  %v10627_v42 = vld [vmem:[%s14204_s25 + $0xd0] sm:$0x8] }
  0xbb   : > { %12525 = vmatprep.subr.bf16.mxu1 %v13823_v38  ;;  %v3020_v47 = vrot.slane %v15362_v27, 4  ;;  %v3027_v34 = vor.u32 %v3025_v1, %v3024_v8  ;;  %12348 = vmatmul.mubr.bf16.gmra.mrb[20].mxu0 %v10318_v17  ;;  %v3030_v62 = vshrl.u32 %v10625_v6, 16  ;;  %v15405_v44 = vrot.slane %v3035_v19, 7  ;;  %v10244_v23 = vld [vmem:[%s14204_s25 + $0x98] sm:$0x3] }
  0xbc   : > { %v10255_v49 = vrot.slane %v10239_v53, 10  ;;  %v3038_v39 = vshll.u32 %v15052_v29, 16  ;;  %v3047_v4 = vshll.u32 %v15360_v36, 16  ;;  %v3057_v61 = vshrl.u32 %v15106_v57, 16 }
  0xbd   : > { %v930_v12 = vrot.slane %v14999_v18, 6  ;;  %v3046_v2 = vrot.slane %v3044_v20, 7  ;;  %v933_v27 = vrot.slane %v10241_v0, 6  ;;  %v10256_v60 = vrot.slane %v10242_v41, 10 }
  0xbe   : > { %12526 = vmatpush3.bf16.msra.mxu1 %v13823_v38  ;;  %v937_v58 = vrot.slane %v15029_v22, 6  ;;  %v10596_v38 = vcombine.low %v15370_v3, %v15378_v16  ;;  %v2997_v29 = vsel %vm14373_vm8, %v15380_v28, %v15390_v37  ;;  %v940_v8 = vrot.slane %v10244_v23, 6 }
  0xbf   : > { %12527 = vmatprep.subr.bf16.mxu1 %v13825_v40  ;;  %v931_v18 = vsel %vm14337_vm5, %v10255_v49, %v930_v12  ;;  %v932_v36 = vrot.slane %v930_v12, 4  ;;  %v3006_v3 = vsel %vm14373_vm8, %v2998_v35, %v3005_v25  ;;  %v3019_v1 = vsel %vm14373_vm8, %v15394_v30, %v15397_v48  ;;  %v10629_v35 = vld [vmem:[%s14204_s25 + $0xe0] sm:$0x8]  ;;  %v10248_v49 = vld [vmem:[%s14204_s25 + $0xb0] sm:$0xc] }
  0xc0   : > { %v938_v22 = vsel %vm14337_vm5, %v10256_v60, %v937_v58  ;;  %v939_v56 = vrot.slane %v937_v58, 4  ;;  %v3028_v5 = vsel %vm14373_vm8, %v3020_v47, %v3027_v34  ;;  %v3052_v45 = vshrl.u32 %v10627_v42, 16  ;;  %v10245_v48 = vld [vmem:[%s14204_s25 + $0xa0] sm:$0xc]  ;;  %v13831_v47 = vld [vmem:[%s17906_s2 + $0x1f8] sm:$0xff]  }
  0xc1   : > { %12512 = vmatmul.mubr.bf16.gmra.mrb[8].mxu1 %v10594_v14  ;;  %v13829_v14 = vld [vmem:[%s17906_s2 + $0x1f0] sm:$0xff]   ;;  %v10639_v19 = vrot.slane %v3030_v62, 11  ;;  %v934_v16 = vsel %vm14337_vm5, %v932_v36, %v933_v27  ;;  %v3040_v6 = vor.u32 %v3038_v39, %v15405_v44  ;;  %v3042_v53 = vrot.slane %v15405_v44, 4  ;;  %v10247_v62 = vld [vmem:[%s14204_s25 + $0xa8] sm:$0x3] }
  0xc2   : > { %12528 = vmatpush3.bf16.msra.mxu1 %v13825_v40  ;;  %12515 = vmatprep.mubr.bf16.mxu1 %v10595_v33  ;;  %v3066_v33 = vshrl.u32 %v15414_v54, 16  ;;  %v941_v28 = vsel %vm14337_vm5, %v939_v56, %v940_v8  ;;  %v10319_v40 = vcombine.low %v931_v18, %v934_v16  ;;  %v3049_v17 = vor.u32 %v3047_v4, %v3046_v2  ;;  %v10250_v2 = vld [vmem:[%s14204_s25 + $0xb8] sm:$0x3] }
  0xc3   : > { %12529 = vmatprep.subr.bf16.mxu1 %v13827_v55  ;;  %v10320_v37 = vcombine.low %v938_v22, %v941_v28  ;;  %v15452_v20 = vrot.slane %v3057_v61, 7  ;;  %v3060_v25 = vshll.u32 %v15106_v57, 16  ;;  %v3079_v30 = vshrl.u32 %v15155_v15, 16  ;;  %v15470_v61 = vld [vmem:[%s14204_s25 + $0xf8] sm:$0xf] }
  0xc4   : > { %v10645_v0 = vcombine.low %v2997_v29, %v3006_v3  ;;  %v15460_v41 = vrot.slane %v3052_v45, 11  ;;  %12351 = vmatprep.mubr.bf16.mxu0 %v10319_v40  ;;  %v3088_v34 = vshrl.u32 %v15447_v63, 16  ;;  %v3068_v57 = vrot.slane %v3066_v33, 7 }
  0xc5   : > { %v3069_v44 = vshll.u32 %v15414_v54, 16  ;;  %12352 = vmatmul.mubr.bf16.gmra.mrb[24].mxu0 %v10320_v37  ;;  %v3074_v42 = vshrl.u32 %v10629_v35, 16  ;;  %v10646_v39 = vcombine.low %v3019_v1, %v3028_v5  ;;  %v3041_v4 = vsel %vm14373_vm8, %v10639_v19, %v3040_v6  ;;  %v10631_v19 = vld [vmem:[%s14204_s25 + $0xf0] sm:$0x8]  ;;  %v13833_v37 = vld [vmem:[%s17906_s2 + $0x208] sm:$0xff]  }
  0xc6   : > { %12530 = vmatpush3.bf16.msra.mxu1 %v13827_v55  ;;  %v3082_v55 = vshll.u32 %v15155_v15, 16  ;;  %v10257_v12 = vrot.slane %v10245_v48, 10  ;;  %v944_v23 = vrot.slane %v15139_v21, 6  ;;  %v3050_v27 = vsel %vm14373_vm8, %v3042_v53, %v3049_v17  ;;  %v10633_v17 = vld [vmem:[%s14204_s25 + $0x100] sm:$0x8] }
  0xc7   : > { %12531 = vmatprep.subr.bf16.mxu1 %v13829_v14  ;;  %v3062_v54 = vor.u32 %v3060_v25, %v15452_v20  ;;  %v3081_v60 = vrot.slane %v3079_v30, 7  ;;  %v947_v58 = vrot.slane %v10247_v62, 6  ;;  %v3090_v15 = vrot.slane %v3088_v34, 7 }
  0xc8   : > { %v3091_v29 = vshll.u32 %v15447_v63, 16  ;;  %v945_v18 = vsel %vm14337_vm5, %v10257_v12, %v944_v23  ;;  %v946_v21 = vrot.slane %v944_v23, 4  ;;  %v3064_v36 = vrot.slane %v15452_v20, 4  ;;  %v10636_v12 = vld [vmem:[%s14204_s25 + $0x118] sm:$0xf] }
  0xc9   : > { %12516 = vmatmul.mubr.bf16.gmra.mrb[12].mxu1 %v10596_v38  ;;  %v13832_v38 = vld [vmem:[%s17906_s2 + $0x200] sm:$0xff]   ;;  %v10258_v22 = vrot.slane %v10248_v49, 10  ;;  %v951_v56 = vrot.slane %v15163_v26, 6  ;;  %v954_v8 = vrot.slane %v10250_v2, 6  ;;  %v10647_v3 = vcombine.low %v3041_v4, %v3050_v27 }
  0xca   : > { %12532 = vmatpush3.bf16.msra.mxu1 %v13829_v14  ;;  %12535 = vmatprep.mubr.bf16.mxu1 %v10645_v0  ;;  %v3071_v1 = vor.u32 %v3069_v44, %v3068_v57  ;;  %v3101_v5 = vshrl.u32 %v15193_v51, 16  ;;  %v948_v45 = vsel %vm14337_vm5, %v946_v21, %v947_v58  ;;  %v10634_v14 = vld [vmem:[%s14204_s25 + $0x108] sm:$0xf]  ;;  %v3110_v33 = vshrl.u32 %v15470_v61, 16 }
  0xcb   : > { %12533 = vmatprep.subr.bf16.mxu1 %v13831_v47  ;;  %v10321_v16 = vcombine.low %v945_v18, %v948_v45  ;;  %v952_v28 = vsel %vm14337_vm5, %v10258_v22, %v951_v56  ;;  %v953_v63 = vrot.slane %v951_v56, 4  ;;  %v10641_v26 = vrot.slane %v3074_v42, 11  ;;  %v13834_v42 = vld [vmem:[%s17906_s2 + $0x210] sm:$0xff]   ;;  %v10678_v56 = vld [vmem:[%s14204_s25 + $0xa8] sm:$0xf] }
  0xcc   : > { %v3084_v6 = vor.u32 %v3082_v55, %v3081_v60  ;;  %v3086_v53 = vrot.slane %v3081_v60, 4  ;;  %v3093_v40 = vor.u32 %v3091_v29, %v3090_v15  ;;  %v3123_v20 = vshrl.u32 %v15221_v31, 16  ;;  %v10635_v15 = vld [vmem:[%s14204_s25 + $0x110] sm:$0x8] }
  0xcd   : > { %12355 = vmatprep.mubr.bf16.mxu0 %v10321_v16  ;;  %v955_v35 = vsel %vm14337_vm5, %v953_v63, %v954_v8  ;;  %v3132_v25 = vshrl.u32 %v10634_v14, 16  ;;  %v3063_v30 = vsel %vm14373_vm8, %v15460_v41, %v3062_v54  ;;  %v3072_v48 = vsel %vm14373_vm8, %v3064_v36, %v3071_v1  ;;  %v13836_v16 = vld [vmem:[%s17906_s2 + $0x220] sm:$0xff]  }
  0xce   : > { %12534 = vmatpush3.bf16.msra.mxu1 %v13831_v47  ;;  %v3096_v47 = vshrl.u32 %v10631_v19, 16  ;;  %v10322_v0 = vcombine.low %v952_v28, %v955_v35  ;;  %v3103_v34 = vrot.slane %v3101_v5, 7  ;;  %v3104_v62 = vshll.u32 %v15193_v51, 16  ;;  %v10677_v5 = vld [vmem:[%s14204_s25 + $0xa4] sm:$0xe] }
  0xcf   : > { %12551 = vmatprep.subr.bf16.mxu1 %v13832_v38  ;;  %v3112_v57 = vrot.slane %v3110_v33, 7  ;;  %v3113_v44 = vshll.u32 %v15470_v61, 16  ;;  %v3085_v41 = vsel %vm14373_vm8, %v10641_v26, %v3084_v6  ;;  %v3094_v55 = vsel %vm14373_vm8, %v3086_v53, %v3093_v40  ;;  %v10679_v6 = vld [vmem:[%s14204_s25 + $0xac] sm:$0x1] }
  0xd0   : > { %v3118_v49 = vshrl.u32 %v10633_v17, 16  ;;  %12356 = vmatmul.mubr.bf16.gmra.mrb[28].mxu0 %v10322_v0  ;;  %v3125_v51 = vrot.slane %v3123_v20, 7  ;;  %v3134_v4 = vrot.slane %v3132_v25, 7  ;;  %v3135_v61 = vshll.u32 %v10634_v14, 16  ;;  %v10684_v0 = vld [vmem:[%s14204_s25 + $0xc8] sm:$0xf] }
  0xd1   : > { %12536 = vmatmul.mubr.bf16.vlgmr.msra.gmra.mrb[0].mxu1 %v10646_v39  ;;  %v3126_v39 = vshll.u32 %v15221_v31, 16  ;;  %v10648_v23 = vcombine.low %v3063_v30, %v3072_v48  ;;  %v10642_v2 = vrot.slane %v3096_v47, 11  ;;  %v3106_v27 = vor.u32 %v3104_v62, %v3103_v34  ;;  %v13835_v31 = vld [vmem:[%s17906_s2 + $0x218] sm:$0xff]  }
  0xd2   : > { %12552 = vmatpush3.bf16.msra.mxu1 %v13832_v38  ;;  %12539 = vmatprep.mubr.bf16.mxu1 %v10647_v3  ;;  %v3108_v54 = vrot.slane %v3103_v34, 4  ;;  %v3115_v60 = vor.u32 %v3113_v44, %v3112_v57  ;;  %v10649_v58 = vcombine.low %v3085_v41, %v3094_v55  ;;  %v3145_v29 = vshrl.u32 %v15241_v24, 16  ;;  %v10681_v30 = vld [vmem:[%s14204_s25 + $0xb8] sm:$0xf]  ;;  %v10680_v34 = vld [vmem:[%s14204_s25 + $0xb4] sm:$0xe] }
  0xd3   : > { %12553 = vmatprep.subr.bf16.mxu1 %v13833_v37  ;;  %v3154_v18 = vshrl.u32 %v10636_v12, 16  ;;  %v10643_v21 = vrot.slane %v3118_v49, 11  ;;  %v3128_v38 = vor.u32 %v3126_v39, %v3125_v51  ;;  %v3130_v36 = vrot.slane %v3125_v51, 4  ;;  %v10682_v49 = vld [vmem:[%s14204_s25 + $0xbc] sm:$0x1] }
  0xd4   : > { %v3137_v22 = vor.u32 %v3135_v61, %v3134_v4  ;;  %v3107_v8 = vsel %vm14373_vm8, %v10642_v2, %v3106_v27  ;;  %v3116_v3 = vsel %vm14373_vm8, %v3108_v54, %v3115_v60  ;;  %v3140_v1 = vshrl.u32 %v10635_v15, 16  ;;  %v10683_v39 = vld [vmem:[%s14204_s25 + $0xc4] sm:$0xe]  ;;  %v10685_v4 = vld [vmem:[%s14204_s25 + $0xcc] sm:$0x1]  ;;  %v13839_v60 = vld [vmem:[%s17906_s2 + $0x238] sm:$0xff]  }
  0xd5   : > { %v3147_v45 = vrot.slane %v3145_v29, 7  ;;  %v3148_v14 = vshll.u32 %v15241_v24, 16  ;;  %v3156_v19 = vrot.slane %v3154_v18, 7  ;;  %v3157_v33 = vshll.u32 %v10636_v12, 16  ;;  %v10687_v54 = vld [vmem:[%s14204_s25 + $0xd8] sm:$0xf] }
  0xd6   : > { %12554 = vmatpush3.bf16.msra.mxu1 %v13833_v37  ;;  %v3129_v28 = vsel %vm14373_vm8, %v10643_v21, %v3128_v38  ;;  %v3138_v63 = vsel %vm14373_vm8, %v3130_v36, %v3137_v22  ;;  %v3421_v26 = vrot.slane %v10678_v56, 5  ;;  %v10650_v53 = vcombine.low %v3107_v8, %v3116_v3  ;;  %v13837_v37 = vld [vmem:[%s17906_s2 + $0x228] sm:$0xff]   ;;  %v10686_v18 = vld [vmem:[%s14204_s25 + $0xd4] sm:$0xe]  ;;  %v10688_v22 = vld [vmem:[%s14204_s25 + $0xdc] sm:$0x1] }
  0xd7   : > { %12555 = vmatprep.subr.bf16.mxu1 %v13834_v42  ;;  %v10644_v24 = vrot.slane %v3140_v1, 11  ;;  %v10701_v40 = vrot.slane %v10677_v5, 9  ;;  %v10651_v35 = vcombine.low %v3129_v28, %v3138_v63  ;;  %v3150_v17 = vor.u32 %v3148_v14, %v3147_v45  ;;  %v10693_v56 = vld [vmem:[%s14204_s25 + $0xf8] sm:$0xf]  ;;  %v10689_v1 = vld [vmem:[%s14204_s25 + $0xe4] sm:$0xe] }
  0xd8   : > { %v3152_v20 = vrot.slane %v3147_v45, 4  ;;  %v3159_v25 = vor.u32 %v3157_v33, %v3156_v19  ;;  %v3423_v48 = vrot.slane %v3421_v26, 4  ;;  %v3424_v47 = vrot.slane %v10679_v6, 5  ;;  %v13840_v45 = vld [vmem:[%s17906_s2 + $0x4c0] sm:$0xff]   ;;  %v10691_v19 = vld [vmem:[%s14204_s25 + $0xec] sm:$0x1] }
  0xd9   : > { %12540 = vmatmul.mubr.bf16.gmra.mrb[4].mxu1 %v10648_v23  ;;  %v3428_v62 = vrot.slane %v10681_v30, 5  ;;  %v3151_v57 = vsel %vm14373_vm8, %v10644_v24, %v3150_v17  ;;  %v3422_v41 = vsel %vm14209_vm2, %v10701_v40, %v3421_v26  ;;  %v3435_v51 = vrot.slane %v10684_v0, 5  ;;  %v10692_v33 = vld [vmem:[%s14204_s25 + $0xf4] sm:$0xe]  ;;  %v10696_v6 = vld [vmem:[%s14204_s25 + $0x108] sm:$0xf] }
  0xda   : > { %12556 = vmatpush3.bf16.msra.mxu1 %v13834_v42  ;;  %12543 = vmatprep.mubr.bf16.mxu1 %v10649_v58  ;;  %v3160_v44 = vsel %vm14373_vm8, %v3152_v20, %v3159_v25  ;;  %v13838_v42 = vld [vmem:[%s17906_s2 + $0x230] sm:$0xff]   ;;  %v3425_v55 = vsel %vm14209_vm2, %v3423_v48, %v3424_v47  ;;  %v10702_v23 = vrot.slane %v10680_v34, 9  ;;  %v3431_v27 = vrot.slane %v10682_v49, 5  ;;  %v10694_v40 = vld [vmem:[%s14204_s25 + $0xfc] sm:$0x1] }
  0xdb   : > { %12557 = vmatprep.subr.bf16.mxu1 %v13835_v31  ;;  %v10652_v61 = vcombine.low %v3151_v57, %v3160_v44  ;;  %v10709_v12 = vcombine.low %v3422_v41, %v3425_v55  ;;  %v3430_v2 = vrot.slane %v3428_v62, 4  ;;  %v10703_v58 = vrot.slane %v10683_v39, 9  ;;  %v10697_v25 = vld [vmem:[%s14204_s25 + $0x10c] sm:$0x1]  ;;  %v15593_v57 = vld [vmem:[%s14204_s25 + $0x4] sm:$0xf] }
  0xdc   : > { %v3437_v15 = vrot.slane %v3435_v51, 4  ;;  %v3438_v29 = vrot.slane %v10685_v4, 5  ;;  %v3442_v21 = vrot.slane %v10687_v54, 5  ;;  %v3429_v38 = vsel %vm14209_vm2, %v10702_v23, %v3428_v62  ;;  %v15590_v62 = vld [vmem:[%s14204_s25 + $0x118] sm:$0xf]  ;;  %v13842_v23 = vld [vmem:[%s17906_s2 + $0x4d0] sm:$0xff]  }
  0xdd   : > { %v3432_v36 = vsel %vm14209_vm2, %v3430_v2, %v3431_v27  ;;  %v3436_v8 = vsel %vm14209_vm2, %v10703_v58, %v3435_v51  ;;  %v10704_v14 = vrot.slane %v10686_v18, 9  ;;  %v3445_v63 = vrot.slane %v10688_v22, 5  ;;  %v7148_v41 = vld [vmem:[%s14204_s25] sm:$0x8]  ;;  %v7149_v55 = vld [vmem:[%s14204_s25 + $0x8] sm:$0xf] }
  0xde   : > { %12558 = vmatpush3.bf16.msra.mxu1 %v13835_v31  ;;  %v10690_v31 = vld [vmem:[%s14204_s25 + $0xe8] sm:$0xf]  ;;  %v3439_v3 = vsel %vm14209_vm2, %v3437_v15, %v3438_v29  ;;  %v3444_v28 = vrot.slane %v3442_v21, 4  ;;  %v3456_v26 = vrot.slane %v10693_v56, 5  ;;  %v10705_v24 = vrot.slane %v10689_v1, 9  ;;  %v13843_v56 = vld [vmem:[%s17906_s2 + $0x4d8] sm:$0xff]  }
  0xdf   : > { %12559 = vmatprep.subr.bf16.mxu1 %v13836_v16  ;;  %v3449_v5 = vrot.slane %v10690_v31, 5  ;;  %v3452_v20 = vrot.slane %v10691_v19, 5  ;;  %v3463_v30 = vrot.slane %v10696_v6, 5  ;;  %v3443_v48 = vsel %vm14209_vm2, %v10704_v14, %v3442_v21  ;;  %v15603_v49 = vld [vmem:[%s14204_s25 + $0x14] sm:$0xf] }
  0xe0   : > { %v3446_v47 = vsel %vm14209_vm2, %v3444_v28, %v3445_v63  ;;  %v10706_v0 = vrot.slane %v10692_v33, 9  ;;  %v3458_v34 = vrot.slane %v3456_v26, 4  ;;  %v3459_v39 = vrot.slane %v10694_v40, 5  ;;  %v7150_v31 = vld [vmem:[%s14204_s25 + $0x10] sm:$0x8]  ;;  %v13844_v63 = vld [vmem:[%s17906_s2 + $0x4e0] sm:$0xff]  }
  0xe1   : > { %12544 = vmatmul.mubr.bf16.gmra.mrb[8].mxu1 %v10650_v53  ;;  %v10711_v53 = vcombine.low %v3436_v8, %v3439_v3  ;;  %v3451_v17 = vrot.slane %v3449_v5, 4  ;;  %v3450_v44 = vsel %vm14209_vm2, %v10705_v24, %v3449_v5  ;;  %v10712_v2 = vcombine.low %v3443_v48, %v3446_v47  ;;  %v15618_v21 = vld [vmem:[%s14204_s25 + $0x18] sm:$0xf]  ;;  %v7152_v14 = vld [vmem:[%s14204_s25 + $0x20] sm:$0x8]  ;;  %v13845_v48 = vld [vmem:[%s17906_s2 + $0x4e8] sm:$0xff]  }
  0xe2   : > { %12560 = vmatpush3.bf16.msra.mxu1 %v13836_v16  ;;  %12547 = vmatprep.mubr.bf16.mxu1 %v10651_v35  ;;  %v10710_v16 = vcombine.low %v3429_v38, %v3432_v36  ;;  %v13841_v35 = vld [vmem:[%s17906_s2 + $0x4c8] sm:$0xff]   ;;  %v3465_v27 = vrot.slane %v3463_v30, 4  ;;  %v7170_v54 = vshrl.u32 %v15593_v57, 16  ;;  %v7165_v58 = vshrl.u32 %v7148_v41, 16 }
  0xe3   : > { %12561 = vmatprep.subr.bf16.mxu1 %v13837_v37  ;;  %v3453_v51 = vsel %vm14209_vm2, %v3451_v17, %v3452_v20  ;;  %v7179_v15 = vshrl.u32 %v7149_v55, 16  ;;  %v7192_v29 = vshrl.u32 %v15603_v49, 16  ;;  %v3457_v38 = vsel %vm14209_vm2, %v10706_v0, %v3456_v26  ;;  %v7153_v40 = vld [vmem:[%s14204_s25 + $0x28] sm:$0xf] }
  0xe4   : > { %v10713_v18 = vcombine.low %v3450_v44, %v3453_v51  ;;  %v3460_v36 = vsel %vm14209_vm2, %v3458_v34, %v3459_v39  ;;  %v7172_v5 = vrot.slane %v7170_v54, 7  ;;  %v7187_v33 = vshrl.u32 %v7150_v31, 16  ;;  %v15656_v51 = vld [vmem:[%s14204_s25 + $0x34] sm:$0xf]  ;;  %v7154_v39 = vld [vmem:[%s14204_s25 + $0x30] sm:$0x8] }
  0xe5   : > { %v7201_v28 = vshrl.u32 %v15618_v21, 16  ;;  %v11327_v26 = vrot.slane %v7165_v58, 11  ;;  %v7173_v6 = vshll.u32 %v15593_v57, 16  ;;  %v7182_v24 = vshll.u32 %v7149_v55, 16  ;;  %v7157_v31 = vld [vmem:[%s14204_s25 + $0x48] sm:$0xf] }
  0xe6   : > { %12562 = vmatpush3.bf16.msra.mxu1 %v13837_v37  ;;  %v10695_v37 = vld [vmem:[%s14204_s25 + $0x104] sm:$0xe]  ;;  %v10714_v17 = vcombine.low %v3457_v38, %v3460_v36  ;;  %v15650_v47 = vrot.slane %v7187_v33, 11  ;;  %v7223_v55 = vshrl.u32 %v7153_v40, 16  ;;  %v7226_v54 = vshll.u32 %v7153_v40, 16 }
  0xe7   : > { %12563 = vmatprep.subr.bf16.mxu1 %v13838_v42  ;;  %v10707_v4 = vrot.slane %v10695_v37, 9  ;;  %v7209_v37 = vshrl.u32 %v7152_v14, 16  ;;  %v7203_v34 = vrot.slane %v7201_v28, 7  ;;  %v7175_v44 = vor.u32 %v7173_v6, %v7172_v5 }
  0xe8   : > { %v7231_v58 = vshrl.u32 %v7154_v39, 16  ;;  %v7225_v38 = vrot.slane %v7223_v55, 7  ;;  %v7236_v36 = vshrl.u32 %v15656_v51, 16  ;;  %v7267_v14 = vshrl.u32 %v7157_v31, 16 }
  0xe9   : > { %12548 = vmatmul.mubr.bf16.gmra.mrb[12].mxu1 %v10652_v61  ;;  %v3466_v61 = vrot.slane %v10697_v25, 5  ;;  %v3464_v8 = vsel %vm14209_vm2, %v10707_v4, %v3463_v30  ;;  %v7177_v25 = vrot.slane %v7172_v5, 4  ;;  %v7195_v30 = vshll.u32 %v15603_v49, 16 }
  0xea   : > { %12564 = vmatpush3.bf16.msra.mxu1 %v13838_v42  ;;  %12567 = vmatprep.mubr.bf16.mxu1 %v10709_v12  ;;  %v15598_v42 = vld [vmem:[%s14204_s25 + $0x114] sm:$0xe]  ;;  %v15608_v12 = vld [vmem:[%s14204_s25 + $0x11c] sm:$0x1]  ;;  %v15659_v4 = vrot.slane %v7209_v37, 11  ;;  %v7228_v28 = vor.u32 %v7226_v54, %v7225_v38  ;;  %v11330_v55 = vrot.slane %v7231_v58, 11 }
  0xeb   : > { %12565 = vmatprep.subr.bf16.mxu1 %v13839_v60  ;;  %v10708_v22 = vrot.slane %v15598_v42, 9  ;;  %v3467_v3 = vsel %vm14209_vm2, %v3465_v27, %v3466_v61  ;;  %v3473_v1 = vrot.slane %v15608_v12, 5  ;;  %v7155_v12 = vld [vmem:[%s14204_s25 + $0x38] sm:$0xf]  ;;  %v13846_v27 = vld [vmem:[%s17906_s2 + $0x4f0] sm:$0xff]  }
  0xec   : > { %v10715_v20 = vcombine.low %v3464_v8, %v3467_v3  ;;  %v13847_v3 = vld [vmem:[%s17906_s2 + $0x4f8] sm:$0xff]   ;;  %v7248_v40 = vshll.u32 %v7155_v12, 16 }
  0xee   : > { %12566 = vmatpush3.bf16.msra.mxu1 %v13839_v60  ;;  %v3470_v60 = vrot.slane %v15590_v62, 5  ;;  %v7204_v62 = vshll.u32 %v15618_v21, 16 }
  0xef   : > { %12967 = vmatprep.subr.bf16.mxu1 %v13840_v45 }
  0xf0   : > { %v3472_v19 = vrot.slane %v3470_v60, 4 }
  0xf1   : > { %12568 = vmatmul.mubr.bf16.vlgmr.msra.gmra.mrb[0].mxu1 %v10710_v16  ;;  %v15637_v16 = vrot.slane %v7192_v29, 7  ;;  %v7176_v29 = vsel %vm14373_vm8, %v11327_v26, %v7175_v44  ;;  %v15691_v26 = vld [vmem:[%s14204_s25 + $0x58] sm:$0xf]  ;;  %v15708_v44 = vld [vmem:[%s14204_s25 + $0x64] sm:$0xf] }
  0xf2   : > { %12571 = vmatprep.mubr.bf16.mxu1 %v10711_v53  ;;  %12968 = vmatpush3.bf16.msra.mxu1 %v13840_v45  ;;  %v15634_v45 = vld [vmem:[%s14204_s25 + $0x24] sm:$0xf]  ;;  %v7181_v53 = vrot.slane %v7179_v15, 7 }
  0xf3   : > { %12969 = vmatprep.subr.bf16.mxu1 %v13841_v35  ;;  %v7199_v0 = vrot.slane %v15637_v16, 4  ;;  %v7217_v41 = vshll.u32 %v15634_v45, 16  ;;  %v15670_v15 = vld [vmem:[%s14204_s25 + $0x44] sm:$0xf] }
  0xf4   : > { %v7184_v42 = vor.u32 %v7182_v24, %v7181_v53  ;;  %v7258_v5 = vshrl.u32 %v15670_v15, 16  ;;  %v7238_v53 = vrot.slane %v7236_v36, 7  ;;  %v7239_v24 = vshll.u32 %v15656_v51, 16 }
  0xf6   : > { %12970 = vmatpush3.bf16.msra.mxu1 %v13841_v35  ;;  %v7214_v35 = vshrl.u32 %v15634_v45, 16  ;;  %v7241_v39 = vor.u32 %v7239_v24, %v7238_v53  ;;  %v7163_v24 = vld [vmem:[%s14204_s25 + $0x78] sm:$0xf] }
  0xf7   : > { %12971 = vmatprep.subr.bf16.mxu1 %v13842_v23 }
  0xf8   : > { %v7216_v61 = vrot.slane %v7214_v35, 7 }
  0xf9   : > { %12572 = vmatmul.mubr.bf16.gmra.mrb[4].mxu1 %v10712_v2  ;;  %v3474_v2 = vsel %vm14209_vm2, %v3472_v19, %v3473_v1  ;;  %v7156_v1 = vld [vmem:[%s14204_s25 + $0x40] sm:$0x8] }
  0xfa   : > { %12575 = vmatprep.mubr.bf16.mxu1 %v10713_v18  ;;  %12972 = vmatpush3.bf16.msra.mxu1 %v13842_v23  ;;  %v3471_v23 = vsel %vm14209_vm2, %v10708_v22, %v3470_v60  ;;  %v7185_v60 = vsel %vm14373_vm8, %v7177_v25, %v7184_v42  ;;  %v7197_v18 = vor.u32 %v7195_v30, %v15637_v16  ;;  %v7221_v21 = vrot.slane %v7216_v61, 4  ;;  %v13848_v25 = vld [vmem:[%s17906_s2 + $0x480] sm:$0xff]  }
  0xfb   : > { %12973 = vmatprep.subr.bf16.mxu1 %v13843_v56  ;;  %v7245_v22 = vshrl.u32 %v7155_v12, 16  ;;  %v10716_v8 = vcombine.low %v3471_v23, %v3474_v2  ;;  %v11335_v19 = vcombine.low %v7176_v29, %v7185_v60  ;;  %v7219_v16 = vor.u32 %v7217_v41, %v7216_v61  ;;  %v7161_v41 = vld [vmem:[%s14204_s25 + $0x68] sm:$0xf]  ;;  %v7158_v23 = vld [vmem:[%s14204_s25 + $0x50] sm:$0x8] }
  0xfc   : > { %v7198_v33 = vsel %vm14373_vm8, %v15650_v47, %v7197_v18  ;;  %v7253_v35 = vshrl.u32 %v7156_v1, 16  ;;  %v7260_v30 = vrot.slane %v7258_v5, 7  ;;  %v7243_v61 = vrot.slane %v7238_v53, 4  ;;  %v7160_v18 = vld [vmem:[%s14204_s25 + $0x60] sm:$0x8] }
  0xfd   : > { %v7247_v37 = vrot.slane %v7245_v22, 7  ;;  %v7311_v58 = vshrl.u32 %v7161_v41, 16  ;;  %v7292_v1 = vshll.u32 %v15691_v26, 16  ;;  %v7297_v5 = vshrl.u32 %v7160_v18, 16  ;;  %v13853_v18 = vld [vmem:[%s17906_s2 + $0x4a8] sm:$0xff]  }
  0xfe   : > { %12974 = vmatpush3.bf16.msra.mxu1 %v13843_v56  ;;  %v7206_v56 = vor.u32 %v7204_v62, %v7203_v34  ;;  %v7220_v34 = vsel %vm14373_vm8, %v15659_v4, %v7219_v16  ;;  %v7229_v62 = vsel %vm14373_vm8, %v7221_v21, %v7228_v28  ;;  %v13849_v4 = vld [vmem:[%s17906_s2 + $0x488] sm:$0xff]   ;;  %v7265_v29 = vrot.slane %v7260_v30, 4 }
  0xff   : > { %12975 = vmatprep.subr.bf16.mxu1 %v13844_v63  ;;  %v7250_v12 = vor.u32 %v7248_v40, %v7247_v37  ;;  %v11337_v2 = vcombine.low %v7220_v34, %v7229_v62  ;;  %v7275_v21 = vshrl.u32 %v7158_v23, 16  ;;  %v7314_v53 = vshll.u32 %v7161_v41, 16 }
 0x100   : > { %v7207_v6 = vsel %vm14373_vm8, %v7199_v0, %v7206_v56  ;;  %v7289_v0 = vshrl.u32 %v15691_v26, 16  ;;  %v7242_v56 = vsel %vm14373_vm8, %v11330_v55, %v7241_v39 }
 0x101   : > { %12576 = vmatmul.mubr.bf16.gmra.mrb[8].mxu1 %v10714_v17  ;;  %v7261_v17 = vshll.u32 %v15670_v15, 16  ;;  %v11336_v42 = vcombine.low %v7198_v33, %v7207_v6  ;;  %v13850_v33 = vld [vmem:[%s17906_s2 + $0x490] sm:$0xff]   ;;  %v7313_v6 = vrot.slane %v7311_v58, 7  ;;  %v11332_v26 = vrot.slane %v7275_v21, 11 }
 0x102   : > { %12579 = vmatprep.mubr.bf16.mxu1 %v10715_v20  ;;  %12976 = vmatpush3.bf16.msra.mxu1 %v13844_v63  ;;  %v15688_v63 = vld [vmem:[%s14204_s25 + $0x54] sm:$0xf]  ;;  %v7270_v20 = vshll.u32 %v7157_v31, 16  ;;  %v7302_v31 = vshrl.u32 %v15708_v44, 16  ;;  %v7291_v22 = vrot.slane %v7289_v0, 7  ;;  %v11333_v0 = vrot.slane %v7297_v5, 11 }
 0x103   : > { %12977 = vmatprep.subr.bf16.mxu1 %v13845_v48  ;;  %v7280_v47 = vshrl.u32 %v15688_v63, 16  ;;  %v7263_v54 = vor.u32 %v7261_v17, %v7260_v30  ;;  %v7283_v36 = vshll.u32 %v15688_v63, 16  ;;  %v13851_v17 = vld [vmem:[%s17906_s2 + $0x498] sm:$0xff]  }
 0x104   : > { %v7304_v28 = vrot.slane %v7302_v31, 7  ;;  %v7294_v30 = vor.u32 %v7292_v1, %v7291_v22  ;;  %v13854_v22 = vld [vmem:[%s17906_s2 + $0x4b0] sm:$0xff]   ;;  %v13855_v5 = vld [vmem:[%s17906_s2 + $0x4b8] sm:$0xff]  }
 0x105   : > { %v7282_v38 = vrot.slane %v7280_v47, 7  ;;  %v7333_v47 = vshrl.u32 %v7163_v24, 16 }
 0x106   : > { %12978 = vmatpush3.bf16.msra.mxu1 %v13845_v48  ;;  %v7269_v48 = vrot.slane %v7267_v14, 7  ;;  %v7305_v14 = vshll.u32 %v15708_v44, 16  ;;  %v7309_v62 = vrot.slane %v7304_v28, 4 }
 0x107   : > { %12979 = vmatprep.subr.bf16.mxu1 %v13846_v27  ;;  %v7285_v37 = vor.u32 %v7283_v36, %v7282_v38  ;;  %v7335_v23 = vrot.slane %v7333_v47, 7  ;;  %v15813_v47 = vld [vmem:[%s14204_s25 + $0xc] sm:$0x7] }
 0x108   : > { %v7272_v60 = vor.u32 %v7270_v20, %v7269_v48  ;;  %v7162_v48 = vld [vmem:[%s14204_s25 + $0x70] sm:$0x8]  ;;  %v7307_v34 = vor.u32 %v7305_v14, %v7304_v28  ;;  %v13899_v28 = vld [vmem:[%s17907_s3 + $0x48] sm:$0xff]  }
 0x109   : > { %12580 = vmatmul.mubr.bf16.gmra.mrb[12].mxu1 %v10716_v8  ;;  %v7251_v8 = vsel %vm14373_vm8, %v7243_v61, %v7250_v12  ;;  %v7286_v41 = vsel %vm14373_vm8, %v11332_v26, %v7285_v37  ;;  %v7319_v55 = vshrl.u32 %v7162_v48, 16  ;;  %v13903_v26 = vld [vmem:[%s17907_s3 + $0x58] sm:$0xff]   ;;  %v7121_v37 = vld [vmem:[%s14204_s25 + $0x30] sm:$0xf] }
 0x10a   : > { %12980 = vmatpush3.bf16.msra.mxu1 %v13846_v27  ;;  %12983 = vmatprep.mubr.bf16.mxu1 %v11335_v19  ;;  %v11331_v27 = vrot.slane %v7253_v35, 11  ;;  %v15727_v19 = vld [vmem:[%s14204_s25 + $0x74] sm:$0xf]  ;;  %v7273_v16 = vsel %vm14373_vm8, %v7265_v29, %v7272_v60  ;;  %v11338_v40 = vcombine.low %v7242_v56, %v7251_v8  ;;  %v13897_v29 = vld [vmem:[%s17907_s3 + $0x40] sm:$0xff]   ;;  %v13863_v48 = vld [vmem:[%s17906_s2 + $0x518] sm:$0xff]  }
 0x10b   : > { %12981 = vmatprep.subr.bf16.mxu1 %v13847_v3  ;;  %v7324_v35 = vshrl.u32 %v15727_v19, 16  ;;  %v7327_v12 = vshll.u32 %v15727_v19, 16  ;;  %v11334_v31 = vrot.slane %v7319_v55, 11  ;;  %12583 = vmatprep.subr.bf16.mxu0 %v13897_v29  ;;  %v7115_v56 = vld [vmem:[%s14204_s25] sm:$0xf] }
 0x10c   : > { %12584 = vmatpush3.bf16.msra.mxu0 %v13897_v29  ;;  %v11351_v14 = vcombine.low %v7115_v56, %v15593_v57  ;;  %v13901_v57 = vld [vmem:[%s17907_s3 + $0x50] sm:$0xff]  }
 0x10d   : > { %v7326_v39 = vrot.slane %v7324_v35, 7  ;;  %12585 = vmatprep.subr.bf16.mxu0 %v13899_v28  ;;  %v13862_v35 = vld [vmem:[%s17906_s2 + $0x510] sm:$0xff]  }
 0x10e   : > { %12982 = vmatpush3.bf16.msra.mxu1 %v13847_v3  ;;  %v7264_v3 = vsel %vm14373_vm8, %v11331_v27, %v7263_v54  ;;  %v13852_v27 = vld [vmem:[%s17906_s2 + $0x4a0] sm:$0xff]   ;;  %v7308_v54 = vsel %vm14373_vm8, %v11333_v0, %v7307_v34 }
 0x10f   : > { %12999 = vmatprep.subr.bf16.mxu1 %v13848_v25  ;;  %v11339_v20 = vcombine.low %v7264_v3, %v7273_v16  ;;  %v7331_v58 = vrot.slane %v7326_v39, 4  ;;  %v13858_v16 = vld [vmem:[%s17906_s2 + $0x500] sm:$0xff]  }
 0x110   : > { %12586 = vmatpush3.bf16.msra.mxu0 %v13899_v28  ;;  %v15818_v0 = vld [vmem:[%s17909_s5] ss:$0 sm:$0xff]  ;;  %v7129_v28 = vld [vmem:[%s14204_s25 + $0x70] sm:$0xf] }
 0x111   : > { %12984 = vmatmul.mubr.bf16.vlgmr.msra.gmra.mrb[16].mxu1 %v11336_v42  ;;  %v7316_v42 = vor.u32 %v7314_v53, %v7313_v6  ;;  %v7119_v6 = vld [vmem:[%s14204_s25 + $0x20] sm:$0xf]  ;;  %12587 = vmatprep.subr.bf16.mxu0 %v13901_v57 }
 0x112   : > { %13000 = vmatpush3.bf16.msra.mxu1 %v13848_v25  ;;  %12987 = vmatprep.mubr.bf16.mxu1 %v11337_v2  ;;  %v7287_v25 = vrot.slane %v7282_v38, 4  ;;  %v7336_v2 = vshll.u32 %v7163_v24, 16  ;;  %v7329_v38 = vor.u32 %v7327_v12, %v7326_v39  ;;  %v13859_v24 = vld [vmem:[%s17906_s2 + $0x508] sm:$0xff]   ;;  %v7127_v12 = vld [vmem:[%s14204_s25 + $0x60] sm:$0xf] }
 0x113   : > { %13001 = vmatprep.subr.bf16.mxu1 %v13849_v4 }
 0x114   : > { %v7295_v61 = vsel %vm14373_vm8, %v7287_v25, %v7294_v30  ;;  %v7338_v36 = vor.u32 %v7336_v2, %v7335_v23  ;;  %v7330_v8 = vsel %vm14373_vm8, %v11334_v31, %v7329_v38  ;;  %12588 = vmatpush3.bf16.msra.mxu0 %v13901_v57  ;;  %v15806_v25 = vld [vmem:[%s14204_s25 + $0x4] sm:$0x8]  ;;  %v11354_v30 = vcombine.low %v7121_v37, %v15656_v51  ;;  %v15833_v23 = vld [vmem:[%s14204_s25 + $0x18] sm:$0xf]  ;;  %v15845_v38 = vld [vmem:[%s14204_s25 + $0x28] sm:$0xf] }
 0x115   : > { %v11340_v60 = vcombine.low %v7286_v41, %v7295_v61  ;;  %12589 = vmatprep.subr.bf16.mxu0 %v13903_v26  ;;  %v15824_v41 = vld [vmem:[%s14204_s25 + $0x14] sm:$0x8]  ;;  %v13866_v61 = vld [vmem:[%s17906_s2 + $0x520] sm:$0xff]  }
 0x116   : > { %13002 = vmatpush3.bf16.msra.mxu1 %v13849_v4  ;;  %v7317_v4 = vsel %vm14373_vm8, %v7309_v62, %v7316_v42  ;;  %v7339_v3 = vsel %vm14373_vm8, %v7331_v58, %v7338_v36  ;;  %v7125_v62 = vld [vmem:[%s14204_s25 + $0x50] sm:$0xf] }
 0x117   : > { %13003 = vmatprep.subr.bf16.mxu1 %v13850_v33  ;;  %v11341_v21 = vcombine.low %v7308_v54, %v7317_v4  ;;  %v11342_v1 = vcombine.low %v7330_v8, %v7339_v3  ;;  %v7783_v54 = vrot.slane %v15813_v47, 7  ;;  %v11356_v56 = vcombine.low %v7125_v62, %v15688_v63  ;;  %v13867_v8 = vld [vmem:[%s17906_s2 + $0x528] sm:$0xff]   ;;  %v7733_v63 = vld [vmem:[%s14204_s25 + $0x24] sm:$0x8] }
 0x118   : > { %12590 = vmatpush3.bf16.msra.mxu0 %v13903_v26  ;;  %v11384_v3 = vrot.slane %v15824_v41, 11 }
 0x119   : > { %12988 = vmatmul.mubr.bf16.gmra.mrb[20].mxu1 %v11338_v40  ;;  %v11353_v40 = vcombine.low %v7119_v6, %v15634_v45  ;;  %v15798_v45 = vld [vmem:[%s14204_s25 + $0x8] sm:$0xf] }
 0x11a   : > { %13004 = vmatpush3.bf16.msra.mxu1 %v13850_v33  ;;  %12991 = vmatprep.mubr.bf16.mxu1 %v11339_v20  ;;  %v7117_v33 = vld [vmem:[%s14204_s25 + $0x10] sm:$0xf]  ;;  %v15803_v20 = vld [vmem:[%s17908_s4] ss:$0 sm:$0xff]  ;;  %v7780_v42 = vrot.slane %v15798_v45, 7 }
 0x11b   : > { %13005 = vmatprep.subr.bf16.mxu1 %v13851_v17  ;;  %v11352_v53 = vcombine.low %v7117_v33, %v15603_v49  ;;  %v13905_v49 = vld [vmem:[%s17907_s3 + $0x60] sm:$0xff]   ;;  %v7787_v33 = vrot.slane %v15833_v23, 7  ;;  %v11385_v23 = vrot.slane %v7733_v63, 11 }
 0x11c   : > { %12591 = vmatprep.subr.bf16.mxu0 %v13905_v49 }
 0x11d   : > { %12592 = vmatpush3.bf16.msra.mxu0 %v13905_v49  ;;  %v13870_v49 = vld [vmem:[%s17906_s2 + $0x530] sm:$0xff]  }
 0x11e   : > { %13006 = vmatpush3.bf16.msra.mxu1 %v13851_v17  ;;  %v7123_v17 = vld [vmem:[%s14204_s25 + $0x40] sm:$0xf] }
 0x11f   : > { %13007 = vmatprep.subr.bf16.mxu1 %v13852_v27  ;;  %v11355_v34 = vcombine.low %v7123_v17, %v15670_v15  ;;  %v11383_v15 = vrot.slane %v15806_v25, 11  ;;  %v15876_v17 = vld [vmem:[%s14204_s25 + $0x38] sm:$0xf] }
 0x121   : > { %12992 = vmatmul.mubr.bf16.gmra.mrb[24].mxu1 %v11340_v60  ;;  %v7781_v62 = vsel %vm15860_vm11, %v11383_v15, %v7780_v42 }
 0x122   : > { %13008 = vmatpush3.bf16.msra.mxu1 %v13852_v27  ;;  %12995 = vmatprep.mubr.bf16.mxu1 %v11341_v21  ;;  %v7782_v21 = vrot.slane %v7780_v42, 4  ;;  %v13871_v42 = vld [vmem:[%s17906_s2 + $0x538] sm:$0xff]  }
 0x123   : > { %13009 = vmatprep.subr.bf16.mxu1 %v13853_v18 }
 0x124   : > { %v7784_v41 = vsel %vm15860_vm11, %v7782_v21, %v7783_v54 }
 0x126   : > { %13010 = vmatpush3.bf16.msra.mxu1 %v13853_v18  ;;  %v15840_v18 = vld [vmem:[%s14204_s25 + $0x1c] sm:$0x7] }
 0x127   : > { %13011 = vmatprep.subr.bf16.mxu1 %v13854_v22 }
 0x129   : > { %12996 = vmatmul.mubr.bf16.gmra.mrb[28].mxu1 %v11342_v1 }
 0x12a   : > { %13012 = vmatpush3.bf16.msra.mxu1 %v13854_v22  ;;  %13015 = vmatprep.mubr.bf16.mxu1 %v11351_v14  ;;  %v12281_v51 = vpop.f32.mrb[0].mxu0  ;;  %v11357_v14 = vcombine.low %v7127_v12, %v15708_v44  ;;  %v11358_v12 = vcombine.low %v7129_v28, %v15727_v19  ;;  %v13907_v19 = vld [vmem:[%s17907_s3 + $0x68] sm:$0xff]  }
 0x12b   : > { %13013 = vmatprep.subr.bf16.mxu1 %v13855_v5  ;;  %v754_v55 = vmul.f32 %v12281_v51, %v15803_v20  ;;  %v684_v39 = vpop.f32.mrb[1].mxu0  ;;  %12593 = vmatprep.subr.bf16.mxu0 %v13907_v19  ;;  %v15924_v28 = vld [vmem:[%s14204_s25 + $0x4c] sm:$0x7] }
 0x12c   : > { %v752_v2 = vmul.f32 %v15803_v20, %v684_v39  ;;  %v12282_v27 = vpop.f32.mrb[2].mxu0  ;;  %12594 = vmatpush3.bf16.msra.mxu0 %v13907_v19 }
 0x12d   : > { %v775_v4 = vadd.f32 %v15818_v0, %v754_v55  ;;  %v755_v29 = vmul.f32 %v12282_v27, %v15803_v20  ;;  %v687_v60 = vpop.f32.mrb[3].mxu0  ;;  %v15888_v55 = vld [vmem:[%s14204_s25 + $0x34] sm:$0x8] }
 0x12e   : > { %13014 = vmatpush3.bf16.msra.mxu1 %v13855_v5  ;;  %v773_v31 = vadd.f32 %v15818_v0, %v752_v2  ;;  %v753_v58 = vmul.f32 %v15803_v20, %v687_v60  ;;  %v15894_v2 = vld [vmem:[%s14204_s25 + $0x3c] sm:$0x7] }
 0x12f   : > { %13031 = vmatprep.subr.bf16.mxu1 %v13858_v16  ;;  %v791_v36 = vmax.f32 %v775_v4, 0.0  ;;  %v776_v22 = vadd.f32 %v15818_v0, %v755_v29 }
 0x130   : > { %v789_v1 = vmax.f32 %v773_v31, 0.0  ;;  %v774_v5 = vadd.f32 %v15818_v0, %v753_v58  ;;  %v7801_v31 = vrot.slane %v15876_v17, 7  ;;  %v15907_v58 = vld [vmem:[%s14204_s25 + $0x44] sm:$0x8] }
 0x131   : > { %13016 = vmatmul.mubr.bf16.vlgmr.msra.gmra.mrb[16].mxu1 %v11352_v53 }
 0x132   : > { %13032 = vmatpush3.bf16.msra.mxu1 %v13858_v16  ;;  %13019 = vmatprep.mubr.bf16.mxu1 %v11353_v40  ;;  %v792_v16 = vmax.f32 %v776_v22, 0.0  ;;  %v790_v6 = vmax.f32 %v774_v5, 0.0  ;;  %v15866_v40 = vld [vmem:[%s14204_s25 + $0x2c] sm:$0x7] }
 0x133   : > { %13033 = vmatprep.subr.bf16.mxu1 %v13859_v24  ;;  %v7797_v54 = vrot.slane %v15866_v40, 7 }
 0x134   : > { %v15868_v44 = vpack.c.bf16 %v792_v16, %v791_v36  ;;  %v15912_v36 = vld [vmem:[%s14204_s25 + $0x48] sm:$0xf] }
 0x136   : > { %13034 = vmatpush3.bf16.msra.mxu1 %v13859_v24  ;;  %v7790_v24 = vrot.slane %v15840_v18, 7  ;;  %v11391_v18 = vcombine.low %v7781_v62, %v7784_v41 }
 0x137   : > { %13035 = vmatprep.subr.bf16.mxu1 %v13862_v35 }
 0x139   : > { %13020 = vmatmul.mubr.bf16.gmra.mrb[20].mxu1 %v11354_v30  ;;  %v15879_v30 = vpack.c.bf16 %v790_v6, %v789_v1 }
 0x13a   : > { %13036 = vmatpush3.bf16.msra.mxu1 %v13862_v35  ;;  %13023 = vmatprep.mubr.bf16.mxu1 %v11355_v34  ;;  %v7794_v35 = vrot.slane %v15845_v38, 7  ;;  %v7788_v38 = vsel %vm15860_vm11, %v11384_v3, %v7787_v33 }
 0x13b   : > { %13037 = vmatprep.subr.bf16.mxu1 %v13863_v48  ;;  %v12285_v57 = vpop.f32.mrb[4].mxu0 }
 0x13c   : > { %v758_v26 = vmul.f32 %v12285_v57, %v15803_v20  ;;  %v700_v37 = vpop.f32.mrb[5].mxu0  ;;  %v7796_v15 = vrot.slane %v7794_v35, 4  ;;  %v7795_v3 = vsel %vm15860_vm11, %v11385_v23, %v7794_v35  ;;  %v13909_v57 = vld [vmem:[%s17907_s3 + $0x70] sm:$0xff]  }
 0x13d   : > { %v756_v45 = vmul.f32 %v15803_v20, %v700_v37  ;;  %v12286_v25 = vpop.f32.mrb[6].mxu0  ;;  %12595 = vmatprep.subr.bf16.mxu0 %v13909_v57 }
 0x13e   : > { %13038 = vmatpush3.bf16.msra.mxu1 %v13863_v48  ;;  %v7789_v48 = vrot.slane %v7787_v33, 4  ;;  %v779_v47 = vadd.f32 %v15818_v0, %v758_v26  ;;  %v759_v34 = vmul.f32 %v12286_v25, %v15803_v20  ;;  %v703_v51 = vpop.f32.mrb[7].mxu0  ;;  %v7804_v33 = vrot.slane %v15894_v2, 7  ;;  %12596 = vmatpush3.bf16.msra.mxu0 %v13909_v57  ;;  %v13911_v2 = vld [vmem:[%s17907_s3 + $0x78] sm:$0xff]   ;;  %v7747_v57 = vld [vmem:[%s14204_s25 + $0x6c] sm:$0x7] }
 0x13f   : > { %13039 = vmatprep.subr.bf16.mxu1 %v13866_v61  ;;  %v777_v39 = vadd.f32 %v15818_v0, %v756_v45  ;;  %v7798_v40 = vsel %vm15860_vm11, %v7796_v15, %v7797_v54  ;;  %v7808_v26 = vrot.slane %v15912_v36, 7  ;;  %v13872_v45 = vld [vmem:[%s17906_s2 + $0x540] sm:$0xff]   ;;  %v7803_v25 = vrot.slane %v7801_v31, 4  ;;  %v15959_v15 = vld [vmem:[%s14204_s25 + $0x68] sm:$0xf]  ;;  %12597 = vmatprep.subr.bf16.mxu0 %v13911_v2 }
 0x140   : > { %v795_v27 = vmax.f32 %v779_v47, 0.0  ;;  %v780_v4 = vadd.f32 %v15818_v0, %v759_v34  ;;  %v7791_v1 = vsel %vm15860_vm11, %v7789_v48, %v7790_v24  ;;  %v7811_v34 = vrot.slane %v15924_v28, 7 }
 0x141   : > { %13024 = vmatmul.mubr.bf16.gmra.mrb[24].mxu1 %v11356_v56  ;;  %v793_v29 = vmax.f32 %v777_v39, 0.0  ;;  %v11392_v41 = vcombine.low %v7788_v38, %v7791_v1  ;;  %v15949_v39 = vld [vmem:[%s14204_s25 + $0x54] sm:$0x8]  ;;  %v7744_v38 = vld [vmem:[%s14204_s25 + $0x5c] sm:$0x7] }
 0x142   : > { %13040 = vmatpush3.bf16.msra.mxu1 %v13866_v61  ;;  %13027 = vmatprep.mubr.bf16.mxu1 %v11357_v14  ;;  %v757_v61 = vmul.f32 %v15803_v20, %v703_v51  ;;  %v796_v21 = vmax.f32 %v780_v4, 0.0  ;;  %v7810_v4 = vrot.slane %v7808_v26, 4 }
 0x143   : > { %13041 = vmatprep.subr.bf16.mxu1 %v13867_v8  ;;  %v12289_v56 = vpop.f32.mrb[8].mxu0  ;;  %12598 = vmatpush3.bf16.msra.mxu0 %v13911_v2 }
 0x144   : > { %v778_v60 = vadd.f32 %v15818_v0, %v757_v61  ;;  %v762_v5 = vmul.f32 %v12289_v56, %v15803_v20  ;;  %v716_v14 = vpop.f32.mrb[9].mxu0  ;;  %v15918_v16 = vpack.c.bf16 %v796_v21, %v795_v27  ;;  %v15952_v61 = vld [vmem:[%s14204_s25 + $0x58] sm:$0xf]  ;;  %v11393_v27 = vcombine.low %v7795_v3, %v7798_v40 }
 0x145   : > { %v760_v63 = vmul.f32 %v15803_v20, %v716_v14  ;;  %v12290_v6 = vpop.f32.mrb[10].mxu0  ;;  %v7815_v36 = vrot.slane %v15952_v61, 7  ;;  %v7745_v14 = vld [vmem:[%s14204_s25 + $0x64] sm:$0x8]  ;;  %v7822_v40 = vrot.slane %v15959_v15, 7 }
 0x146   : > { %13042 = vmatpush3.bf16.msra.mxu1 %v13867_v8  ;;  %v794_v22 = vmax.f32 %v778_v60, 0.0  ;;  %v11386_v8 = vrot.slane %v15888_v55, 11  ;;  %v783_v37 = vadd.f32 %v15818_v0, %v762_v5  ;;  %v763_v35 = vmul.f32 %v12290_v6, %v15803_v20  ;;  %v719_v17 = vpop.f32.mrb[11].mxu0  ;;  %v13873_v55 = vld [vmem:[%s17906_s2 + $0x548] sm:$0xff]   ;;  %v13876_v15 = vld [vmem:[%s17906_s2 + $0x560] sm:$0xff]  }
 0x147   : > { %13043 = vmatprep.subr.bf16.mxu1 %v13870_v49  ;;  %v781_v48 = vadd.f32 %v15818_v0, %v760_v63  ;;  %v761_v47 = vmul.f32 %v15803_v20, %v719_v17  ;;  %v11388_v5 = vrot.slane %v15949_v39, 11  ;;  %v13874_v63 = vld [vmem:[%s17906_s2 + $0x550] sm:$0xff]   ;;  %v7812_v6 = vsel %vm15860_vm11, %v7810_v4, %v7811_v34 }
 0x148   : > { %v15930_v24 = vpack.c.bf16 %v794_v22, %v793_v29  ;;  %v799_v51 = vmax.f32 %v783_v37, 0.0  ;;  %v784_v62 = vadd.f32 %v15818_v0, %v763_v35  ;;  %v7802_v19 = vsel %vm15860_vm11, %v11386_v8, %v7801_v31  ;;  %v15974_v31 = vld [vmem:[%s17907_s3] sm:$0xff]  }
 0x149   : > { %13028 = vmatmul.mubr.bf16.gmra.mrb[28].mxu1 %v11358_v12  ;;  %v797_v12 = vmax.f32 %v781_v48, 0.0  ;;  %v782_v23 = vadd.f32 %v15818_v0, %v761_v47  ;;  %12615 = vmatprep.subr.bf16.mxu0 %v15974_v31  ;;  %v7818_v17 = vrot.slane %v7744_v38, 7  ;;  %v7817_v48 = vrot.slane %v7815_v36, 4 }
 0x14a   : > { %13044 = vmatpush3.bf16.msra.mxu1 %v13870_v49  ;;  %13047 = vmatprep.mubr.bf16.mxu1 %v11391_v18  ;;  %v11387_v49 = vrot.slane %v15907_v58, 11  ;;  %v800_v54 = vmax.f32 %v784_v62, 0.0  ;;  %v11389_v47 = vrot.slane %v7745_v14, 11  ;;  %v7824_v61 = vrot.slane %v7822_v40, 4  ;;  %v13879_v14 = vld [vmem:[%s17906_s2 + $0x578] sm:$0xff]  }
 0x14b   : > { %13045 = vmatprep.subr.bf16.mxu1 %v13871_v42  ;;  %v798_v29 = vmax.f32 %v782_v23, 0.0  ;;  %v12293_v60 = vpop.f32.mrb[12].mxu0 }
 0x14c   : > { %v766_v18 = vmul.f32 %v12293_v60, %v15803_v20  ;;  %v732_v58 = vpop.f32.mrb[13].mxu0  ;;  %v15964_v21 = vpack.c.bf16 %v800_v54, %v799_v51  ;;  %v7809_v8 = vsel %vm15860_vm11, %v11387_v49, %v7808_v26  ;;  %v13875_v49 = vld [vmem:[%s17906_s2 + $0x558] sm:$0xff]   ;;  %v7823_v54 = vsel %vm15860_vm11, %v11389_v47, %v7822_v40  ;;  %v13885_v40 = vld [vmem:[%s14204_s25 + $0xa0] sm:$0xff]  }
 0x14d   : > { %v764_v22 = vmul.f32 %v15803_v20, %v732_v58  ;;  %v12294_v56 = vpop.f32.mrb[14].mxu0  ;;  %v15976_v1 = vpack.c.bf16 %v798_v29, %v797_v12  ;;  %v11395_v62 = vcombine.low %v7809_v8, %v7812_v6  ;;  %v7750_v60 = vld [vmem:[%s14204_s25 + $0x7c] sm:$0x7]  ;;  %v13878_v8 = vld [vmem:[%s17906_s2 + $0x570] sm:$0xff]  }
 0x14e   : > { %13046 = vmatpush3.bf16.msra.mxu1 %v13871_v42  ;;  %v7805_v42 = vsel %vm15860_vm11, %v7803_v25, %v7804_v33  ;;  %v787_v3 = vadd.f32 %v15818_v0, %v766_v18  ;;  %v767_v33 = vmul.f32 %v12294_v56, %v15803_v20  ;;  %v735_v28 = vpop.f32.mrb[15].mxu0  ;;  %v13877_v18 = vld [vmem:[%s17906_s2 + $0x568] sm:$0xff]   ;;  %v13884_v6 = vld [vmem:[%s14204_s25 + $0x90] sm:$0xff]  }
 0x14f   : > { %13063 = vmatprep.subr.bf16.mxu1 %v13872_v45  ;;  %v785_v26 = vadd.f32 %v15818_v0, %v764_v22  ;;  %v765_v37 = vmul.f32 %v15803_v20, %v735_v28  ;;  %v11394_v35 = vcombine.low %v7802_v19, %v7805_v42  ;;  %v7825_v20 = vrot.slane %v7747_v57, 7  ;;  %v13881_v28 = vld [vmem:[%s14204_s25 + $0x80] sm:$0xff]   ;;  %v13886_v57 = vld [vmem:[%s17906_s2 + $0x590] sm:$0xff]  }
 0x150   : > { %v788_v25 = vadd.f32 %v15818_v0, %v767_v33  ;;  %v13882_v33 = vld [vmem:[%s17906_s2 + $0x580] sm:$0xff]  }
 0x151   : > { %13048 = vmatmul.mubr.bf16.vlgmr.msra.gmra.mrb[16].mxu1 %v11392_v41  ;;  %v801_v34 = vmax.f32 %v785_v26, 0.0  ;;  %v786_v51 = vadd.f32 %v15818_v0, %v765_v37  ;;  %v7749_v41 = vld [vmem:[%s14204_s25 + $0x78] sm:$0xf]  ;;  %v7816_v0 = vsel %vm15860_vm11, %v11388_v5, %v7815_v36  ;;  %v7826_v29 = vsel %vm15860_vm11, %v7824_v61, %v7825_v20  ;;  %v13888_v37 = vld [vmem:[%s14204_s25 + $0xb0] sm:$0xff]  }
 0x152   : > { %13064 = vmatpush3.bf16.msra.mxu1 %v13872_v45  ;;  %13051 = vmatprep.mubr.bf16.mxu1 %v11393_v27  ;;  %v803_v45 = vmax.f32 %v787_v3, 0.0  ;;  %v804_v39 = vmax.f32 %v788_v25, 0.0  ;;  %v7748_v27 = vld [vmem:[%s14204_s25 + $0x74] sm:$0x8]  ;;  %v7829_v4 = vrot.slane %v7749_v41, 7  ;;  %v11397_v42 = vcombine.low %v7823_v54, %v7826_v29  ;;  %v13887_v26 = vld [vmem:[%s17906_s2 + $0x598] sm:$0xff]  }
 0x153   : > { %13065 = vmatprep.subr.bf16.mxu1 %v13873_v55  ;;  %v802_v12 = vmax.f32 %v786_v51, 0.0  ;;  %v11390_v58 = vrot.slane %v7748_v27, 11  ;;  %v7832_v36 = vrot.slane %v7750_v60, 7  ;;  %v13880_v3 = vld [vmem:[%s14204_s25 + $0x70] sm:$0xff]   ;;  %v13895_v51 = vld [vmem:[%s17906_s2 + $0x5b8] sm:$0xff]   ;;  %v13896_v41 = vld [vmem:[%s17906_s2 + $0x5c0] sm:$0xff]  }
 0x154   : > { %v16000_v23 = vpack.c.bf16 %v804_v39, %v803_v45  ;;  %v7831_v38 = vrot.slane %v7829_v4, 4  ;;  %v13891_v45 = vld [vmem:[%s17906_s2 + $0x5a8] sm:$0xff]   ;;  %v13892_v25 = vld [vmem:[%s14204_s25 + $0xd0] sm:$0xff]   ;;  %v13904_v29 = vld [vmem:[%s17906_s2 + $0x5e0] sm:$0xff]  }
 0x155   : > { %v16002_v2 = vpack.c.bf16 %v802_v12, %v801_v34  ;;  %v7830_v22 = vsel %vm15860_vm11, %v11390_v58, %v7829_v4  ;;  %v13898_v39 = vld [vmem:[%s17906_s2 + $0x5c8] sm:$0xff]   ;;  %v13900_v27 = vld [vmem:[%s17906_s2 + $0x5d0] sm:$0xff]   ;;  %v13902_v4 = vld [vmem:[%s17906_s2 + $0x5d8] sm:$0xff]  }
 0x156   : > { %13066 = vmatpush3.bf16.msra.mxu1 %v13873_v55  ;;  %17969 = vst [vmem:[#allocation12_spill] sm:$0xff] %v16000_v23  ;;  %v7819_v55 = vsel %vm15860_vm11, %v7817_v48, %v7818_v17  ;;  %v7833_v56 = vsel %vm15860_vm11, %v7831_v38, %v7832_v36  ;;  %v13889_v17 = vld [vmem:[%s14204_s25 + $0xc0] sm:$0xff]   ;;  %v14040_v60 = vld [vmem:[%s14204_s25 + $0x78] sm:$0xf]  ;;  %v11495_v58 = vld [vmem:[%s14204_s25 + $0x74] sm:$0x8] }
 0x157   : > { %13067 = vmatprep.subr.bf16.mxu1 %v13874_v63  ;;  %17970 = vst [vmem:[#allocation13_spill] sm:$0xff] %v16002_v2  ;;  %v11396_v19 = vcombine.low %v7816_v0, %v7819_v55  ;;  %v11398_v5 = vcombine.low %v7830_v22, %v7833_v56  ;;  %v13893_v48 = vld [vmem:[%s14204_s25 + $0xe0] sm:$0xff]   ;;  %v13906_v36 = vld [vmem:[%s17906_s2 + $0x5e8] sm:$0xff]   ;;  %v11511_v22 = vrot.slane %v11495_v58, 11 }
 0x158   : > { %v14043_v58 = vld [vmem:[%s14204_s25 + $0xa8] sm:$0xf] }
 0x159   : > { %13052 = vmatmul.mubr.bf16.gmra.mrb[20].mxu1 %v11394_v35  ;;  %v13890_v35 = vld [vmem:[%s17906_s2 + $0x5a0] sm:$0xff]  }
 0x15a   : > { %13068 = vmatpush3.bf16.msra.mxu1 %v13874_v63  ;;  %13055 = vmatprep.mubr.bf16.mxu1 %v11395_v62  ;;  %v13883_v63 = vld [vmem:[%s17906_s2 + $0x588] sm:$0xff]  }
 0x15b   : > { %13069 = vmatprep.subr.bf16.mxu1 %v13875_v49 }
 0x15e   : > { %13070 = vmatpush3.bf16.msra.mxu1 %v13875_v49  ;;  %v13894_v49 = vld [vmem:[%s17906_s2 + $0x5b0] sm:$0xff]  }
 0x15f   : > { %13071 = vmatprep.subr.bf16.mxu1 %v13876_v15 }
 0x161   : > { %13056 = vmatmul.mubr.bf16.gmra.mrb[24].mxu1 %v11396_v19  ;;  %v8498_v19 = vrot.slane %v14040_v60, 7 }
 0x162   : > { %13072 = vmatpush3.bf16.msra.mxu1 %v13876_v15  ;;  %13059 = vmatprep.mubr.bf16.mxu1 %v11397_v42  ;;  %v11496_v42 = vld [vmem:[%s14204_s25 + $0x7c] sm:$0x7] }
 0x163   : > { %13073 = vmatprep.subr.bf16.mxu1 %v13877_v18  ;;  %v8500_v56 = vrot.slane %v8498_v19, 4 }
 0x166   : > { %13074 = vmatpush3.bf16.msra.mxu1 %v13877_v18 }
 0x167   : > { %13075 = vmatprep.subr.bf16.mxu1 %v13878_v8 }
 0x169   : > { %13060 = vmatmul.mubr.bf16.gmra.mrb[28].mxu1 %v11398_v5  ;;  %v14041_v5 = vld [vmem:[%s14204_s25 + $0x88] sm:$0xf] }
 0x16a   : > { %13076 = vmatpush3.bf16.msra.mxu1 %v13878_v8  ;;  %13079 = vmatprep.mubr.bf16.mxu1 %v13880_v3  ;;  %v8501_v8 = vrot.slane %v11496_v42, 7  ;;  %v13908_v3 = vld [vmem:[%s17906_s2 + $0x5f0] sm:$0xff]   ;;  %v8519_v42 = vrot.slane %v14043_v58, 7 }
 0x16b   : > { %13077 = vmatprep.subr.bf16.mxu1 %v13879_v14 }
 0x16e   : > { %13078 = vmatpush3.bf16.msra.mxu1 %v13879_v14  ;;  %v8505_v14 = vrot.slane %v14041_v5, 7  ;;  %v11502_v5 = vld [vmem:[%s14204_s25 + $0xac] sm:$0x7] }
 0x16f   : > { %13095 = vmatprep.subr.bf16.mxu1 %v13882_v33 }
 0x171   : > { %13080 = vmatmul.mubr.bf16.vlgmr.msra.gmra.mrb[16].mxu1 %v13881_v28  ;;  %v8502_v28 = vsel %vm15860_vm11, %v8500_v56, %v8501_v8  ;;  %v11501_v8 = vld [vmem:[%s14204_s25 + $0xa4] sm:$0x8] }
 0x172   : > { %13096 = vmatpush3.bf16.msra.mxu1 %v13882_v33  ;;  %13083 = vmatprep.mubr.bf16.mxu1 %v13884_v6  ;;  %v8499_v33 = vsel %vm15860_vm11, %v11511_v22, %v8498_v19  ;;  %v11498_v6 = vld [vmem:[%s14204_s25 + $0x8c] sm:$0x7] }
 0x173   : > { %13097 = vmatprep.subr.bf16.mxu1 %v13883_v63 }
 0x176   : > { %13098 = vmatpush3.bf16.msra.mxu1 %v13883_v63  ;;  %v11497_v63 = vld [vmem:[%s14204_s25 + $0x84] sm:$0x8] }
 0x177   : > { %13099 = vmatprep.subr.bf16.mxu1 %v13886_v57 }
 0x179   : > { %13084 = vmatmul.mubr.bf16.gmra.mrb[20].mxu1 %v13885_v40 }
 0x17a   : > { %13100 = vmatpush3.bf16.msra.mxu1 %v13886_v57  ;;  %13087 = vmatprep.mubr.bf16.mxu1 %v13888_v37  ;;  %v14042_v57 = vld [vmem:[%s14204_s25 + $0x98] sm:$0xf]  ;;  %v11500_v37 = vld [vmem:[%s14204_s25 + $0x9c] sm:$0x7] }
 0x17b   : > { %13101 = vmatprep.subr.bf16.mxu1 %v13887_v26  ;;  %v8512_v40 = vrot.slane %v14042_v57, 7  ;;  %v11514_v57 = vrot.slane %v11501_v8, 11  ;;  %v11508_v8 = vld [vmem:[%s14204_s25 + $0xdc] sm:$0x7] }
 0x17e   : > { %13102 = vmatpush3.bf16.msra.mxu1 %v13887_v26  ;;  %v11499_v26 = vld [vmem:[%s14204_s25 + $0x94] sm:$0x8] }
 0x17f   : > { %13103 = vmatprep.subr.bf16.mxu1 %v13890_v35 }
 0x181   : > { %13088 = vmatmul.mubr.bf16.gmra.mrb[24].mxu1 %v13889_v17  ;;  %v11519_v17 = vcombine.low %v8499_v33, %v8502_v28  ;;  %v11503_v33 = vld [vmem:[%s14204_s25 + $0xb4] sm:$0x8]  ;;  %v11504_v28 = vld [vmem:[%s14204_s25 + $0xbc] sm:$0x7] }
 0x182   : > { %13104 = vmatpush3.bf16.msra.mxu1 %v13890_v35  ;;  %13091 = vmatprep.mubr.bf16.mxu1 %v13892_v25  ;;  %v8507_v25 = vrot.slane %v8505_v14, 4 }
 0x183   : > { %13105 = vmatprep.subr.bf16.mxu1 %v13891_v45 }
 0x186   : > { %v16059_v47 = vpop.f32.mrb[16].mxu0  ;;  %13106 = vmatpush3.bf16.msra.mxu1 %v13891_v45  ;;  %v11512_v45 = vrot.slane %v11497_v63, 11 }
 0x187   : > { %v16061_v34 = vpop.f32.mrb[17].mxu0  ;;  %13107 = vmatprep.subr.bf16.mxu1 %v13894_v49 }
 0x188   : > { %v16066_v62 = vpop.f32.mrb[18].mxu0  ;;  %v8506_v60 = vsel %vm15860_vm11, %v11512_v45, %v8505_v14 }
 0x189   : > { %v16068_v20 = vpop.f32.mrb[19].mxu0  ;;  %13092 = vmatmul.mubr.bf16.gmra.mrb[28].mxu1 %v13893_v48 }
 0x18a   : > { %13108 = vmatpush3.bf16.msra.mxu1 %v13894_v49  ;;  %13111 = vmatprep.mubr.bf16.mxu1 %v14425_v46  ;;  %v8508_v49 = vrot.slane %v11498_v6, 7 }
 0x18b   : > { %13109 = vmatprep.subr.bf16.mxu1 %v13895_v51 }
 0x18c   : > { %v8509_v19 = vsel %vm15860_vm11, %v8507_v25, %v8508_v49  ;;  %v8529_v25 = vrot.slane %v11504_v28, 7  ;;  %v8520_v49 = vsel %vm15860_vm11, %v11514_v57, %v8519_v42 }
 0x18d   : > { %v11520_v63 = vcombine.low %v8506_v60, %v8509_v19  ;;  %v13916_v60 = vld [vmem:[%s17906_s2 + $0x610] sm:$0xff]  }
 0x18e   : > { %13110 = vmatpush3.bf16.msra.mxu1 %v13895_v51  ;;  %v16077_v61 = vpop.f32.mrb[20].mxu0  ;;  %v13910_v51 = vld [vmem:[%s17906_s2 + $0x5f8] sm:$0xff]  }
 0x18f   : > { %13127 = vmatprep.subr.bf16.mxu1 %v13896_v41  ;;  %v16079_v12 = vpop.f32.mrb[21].mxu0 }
 0x190   : > { %v16082_v0 = vpop.f32.mrb[22].mxu0 }
 0x191   : > { %13112 = vmatmul.mubr.bf16.vlgmr.msra.gmra.mrb[16].mxu1 %v14569_v59  ;;  %v16085_v55 = vpop.f32.mrb[23].mxu0  ;;  %v16314_v59 = vld [vmem:[%s14204_s25 + $0x114] sm:$0xf] }
 0x192   : > { %13128 = vmatpush3.bf16.msra.mxu1 %v13896_v41  ;;  %13115 = vmatprep.mubr.bf16.mxu1 %v14596_v32  ;;  %v11513_v41 = vrot.slane %v11499_v26, 11  ;;  %v8521_v26 = vrot.slane %v8519_v42, 4  ;;  %v11506_v42 = vld [vmem:[%s14204_s25 + $0xcc] sm:$0x7] }
 0x193   : > { %13129 = vmatprep.subr.bf16.mxu1 %v13898_v39 }
 0x194   : > { %v8513_v22 = vsel %vm15860_vm11, %v11513_v41, %v8512_v40  ;;  %v11505_v41 = vld [vmem:[%s14204_s25 + $0xc4] sm:$0x8] }
 0x196   : > { %13130 = vmatpush3.bf16.msra.mxu1 %v13898_v39  ;;  %v8514_v39 = vrot.slane %v8512_v40, 4  ;;  %v13914_v40 = vld [vmem:[%s17906_s2 + $0x608] sm:$0xff]  }
 0x197   : > { %13131 = vmatprep.subr.bf16.mxu1 %v13900_v27 }
 0x198   : > { %v16094_v15 = vpop.f32.mrb[24].mxu0 }
 0x199   : > { %13116 = vmatmul.mubr.bf16.gmra.mrb[20].mxu1 %v14641_v9  ;;  %v16097_v54 = vpop.f32.mrb[25].mxu0 }
 0x19a   : > { %13132 = vmatpush3.bf16.msra.mxu1 %v13900_v27  ;;  %13119 = vmatprep.mubr.bf16.mxu1 %v14643_v11  ;;  %v16103_v18 = vpop.f32.mrb[26].mxu0  ;;  %v8515_v27 = vrot.slane %v11500_v37, 7  ;;  %v8522_v37 = vrot.slane %v11502_v5, 7  ;;  %v16258_v11 = vld [vmem:[%s14204_s25 + $0x34] sm:$0xf] }
 0x19b   : > { %13133 = vmatprep.subr.bf16.mxu1 %v13902_v4  ;;  %v16107_v38 = vpop.f32.mrb[27].mxu0  ;;  %17971 = vst [vmem:[#allocation14_spill] sm:$0xff] %v16258_v11 }
 0x19c   : > { %v8516_v56 = vsel %vm15860_vm11, %v8514_v39, %v8515_v27  ;;  %v14045_v39 = vld [vmem:[%s14204_s25 + $0xc8] sm:$0xf] }
 0x19d   : > { %v11521_v6 = vcombine.low %v8513_v22, %v8516_v56  ;;  %v8533_v27 = vrot.slane %v14045_v39, 7  ;;  %v11507_v56 = vld [vmem:[%s14204_s25 + $0xd4] sm:$0x8] }
 0x19e   : > { %13134 = vmatpush3.bf16.msra.mxu1 %v13902_v4 }
 0x19f   : > { %13135 = vmatprep.subr.bf16.mxu1 %v13904_v29 }
 0x1a1   : > { %13120 = vmatmul.mubr.bf16.gmra.mrb[24].mxu1 %v14707_v50 }
 0x1a2   : > { %13136 = vmatpush3.bf16.msra.mxu1 %v13904_v29  ;;  %13123 = vmatprep.mubr.bf16.mxu1 %v14714_v43  ;;  %v16204_v43 = vld [vmem:[%s14204_s25 + $0x24] sm:$0xf] }
 0x1a3   : > { %13137 = vmatprep.subr.bf16.mxu1 %v13906_v36  ;;  %v16127_v35 = vpop.f32.mrb[28].mxu0 }
 0x1a4   : > { %v16129_v48 = vpop.f32.mrb[29].mxu0 }
 0x1a5   : > { %v16134_v4 = vpop.f32.mrb[30].mxu0 }
 0x1a6   : > { %13138 = vmatpush3.bf16.msra.mxu1 %v13906_v36  ;;  %v16136_v29 = vpop.f32.mrb[31].mxu0  ;;  %v13912_v36 = vld [vmem:[%s17906_s2 + $0x600] sm:$0xff]  }
 0x1a7   : > { %13139 = vmatprep.subr.bf16.mxu1 %v13908_v3 }
 0x1a9   : > { %13124 = vmatmul.mubr.bf16.gmra.mrb[28].mxu1 %v14774_v13 }
 0x1aa   : > { %13140 = vmatpush3.bf16.msra.mxu1 %v13908_v3  ;;  %13143 = vmatprep.mubr.bf16.mxu1 %v11519_v17  ;;  %v14044_v3 = vld [vmem:[%s14204_s25 + $0xb8] sm:$0xf]  ;;  %v11515_v17 = vrot.slane %v11503_v33, 11  ;;  %v11602_v33 = vld [vmem:[%s14204_s25 + $0xe4] sm:$0xf] }
 0x1ab   : > { %13141 = vmatprep.subr.bf16.mxu1 %v13910_v51  ;;  %v8526_v14 = vrot.slane %v14044_v3, 7  ;;  %v11516_v3 = vrot.slane %v11505_v41, 11  ;;  %v9038_v41 = vshrl.u32 %v11602_v33, 16 }
 0x1ad   : > { %v8528_v45 = vrot.slane %v8526_v14, 4  ;;  %v8527_v19 = vsel %vm15860_vm11, %v11515_v17, %v8526_v14  ;;  %v14047_v14 = vld [vmem:[%s14204_s25 + $0xe8] sm:$0xf]  ;;  %v8534_v39 = vsel %vm15860_vm11, %v11516_v3, %v8533_v27 }
 0x1ae   : > { %13142 = vmatpush3.bf16.msra.mxu1 %v13910_v51  ;;  %v8523_v51 = vsel %vm15860_vm11, %v8521_v26, %v8522_v37  ;;  %v8547_v57 = vrot.slane %v14047_v14, 7  ;;  %v13918_v26 = vld [vmem:[%s17906_s2 + $0x618] sm:$0xff]   ;;  %v11517_v37 = vrot.slane %v11507_v56, 11  ;;  %v11604_v14 = vld [vmem:[%s14204_s25 + $0xf0] sm:$0x8] }
 0x1af   : > { %13159 = vmatprep.subr.bf16.mxu1 %v13912_v36  ;;  %v8530_v58 = vsel %vm15860_vm11, %v8528_v45, %v8529_v25  ;;  %v11522_v5 = vcombine.low %v8520_v49, %v8523_v51  ;;  %v8543_v45 = vrot.slane %v11508_v8, 7  ;;  %v11509_v25 = vld [vmem:[%s14204_s25 + $0xe4] sm:$0x8]  ;;  %v11510_v49 = vld [vmem:[%s14204_s25 + $0xec] sm:$0x7] }
 0x1b0   : > { %v11523_v28 = vcombine.low %v8527_v19, %v8530_v58  ;;  %v11603_v51 = vld [vmem:[%s14204_s25 + $0xe8] sm:$0xf]  ;;  %v11518_v58 = vrot.slane %v11509_v25, 11  ;;  %v8550_v8 = vrot.slane %v11510_v49, 7 }
 0x1b1   : > { %13144 = vmatmul.mubr.bf16.vlgmr.msra.gmra.mrb[16].mxu1 %v11520_v63  ;;  %v8535_v63 = vrot.slane %v8533_v27, 4  ;;  %v16197_v27 = vld [vmem:[%s14204_s25 + $0xf4] sm:$0xf] }
 0x1b2   : > { %13160 = vmatpush3.bf16.msra.mxu1 %v13912_v36  ;;  %13147 = vmatprep.mubr.bf16.mxu1 %v11521_v6  ;;  %v14046_v36 = vld [vmem:[%s14204_s25 + $0xd8] sm:$0xf]  ;;  %v8536_v6 = vrot.slane %v11506_v42, 7  ;;  %v8549_v42 = vrot.slane %v8547_v57, 4  ;;  %v9060_v13 = vshrl.u32 %v16197_v27, 16 }
 0x1b3   : > { %13161 = vmatprep.subr.bf16.mxu1 %v13914_v40  ;;  %v8540_v22 = vrot.slane %v14046_v36, 7  ;;  %v13920_v36 = vld [vmem:[%s17906_s2 + $0x620] sm:$0xff]  }
 0x1b4   : > { %v8537_v19 = vsel %vm15860_vm11, %v8535_v63, %v8536_v6  ;;  %v9041_v63 = vshll.u32 %v11602_v33, 16  ;;  %v8551_v33 = vsel %vm15860_vm11, %v8549_v42, %v8550_v8  ;;  %v16229_v42 = vld [vmem:[%s17908_s4 + $0x1] ss:$0 sm:$0xff] }
 0x1b5   : > { %v8542_v17 = vrot.slane %v8540_v22, 4  ;;  %v8541_v56 = vsel %vm15860_vm11, %v11517_v37, %v8540_v22  ;;  %v11524_v6 = vcombine.low %v8534_v39, %v8537_v19  ;;  %v13922_v22 = vld [vmem:[%s17906_s2 + $0x628] sm:$0xff]   ;;  %v8548_v37 = vsel %vm15860_vm11, %v11518_v58, %v8547_v57  ;;  %v10825_v58 = vld [vmem:[%s14204_s25 + $0x20] sm:$0x8]  ;;  %v16241_v8 = vld [vmem:[%s17909_s5 + $0x1] ss:$0 sm:$0xff] }
 0x1b6   : > { %13162 = vmatpush3.bf16.msra.mxu1 %v13914_v40  ;;  %v11601_v40 = vld [vmem:[%s14204_s25 + $0xe0] sm:$0x8]  ;;  %v4205_v39 = vshrl.u32 %v16204_v43, 16  ;;  %v16222_v57 = vrot.slane %v9060_v13, 7 }
 0x1b7   : > { %13163 = vmatprep.subr.bf16.mxu1 %v13916_v60  ;;  %v9033_v3 = vshrl.u32 %v11601_v40, 16  ;;  %v9055_v40 = vshrl.u32 %v11604_v14, 16  ;;  %v10827_v14 = vld [vmem:[%s14204_s25 + $0x30] sm:$0x8] }
 0x1b8   : > { %v16255_v50 = vrot.slane %v4205_v39, 7 }
 0x1b9   : > { %13148 = vmatmul.mubr.bf16.gmra.mrb[20].mxu1 %v11522_v5  ;;  %v9047_v5 = vshrl.u32 %v11603_v51, 16 }
 0x1ba   : > { %13164 = vmatpush3.bf16.msra.mxu1 %v13916_v60  ;;  %13151 = vmatprep.mubr.bf16.mxu1 %v11523_v28  ;;  %v8544_v60 = vsel %vm15860_vm11, %v8542_v17, %v8543_v45  ;;  %v16199_v28 = vrot.slane %v9038_v41, 7  ;;  %v16214_v45 = vld [vmem:[%s14204_s25 + $0xf8] sm:$0xf]  ;;  %v9050_v41 = vshll.u32 %v11603_v51, 16  ;;  %v13924_v51 = vld [vmem:[%s17906_s2 + $0x630] sm:$0xff]  }
 0x1bb   : > { %13165 = vmatprep.subr.bf16.mxu1 %v13918_v26  ;;  %v11525_v25 = vcombine.low %v8541_v56, %v8544_v60  ;;  %v9049_v17 = vrot.slane %v9047_v5, 7  ;;  %v9069_v19 = vshrl.u32 %v16214_v45, 16  ;;  %v11526_v56 = vcombine.low %v8548_v37, %v8551_v33  ;;  %v16236_v60 = vld [vmem:[%s14204_s25 + $0x28] sm:$0xf] }
 0x1bc   : > { %v16219_v49 = vor.u32 %v9041_v63, %v16199_v28  ;;  %v16249_v63 = vrot.slane %v9055_v40, 11 }
 0x1be   : > { %13166 = vmatpush3.bf16.msra.mxu1 %v13918_v26  ;;  %v16216_v26 = vrot.slane %v9033_v3, 11  ;;  %v16247_v3 = vor.u32 %v9050_v41, %v9049_v17  ;;  %v13928_v17 = vld [vmem:[%s14204_s25 + $0xe0] sm:$0xff]  }
 0x1bf   : > { %13167 = vmatprep.subr.bf16.mxu1 %v13920_v36 }
 0x1c1   : > { %13152 = vmatmul.mubr.bf16.gmra.mrb[24].mxu1 %v11524_v6  ;;  %v9063_v6 = vshll.u32 %v16197_v27, 16  ;;  %v16263_v27 = vrot.slane %v9069_v19, 7 }
 0x1c2   : > { %13168 = vmatpush3.bf16.msra.mxu1 %v13920_v36  ;;  %13155 = vmatprep.mubr.bf16.mxu1 %v11525_v25  ;;  %v4200_v36 = vshrl.u32 %v10825_v58, 16 }
 0x1c3   : > { %13169 = vmatprep.subr.bf16.mxu1 %v13922_v22 }
 0x1c4   : > { %v12569_v13 = vpop.f32.mrb[0].mxu1  ;;  %v16281_v32 = vrot.slane %v4200_v36, 11  ;;  %v16296_v36 = vld [vmem:[%s14204_s25 + $0x104] sm:$0xf] }
 0x1c5   : > { %v13287_v25 = vadd.f32 %v12569_v13, %v16059_v47  ;;  %v3589_v37 = vpop.f32.mrb[1].mxu1  ;;  %v4214_v47 = vshrl.u32 %v16236_v60, 16  ;;  %v4222_v13 = vshrl.u32 %v10827_v14, 16 }
 0x1c6   : > { %v13288_v9 = vadd.f32 %v3589_v37, %v16061_v34  ;;  %v12570_v5 = vpop.f32.mrb[2].mxu1  ;;  %13170 = vmatpush3.bf16.msra.mxu1 %v13922_v22  ;;  %v13926_v34 = vld [vmem:[%s17906_s2 + $0x638] sm:$0xff]  }
 0x1c7   : > { %v3675_v40 = vmul.f32 %v13287_v25, %v16229_v42  ;;  %v13289_v58 = vadd.f32 %v12570_v5, %v16066_v62  ;;  %v3592_v39 = vpop.f32.mrb[3].mxu1  ;;  %13171 = vmatprep.subr.bf16.mxu1 %v13924_v51  ;;  %v16276_v25 = vld [vmem:[%s14204_s25 + $0x38] sm:$0xf]  ;;  %v4227_v62 = vshrl.u32 %v16258_v11, 16 }
 0x1c8   : > { %v3673_v37 = vmul.f32 %v13288_v9, %v16229_v42  ;;  %v13290_v19 = vadd.f32 %v3592_v39, %v16068_v20  ;;  %17972 = vst [vmem:[#allocation15_spill] sm:$0xff] %v16276_v25  ;;  %v16285_v9 = vld [vmem:[%s14204_s25 + $0x100] sm:$0x8] }
 0x1c9   : > { %v3696_v5 = vadd.f32 %v16241_v8, %v3675_v40  ;;  %v3676_v33 = vmul.f32 %v13289_v58, %v16229_v42  ;;  %13156 = vmatmul.mubr.bf16.gmra.mrb[28].mxu1 %v11526_v56  ;;  %v13930_v40 = vld [vmem:[%s17906_s2 + $0x640] sm:$0xff]   ;;  %v16292_v58 = vrot.slane %v4214_v47, 7  ;;  %v16309_v22 = vrot.slane %v4227_v62, 7 }
 0x1ca   : > { %v3694_v20 = vadd.f32 %v16241_v8, %v3673_v37  ;;  %v3674_v39 = vmul.f32 %v13290_v19, %v16229_v42  ;;  %13172 = vmatpush3.bf16.msra.mxu1 %v13924_v51  ;;  %13175 = vmatprep.mubr.bf16.mxu1 %v13928_v17  ;;  %v16300_v37 = vor.u32 %v9063_v6, %v16222_v57  ;;  %v16302_v51 = vrot.slane %v4222_v13, 11  ;;  %v16306_v19 = vld [vmem:[%s14204_s25 + $0x108] sm:$0xf] }
 0x1cb   : > { %v3697_v14 = vadd.f32 %v16241_v8, %v3676_v33  ;;  %13173 = vmatprep.subr.bf16.mxu1 %v13926_v34  ;;  %v4236_v17 = vshrl.u32 %v16276_v25, 16  ;;  %17974 = vst [vmem:[#allocation17_spill] sm:$0xff] %v16309_v22  ;;  %v9077_v33 = vshrl.u32 %v16285_v9, 16  ;;  %v3712_v46 = vmax.f32 %v3696_v5, 0.0 }
 0x1cc   : > { %17973 = vst [vmem:[#allocation16_spill] sm:$0xff] %v16302_v51  ;;  %v3695_v47 = vadd.f32 %v16241_v8, %v3674_v39  ;;  %v12573_v41 = vpop.f32.mrb[4].mxu1  ;;  %v9082_v51 = vshrl.u32 %v16296_v36, 16  ;;  %v3710_v23 = vmax.f32 %v3694_v20, 0.0  ;;  %v9091_v56 = vshrl.u32 %v16306_v19, 16 }
 0x1cd   : > { %v3713_v6 = vmax.f32 %v3697_v14, 0.0  ;;  %v13291_v13 = vadd.f32 %v12573_v41, %v16077_v61  ;;  %v3605_v52 = vpop.f32.mrb[5].mxu1  ;;  %v16326_v41 = vld [vmem:[%s17907_s3 + $0x8] sm:$0xff]   ;;  %v17975_v14 = vrot.slane %v16199_v28, 4  ;;  %v16352_v28 = vld [vmem:[%s14204_s25 + $0x110] sm:$0x8] }
 0x1ce   : > { %v3711_v39 = vmax.f32 %v3695_v47, 0.0  ;;  %v13292_v62 = vadd.f32 %v3605_v52, %v16079_v12  ;;  %v12574_v2 = vpop.f32.mrb[6].mxu1  ;;  %13174 = vmatpush3.bf16.msra.mxu1 %v13926_v34  ;;  %v13932_v52 = vld [vmem:[%s17906_s2 + $0x648] sm:$0xff]   ;;  %v13934_v12 = vld [vmem:[%s14204_s25 + $0x100] sm:$0xff]   ;;  %v9104_v34 = vshrl.u32 %v16314_v59, 16 }
 0x1cf   : > { %v3727_v9 = vpack.c.bf16 %v3713_v6, %v3712_v46  ;;  %v3679_v25 = vmul.f32 %v13291_v13, %v16229_v42  ;;  %v13293_v5 = vadd.f32 %v12574_v2, %v16082_v0  ;;  %v3608_v61 = vpop.f32.mrb[7].mxu1  ;;  %13191 = vmatprep.subr.bf16.mxu1 %v13930_v40  ;;  %v16340_v20 = vsel %vm14373_vm8, %v17975_v14, %v16247_v3 }
 0x1d0   : > { %v3677_v46 = vmul.f32 %v13292_v62, %v16229_v42  ;;  %v13294_v2 = vadd.f32 %v3608_v61, %v16085_v55  ;;  %v3726_v0 = vpack.c.bf16 %v3711_v39, %v3710_v23  ;;  %v17976_v23 = vshll.u32 %v16214_v45, 16  ;;  %v16360_v62 = vld [vmem:[%s14204_s25 + $0x118] sm:$0xf]  ;;  %v13936_v45 = vld [vmem:[%s17906_s2 + $0x650] sm:$0xff]  }
 0x1d1   : > { %v3700_v47 = vadd.f32 %v16241_v8, %v3679_v25  ;;  %v3680_v6 = vmul.f32 %v13293_v5, %v16229_v42  ;;  %13176 = vmatmul.mubr.bf16.vlgmr.msra.gmra.mrb[16].mxu1 %v13929_v7  ;;  %v16356_v25 = vrot.slane %v4236_v17, 7  ;;  %v16367_v61 = vrot.slane %v9077_v33, 11  ;;  %v16372_v17 = vld [vmem:[%s14204_s25 + $0x40] sm:$0x8]  ;;  %v16382_v33 = vld [vmem:[%s14204_s25 + $0x44] sm:$0xf] }
 0x1d2   : > { %v9074_v55 = vor.u32 %v17976_v23, %v16263_v27  ;;  %v3698_v3 = vadd.f32 %v16241_v8, %v3677_v46  ;;  %v3678_v39 = vmul.f32 %v13294_v2, %v16229_v42  ;;  %12599 = vmatprep.mubr.bf16.mxu0 %v3726_v0  ;;  %13192 = vmatpush3.bf16.msra.mxu1 %v13930_v40  ;;  %v16369_v40 = vrot.slane %v9082_v51, 7 }
 0x1d3   : > { %17977 = vst [vmem:[#allocation18_spill] sm:$0xff] %v16356_v25  ;;  %v3701_v5 = vadd.f32 %v16241_v8, %v3680_v6  ;;  %12600 = vmatmul.mubr.bf16.vlgmr.msra.gmra.mrb[32].mxu0 %v3727_v9  ;;  %13193 = vmatprep.subr.bf16.mxu1 %v13932_v52  ;;  %v16376_v9 = vrot.slane %v9091_v56, 7  ;;  %v9099_v0 = vshrl.u32 %v16352_v28, 16  ;;  %v16379_v14 = vrot.slane %v9104_v34, 7  ;;  %v13935_v56 = vld [vmem:[%s14204_s25 + $0x110] sm:$0xff]  }
 0x1d4   : > { %v3699_v46 = vadd.f32 %v16241_v8, %v3678_v39  ;;  %v12577_v2 = vpop.f32.mrb[8].mxu1  ;;  %12616 = vmatpush3.bf16.msra.mxu0 %v15974_v31  ;;  %13179 = vmatprep.mubr.bf16.mxu1 %v13934_v12  ;;  %v3716_v51 = vmax.f32 %v3700_v47, 0.0  ;;  %v13917_v31 = vld [vmem:[%s17907_s3 + $0x10] sm:$0xff]   ;;  %v9113_v12 = vshrl.u32 %v16360_v62, 16  ;;  %v3714_v28 = vmax.f32 %v3698_v3, 0.0  ;;  %v13940_v47 = vld [vmem:[%s14204_s25 + $0x120] sm:$0xff]  }
 0x1d5   : > { %v3717_v6 = vmax.f32 %v3701_v5, 0.0  ;;  %v13295_v23 = vadd.f32 %v12577_v2, %v16094_v15  ;;  %v3621_v27 = vpop.f32.mrb[9].mxu1  ;;  %12617 = vmatprep.subr.bf16.mxu0 %v16326_v41  ;;  %v13938_v15 = vld [vmem:[%s17906_s2 + $0x658] sm:$0xff]   ;;  %v4244_v5 = vshrl.u32 %v16372_v17, 16 }
 0x1d6   : > { %v3715_v34 = vmax.f32 %v3699_v46, 0.0  ;;  %v13296_v39 = vadd.f32 %v3621_v27, %v16097_v54  ;;  %v12578_v13 = vpop.f32.mrb[10].mxu1  ;;  %13194 = vmatpush3.bf16.msra.mxu1 %v13932_v52  ;;  %v16402_v3 = vld [vmem:[%s17907_s3 + $0x18] sm:$0xff]   ;;  %v4249_v54 = vshrl.u32 %v16382_v33, 16 }
 0x1d7   : > { %v3683_v2 = vmul.f32 %v13295_v23, %v16229_v42  ;;  %v13297_v7 = vadd.f32 %v12578_v13, %v16103_v18  ;;  %v3624_v25 = vpop.f32.mrb[11].mxu1  ;;  %v3729_v11 = vpack.c.bf16 %v3717_v6, %v3716_v51  ;;  %13195 = vmatprep.subr.bf16.mxu1 %v13936_v45  ;;  %v17978_v18 = vrot.slane %v16222_v57, 4  ;;  %v16429_v23 = vld [vmem:[%s14204_s25 + $0x48] sm:$0xf] }
 0x1d8   : > { %v3681_v52 = vmul.f32 %v13296_v39, %v16229_v42  ;;  %v13298_v27 = vadd.f32 %v3624_v25, %v16107_v38  ;;  %12618 = vmatpush3.bf16.msra.mxu0 %v16326_v41  ;;  %v3728_v17 = vpack.c.bf16 %v3715_v34, %v3714_v28  ;;  %v16419_v38 = vld [vmem:[%s17906_s2 + $0x660] sm:$0xff]   ;;  %v9094_v57 = vshll.u32 %v16306_v19, 16  ;;  %v13941_v28 = vld [vmem:[%s14204_s25 + $0x130] sm:$0xff]  }
 0x1d9   : > { %v16412_v13 = vsel %vm14373_vm8, %v17978_v18, %v9074_v55  ;;  %v3704_v46 = vadd.f32 %v16241_v8, %v3683_v2  ;;  %v3684_v51 = vmul.f32 %v13297_v7, %v16229_v42  ;;  %12619 = vmatprep.subr.bf16.mxu0 %v13917_v31  ;;  %13180 = vmatmul.mubr.bf16.gmra.mrb[20].mxu1 %v13935_v56  ;;  %v16425_v7 = vrot.slane %v9099_v0, 11  ;;  %v16435_v19 = vld [vmem:[%s17907_s3 + $0x20] sm:$0xff]   ;;  %v16446_v2 = vld [vmem:[%s14204_s25 + $0x50] sm:$0x8]  ;;  %v16456_v18 = vld [vmem:[%s14204_s25 + $0x54] sm:$0xf] }
 0x1da   : > { %v3702_v55 = vadd.f32 %v16241_v8, %v3681_v52  ;;  %v3682_v25 = vmul.f32 %v13298_v27, %v16229_v42  ;;  %12603 = vmatprep.mubr.bf16.mxu0 %v3728_v17  ;;  %13196 = vmatpush3.bf16.msra.mxu1 %v13936_v45  ;;  %v17979_v45 = vshll.u32 %v16296_v36, 16  ;;  %v16449_v27 = vrot.slane %v9113_v12, 7 }
 0x1db   : > { %v3705_v56 = vadd.f32 %v16241_v8, %v3684_v51  ;;  %12604 = vmatmul.mubr.bf16.gmra.mrb[36].mxu0 %v3729_v11  ;;  %13197 = vmatprep.subr.bf16.mxu1 %v13938_v15  ;;  %v16451_v17 = vrot.slane %v4244_v5, 11  ;;  %v16453_v36 = vrot.slane %v4249_v54, 7  ;;  %v3720_v51 = vmax.f32 %v3704_v46, 0.0 }
 0x1dc   : > { %v16441_v0 = vor.u32 %v17979_v45, %v16369_v40  ;;  %v3703_v11 = vadd.f32 %v16241_v8, %v3682_v25  ;;  %v12581_v52 = vpop.f32.mrb[12].mxu1  ;;  %12620 = vmatpush3.bf16.msra.mxu0 %v13917_v31  ;;  %13183 = vmatprep.mubr.bf16.mxu1 %v13940_v47  ;;  %v13944_v31 = vld [vmem:[%s17906_s2 + $0x668] sm:$0xff]   ;;  %v4258_v12 = vshrl.u32 %v16429_v23, 16  ;;  %v16465_v47 = vld [vmem:[%s14204_s25 + $0x58] sm:$0xf]  ;;  %v3718_v5 = vmax.f32 %v3702_v55, 0.0 }
 0x1dd   : > { %17980 = vst [vmem:[#allocation19_spill] sm:$0xff] %v16451_v17  ;;  %v3721_v45 = vmax.f32 %v3705_v56, 0.0  ;;  %v13299_v34 = vadd.f32 %v12581_v52, %v16127_v35  ;;  %v3637_v39 = vpop.f32.mrb[13].mxu1  ;;  %12621 = vmatprep.subr.bf16.mxu0 %v16402_v3  ;;  %v13946_v56 = vld [vmem:[%s14204_s25 + $0x140] sm:$0xff]   ;;  %v4266_v35 = vshrl.u32 %v16446_v2, 16  ;;  %v13923_v55 = vld [vmem:[%s17907_s3 + $0x28] sm:$0xff]  }
 0x1de   : > { %v3719_v54 = vmax.f32 %v3703_v11, 0.0  ;;  %v13300_v25 = vadd.f32 %v3637_v39, %v16129_v48  ;;  %v12582_v46 = vpop.f32.mrb[14].mxu1  ;;  %13198 = vmatpush3.bf16.msra.mxu1 %v13938_v15  ;;  %v16471_v52 = vld [vmem:[%s14204_s25 + $0x124] sm:$0xf]  ;;  %v4271_v48 = vshrl.u32 %v16456_v18, 16 }
 0x1df   : > { %v3687_v6 = vmul.f32 %v13299_v34, %v16229_v42  ;;  %v13301_v41 = vadd.f32 %v12582_v46, %v16134_v4  ;;  %v3640_v17 = vpop.f32.mrb[15].mxu1  ;;  %v3731_v22 = vpack.c.bf16 %v3721_v45, %v3720_v51  ;;  %13199 = vmatprep.subr.bf16.mxu1 %v16419_v38  ;;  %v16481_v15 = vld [vmem:[%s14204_s25 + $0x128] sm:$0xf]  ;;  %v9096_v4 = vor.u32 %v9094_v57, %v16376_v9  ;;  %v13925_v57 = vld [vmem:[%s17907_s3 + $0x30] sm:$0xff]   ;;  %v13927_v9 = vld [vmem:[%s17907_s3 + $0x38] sm:$0xff]  }
 0x1e0   : > { %v3685_v39 = vmul.f32 %v13300_v25, %v16229_v42  ;;  %v13302_v2 = vadd.f32 %v3640_v17, %v16136_v29  ;;  %12622 = vmatpush3.bf16.msra.mxu0 %v16402_v3  ;;  %v3730_v34 = vpack.c.bf16 %v3719_v54, %v3718_v5  ;;  %v4280_v46 = vshrl.u32 %v16465_v47, 16  ;;  %v16830_v45 = vld [vmem:[%s14204_s25 + $0x138] sm:$0xf] }
 0x1e1   : > { %v3708_v11 = vadd.f32 %v16241_v8, %v3687_v6  ;;  %v3688_v51 = vmul.f32 %v13301_v41, %v16229_v42  ;;  %12623 = vmatprep.subr.bf16.mxu0 %v16435_v19  ;;  %13184 = vmatmul.mubr.bf16.gmra.mrb[24].mxu1 %v13941_v28  ;;  %v9126_v28 = vshrl.u32 %v16471_v52, 16  ;;  %v9135_v17 = vshrl.u32 %v16481_v15, 16  ;;  %v13950_v6 = vld [vmem:[%s17906_s2 + $0x678] sm:$0xff]  }
 0x1e2   : > { %v3706_v25 = vadd.f32 %v16241_v8, %v3685_v39  ;;  %v3686_v29 = vmul.f32 %v13302_v2, %v16229_v42  ;;  %12607 = vmatprep.mubr.bf16.mxu0 %v3730_v34  ;;  %13200 = vmatpush3.bf16.msra.mxu1 %v16419_v38  ;;  %v13948_v42 = vld [vmem:[%s17906_s2 + $0x670] sm:$0xff]   ;;  %v11613_v38 = vld [vmem:[%s14204_s25 + $0x120] sm:$0x8]  ;;  %v16511_v54 = vrot.slane %v4258_v12, 7  ;;  %v16513_v39 = vrot.slane %v4266_v35, 11 }
 0x1e3   : > { %v3709_v41 = vadd.f32 %v16241_v8, %v3688_v51  ;;  %12608 = vmatmul.mubr.bf16.gmra.mrb[40].mxu0 %v3731_v22  ;;  %13201 = vmatprep.subr.bf16.mxu1 %v13944_v31  ;;  %v13947_v22 = vld [vmem:[%s14204_s25 + $0x150] sm:$0xff]   ;;  %v16515_v2 = vrot.slane %v4271_v48, 7  ;;  %v3724_v51 = vmax.f32 %v3708_v11, 0.0  ;;  %v9121_v35 = vshrl.u32 %v11613_v38, 16  ;;  %v16529_v11 = vld [vmem:[%s14204_s25 + $0x138] sm:$0xf] }
 0x1e4   : > { %v3707_v5 = vadd.f32 %v16241_v8, %v3686_v29  ;;  %12624 = vmatpush3.bf16.msra.mxu0 %v16435_v19  ;;  %13187 = vmatprep.mubr.bf16.mxu1 %v13946_v56  ;;  %v11616_v34 = vld [vmem:[%s14204_s25 + $0x130] sm:$0x8]  ;;  %v16521_v8 = vrot.slane %v4280_v46, 7  ;;  %v16525_v56 = vld [vmem:[%s14204_s25 + $0x134] sm:$0xf]  ;;  %v3722_v12 = vmax.f32 %v3706_v25, 0.0  ;;  %v9088_v46 = vsel %vm14373_vm8, %v16367_v61, %v16441_v0 }
 0x1e5   : > { %v3725_v3 = vmax.f32 %v3709_v41, 0.0  ;;  %12625 = vmatprep.subr.bf16.mxu0 %v13923_v55  ;;  %v9129_v48 = vshll.u32 %v16471_v52, 16  ;;  %v9128_v25 = vrot.slane %v9126_v28, 7  ;;  %v17981_v52 = vrot.slane %v16369_v40, 4  ;;  %v16545_v19 = vld [vmem:[%s14204_s25 + $0x64] sm:$0xf] }
 0x1e6   : > { %v3723_v29 = vmax.f32 %v3707_v5, 0.0  ;;  %13202 = vmatpush3.bf16.msra.mxu1 %v13944_v31  ;;  %v9137_v5 = vrot.slane %v9135_v17, 7  ;;  %v9138_v38 = vshll.u32 %v16481_v15, 16  ;;  %v17982_v61 = vsel %vm14373_vm8, %v16216_v26, %v16219_v49  ;;  %v13952_v40 = vld [vmem:[%s17906_s2 + $0x680] sm:$0xff]  }
 0x1e7   : > { %v3733_v41 = vpack.c.bf16 %v3725_v3, %v3724_v51  ;;  %13203 = vmatprep.subr.bf16.mxu1 %v13948_v42  ;;  %v9097_v3 = vsel %vm14373_vm8, %v17981_v52, %v9096_v4  ;;  %v9148_v51 = vshrl.u32 %v16525_v56, 16  ;;  %v11633_v0 = vcombine.low %v17982_v61, %v16340_v20  ;;  %v16558_v4 = vld [vmem:[%s14204_s25 + $0x60] sm:$0x8]  ;;  %v16570_v17 = vld [vmem:[%s14204_s25 + $0x144] sm:$0xf] }
 0x1e8   : > { %12626 = vmatpush3.bf16.msra.mxu0 %v13923_v55  ;;  %v3732_v31 = vpack.c.bf16 %v3723_v29, %v3722_v12  ;;  %v9143_v15 = vshrl.u32 %v11616_v34, 16  ;;  %v17983_v28 = vsel %vm14373_vm8, %v16249_v63, %v16300_v37  ;;  %v16566_v49 = vrot.slane %v9121_v35, 11  ;;  %v16601_v52 = vld [vmem:[%s14204_s25 + $0x74] sm:$0xf] }
 0x1e9   : > { %12627 = vmatprep.subr.bf16.mxu0 %v13925_v57  ;;  %13188 = vmatmul.mubr.bf16.gmra.mrb[28].mxu1 %v13947_v22  ;;  %v11634_v26 = vcombine.low %v17983_v28, %v16412_v13  ;;  %v9157_v20 = vshrl.u32 %v16529_v11, 16  ;;  %v11635_v22 = vcombine.low %v9088_v46, %v9097_v3  ;;  %v17984_v34 = vshll.u32 %v16314_v59, 16  ;;  %v13931_v59 = vld [vmem:[%s17906_s2 + $0x280] sm:$0xff]   ;;  %v16616_v61 = vld [vmem:[%s14204_s25 + $0x154] sm:$0xf] }
 0x1ea   : > { %12611 = vmatprep.mubr.bf16.mxu0 %v3732_v31  ;;  %13204 = vmatpush3.bf16.msra.mxu1 %v13948_v42  ;;  %v17985_v12 = vshll.u32 %v16360_v62, 16  ;;  %v16579_v31 = vld [vmem:[%s14204_s25 + $0x148] sm:$0xf]  ;;  %v9131_v63 = vor.u32 %v9129_v48, %v9128_v25  ;;  %v9133_v37 = vrot.slane %v9128_v25, 4  ;;  %v9140_v13 = vor.u32 %v9138_v38, %v9137_v5  ;;  %v11619_v3 = vld [vmem:[%s14204_s25 + $0x140] sm:$0x8] }
 0x1eb   : > { %12612 = vmatmul.mubr.bf16.gmra.mrb[44].mxu0 %v3733_v41  ;;  %13205 = vmatprep.subr.bf16.mxu1 %v13950_v6  ;;  %v9109_v42 = vor.u32 %v17984_v34, %v16379_v14  ;;  %v16582_v35 = vrot.slane %v9148_v51, 7  ;;  %v13954_v62 = vld [vmem:[%s17906_s2 + $0x688] sm:$0xff]   ;;  %v9170_v48 = vshrl.u32 %v16570_v17, 16  ;;  %v9159_v41 = vrot.slane %v9157_v20, 7  ;;  %v16825_v55 = vld [vmem:[%s14204_s25 + $0x134] sm:$0x8] }
 0x1ec   : > { %v9118_v29 = vor.u32 %v17985_v12, %v16449_v27  ;;  %12628 = vmatpush3.bf16.msra.mxu0 %v13925_v57  ;;  %12631 = vmatprep.mubr.bf16.mxu0 %v15879_v30  ;;  %v16590_v27 = vrot.slane %v9143_v15, 11  ;;  %v9151_v30 = vshll.u32 %v16525_v56, 16  ;;  %v4293_v57 = vshrl.u32 %v16545_v19, 16  ;;  %v16597_v25 = vld [vmem:[%s14204_s25 + $0x68] sm:$0xf] }
 0x1ed   : > { %12629 = vmatprep.subr.bf16.mxu0 %v13927_v9  ;;  %13207 = vmatprep.mubr.bf16.mxu1 %v11633_v0  ;;  %v9160_v46 = vshll.u32 %v16529_v11, 16  ;;  %v4288_v5 = vshrl.u32 %v16558_v4, 16  ;;  %v9179_v38 = vshrl.u32 %v16579_v31, 16  ;;  %v13933_v56 = vld [vmem:[%s17906_s2 + $0x288] sm:$0xff]   ;;  %v17986_v11 = vrot.slane %v16379_v14, 4 }
 0x1ee   : > { %13206 = vmatpush3.bf16.msra.mxu1 %v13950_v6  ;;  %v9110_v6 = vsel %vm14373_vm8, %v16425_v7, %v9109_v42  ;;  %v9132_v0 = vsel %vm14373_vm8, %v16566_v49, %v9131_v63  ;;  %v9141_v15 = vsel %vm14373_vm8, %v9133_v37, %v9140_v13  ;;  %v9155_v4 = vrot.slane %v16582_v35, 4  ;;  %v16626_v7 = vld [vmem:[%s14204_s25 + $0x70] sm:$0x8]  ;;  %v16629_v14 = vld [vmem:[%s14204_s25 + $0x158] sm:$0xf] }
 0x1ef   : > { %13223 = vmatprep.subr.bf16.mxu1 %v13952_v40  ;;  %v9119_v51 = vsel %vm14373_vm8, %v17986_v11, %v9118_v29  ;;  %v16634_v20 = vrot.slane %v4293_v57, 7  ;;  %v9165_v49 = vshrl.u32 %v11619_v3, 16  ;;  %v9172_v34 = vrot.slane %v9170_v48, 7  ;;  %v16662_v11 = vld [vmem:[%s14204_s25 + $0x84] sm:$0xf] }
 0x1f0   : > { %12630 = vmatpush3.bf16.msra.mxu0 %v13927_v9  ;;  %v13956_v9 = vld [vmem:[%s17906_s2 + $0x690] sm:$0xff]   ;;  %v9173_v42 = vshll.u32 %v16570_v17, 16  ;;  %v11636_v12 = vcombine.low %v9110_v6, %v9119_v51  ;;  %v9181_v29 = vrot.slane %v9179_v38, 7  ;;  %v9182_v63 = vshll.u32 %v16579_v31, 16  ;;  %v16650_v31 = vld [vmem:[%s14204_s25 + $0x78] sm:$0xf] }
 0x1f1   : > { %12647 = vmatprep.subr.bf16.mxu0 %v13931_v59  ;;  %13208 = vmatmul.mubr.bf16.vlgmr.msra.gmra.mrb[16].mxu1 %v11634_v26  ;;  %v9153_v26 = vor.u32 %v9151_v30, %v16582_v35  ;;  %v9162_v37 = vor.u32 %v9160_v46, %v9159_v41  ;;  %v4302_v13 = vshrl.u32 %v16597_v25, 16  ;;  %v4315_v57 = vshrl.u32 %v16601_v52, 16  ;;  %v11622_v41 = vld [vmem:[%s14204_s25 + $0x150] sm:$0x8]  ;;  %v10837_v51 = vld [vmem:[%s14204_s25 + $0x80] sm:$0x8] }
 0x1f2   : > { %13224 = vmatpush3.bf16.msra.mxu1 %v13952_v40  ;;  %13211 = vmatprep.mubr.bf16.mxu1 %v11635_v22  ;;  %v13937_v40 = vld [vmem:[%s17906_s2 + $0x290] sm:$0xff]   ;;  %v11637_v17 = vcombine.low %v9132_v0, %v9141_v15  ;;  %v16646_v22 = vrot.slane %v4288_v5, 11  ;;  %v9192_v35 = vshrl.u32 %v16616_v61, 16  ;;  %v4310_v30 = vshrl.u32 %v16626_v7, 16  ;;  %v13939_v0 = vld [vmem:[%s17906_s2 + $0x298] sm:$0xff]  }
 0x1f3   : > { %12632 = vmatmul.mubr.bf16.vlgmr.msra.gmra.mrb[32].mxu0 %v15868_v44  ;;  %13225 = vmatprep.subr.bf16.mxu1 %v13954_v62  ;;  %v9201_v46 = vshrl.u32 %v16629_v14, 16  ;;  %v11631_v5 = vrot.slane %v9165_v49, 11  ;;  %v9175_v3 = vor.u32 %v9173_v42, %v9172_v34  ;;  %v9177_v38 = vrot.slane %v9172_v34, 4  ;;  %v16678_v34 = vld [vmem:[%s14204_s25 + $0xe8] sm:$0xf] }
 0x1f4   : > { %12635 = vmatprep.mubr.bf16.mxu0 %v15930_v24  ;;  %12648 = vmatpush3.bf16.msra.mxu0 %v13931_v59  ;;  %v13958_v24 = vld [vmem:[%s17906_s2 + $0x698] sm:$0xff]   ;;  %v9184_v6 = vor.u32 %v9182_v63, %v9181_v29  ;;  %v9154_v15 = vsel %vm14373_vm8, %v16590_v27, %v9153_v26  ;;  %v16673_v7 = vrot.slane %v4302_v13, 7  ;;  %v16675_v49 = vrot.slane %v4315_v57, 7  ;;  %v11665_v13 = vld [vmem:[%s14204_s25 + $0xe4] sm:$0x8] }
 0x1f5   : > { %12649 = vmatprep.subr.bf16.mxu0 %v13933_v56  ;;  %v4324_v42 = vshrl.u32 %v16650_v31, 16  ;;  %v9187_v29 = vshrl.u32 %v11622_v41, 16  ;;  %v9194_v63 = vrot.slane %v9192_v35, 7  ;;  %v9195_v48 = vshll.u32 %v16616_v61, 16  ;;  %v16697_v57 = vld [vmem:[%s14204_s25 + $0x88] sm:$0xf] }
 0x1f6   : > { %13226 = vmatpush3.bf16.msra.mxu1 %v13954_v62  ;;  %v9163_v62 = vsel %vm14373_vm8, %v9155_v4, %v9162_v37  ;;  %v17987_v27 = vshll.u32 %v16204_v43, 16  ;;  %v13960_v4 = vld [vmem:[%s17906_s2 + $0x6a0] sm:$0xff]   ;;  %v9203_v37 = vrot.slane %v9201_v46, 7  ;;  %v9176_v61 = vsel %vm14373_vm8, %v11631_v5, %v9175_v3  ;;  %v11667_v3 = vld [vmem:[%s14204_s25 + $0xec] sm:$0x7] }
 0x1f7   : > { %13227 = vmatprep.subr.bf16.mxu1 %v13956_v9  ;;  %v9185_v43 = vsel %vm14373_vm8, %v9177_v38, %v9184_v6  ;;  %v9468_v35 = vrot.slane %v16678_v34, 7  ;;  %v11638_v41 = vcombine.low %v9154_v15, %v9163_v62  ;;  %v16709_v46 = vrot.slane %v4310_v30, 11  ;;  %v13962_v30 = vld [vmem:[%s17906_s2 + $0x6a8] sm:$0xff]   ;;  %v16728_v34 = vld [vmem:[%s14204_s25 + $0xf8] sm:$0xf] }
 0x1f8   : > { %12650 = vmatpush3.bf16.msra.mxu0 %v13933_v56  ;;  %v16685_v26 = vor.u32 %v17987_v27, %v16255_v50  ;;  %v9204_v56 = vshll.u32 %v16629_v14, 16  ;;  %v16704_v14 = vld [vmem:[%s17906_s2 + $0x2a0] sm:$0xff]   ;;  %v4337_v5 = vshrl.u32 %v16662_v11, 16  ;;  %v16715_v38 = vrot.slane %v4324_v42, 7  ;;  %v16771_v59 = vld [vmem:[%s14204_s25 + $0x10c] sm:$0x7] }
 0x1f9   : > { %12651 = vmatprep.subr.bf16.mxu0 %v13937_v40  ;;  %13212 = vmatmul.mubr.bf16.gmra.mrb[20].mxu1 %v11636_v12  ;;  %v4332_v12 = vshrl.u32 %v10837_v51, 16  ;;  %v11639_v51 = vcombine.low %v9176_v61, %v9185_v43  ;;  %v9197_v15 = vor.u32 %v9195_v48, %v9194_v63  ;;  %v9199_v62 = vrot.slane %v9194_v63, 4  ;;  %v16738_v48 = vld [vmem:[%s17906_s2 + $0x2a8] sm:$0xff]   ;;  %v16749_v61 = vld [vmem:[%s14204_s25 + $0xf4] sm:$0x8] }
 0x1fa   : > { %13228 = vmatpush3.bf16.msra.mxu1 %v13956_v9  ;;  %13215 = vmatprep.mubr.bf16.mxu1 %v11637_v17  ;;  %v17988_v9 = vshll.u32 %v16236_v60, 16  ;;  %v11632_v60 = vrot.slane %v9187_v29, 11  ;;  %v11689_v29 = vrot.slane %v11665_v13, 11  ;;  %v9470_v27 = vrot.slane %v9468_v35, 4  ;;  %v16746_v13 = vld [vmem:[%s14204_s25 + $0x98] sm:$0xf] }
 0x1fb   : > { %12636 = vmatmul.mubr.bf16.gmra.mrb[36].mxu0 %v15918_v16  ;;  %13229 = vmatprep.subr.bf16.mxu1 %v13958_v24  ;;  %v16730_v42 = vrot.slane %v4332_v12, 11  ;;  %v16733_v16 = vld [vmem:[%s14204_s25 + $0x108] sm:$0xf]  ;;  %v16740_v63 = vrot.slane %v4337_v5, 7  ;;  %17992 = vst [vmem:[#allocation23_spill] sm:$0xff] %v16746_v13 }
 0x1fc   : > { %v4219_v17 = vor.u32 %v17988_v9, %v16292_v58  ;;  %12639 = vmatprep.mubr.bf16.mxu0 %v15976_v1  ;;  %12652 = vmatpush3.bf16.msra.mxu0 %v13937_v40  ;;  %v16719_v58 = vld [vmem:[%s14204_s25 + $0x94] sm:$0xf]  ;;  %v9206_v1 = vor.u32 %v9204_v56, %v9203_v37  ;;  %v16725_v40 = vld [vmem:[%s14204_s25 + $0x90] sm:$0x8]  ;;  %v9471_v9 = vrot.slane %v11667_v3, 7  ;;  %v9198_v5 = vsel %vm14373_vm8, %v11632_v60, %v9197_v15  ;;  %v17997_v37 = vld [vmem:[#allocation13_spill] sm:$0xff] }
 0x1fd   : > { %17989 = vst [vmem:[#allocation20_spill] sm:$0xff] %v16719_v58  ;;  %12653 = vmatprep.subr.bf16.mxu0 %v13939_v0  ;;  %17990 = vst [vmem:[#allocation21_spill] sm:$0xff] %v16725_v40  ;;  %v16752_v43 = vld [vmem:[%s14204_s25 + $0xfc] sm:$0x7]  ;;  %v16755_v12 = vld [vmem:[%s14204_s25 + $0x118] sm:$0xf]  ;;  %v9469_v60 = vsel %vm15860_vm11, %v11689_v29, %v9468_v35  ;;  %v4211_v35 = vsel %vm14373_vm8, %v16281_v32, %v16685_v26 }
 0x1fe   : > { %13230 = vmatpush3.bf16.msra.mxu1 %v13958_v24  ;;  %17991 = vst [vmem:[#allocation22_spill] sm:$0xff] %v16730_v42  ;;  %v4346_v24 = vshrl.u32 %v16697_v57, 16  ;;  %v9207_v3 = vsel %vm14373_vm8, %v9199_v62, %v9206_v1  ;;  %v16768_v6 = vld [vmem:[%s14204_s25 + $0x104] sm:$0x8]  ;;  %v9472_v15 = vsel %vm15860_vm11, %v9470_v27, %v9471_v9  ;;  %v9475_v62 = vrot.slane %v16728_v34, 7  ;;  %v17994_v29 = vld [vmem:[#allocation17_spill] sm:$0xff] }
 0x1ff   : > { %13231 = vmatprep.subr.bf16.mxu1 %v13960_v4  ;;  %v9482_v1 = vrot.slane %v16733_v16, 7  ;;  %v16783_v56 = vld [vmem:[%s14204_s25 + $0x114] sm:$0x8]  ;;  %v17995_v16 = vld [vmem:[#allocation14_spill] sm:$0xff]  ;;  %v11691_v28 = vrot.slane %v16768_v6, 11 }
 0x200   : > { %12654 = vmatpush3.bf16.msra.mxu0 %v13939_v0  ;;  %v13964_v0 = vld [vmem:[%s17906_s2 + $0x6b0] sm:$0xff]   ;;  %v17996_v27 = vshll.u32 %v17995_v16, 16  ;;  %v16807_v32 = vrot.slane %v4346_v24, 7  ;;  %v11640_v16 = vcombine.low %v9198_v5, %v9207_v3  ;;  %v9478_v24 = vrot.slane %v16752_v43, 7  ;;  %v17998_v43 = vld [vmem:[#allocation18_spill] sm:$0xff] }
 0x201   : > { %12655 = vmatprep.subr.bf16.mxu0 %v16704_v14  ;;  %13216 = vmatmul.mubr.bf16.gmra.mrb[24].mxu1 %v11638_v41  ;;  %v16774_v41 = vld [vmem:[%s14204_s25 + $0x128] sm:$0xf]  ;;  %v9477_v44 = vrot.slane %v9475_v62, 4  ;;  %v9484_v5 = vrot.slane %v9482_v1, 4  ;;  %v9485_v3 = vrot.slane %v16771_v59, 7  ;;  %v18001_v59 = vrot.slane %v16755_v12, 7 }
 0x202   : > { %13232 = vmatpush3.bf16.msra.mxu1 %v13960_v4  ;;  %13219 = vmatprep.mubr.bf16.mxu1 %v11639_v51  ;;  %v13949_v4 = vld [vmem:[%s17906_s2 + $0x2b0] sm:$0xff]   ;;  %v17993_v51 = vrot.slane %v16255_v50, 4  ;;  %v16800_v9 = vor.u32 %v17996_v27, %v17994_v29  ;;  %v11697_v27 = vcombine.low %v9469_v60, %v9472_v15  ;;  %v16822_v50 = vld [vmem:[%s14204_s25 + $0x12c] sm:$0x7]  ;;  %v16841_v6 = vld [vmem:[%s14204_s25 + $0x13c] sm:$0x7] }
 0x203   : > { %12640 = vmatmul.mubr.bf16.gmra.mrb[40].mxu0 %v15964_v21  ;;  %13233 = vmatprep.subr.bf16.mxu1 %v13962_v30  ;;  %v16803_v21 = vld [vmem:[%s14204_s25 + $0x11c] sm:$0x7]  ;;  %v17999_v15 = vld [vmem:[#allocation15_spill] sm:$0xff]  ;;  %v9491_v13 = vrot.slane %v18001_v59, 4  ;;  %v9479_v59 = vsel %vm15860_vm11, %v9477_v44, %v9478_v24  ;;  %v11683_v24 = vld [vmem:[%s14204_s25 + $0x144] sm:$0x8] }
 0x204   : > { %v4220_v34 = vsel %vm14373_vm8, %v17993_v51, %v4219_v17  ;;  %12643 = vmatprep.mubr.bf16.mxu0 %v17997_v37  ;;  %12656 = vmatpush3.bf16.msra.mxu0 %v16704_v14  ;;  %v16812_v17 = vld [vmem:[%s14204_s25 + $0x124] sm:$0x8]  ;;  %v13966_v37 = vld [vmem:[%s17906_s2 + $0x6b8] sm:$0xff]   ;;  %v11690_v14 = vrot.slane %v16749_v61, 11  ;;  %v18000_v51 = vshll.u32 %v17999_v15, 16  ;;  %v9492_v40 = vrot.slane %v16803_v21, 7 }
 0x205   : > { %12657 = vmatprep.subr.bf16.mxu0 %v16738_v48  ;;  %v13951_v61 = vld [vmem:[%s17906_s2 + $0x2b8] sm:$0xff]   ;;  %v10849_v60 = vcombine.low %v4211_v35, %v4220_v34  ;;  %v16844_v42 = vld [vmem:[%s14204_s25 + $0x148] sm:$0xf]  ;;  %v11693_v35 = vrot.slane %v16812_v17, 11  ;;  %v18002_v34 = vrot.slane %v16774_v41, 7  ;;  %v9503_v17 = vrot.slane %v16830_v45, 7 }
 0x206   : > { %13234 = vmatpush3.bf16.msra.mxu1 %v13962_v30  ;;  %v4241_v26 = vor.u32 %v18000_v51, %v17998_v43  ;;  %v11692_v30 = vrot.slane %v16783_v56, 11  ;;  %v9499_v51 = vrot.slane %v16822_v50, 7  ;;  %v18003_v56 = vshll.u32 %v16382_v33, 16  ;;  %v18005_v33 = vld [vmem:[#allocation12_spill] sm:$0xff] }
 0x207   : > { %13235 = vmatprep.subr.bf16.mxu1 %v13964_v0  ;;  %v9498_v15 = vrot.slane %v18002_v34, 4  ;;  %v18004_v43 = vshll.u32 %v16429_v23, 16  ;;  %v9476_v50 = vsel %vm15860_vm11, %v11690_v14, %v9475_v62  ;;  %v13953_v23 = vld [vmem:[%s17906_s2 + $0x240] sm:$0xff]   ;;  %v18006_v62 = vld [vmem:[#allocation16_spill] sm:$0xff]  ;;  %v9506_v14 = vrot.slane %v16841_v6, 7 }
 0x208   : > { %12658 = vmatpush3.bf16.msra.mxu0 %v16738_v48  ;;  %v4254_v21 = vor.u32 %v18003_v56, %v16453_v36  ;;  %v11694_v48 = vrot.slane %v16825_v55, 11  ;;  %v4233_v44 = vsel %vm14373_vm8, %v18006_v62, %v16800_v9  ;;  %v11685_v6 = vld [vmem:[%s14204_s25 + $0x14c] sm:$0x7]  ;;  %v18010_v34 = vshll.u32 %v16456_v18, 16  ;;  %v13959_v62 = vld [vmem:[%s17906_s2 + $0x258] sm:$0xff]  }
 0x209   : > { %12659 = vmatprep.subr.bf16.mxu0 %v13949_v4  ;;  %v4263_v58 = vor.u32 %v18004_v43, %v16511_v54  ;;  %13220 = vmatmul.mubr.bf16.gmra.mrb[28].mxu1 %v11640_v16  ;;  %v9483_v54 = vsel %vm15860_vm11, %v11691_v28, %v9482_v1  ;;  %v18007_v16 = vrot.slane %v17994_v29, 4  ;;  %v9510_v28 = vrot.slane %v16844_v42, 7  ;;  %v18008_v1 = vld [vmem:[#allocation19_spill] sm:$0xff] }
 0x20a   : > { %13236 = vmatpush3.bf16.msra.mxu1 %v13964_v0  ;;  %13239 = vmatprep.mubr.bf16.mxu1 %v11697_v27  ;;  %v9486_v0 = vsel %vm15860_vm11, %v9484_v5, %v9485_v3  ;;  %v18009_v5 = vrot.slane %v16453_v36, 4  ;;  %v11698_v3 = vcombine.low %v9476_v50, %v9479_v59  ;;  %v4276_v56 = vor.u32 %v18010_v34, %v16515_v2  ;;  %v18027_v34 = vld [vmem:[#allocation22_spill] sm:$0xff] }
 0x20b   : > { %12644 = vmatmul.mubr.bf16.gmra.mrb[44].mxu0 %v18005_v33  ;;  %13237 = vmatprep.subr.bf16.mxu1 %v13966_v37  ;;  %v4242_v27 = vsel %vm14373_vm8, %v18007_v16, %v4241_v26  ;;  %v11699_v29 = vcombine.low %v9483_v54, %v9486_v0  ;;  %v13955_v26 = vld [vmem:[%s17906_s2 + $0x248] sm:$0xff]   ;;  %v18011_v36 = vshll.u32 %v16465_v47, 16  ;;  %v18013_v43 = vshll.u32 %v16597_v25, 16  ;;  %v13957_v25 = vld [vmem:[%s17906_s2 + $0x250] sm:$0xff]  }
 0x20c   : > { %12660 = vmatpush3.bf16.msra.mxu0 %v13949_v4  ;;  %12663 = vmatprep.mubr.bf16.mxu0 %v10849_v60  ;;  %v4255_v4 = vsel %vm14373_vm8, %v18008_v1, %v4254_v21  ;;  %v4264_v9 = vsel %vm14373_vm8, %v18009_v5, %v4263_v58  ;;  %v10850_v60 = vcombine.low %v4233_v44, %v4242_v27  ;;  %v18012_v58 = vshll.u32 %v16545_v19, 16 }
 0x20d   : > { %12661 = vmatprep.subr.bf16.mxu0 %v13951_v61  ;;  %v10851_v42 = vcombine.low %v4255_v4, %v4264_v9  ;;  %v4285_v21 = vor.u32 %v18011_v36, %v16521_v8  ;;  %v4307_v50 = vor.u32 %v18013_v43, %v16673_v7  ;;  %v11695_v18 = vrot.slane %v11683_v24, 11 }
 0x20e   : > { %13238 = vmatpush3.bf16.msra.mxu1 %v13966_v37  ;;  %v4298_v37 = vor.u32 %v18012_v58, %v16634_v20  ;;  %v18014_v59 = vrot.slane %v16755_v12, 7  ;;  %v9493_v8 = vsel %vm15860_vm11, %v9491_v13, %v9492_v40  ;;  %v18015_v7 = vrot.slane %v16774_v41, 7  ;;  %v16932_v41 = vld [vmem:[%s14204_s25 + $0x158] sm:$0xf]  ;;  %v14048_v58 = vld [vmem:[%s14204_s25 + $0x24] sm:$0xf] }
 0x20f   : > { %v9500_v54 = vsel %vm15860_vm11, %v9498_v15, %v9499_v51  ;;  %v4277_v12 = vsel %vm14373_vm8, %v16513_v39, %v4276_v56  ;;  %v18016_v40 = vrot.slane %v16515_v2, 4  ;;  %v9513_v0 = vrot.slane %v11685_v6, 7 }
 0x210   : > { %12662 = vmatpush3.bf16.msra.mxu0 %v13951_v61  ;;  %v9505_v61 = vrot.slane %v9503_v17, 4  ;;  %v9490_v47 = vsel %vm15860_vm11, %v11692_v30, %v18014_v59  ;;  %v9497_v33 = vsel %vm15860_vm11, %v11693_v35, %v18015_v7  ;;  %v9512_v30 = vrot.slane %v9510_v28, 4 }
 0x211   : > { %12679 = vmatprep.subr.bf16.mxu0 %v13953_v23  ;;  %13240 = vmatmul.mubr.bf16.vlgmr.msra.gmra.mrb[16].mxu1 %v11698_v3  ;;  %v4286_v13 = vsel %vm14373_vm8, %v18016_v40, %v4285_v21  ;;  %v4299_v35 = vsel %vm14373_vm8, %v16646_v22, %v4298_v37  ;;  %v18017_v15 = vrot.slane %v16634_v20, 4  ;;  %v11700_v39 = vcombine.low %v9490_v47, %v9493_v8  ;;  %v10777_v21 = vld [vmem:[%s14204_s25 + $0x20] sm:$0xe] }
 0x212   : > { %13243 = vmatprep.mubr.bf16.mxu1 %v11699_v29  ;;  %v10852_v2 = vcombine.low %v4277_v12, %v4286_v13  ;;  %v18018_v44 = vshll.u32 %v16601_v52, 16  ;;  %v18019_v27 = vshll.u32 %v16650_v31, 16  ;;  %v18020_v24 = vshll.u32 %v16662_v11, 16 }
 0x213   : > { %12664 = vmatmul.mubr.bf16.vlgmr.msra.gmra.mrb[48].mxu0 %v10850_v60  ;;  %v4308_v51 = vsel %vm14373_vm8, %v18017_v15, %v4307_v50  ;;  %v4344_v4 = vrot.slane %v16740_v63, 4  ;;  %v18021_v5 = vshll.u32 %v16697_v57, 16  ;;  %v9517_v3 = vrot.slane %v16932_v41, 7  ;;  %v18025_v60 = vld [vmem:[#allocation23_spill] sm:$0xff] }
 0x214   : > { %12680 = vmatpush3.bf16.msra.mxu0 %v13953_v23  ;;  %12667 = vmatprep.mubr.bf16.mxu0 %v10851_v42  ;;  %v11701_v23 = vcombine.low %v9497_v33, %v9500_v54  ;;  %v4320_v16 = vor.u32 %v18018_v44, %v16675_v49  ;;  %v4329_v22 = vor.u32 %v18019_v27, %v16715_v38  ;;  %v4371_v42 = vshll.u32 %v18025_v60, 16  ;;  %v10779_v50 = vld [vmem:[%s14204_s25 + $0x28] sm:$0x1]  ;;  %v13965_v44 = vld [vmem:[%s17906_s2 + $0x270] sm:$0xff]  }
 0x215   : > { %12681 = vmatprep.subr.bf16.mxu0 %v13955_v26  ;;  %v10853_v20 = vcombine.low %v4299_v35, %v4308_v51  ;;  %v4342_v1 = vor.u32 %v18020_v24, %v16740_v63  ;;  %v4351_v9 = vor.u32 %v18021_v5, %v16807_v32  ;;  %v9504_v31 = vsel %vm15860_vm11, %v11694_v48, %v9503_v17  ;;  %v11686_v48 = vld [vmem:[%s14204_s25 + $0x154] sm:$0x8]  ;;  %v11688_v17 = vld [vmem:[%s14204_s25 + $0x15c] sm:$0x7]  ;;  %v14050_v24 = vld [vmem:[%s14204_s25 + $0x44] sm:$0xf] }
 0x216   : > { %v9507_v38 = vsel %vm15860_vm11, %v9505_v61, %v9506_v14  ;;  %v4321_v57 = vsel %vm14373_vm8, %v16709_v46, %v4320_v16  ;;  %v18022_v63 = vrot.slane %v16675_v49, 4  ;;  %v9511_v45 = vsel %vm15860_vm11, %v11695_v18, %v9510_v28  ;;  %v18023_v14 = vld [vmem:[#allocation20_spill] sm:$0xff]  ;;  %v13961_v28 = vld [vmem:[%s17906_s2 + $0x260] sm:$0xff]  }
 0x217   : > { %v9514_v55 = vsel %vm15860_vm11, %v9512_v30, %v9513_v0  ;;  %v18024_v46 = vshrl.u32 %v18023_v14, 16  ;;  %v4362_v49 = vshll.u32 %v18023_v14, 16  ;;  %v4343_v56 = vsel %vm14373_vm8, %v18027_v34, %v4342_v1  ;;  %v13963_v30 = vld [vmem:[%s17906_s2 + $0x268] sm:$0xff]   ;;  %v10783_v5 = vld [vmem:[%s14204_s25 + $0x40] sm:$0xe] }
 0x218   : > { %12682 = vmatpush3.bf16.msra.mxu0 %v13955_v26  ;;  %v4330_v32 = vsel %vm14373_vm8, %v18022_v63, %v4329_v22  ;;  %v18026_v26 = vshrl.u32 %v18025_v60, 16  ;;  %v4352_v36 = vsel %vm14373_vm8, %v4344_v4, %v4351_v9  ;;  %v4112_v37 = vrot.slane %v14048_v58, 5  ;;  %v10780_v22 = vld [vmem:[%s14204_s25 + $0x30] sm:$0xe]  ;;  %v10785_v9 = vld [vmem:[%s14204_s25 + $0x48] sm:$0x1] }
 0x219   : > { %12683 = vmatprep.subr.bf16.mxu0 %v13957_v25  ;;  %13244 = vmatmul.mubr.bf16.gmra.mrb[20].mxu1 %v11700_v39  ;;  %v4361_v29 = vrot.slane %v18024_v46, 7  ;;  %v11702_v43 = vcombine.low %v9504_v31, %v9507_v38  ;;  %v11703_v61 = vcombine.low %v9511_v45, %v9514_v55  ;;  %v11696_v18 = vrot.slane %v11686_v48, 11  ;;  %v13968_v60 = vld [vmem:[%s17906_s2 + $0x2c0] sm:$0xff]  }
 0x21a   : > { %13247 = vmatprep.mubr.bf16.mxu1 %v11701_v23  ;;  %v4370_v6 = vrot.slane %v18026_v26, 7  ;;  %v9519_v59 = vrot.slane %v9517_v3, 4  ;;  %v9520_v47 = vrot.slane %v11688_v17, 7  ;;  %v10854_v8 = vcombine.low %v4321_v57, %v4330_v32  ;;  %v13967_v32 = vld [vmem:[%s17906_s2 + $0x278] sm:$0xff]  }
 0x21b   : > { %12668 = vmatmul.mubr.bf16.gmra.mrb[52].mxu0 %v10852_v2  ;;  %v10855_v54 = vcombine.low %v4343_v56, %v4352_v36  ;;  %v4364_v12 = vor.u32 %v4362_v49, %v4361_v29  ;;  %v4366_v40 = vrot.slane %v4361_v29, 4  ;;  %v10801_v0 = vrot.slane %v10777_v21, 9  ;;  %v14049_v2 = vld [vmem:[%s14204_s25 + $0x34] sm:$0xf]  ;;  %v10789_v56 = vld [vmem:[%s14204_s25 + $0x60] sm:$0xe] }
 0x21c   : > { %12684 = vmatpush3.bf16.msra.mxu0 %v13957_v25  ;;  %12671 = vmatprep.mubr.bf16.mxu0 %v10853_v20  ;;  %v18028_v25 = vld [vmem:[#allocation21_spill] sm:$0xff]  ;;  %v4373_v13 = vor.u32 %v4371_v42, %v4370_v6  ;;  %v4114_v41 = vrot.slane %v4112_v37, 4  ;;  %v4115_v35 = vrot.slane %v10779_v50, 5  ;;  %v9518_v15 = vsel %vm15860_vm11, %v11696_v18, %v9517_v3  ;;  %v14051_v29 = vld [vmem:[%s14204_s25 + $0x54] sm:$0xf] }
 0x21d   : > { %12685 = vmatprep.subr.bf16.mxu0 %v13959_v62  ;;  %v18029_v7 = vshrl.u32 %v18028_v25, 16  ;;  %v9521_v51 = vsel %vm15860_vm11, %v9519_v59, %v9520_v47  ;;  %v4113_v16 = vsel %vm14209_vm2, %v10801_v0, %v4112_v37  ;;  %v10782_v20 = vld [vmem:[%s14204_s25 + $0x38] sm:$0x1]  ;;  %v4126_v1 = vrot.slane %v14050_v24, 5  ;;  %v10786_v42 = vld [vmem:[%s14204_s25 + $0x50] sm:$0xe] }
 0x21e   : > { %v4374_v23 = vsel %vm14373_vm8, %v4366_v40, %v4373_v13  ;;  %v4116_v27 = vsel %vm14209_vm2, %v4114_v41, %v4115_v35  ;;  %v11704_v4 = vcombine.low %v9518_v15, %v9521_v51  ;;  %v10802_v38 = vrot.slane %v10780_v22, 9  ;;  %v10791_v36 = vld [vmem:[%s14204_s25 + $0x68] sm:$0x1]  ;;  %v10794_v40 = vld [vmem:[%s14204_s25 + $0x78] sm:$0x1]  ;;  %v13972_v22 = vld [vmem:[%s17906_s2 + $0x2e0] sm:$0xff]  }
 0x21f   : > { %v10848_v33 = vrot.slane %v18029_v7, 11  ;;  %v10865_v31 = vcombine.low %v4113_v16, %v4116_v27  ;;  %v4122_v63 = vrot.slane %v10782_v20, 5  ;;  %v10803_v45 = vrot.slane %v10783_v5, 9  ;;  %v13970_v7 = vld [vmem:[%s17906_s2 + $0x2d0] sm:$0xff]   ;;  %v10797_v0 = vld [vmem:[%s14204_s25 + $0x88] sm:$0x1] }
 0x220   : > { %12686 = vmatpush3.bf16.msra.mxu0 %v13959_v62  ;;  %v4119_v62 = vrot.slane %v14049_v2, 5  ;;  %v4128_v55 = vrot.slane %v4126_v1, 4  ;;  %v4129_v48 = vrot.slane %v10785_v9, 5  ;;  %v4133_v49 = vrot.slane %v14051_v29, 5  ;;  %v10897_v9 = vld [vmem:[%s14204_s25 + $0x24] sm:$0xc] }
 0x221   : > { %12687 = vmatprep.subr.bf16.mxu0 %v13961_v28  ;;  %13248 = vmatmul.mubr.bf16.gmra.mrb[24].mxu1 %v11702_v43  ;;  %v4365_v39 = vsel %vm14373_vm8, %v10848_v33, %v4364_v12  ;;  %v4127_v26 = vsel %vm14209_vm2, %v10803_v45, %v4126_v1  ;;  %v4140_v34 = vrot.slane %v16545_v19, 5  ;;  %v10804_v37 = vrot.slane %v10786_v42, 9  ;;  %v10792_v12 = vld [vmem:[%s14204_s25 + $0x70] sm:$0xe] }
 0x222   : > { %13251 = vmatprep.mubr.bf16.mxu1 %v11703_v61  ;;  %v10856_v3 = vcombine.low %v4365_v39, %v4374_v23  ;;  %v4121_v57 = vrot.slane %v4119_v62, 4  ;;  %v4120_v17 = vsel %vm14209_vm2, %v10802_v38, %v4119_v62  ;;  %v4130_v6 = vsel %vm14209_vm2, %v4128_v55, %v4129_v48  ;;  %v13969_v61 = vld [vmem:[%s17906_s2 + $0x2c8] sm:$0xff]   ;;  %v13971_v39 = vld [vmem:[%s17906_s2 + $0x2d8] sm:$0xff]   ;;  %v10798_v1 = vld [vmem:[%s14204_s25 + $0x90] sm:$0xe] }
 0x223   : > { %12672 = vmatmul.mubr.bf16.gmra.mrb[56].mxu0 %v10854_v8  ;;  %v10867_v58 = vcombine.low %v4127_v26, %v4130_v6  ;;  %v4135_v43 = vrot.slane %v4133_v49, 4  ;;  %v10805_v18 = vrot.slane %v10789_v56, 9  ;;  %v4142_v59 = vrot.slane %v4140_v34, 4  ;;  %v13974_v26 = vld [vmem:[%s17906_s2 + $0x2f0] sm:$0xff]   ;;  %v10902_v56 = vld [vmem:[%s14204_s25 + $0x3c] sm:$0x3] }
 0x224   : > { %12688 = vmatpush3.bf16.msra.mxu0 %v13961_v28  ;;  %12675 = vmatprep.mubr.bf16.mxu0 %v10855_v54  ;;  %v4123_v46 = vsel %vm14209_vm2, %v4121_v57, %v4122_v63  ;;  %v10788_v28 = vld [vmem:[%s14204_s25 + $0x58] sm:$0x1]  ;;  %v4143_v19 = vrot.slane %v10791_v36, 5  ;;  %v4134_v47 = vsel %vm14209_vm2, %v10804_v37, %v4133_v49  ;;  %v4147_v25 = vrot.slane %v16601_v52, 5 }
 0x225   : > { %12689 = vmatprep.subr.bf16.mxu0 %v13963_v30  ;;  %v10866_v21 = vcombine.low %v4120_v17, %v4123_v46  ;;  %v4136_v50 = vrot.slane %v10788_v28, 5  ;;  %v4141_v33 = vsel %vm14209_vm2, %v10805_v18, %v4140_v34  ;;  %v4154_v13 = vrot.slane %v16662_v11, 5  ;;  %v10898_v11 = vld [vmem:[%s14204_s25 + $0x28] sm:$0xf]  ;;  %v10901_v17 = vld [vmem:[%s14204_s25 + $0x38] sm:$0xf] }
 0x226   : > { %v4144_v54 = vsel %vm14209_vm2, %v4142_v59, %v4143_v19  ;;  %v10806_v35 = vrot.slane %v10792_v12, 9  ;;  %v4149_v15 = vrot.slane %v4147_v25, 4  ;;  %v4150_v51 = vrot.slane %v10794_v40, 5  ;;  %v10904_v46 = vld [vmem:[%s14204_s25 + $0x48] sm:$0xf]  ;;  %v13975_v59 = vld [vmem:[%s17906_s2 + $0x2f8] sm:$0xff]  }
 0x227   : > { %v4137_v8 = vsel %vm14209_vm2, %v4135_v43, %v4136_v50  ;;  %v10869_v52 = vcombine.low %v4141_v33, %v4144_v54  ;;  %v4156_v2 = vrot.slane %v4154_v13, 4  ;;  %v4157_v62 = vrot.slane %v10797_v0, 5  ;;  %v10900_v34 = vld [vmem:[%s14204_s25 + $0x34] sm:$0xc]  ;;  %v13976_v40 = vld [vmem:[%s17906_s2 + $0x300] sm:$0xff]   ;;  %v14031_v6 = vld [vmem:[%s17907_s3 + $0xb8] sm:$0xff]  }
 0x228   : > { %12690 = vmatpush3.bf16.msra.mxu0 %v13963_v30  ;;  %v10795_v30 = vld [vmem:[%s14204_s25 + $0x80] sm:$0xe]  ;;  %v10868_v41 = vcombine.low %v4134_v47, %v4137_v8  ;;  %v4151_v16 = vsel %vm14209_vm2, %v4149_v15, %v4150_v51  ;;  %v4161_v27 = vrot.slane %v18023_v14, 5  ;;  %v4796_v5 = vrot.slane %v10898_v11, 6  ;;  %v10906_v0 = vld [vmem:[%s14204_s25 + $0x54] sm:$0xc] }
 0x229   : > { %12691 = vmatprep.subr.bf16.mxu0 %v13965_v44  ;;  %13252 = vmatmul.mubr.bf16.gmra.mrb[28].mxu1 %v11704_v4  ;;  %v10807_v23 = vrot.slane %v10795_v30, 9  ;;  %v4158_v24 = vsel %vm14209_vm2, %v4156_v2, %v4157_v62  ;;  %v10800_v4 = vld [vmem:[%s14204_s25 + $0x98] sm:$0x1]  ;;  %v10808_v38 = vrot.slane %v10798_v1, 9  ;;  %v10921_v45 = vrot.slane %v10897_v9, 10  ;;  %v13977_v11 = vld [vmem:[%s17906_s2 + $0x308] sm:$0xff]  }
 0x22a   : > { %v4163_v57 = vrot.slane %v4161_v27, 4  ;;  %v4164_v63 = vrot.slane %v10800_v4, 5  ;;  %v4798_v55 = vrot.slane %v4796_v5, 4  ;;  %v4810_v36 = vrot.slane %v10904_v46, 6  ;;  %v10911_v15 = vld [vmem:[%s14204_s25 + $0x6c] sm:$0x3] }
 0x22b   : > { %12676 = vmatmul.mubr.bf16.gmra.mrb[60].mxu0 %v10856_v3  ;;  %v4155_v20 = vsel %vm14209_vm2, %v10807_v23, %v4154_v13  ;;  %v10899_v3 = vld [vmem:[%s14204_s25 + $0x2c] sm:$0x3]  ;;  %v4162_v29 = vsel %vm14209_vm2, %v10808_v38, %v4161_v27  ;;  %v4797_v42 = vsel %vm14337_vm5, %v10921_v45, %v4796_v5  ;;  %v10922_v50 = vrot.slane %v10900_v34, 10  ;;  %v13978_v5 = vld [vmem:[%s17906_s2 + $0x310] sm:$0xff]   ;;  %v13979_v46 = vld [vmem:[%s17906_s2 + $0x318] sm:$0xff]  }
 0x22c   : > { %12692 = vmatpush3.bf16.msra.mxu0 %v13965_v44  ;;  %12695 = vmatprep.mubr.bf16.mxu0 %v10865_v31  ;;  %v4148_v44 = vsel %vm14209_vm2, %v10806_v35, %v4147_v25  ;;  %v10871_v14 = vcombine.low %v4155_v20, %v4158_v24  ;;  %v4799_v48 = vrot.slane %v10899_v3, 6  ;;  %v4165_v49 = vsel %vm14209_vm2, %v4163_v57, %v4164_v63  ;;  %v10907_v25 = vld [vmem:[%s14204_s25 + $0x58] sm:$0xf]  ;;  %v10909_v35 = vld [vmem:[%s14204_s25 + $0x64] sm:$0xc] }
 0x22d   : > { %12693 = vmatprep.subr.bf16.mxu0 %v13967_v32  ;;  %v10870_v31 = vcombine.low %v4148_v44, %v4151_v16  ;;  %v10872_v37 = vcombine.low %v4162_v29, %v4165_v49  ;;  %v4806_v18 = vrot.slane %v10902_v56, 6  ;;  %v4812_v47 = vrot.slane %v4810_v36, 4  ;;  %v10916_v20 = vld [vmem:[%s14204_s25 + $0x88] sm:$0xf]  ;;  %v10915_v57 = vld [vmem:[%s14204_s25 + $0x84] sm:$0xc] }
 0x22e   : > { %v4800_v28 = vsel %vm14337_vm5, %v4798_v55, %v4799_v48  ;;  %v4817_v12 = vrot.slane %v10907_v25, 6  ;;  %v10924_v23 = vrot.slane %v10906_v0, 10  ;;  %v10925_v44 = vrot.slane %v10909_v35, 10  ;;  %v10917_v63 = vld [vmem:[%s14204_s25 + $0x8c] sm:$0x3]  ;;  %v13980_v56 = vld [vmem:[%s17906_s2 + $0x320] sm:$0xff]  }
 0x22f   : > { %v10929_v43 = vcombine.low %v4797_v42, %v4800_v28  ;;  %v4827_v27 = vrot.slane %v10911_v15, 6  ;;  %v4838_v38 = vrot.slane %v10916_v20, 6  ;;  %v10927_v29 = vrot.slane %v10915_v57, 10  ;;  %v10963_v15 = vld [vmem:[%s14204_s25 + $0x80] sm:$0xe]  ;;  %v13983_v20 = vld [vmem:[%s17906_s2 + $0x338] sm:$0xff]  }
 0x230   : > { %12694 = vmatpush3.bf16.msra.mxu0 %v13967_v32  ;;  %v13973_v32 = vld [vmem:[%s17906_s2 + $0x2e8] sm:$0xff]   ;;  %v4819_v2 = vrot.slane %v4817_v12, 4  ;;  %v4818_v24 = vsel %vm14337_vm5, %v10924_v23, %v4817_v12 }
 0x231   : > { %12711 = vmatprep.subr.bf16.mxu0 %v13968_v60  ;;  %v4840_v49 = vrot.slane %v4838_v38, 4 }
 0x233   : > { %12696 = vmatmul.mubr.bf16.vlgmr.msra.gmra.mrb[48].mxu0 %v10866_v21  ;;  %v10903_v21 = vld [vmem:[%s14204_s25 + $0x44] sm:$0xc] }
 0x234   : > { %12712 = vmatpush3.bf16.msra.mxu0 %v13968_v60  ;;  %12699 = vmatprep.mubr.bf16.mxu0 %v10867_v58  ;;  %v4803_v60 = vrot.slane %v10901_v17, 6  ;;  %v10905_v58 = vld [vmem:[%s14204_s25 + $0x4c] sm:$0x3]  ;;  %v10923_v19 = vrot.slane %v10903_v21, 10 }
 0x235   : > { %12713 = vmatprep.subr.bf16.mxu0 %v13969_v61  ;;  %v4813_v8 = vrot.slane %v10905_v58, 6  ;;  %v10918_v58 = vld [vmem:[%s14204_s25 + $0x94] sm:$0xc] }
 0x236   : > { %v4804_v33 = vsel %vm14337_vm5, %v10922_v50, %v4803_v60  ;;  %v4811_v13 = vsel %vm14337_vm5, %v10923_v19, %v4810_v36  ;;  %v4839_v36 = vsel %vm14337_vm5, %v10927_v29, %v4838_v38 }
 0x237   : > { %v4814_v30 = vsel %vm14337_vm5, %v4812_v47, %v4813_v8  ;;  %v10928_v47 = vrot.slane %v10918_v58, 10  ;;  %v14057_v58 = vld [vmem:[%s14204_s25 + $0xc4] sm:$0xf] }
 0x238   : > { %12714 = vmatpush3.bf16.msra.mxu0 %v13969_v61  ;;  %v4805_v61 = vrot.slane %v4803_v60, 4  ;;  %v4841_v60 = vrot.slane %v10917_v63, 6  ;;  %v10967_v63 = vld [vmem:[%s14204_s25 + $0xa0] sm:$0xe] }
 0x239   : > { %12715 = vmatprep.subr.bf16.mxu0 %v13970_v7 }
 0x23a   : > { %v4807_v54 = vsel %vm14337_vm5, %v4805_v61, %v4806_v18  ;;  %v4842_v21 = vsel %vm14337_vm5, %v4840_v49, %v4841_v60  ;;  %v10961_v61 = vld [vmem:[%s14204_s25 + $0x70] sm:$0xe]  ;;  %v10962_v18 = vld [vmem:[%s14204_s25 + $0x78] sm:$0x1]  ;;  %v10980_v49 = vrot.slane %v10967_v63, 9  ;;  %v18034_v63 = vld [vmem:[#allocation6_spill] sm:$0xff] }
 0x23b   : > { %12700 = vmatmul.mubr.bf16.gmra.mrb[52].mxu0 %v10868_v41  ;;  %v10908_v41 = vld [vmem:[%s14204_s25 + $0x5c] sm:$0x3]  ;;  %v10930_v51 = vcombine.low %v4804_v33, %v4807_v54  ;;  %v10935_v19 = vcombine.low %v4839_v36, %v4842_v21  ;;  %v10977_v33 = vrot.slane %v10961_v61, 9  ;;  %v5097_v12 = vrot.slane %v10962_v18, 5  ;;  %v10971_v18 = vld [vmem:[%s14204_s25 + $0xc0] sm:$0xe] }
 0x23c   : > { %12716 = vmatpush3.bf16.msra.mxu0 %v13970_v7  ;;  %12703 = vmatprep.mubr.bf16.mxu0 %v10869_v52  ;;  %v10910_v7 = vld [vmem:[%s14204_s25 + $0x68] sm:$0xf]  ;;  %v4820_v62 = vrot.slane %v10908_v41, 6  ;;  %v13982_v41 = vld [vmem:[%s17906_s2 + $0x330] sm:$0xff]  }
 0x23d   : > { %12717 = vmatprep.subr.bf16.mxu0 %v13971_v39  ;;  %v4824_v52 = vrot.slane %v10910_v7, 6  ;;  %v13981_v7 = vld [vmem:[%s17906_s2 + $0x328] sm:$0xff]  }
 0x23e   : > { %v4821_v1 = vsel %vm14337_vm5, %v4819_v2, %v4820_v62  ;;  %v10965_v2 = vld [vmem:[%s14204_s25 + $0x90] sm:$0xe]  ;;  %v10966_v62 = vld [vmem:[%s14204_s25 + $0x98] sm:$0x1] }
 0x23f   : > { %v4826_v16 = vrot.slane %v4824_v52, 4  ;;  %v4825_v9 = vsel %vm14337_vm5, %v10925_v44, %v4824_v52 }
 0x240   : > { %12718 = vmatpush3.bf16.msra.mxu0 %v13971_v39  ;;  %v10931_v39 = vcombine.low %v4811_v13, %v4814_v30  ;;  %v14053_v30 = vld [vmem:[%s14204_s25 + $0x84] sm:$0xf] }
 0x241   : > { %12719 = vmatprep.subr.bf16.mxu0 %v13972_v22  ;;  %v4828_v3 = vsel %vm14337_vm5, %v4826_v16, %v4827_v27  ;;  %v5101_v0 = vrot.slane %v14053_v30, 5  ;;  %v10978_v16 = vrot.slane %v10963_v15, 9  ;;  %v14059_v15 = vld [vmem:[%s14204_s25 + $0xe4] sm:$0xf] }
 0x242   : > { %v10933_v45 = vcombine.low %v4825_v9, %v4828_v3  ;;  %v14055_v3 = vld [vmem:[%s14204_s25 + $0xa4] sm:$0xf] }
 0x243   : > { %12704 = vmatmul.mubr.bf16.gmra.mrb[56].mxu0 %v10870_v31  ;;  %v10912_v31 = vld [vmem:[%s14204_s25 + $0x74] sm:$0xc]  ;;  %v5103_v27 = vrot.slane %v5101_v0, 4 }
 0x244   : > { %12720 = vmatpush3.bf16.msra.mxu0 %v13972_v22  ;;  %12707 = vmatprep.mubr.bf16.mxu0 %v10871_v14  ;;  %v10913_v22 = vld [vmem:[%s14204_s25 + $0x78] sm:$0xf]  ;;  %v10914_v14 = vld [vmem:[%s14204_s25 + $0x7c] sm:$0x3]  ;;  %v10926_v55 = vrot.slane %v10912_v31, 10  ;;  %v5115_v31 = vrot.slane %v14055_v3, 5 }
 0x245   : > { %12721 = vmatprep.subr.bf16.mxu0 %v13973_v32  ;;  %v4831_v4 = vrot.slane %v10913_v22, 6  ;;  %v4834_v17 = vrot.slane %v10914_v14, 6  ;;  %v13984_v14 = vld [vmem:[%s17906_s2 + $0x340] sm:$0xff]   ;;  %v13991_v3 = vld [vmem:[%s17906_s2 + $0x378] sm:$0xff]  }
 0x246   : > { %v5117_v60 = vrot.slane %v5115_v31, 4  ;;  %v5116_v36 = vsel %vm14209_vm2, %v10980_v49, %v5115_v31  ;;  %v18032_v31 = vld [vmem:[#allocation4_spill] sm:$0xff] }
 0x247   : > { %v4833_v48 = vrot.slane %v4831_v4, 4  ;;  %v4832_v42 = vsel %vm14337_vm5, %v10926_v55, %v4831_v4  ;;  %v5111_v4 = vrot.slane %v10966_v62, 5  ;;  %v10975_v62 = vld [vmem:[%s14204_s25 + $0xe0] sm:$0xe]  ;;  %v11041_v49 = vld [vmem:[%s14204_s25 + $0x74] sm:$0xc] }
 0x248   : > { %12722 = vmatpush3.bf16.msra.mxu0 %v13973_v32  ;;  %v10932_v32 = vcombine.low %v4818_v24, %v4821_v1  ;;  %v10979_v24 = vrot.slane %v10965_v2, 9 }
 0x249   : > { %12723 = vmatprep.subr.bf16.mxu0 %v13974_v26  ;;  %v4835_v28 = vsel %vm14337_vm5, %v4833_v48, %v4834_v17  ;;  %v10969_v48 = vld [vmem:[%s14204_s25 + $0xb0] sm:$0xe]  ;;  %v10970_v17 = vld [vmem:[%s14204_s25 + $0xb8] sm:$0x1] }
 0x24b   : > { %12708 = vmatmul.mubr.bf16.gmra.mrb[60].mxu0 %v10872_v37  ;;  %v10920_v37 = vld [vmem:[%s14204_s25 + $0x9c] sm:$0x3] }
 0x24c   : > { %12724 = vmatpush3.bf16.msra.mxu0 %v13974_v26  ;;  %12727 = vmatprep.mubr.bf16.mxu0 %v10929_v43  ;;  %v10919_v26 = vld [vmem:[%s14204_s25 + $0x98] sm:$0xf]  ;;  %v14052_v43 = vld [vmem:[%s14204_s25 + $0x74] sm:$0xf]  ;;  %v4848_v25 = vrot.slane %v10920_v37, 6  ;;  %v5129_v37 = vrot.slane %v14057_v58, 5 }
 0x24d   : > { %12725 = vmatprep.subr.bf16.mxu0 %v13975_v59  ;;  %v4845_v34 = vrot.slane %v10919_v26, 6  ;;  %v5094_v50 = vrot.slane %v14052_v43, 5  ;;  %v13986_v43 = vld [vmem:[%s17906_s2 + $0x350] sm:$0xff]  }
 0x24f   : > { %v4847_v8 = vrot.slane %v4845_v34, 4  ;;  %v5096_v54 = vrot.slane %v5094_v50, 4  ;;  %v5095_v52 = vsel %vm14209_vm2, %v10977_v33, %v5094_v50 }
 0x250   : > { %12726 = vmatpush3.bf16.msra.mxu0 %v13975_v59  ;;  %v10934_v59 = vcombine.low %v4832_v42, %v4835_v28  ;;  %v13985_v42 = vld [vmem:[%s17906_s2 + $0x348] sm:$0xff]   ;;  %v10981_v28 = vrot.slane %v10969_v48, 9  ;;  %v18036_v48 = vld [vmem:[#allocation8_spill] sm:$0xff] }
 0x251   : > { %12743 = vmatprep.subr.bf16.mxu0 %v13976_v40  ;;  %v4849_v13 = vsel %vm14337_vm5, %v4847_v8, %v4848_v25  ;;  %v5098_v35 = vsel %vm14209_vm2, %v5096_v54, %v5097_v12  ;;  %v10973_v8 = vld [vmem:[%s14204_s25 + $0xd0] sm:$0xe]  ;;  %v10974_v25 = vld [vmem:[%s14204_s25 + $0xd8] sm:$0x1]  ;;  %v10982_v54 = vrot.slane %v10971_v18, 9  ;;  %v5131_v12 = vrot.slane %v5129_v37, 4 }
 0x252   : > { %v10985_v44 = vcombine.low %v5095_v52, %v5098_v35  ;;  %v10983_v30 = vrot.slane %v10973_v8, 9  ;;  %v11044_v18 = vld [vmem:[%s14204_s25 + $0x8c] sm:$0x3]  ;;  %v11046_v8 = vld [vmem:[%s14204_s25 + $0x9c] sm:$0x3] }
 0x253   : > { %12728 = vmatmul.mubr.bf16.vlgmr.msra.gmra.mrb[48].mxu0 %v10930_v51  ;;  %v10964_v51 = vld [vmem:[%s14204_s25 + $0x88] sm:$0x1]  ;;  %v5130_v52 = vsel %vm14209_vm2, %v10982_v54, %v5129_v37  ;;  %v13998_v37 = vld [vmem:[%s17906_s2 + $0x3b0] sm:$0xff]   ;;  %v5580_v54 = vrot.slane %v11044_v18, 6 }
 0x254   : > { %12744 = vmatpush3.bf16.msra.mxu0 %v13976_v40  ;;  %12731 = vmatprep.mubr.bf16.mxu0 %v10931_v39  ;;  %v4846_v40 = vsel %vm14337_vm5, %v10928_v47, %v4845_v34  ;;  %v14054_v39 = vld [vmem:[%s14204_s25 + $0x94] sm:$0xf]  ;;  %v5104_v22 = vrot.slane %v10964_v51, 5  ;;  %v5143_v51 = vrot.slane %v14059_v15, 5 }
 0x255   : > { %12745 = vmatprep.subr.bf16.mxu0 %v13977_v11  ;;  %v5108_v23 = vrot.slane %v14054_v39, 5  ;;  %v13988_v39 = vld [vmem:[%s17906_s2 + $0x360] sm:$0xff]  }
 0x256   : > { %v5105_v9 = vsel %vm14209_vm2, %v5103_v27, %v5104_v22  ;;  %v10984_v27 = vrot.slane %v10975_v62, 9  ;;  %v5145_v22 = vrot.slane %v5143_v51, 4  ;;  %v11048_v62 = vld [vmem:[%s14204_s25 + $0xac] sm:$0x3] }
 0x257   : > { %v5110_v1 = vrot.slane %v5108_v23, 4  ;;  %v5109_v38 = vsel %vm14209_vm2, %v10979_v24, %v5108_v23  ;;  %v13989_v24 = vld [vmem:[%s17906_s2 + $0x368] sm:$0xff]  }
 0x258   : > { %12746 = vmatpush3.bf16.msra.mxu0 %v13977_v11  ;;  %v10936_v11 = vcombine.low %v4846_v40, %v4849_v13  ;;  %v13987_v13 = vld [vmem:[%s17906_s2 + $0x358] sm:$0xff]  }
 0x259   : > { %12747 = vmatprep.subr.bf16.mxu0 %v13978_v5  ;;  %v5112_v57 = vsel %vm14209_vm2, %v5110_v1, %v5111_v4  ;;  %v5144_v1 = vsel %vm14209_vm2, %v10984_v27, %v5143_v51  ;;  %v14000_v51 = vld [vmem:[%s17906_s2 + $0x3c0] sm:$0xff]   ;;  %v11050_v27 = vld [vmem:[%s14204_s25 + $0xbc] sm:$0x3] }
 0x25a   : > { %v10987_v29 = vcombine.low %v5109_v38, %v5112_v57  ;;  %v13993_v38 = vld [vmem:[%s17906_s2 + $0x388] sm:$0xff]   ;;  %v18033_v57 = vld [vmem:[#allocation5_spill] sm:$0xff] }
 0x25b   : > { %12732 = vmatmul.mubr.bf16.gmra.mrb[52].mxu0 %v10932_v32  ;;  %v10968_v32 = vld [vmem:[%s14204_s25 + $0xa8] sm:$0x1] }
 0x25c   : > { %12748 = vmatpush3.bf16.msra.mxu0 %v13978_v5  ;;  %12735 = vmatprep.mubr.bf16.mxu0 %v10933_v45  ;;  %v5102_v5 = vsel %vm14209_vm2, %v10978_v16, %v5101_v0  ;;  %v14056_v45 = vld [vmem:[%s14204_s25 + $0xb4] sm:$0xf]  ;;  %v5118_v26 = vrot.slane %v10968_v32, 5 }
 0x25d   : > { %12749 = vmatprep.subr.bf16.mxu0 %v13979_v46  ;;  %v5122_v55 = vrot.slane %v14056_v45, 5  ;;  %v13994_v32 = vld [vmem:[%s17906_s2 + $0x390] sm:$0xff]   ;;  %v13995_v45 = vld [vmem:[%s17906_s2 + $0x398] sm:$0xff]  }
 0x25e   : > { %v5119_v21 = vsel %vm14209_vm2, %v5117_v60, %v5118_v26  ;;  %v11042_v60 = vld [vmem:[%s14204_s25 + $0x7c] sm:$0x3]  ;;  %v13997_v26 = vld [vmem:[%s17906_s2 + $0x3a8] sm:$0xff]  }
 0x25f   : > { %v5124_v34 = vrot.slane %v5122_v55, 4  ;;  %v5123_v50 = vsel %vm14209_vm2, %v10981_v28, %v5122_v55  ;;  %v18035_v55 = vld [vmem:[#allocation7_spill] sm:$0xff] }
 0x260   : > { %12750 = vmatpush3.bf16.msra.mxu0 %v13979_v46  ;;  %v10986_v46 = vcombine.low %v5102_v5, %v5105_v9  ;;  %v13990_v5 = vld [vmem:[%s17906_s2 + $0x370] sm:$0xff]  }
 0x261   : > { %12751 = vmatprep.subr.bf16.mxu0 %v13980_v56 }
 0x263   : > { %12736 = vmatmul.mubr.bf16.gmra.mrb[56].mxu0 %v10934_v59  ;;  %v10972_v59 = vld [vmem:[%s14204_s25 + $0xc8] sm:$0x1] }
 0x264   : > { %12752 = vmatpush3.bf16.msra.mxu0 %v13980_v56  ;;  %12739 = vmatprep.mubr.bf16.mxu0 %v10935_v19  ;;  %v5125_v56 = vrot.slane %v10970_v17, 5  ;;  %v14058_v19 = vld [vmem:[%s14204_s25 + $0xd4] sm:$0xf]  ;;  %v5132_v40 = vrot.slane %v10972_v59, 5  ;;  %v13996_v17 = vld [vmem:[%s17906_s2 + $0x3a0] sm:$0xff]  }
 0x265   : > { %12753 = vmatprep.subr.bf16.mxu0 %v13981_v7  ;;  %v5136_v47 = vrot.slane %v14058_v19, 5  ;;  %v14062_v59 = vld [vmem:[%s14204_s25 + $0x98] sm:$0xf] }
 0x266   : > { %v5126_v61 = vsel %vm14209_vm2, %v5124_v34, %v5125_v56  ;;  %v5133_v35 = vsel %vm14209_vm2, %v5131_v12, %v5132_v40  ;;  %v5573_v34 = vrot.slane %v11042_v60, 6  ;;  %v18037_v56 = vld [vmem:[#allocation9_spill] sm:$0xff]  ;;  %v5584_v19 = vrot.slane %v14062_v59, 6 }
 0x267   : > { %v10989_v33 = vcombine.low %v5123_v50, %v5126_v61  ;;  %v5138_v0 = vrot.slane %v5136_v47, 4  ;;  %v5137_v23 = vsel %vm14209_vm2, %v10983_v30, %v5136_v47  ;;  %v11043_v61 = vld [vmem:[%s14204_s25 + $0x84] sm:$0xc]  ;;  %v11045_v47 = vld [vmem:[%s14204_s25 + $0x94] sm:$0xc]  ;;  %v13999_v12 = vld [vmem:[%s17906_s2 + $0x3b8] sm:$0xff]  }
 0x268   : > { %12754 = vmatpush3.bf16.msra.mxu0 %v13981_v7  ;;  %v10988_v7 = vcombine.low %v5116_v36, %v5119_v21  ;;  %v18038_v36 = vld [vmem:[#allocation10_spill] sm:$0xff]  ;;  %v14061_v21 = vld [vmem:[%s14204_s25 + $0x88] sm:$0xf]  ;;  %v11059_v40 = vrot.slane %v11045_v47, 10  ;;  %v5587_v30 = vrot.slane %v11046_v8, 6 }
 0x269   : > { %12755 = vmatprep.subr.bf16.mxu0 %v13982_v41  ;;  %v5577_v58 = vrot.slane %v14061_v21, 6  ;;  %v11054_v60 = vld [vmem:[%s14204_s25 + $0xdc] sm:$0x3]  ;;  %v11056_v47 = vld [vmem:[%s14204_s25 + $0xec] sm:$0x3]  ;;  %v14004_v8 = vld [vmem:[%s17906_s2 + $0x3e0] sm:$0xff]  }
 0x26b   : > { %12740 = vmatmul.mubr.bf16.gmra.mrb[60].mxu0 %v10936_v11  ;;  %v10976_v11 = vld [vmem:[%s14204_s25 + $0xe8] sm:$0x1] }
 0x26c   : > { %12756 = vmatpush3.bf16.msra.mxu0 %v13982_v41  ;;  %12759 = vmatprep.mubr.bf16.mxu0 %v10985_v44  ;;  %v5139_v41 = vrot.slane %v10974_v25, 5  ;;  %v10990_v44 = vcombine.low %v5130_v52, %v5133_v35  ;;  %v14063_v35 = vld [vmem:[%s14204_s25 + $0xa8] sm:$0xf] }
 0x26d   : > { %12757 = vmatprep.subr.bf16.mxu0 %v13983_v20  ;;  %v5591_v15 = vrot.slane %v14063_v35, 6  ;;  %v14005_v35 = vld [vmem:[%s17906_s2 + $0x3e8] sm:$0xff]  }
 0x26e   : > { %v5140_v2 = vsel %vm14209_vm2, %v5138_v0, %v5139_v41  ;;  %v18039_v0 = vld [vmem:[#allocation11_spill] sm:$0xff] }
 0x26f   : > { %v10991_v16 = vcombine.low %v5137_v23, %v5140_v2  ;;  %v11047_v2 = vld [vmem:[%s14204_s25 + $0xa4] sm:$0xc] }
 0x270   : > { %12758 = vmatpush3.bf16.msra.mxu0 %v13983_v20  ;;  %v5146_v20 = vrot.slane %v10976_v11, 5  ;;  %v14064_v11 = vld [vmem:[%s14204_s25 + $0xb8] sm:$0xf] }
 0x271   : > { %12775 = vmatprep.subr.bf16.mxu0 %v13984_v14 }
 0x272   : > { %v5147_v4 = vsel %vm14209_vm2, %v5145_v22, %v5146_v20 }
 0x273   : > { %12760 = vmatmul.mubr.bf16.vlgmr.msra.gmra.mrb[48].mxu0 %v10986_v46  ;;  %v10992_v9 = vcombine.low %v5144_v1, %v5147_v4  ;;  %v14060_v46 = vld [vmem:[%s14204_s25 + $0x78] sm:$0xf]  ;;  %v5593_v1 = vrot.slane %v5591_v15, 4  ;;  %v5594_v4 = vrot.slane %v11048_v62, 6 }
 0x274   : > { %12776 = vmatpush3.bf16.msra.mxu0 %v13984_v14  ;;  %12763 = vmatprep.mubr.bf16.mxu0 %v10987_v29  ;;  %v13992_v14 = vld [vmem:[%s17906_s2 + $0x380] sm:$0xff]   ;;  %v5570_v29 = vrot.slane %v14060_v46, 6  ;;  %v14066_v46 = vld [vmem:[%s14204_s25 + $0xd8] sm:$0xf] }
 0x275   : > { %12777 = vmatprep.subr.bf16.mxu0 %v13985_v42 }
 0x276   : > { %v5572_v28 = vrot.slane %v5570_v29, 4 }
 0x278   : > { %12778 = vmatpush3.bf16.msra.mxu0 %v13985_v42  ;;  %v11057_v42 = vrot.slane %v11041_v49, 10  ;;  %v5574_v50 = vsel %vm14337_vm5, %v5572_v28, %v5573_v34  ;;  %v11053_v49 = vld [vmem:[%s14204_s25 + $0xd4] sm:$0xc] }
 0x279   : > { %12779 = vmatprep.subr.bf16.mxu0 %v13986_v43  ;;  %v11063_v21 = vrot.slane %v11053_v49, 10 }
 0x27b   : > { %12764 = vmatmul.mubr.bf16.gmra.mrb[52].mxu0 %v10988_v7  ;;  %v11058_v7 = vrot.slane %v11043_v61, 10 }
 0x27c   : > { %12780 = vmatpush3.bf16.msra.mxu0 %v13986_v43  ;;  %12767 = vmatprep.mubr.bf16.mxu0 %v10989_v33  ;;  %v5571_v43 = vsel %vm14337_vm5, %v11057_v42, %v5570_v29  ;;  %v5579_v33 = vrot.slane %v5577_v58, 4  ;;  %v5612_v29 = vrot.slane %v14066_v46, 6  ;;  %v14007_v46 = vld [vmem:[%s17906_s2 + $0x3f8] sm:$0xff]  }
 0x27d   : > { %12781 = vmatprep.subr.bf16.mxu0 %v13987_v13  ;;  %v11065_v25 = vcombine.low %v5571_v43, %v5574_v50  ;;  %v5578_v41 = vsel %vm14337_vm5, %v11058_v7, %v5577_v58  ;;  %v17338_v43 = vld [vmem:[%s14204_s25 + $0xc4] sm:$0xf]  ;;  %v14067_v50 = vld [vmem:[%s14204_s25 + $0xe8] sm:$0xf] }
 0x27e   : > { %v5581_v52 = vsel %vm14337_vm5, %v5579_v33, %v5580_v54  ;;  %v5614_v58 = vrot.slane %v5612_v29, 4  ;;  %v5619_v61 = vrot.slane %v14067_v50, 6  ;;  %v5888_v33 = vrot.slane %v17338_v43, 5  ;;  %v11099_v54 = vld [vmem:[%s14204_s25 + $0xc0] sm:$0xe] }
 0x27f   : > { %v11066_v22 = vcombine.low %v5578_v41, %v5581_v52  ;;  %v17358_v52 = vld [vmem:[%s14204_s25 + $0xd4] sm:$0xf] }
 0x280   : > { %12782 = vmatpush3.bf16.msra.mxu0 %v13987_v13  ;;  %v5586_v13 = vrot.slane %v5584_v19, 4 }
 0x281   : > { %12783 = vmatprep.subr.bf16.mxu0 %v13988_v39 }
 0x282   : > { %v5588_v23 = vsel %vm14337_vm5, %v5586_v13, %v5587_v30  ;;  %v5621_v30 = vrot.slane %v5619_v61, 4 }
 0x283   : > { %12768 = vmatmul.mubr.bf16.gmra.mrb[56].mxu0 %v10990_v44  ;;  %v5598_v44 = vrot.slane %v14064_v11, 6  ;;  %v11102_v11 = vld [vmem:[%s14204_s25 + $0xd0] sm:$0xe] }
 0x284   : > { %12784 = vmatpush3.bf16.msra.mxu0 %v13988_v39  ;;  %12771 = vmatprep.mubr.bf16.mxu0 %v10991_v16  ;;  %v5585_v39 = vsel %vm14337_vm5, %v11059_v40, %v5584_v19  ;;  %v11049_v16 = vld [vmem:[%s14204_s25 + $0xb4] sm:$0xc]  ;;  %v11055_v19 = vld [vmem:[%s14204_s25 + $0xe4] sm:$0xc] }
 0x285   : > { %12785 = vmatprep.subr.bf16.mxu0 %v13989_v24  ;;  %v11067_v20 = vcombine.low %v5585_v39, %v5588_v23  ;;  %v11064_v13 = vrot.slane %v11055_v19, 10  ;;  %v17364_v23 = vld [vmem:[%s14204_s25 + $0xe4] sm:$0xf]  ;;  %v11114_v19 = vld [vmem:[%s14204_s25 + $0x110] sm:$0xe] }
 0x288   : > { %12786 = vmatpush3.bf16.msra.mxu0 %v13989_v24  ;;  %v11060_v24 = vrot.slane %v11047_v2, 10  ;;  %v5620_v2 = vsel %vm14337_vm5, %v11064_v13, %v5619_v61 }
 0x289   : > { %12787 = vmatprep.subr.bf16.mxu0 %v13990_v5 }
 0x28b   : > { %12772 = vmatmul.mubr.bf16.gmra.mrb[60].mxu0 %v10992_v9  ;;  %v11061_v9 = vrot.slane %v11049_v16, 10  ;;  %v5895_v16 = vrot.slane %v17358_v52, 5 }
 0x28c   : > { %12788 = vmatpush3.bf16.msra.mxu0 %v13990_v5  ;;  %12791 = vmatprep.mubr.bf16.mxu0 %v18032_v31  ;;  %v14001_v5 = vld [vmem:[%s17906_s2 + $0x3c8] sm:$0xff]   ;;  %v5601_v31 = vrot.slane %v11050_v27, 6  ;;  %v11105_v27 = vld [vmem:[%s14204_s25 + $0xe0] sm:$0xe] }
 0x28d   : > { %12789 = vmatprep.subr.bf16.mxu0 %v13991_v3 }
 0x290   : > { %12790 = vmatpush3.bf16.msra.mxu0 %v13991_v3  ;;  %v5600_v3 = vrot.slane %v5598_v44, 4 }
 0x291   : > { %12807 = vmatprep.subr.bf16.mxu0 %v13992_v14 }
 0x293   : > { %12792 = vmatmul.mubr.bf16.vlgmr.msra.gmra.mrb[48].mxu0 %v18033_v57  ;;  %v14065_v57 = vld [vmem:[%s14204_s25 + $0xc8] sm:$0xf] }
 0x294   : > { %12808 = vmatpush3.bf16.msra.mxu0 %v13992_v14  ;;  %12795 = vmatprep.mubr.bf16.mxu0 %v18034_v63  ;;  %v5592_v14 = vsel %vm14337_vm5, %v11060_v24, %v5591_v15  ;;  %v5605_v63 = vrot.slane %v14065_v57, 6  ;;  %v11123_v15 = vrot.slane %v11099_v54, 9  ;;  %v14006_v24 = vld [vmem:[%s17906_s2 + $0x3f0] sm:$0xff]   ;;  %v11125_v57 = vrot.slane %v11105_v27, 9  ;;  %v17421_v54 = vld [vmem:[%s14204_s25 + $0xc8] sm:$0xf] }
 0x295   : > { %12809 = vmatprep.subr.bf16.mxu0 %v13993_v38  ;;  %v11163_v27 = vld [vmem:[%s14204_s25 + $0xc0] sm:$0x8] }
 0x296   : > { %v5607_v34 = vrot.slane %v5605_v63, 4 }
 0x298   : > { %12810 = vmatpush3.bf16.msra.mxu0 %v13993_v38  ;;  %v5595_v38 = vsel %vm14337_vm5, %v5593_v1, %v5594_v4  ;;  %v5889_v1 = vsel %vm14209_vm2, %v11123_v15, %v5888_v33 }
 0x299   : > { %12811 = vmatprep.subr.bf16.mxu0 %v13994_v32 }
 0x29b   : > { %12796 = vmatmul.mubr.bf16.gmra.mrb[52].mxu0 %v18035_v55  ;;  %v5602_v55 = vsel %vm14337_vm5, %v5600_v3, %v5601_v31  ;;  %v11124_v3 = vrot.slane %v11102_v11, 9  ;;  %v17387_v31 = vld [vmem:[%s14204_s25 + $0x104] sm:$0xf]  ;;  %v6174_v11 = vshrl.u32 %v17338_v43, 16 }
 0x29c   : > { %12812 = vmatpush3.bf16.msra.mxu0 %v13994_v32  ;;  %12799 = vmatprep.mubr.bf16.mxu0 %v18036_v48  ;;  %v14002_v32 = vld [vmem:[%s17906_s2 + $0x3d0] sm:$0xff]   ;;  %v11051_v48 = vld [vmem:[%s14204_s25 + $0xc4] sm:$0xc]  ;;  %v5916_v49 = vrot.slane %v17387_v31, 5 }
 0x29d   : > { %12813 = vmatprep.subr.bf16.mxu0 %v13995_v45  ;;  %v11062_v28 = vrot.slane %v11051_v48, 10  ;;  %v11108_v48 = vld [vmem:[%s14204_s25 + $0xf0] sm:$0xe] }
 0x29f   : > { %v5606_v18 = vsel %vm14337_vm5, %v11062_v28, %v5605_v63 }
 0x2a0   : > { %12814 = vmatpush3.bf16.msra.mxu0 %v13995_v45  ;;  %v5599_v45 = vsel %vm14337_vm5, %v11061_v9, %v5598_v44  ;;  %v11104_v44 = vld [vmem:[%s14204_s25 + $0xd8] sm:$0x1] }
 0x2a1   : > { %12815 = vmatprep.subr.bf16.mxu0 %v13996_v17  ;;  %v11069_v42 = vcombine.low %v5599_v45, %v5602_v55 }
 0x2a3   : > { %12800 = vmatmul.mubr.bf16.gmra.mrb[56].mxu0 %v18037_v56 }
 0x2a4   : > { %12816 = vmatpush3.bf16.msra.mxu0 %v13996_v17  ;;  %12803 = vmatprep.mubr.bf16.mxu0 %v18038_v36  ;;  %v11052_v17 = vld [vmem:[%s14204_s25 + $0xcc] sm:$0x3]  ;;  %v14003_v36 = vld [vmem:[%s17906_s2 + $0x3d8] sm:$0xff]  }
 0x2a5   : > { %12817 = vmatprep.subr.bf16.mxu0 %v13997_v26  ;;  %v5608_v56 = vrot.slane %v11052_v17, 6  ;;  %v11110_v17 = vld [vmem:[%s14204_s25 + $0xf8] sm:$0x1] }
 0x2a7   : > { %v5609_v59 = vsel %vm14337_vm5, %v5607_v34, %v5608_v56  ;;  %v11126_v56 = vrot.slane %v11108_v48, 9  ;;  %v6177_v48 = vshll.u32 %v17338_v43, 16  ;;  %v14011_v43 = vld [vmem:[%s17906_s2 + $0x418] sm:$0xff]  }
 0x2a8   : > { %12818 = vmatpush3.bf16.msra.mxu0 %v13997_v26  ;;  %v11068_v26 = vcombine.low %v5592_v14, %v5595_v38  ;;  %v11070_v40 = vcombine.low %v5606_v18, %v5609_v59  ;;  %v5897_v14 = vrot.slane %v5895_v16, 4  ;;  %v5898_v38 = vrot.slane %v11104_v44, 5 }
 0x2a9   : > { %12819 = vmatprep.subr.bf16.mxu0 %v13998_v37  ;;  %v5918_v18 = vrot.slane %v5916_v49, 4  ;;  %v6183_v44 = vshrl.u32 %v17421_v54, 16 }
 0x2aa   : > { %v5899_v28 = vsel %vm14209_vm2, %v5897_v14, %v5898_v38 }
 0x2ab   : > { %12804 = vmatmul.mubr.bf16.gmra.mrb[60].mxu0 %v18039_v0  ;;  %v5622_v0 = vrot.slane %v11056_v47, 6  ;;  %v11116_v47 = vld [vmem:[%s14204_s25 + $0x118] sm:$0x1] }
 0x2ac   : > { %12820 = vmatpush3.bf16.msra.mxu0 %v13998_v37  ;;  %12823 = vmatprep.mubr.bf16.mxu0 %v11065_v25  ;;  %v5615_v37 = vrot.slane %v11054_v60, 6  ;;  %v5613_v25 = vsel %vm14337_vm5, %v11063_v21, %v5612_v29  ;;  %v11111_v29 = vld [vmem:[%s14204_s25 + $0x100] sm:$0xe]  ;;  %v17398_v60 = vld [vmem:[%s14204_s25 + $0x114] sm:$0xf] }
 0x2ad   : > { %12821 = vmatprep.subr.bf16.mxu0 %v13999_v12  ;;  %v5623_v62 = vsel %vm14337_vm5, %v5621_v30, %v5622_v0  ;;  %v14008_v21 = vld [vmem:[%s17906_s2 + $0x400] sm:$0xff]   ;;  %v11127_v50 = vrot.slane %v11111_v29, 9  ;;  %v5923_v61 = vrot.slane %v17398_v60, 5  ;;  %v5926_v30 = vrot.slane %v11116_v47, 5  ;;  %v14009_v0 = vld [vmem:[%s17906_s2 + $0x408] sm:$0xff]  }
 0x2ae   : > { %v5616_v7 = vsel %vm14337_vm5, %v5614_v58, %v5615_v37  ;;  %v11072_v9 = vcombine.low %v5620_v2, %v5623_v62  ;;  %v5912_v37 = vrot.slane %v11110_v17, 5  ;;  %v11117_v2 = vld [vmem:[%s14204_s25 + $0x120] sm:$0xe]  ;;  %v11119_v62 = vld [vmem:[%s14204_s25 + $0x128] sm:$0x1]  ;;  %v6185_v17 = vrot.slane %v6183_v44, 7 }
 0x2af   : > { %v11071_v41 = vcombine.low %v5613_v25, %v5616_v7  ;;  %v5925_v13 = vrot.slane %v5923_v61, 4  ;;  %v11129_v14 = vrot.slane %v11117_v2, 9  ;;  %v11122_v29 = vld [vmem:[%s14204_s25 + $0x138] sm:$0x1] }
 0x2b0   : > { %12822 = vmatpush3.bf16.msra.mxu0 %v13999_v12  ;;  %v11101_v12 = vld [vmem:[%s14204_s25 + $0xc8] sm:$0x1] }
 0x2b1   : > { %12839 = vmatprep.subr.bf16.mxu0 %v14000_v51  ;;  %v5891_v39 = vrot.slane %v11101_v12, 5 }
 0x2b3   : > { %12824 = vmatmul.mubr.bf16.vlgmr.msra.gmra.mrb[48].mxu0 %v11066_v22  ;;  %v5902_v22 = vrot.slane %v17364_v23, 5 }
 0x2b4   : > { %12840 = vmatpush3.bf16.msra.mxu0 %v14000_v51  ;;  %12827 = vmatprep.mubr.bf16.mxu0 %v11067_v20  ;;  %v5890_v51 = vrot.slane %v5888_v33, 4  ;;  %v17376_v20 = vld [vmem:[%s14204_s25 + $0xf4] sm:$0xf] }
 0x2b5   : > { %12841 = vmatprep.subr.bf16.mxu0 %v14001_v5  ;;  %v5909_v63 = vrot.slane %v17376_v20, 5  ;;  %v5904_v45 = vrot.slane %v5902_v22, 4  ;;  %v5903_v34 = vsel %vm14209_vm2, %v11125_v57, %v5902_v22  ;;  %v6196_v22 = vshrl.u32 %v17358_v52, 16 }
 0x2b6   : > { %v5892_v4 = vsel %vm14209_vm2, %v5890_v51, %v5891_v39  ;;  %v17434_v51 = vld [vmem:[%s14204_s25 + $0x134] sm:$0xf]  ;;  %v11166_v39 = vld [vmem:[%s14204_s25 + $0xd8] sm:$0xf]  ;;  %v5933_v57 = vrot.slane %v11119_v62, 5  ;;  %v6240_v2 = vshrl.u32 %v17376_v20, 16 }
 0x2b7   : > { %v5910_v33 = vsel %vm14209_vm2, %v11126_v56, %v5909_v63 }
 0x2b8   : > { %12842 = vmatpush3.bf16.msra.mxu0 %v14001_v5  ;;  %v11107_v5 = vld [vmem:[%s14204_s25 + $0xe8] sm:$0x1] }
 0x2b9   : > { %12843 = vmatprep.subr.bf16.mxu0 %v14002_v32  ;;  %v5905_v55 = vrot.slane %v11107_v5, 5  ;;  %v17452_v5 = vsel %vm14209_vm2, %v5925_v13, %v5926_v30  ;;  %v6221_v30 = vshll.u32 %v17364_v23, 16 }
 0x2bb   : > { %12828 = vmatmul.mubr.bf16.gmra.mrb[52].mxu0 %v11068_v26  ;;  %v5896_v26 = vsel %vm14209_vm2, %v11124_v3, %v5895_v16  ;;  %v5906_v58 = vsel %vm14209_vm2, %v5904_v45, %v5905_v55  ;;  %v6205_v3 = vshrl.u32 %v11166_v39, 16  ;;  %v6169_v45 = vshrl.u32 %v11163_v27, 16 }
 0x2bc   : > { %12844 = vmatpush3.bf16.msra.mxu0 %v14002_v32  ;;  %12831 = vmatprep.mubr.bf16.mxu0 %v11069_v42  ;;  %v11131_v32 = vcombine.low %v5889_v1, %v5892_v4  ;;  %v11113_v42 = vld [vmem:[%s14204_s25 + $0x108] sm:$0x1]  ;;  %v11132_v25 = vcombine.low %v5896_v26, %v5899_v28  ;;  %v11133_v7 = vcombine.low %v5903_v34, %v5906_v58  ;;  %v6176_v55 = vrot.slane %v6174_v11, 7 }
 0x2bd   : > { %12845 = vmatprep.subr.bf16.mxu0 %v14003_v36  ;;  %v5919_v59 = vrot.slane %v11113_v42, 5  ;;  %v6198_v42 = vrot.slane %v6196_v22, 7  ;;  %v6199_v28 = vshll.u32 %v17358_v52, 16  ;;  %v6207_v56 = vrot.slane %v6205_v3, 7  ;;  %v14013_v3 = vld [vmem:[%s17906_s2 + $0x428] sm:$0xff]  }
 0x2be   : > { %v6181_v47 = vrot.slane %v6176_v55, 4 }
 0x2c0   : > { %12846 = vmatpush3.bf16.msra.mxu0 %v14003_v36  ;;  %v5911_v36 = vrot.slane %v5909_v63, 4  ;;  %v11120_v63 = vld [vmem:[%s14204_s25 + $0x130] sm:$0xe] }
 0x2c1   : > { %12847 = vmatprep.subr.bf16.mxu0 %v14004_v8  ;;  %v11130_v34 = vrot.slane %v11120_v63, 9  ;;  %v6243_v63 = vshll.u32 %v17376_v20, 16 }
 0x2c2   : > { %v5913_v12 = vsel %vm14209_vm2, %v5911_v36, %v5912_v37  ;;  %v6208_v36 = vshll.u32 %v11166_v39, 16  ;;  %v11169_v39 = vld [vmem:[%s14204_s25 + $0xf0] sm:$0x8] }
 0x2c3   : > { %12832 = vmatmul.mubr.bf16.gmra.mrb[56].mxu0 %v11070_v40  ;;  %v11128_v40 = vrot.slane %v11114_v19, 9  ;;  %v11134_v16 = vcombine.low %v5910_v33, %v5913_v12  ;;  %v6179_v19 = vor.u32 %v6177_v48, %v6176_v55  ;;  %v6201_v33 = vor.u32 %v6199_v28, %v6198_v42 }
 0x2c4   : > { %12848 = vmatpush3.bf16.msra.mxu0 %v14004_v8  ;;  %12835 = vmatprep.mubr.bf16.mxu0 %v11071_v41  ;;  %v17416_v8 = vld [vmem:[%s14204_s25 + $0x124] sm:$0xf]  ;;  %v5917_v41 = vsel %vm14209_vm2, %v11127_v50, %v5916_v49  ;;  %v6186_v49 = vshll.u32 %v17421_v54, 16  ;;  %v6203_v54 = vrot.slane %v6198_v42, 4  ;;  %v6210_v12 = vor.u32 %v6208_v36, %v6207_v56  ;;  %v14014_v56 = vld [vmem:[%s17906_s2 + $0x430] sm:$0xff]  }
 0x2c5   : > { %12849 = vmatprep.subr.bf16.mxu0 %v14005_v35  ;;  %v5930_v15 = vrot.slane %v17416_v8, 5  ;;  %v17448_v4 = vsel %vm14209_vm2, %v11128_v40, %v5923_v61  ;;  %v11167_v61 = vld [vmem:[%s14204_s25 + $0xe0] sm:$0x8] }
 0x2c6   : > { %v6213_v40 = vshrl.u32 %v11167_v61, 16  ;;  %v11136_v62 = vcombine.low %v17448_v4, %v17452_v5  ;;  %v6235_v5 = vshrl.u32 %v11169_v39, 16 }
 0x2c7   : > { %v5932_v38 = vrot.slane %v5930_v15, 4  ;;  %v5931_v58 = vsel %vm14209_vm2, %v11129_v14, %v5930_v15 }
 0x2c8   : > { %12850 = vmatpush3.bf16.msra.mxu0 %v14005_v35  ;;  %v5920_v35 = vsel %vm14209_vm2, %v5918_v18, %v5919_v59  ;;  %v5940_v18 = vrot.slane %v11122_v29, 5  ;;  %v11179_v59 = vrot.slane %v6169_v45, 11  ;;  %v11181_v4 = vrot.slane %v6213_v40, 11  ;;  %v17510_v45 = vld [vmem:[%s17908_s4 + $0x3] ss:$0 sm:$0xff] }
 0x2c9   : > { %12851 = vmatprep.subr.bf16.mxu0 %v14006_v24  ;;  %v11135_v1 = vcombine.low %v5917_v41, %v5920_v35  ;;  %v5934_v37 = vsel %vm14209_vm2, %v5932_v38, %v5933_v57  ;;  %v14012_v41 = vld [vmem:[%s17906_s2 + $0x420] sm:$0xff]   ;;  %v17503_v57 = vrot.slane %v6240_v2, 7 }
 0x2ca   : > { %v11137_v11 = vcombine.low %v5931_v58, %v5934_v37  ;;  %v17537_v58 = vld [vmem:[%s14204_s25 + $0x118] sm:$0xf] }
 0x2cb   : > { %12836 = vmatmul.mubr.bf16.gmra.mrb[60].mxu0 %v11072_v9  ;;  %v11165_v9 = vld [vmem:[%s14204_s25 + $0xd0] sm:$0x8] }
 0x2cc   : > { %12852 = vmatpush3.bf16.msra.mxu0 %v14006_v24  ;;  %12855 = vmatprep.mubr.bf16.mxu0 %v11131_v32  ;;  %v14010_v24 = vld [vmem:[%s17906_s2 + $0x410] sm:$0xff]   ;;  %v5937_v32 = vrot.slane %v17434_v51, 5  ;;  %v6191_v26 = vshrl.u32 %v11165_v9, 16  ;;  %v11172_v9 = vld [vmem:[%s14204_s25 + $0x108] sm:$0xf] }
 0x2cd   : > { %12853 = vmatprep.subr.bf16.mxu0 %v14007_v46  ;;  %v6271_v29 = vshrl.u32 %v11172_v9, 16 }
 0x2ce   : > { %v5939_v50 = vrot.slane %v5937_v32, 4 }
 0x2d0   : > { %12854 = vmatpush3.bf16.msra.mxu0 %v14007_v46  ;;  %v11168_v46 = vld [vmem:[%s14204_s25 + $0xe8] sm:$0xf]  ;;  %v17488_v44 = vsel %vm14209_vm2, %v5939_v50, %v5940_v18  ;;  %v6265_v18 = vshll.u32 %v17387_v31, 16 }
 0x2d1   : > { %12871 = vmatprep.subr.bf16.mxu0 %v14008_v21  ;;  %v6227_v52 = vshrl.u32 %v11168_v46, 16  ;;  %v6230_v15 = vshll.u32 %v11168_v46, 16  ;;  %v11171_v46 = vld [vmem:[%s14204_s25 + $0x100] sm:$0x8] }
 0x2d2   : > { %v6257_v61 = vshrl.u32 %v11171_v46, 16 }
 0x2d3   : > { %12856 = vmatmul.mubr.bf16.vlgmr.msra.gmra.mrb[48].mxu0 %v11132_v25  ;;  %v6188_v25 = vor.u32 %v6186_v49, %v6185_v17  ;;  %v6229_v35 = vrot.slane %v6227_v52, 7  ;;  %v17519_v49 = vrot.slane %v6235_v5, 11 }
 0x2d4   : > { %12872 = vmatpush3.bf16.msra.mxu0 %v14008_v21  ;;  %12859 = vmatprep.mubr.bf16.mxu0 %v11133_v7  ;;  %v6218_v21 = vshrl.u32 %v17364_v23, 16  ;;  %v11180_v7 = vrot.slane %v6191_v26, 11  ;;  %v17484_v23 = vsel %vm14209_vm2, %v11130_v34, %v5937_v32  ;;  %v6262_v32 = vshrl.u32 %v17387_v31, 16  ;;  %v17525_v34 = vld [vmem:[%s17909_s5 + $0x3] ss:$0 sm:$0xff]  ;;  %v14015_v31 = vld [vmem:[%s17906_s2 + $0x438] sm:$0xff]  }
 0x2d5   : > { %12873 = vmatprep.subr.bf16.mxu0 %v14009_v0  ;;  %v6189_v27 = vsel %vm14373_vm8, %v6181_v47, %v6188_v25  ;;  %v6232_v38 = vor.u32 %v6230_v15, %v6229_v35  ;;  %v11138_v55 = vcombine.low %v17484_v23, %v17488_v44  ;;  %v6273_v25 = vrot.slane %v6271_v29, 7 }
 0x2d6   : > { %v6220_v13 = vrot.slane %v6218_v21, 7  ;;  %v6202_v22 = vsel %vm14373_vm8, %v11180_v7, %v6201_v33  ;;  %v17533_v21 = vor.u32 %v6243_v63, %v17503_v57  ;;  %v6264_v52 = vrot.slane %v6262_v32, 7 }
 0x2d7   : > { %v6274_v7 = vshll.u32 %v11172_v9, 16  ;;  %v6293_v35 = vshrl.u32 %v17537_v58, 16  ;;  %v11183_v2 = vrot.slane %v6257_v61, 11  ;;  %v14016_v9 = vld [vmem:[%s17906_s2 + $0x440] sm:$0xff]  }
 0x2d8   : > { %12874 = vmatpush3.bf16.msra.mxu0 %v14009_v0  ;;  %v17473_v0 = vld [vmem:[%s14204_s25 + $0xf8] sm:$0xf]  ;;  %v6223_v53 = vor.u32 %v6221_v30, %v6220_v13  ;;  %v6225_v14 = vrot.slane %v6220_v13, 4  ;;  %v6284_v13 = vshrl.u32 %v17398_v60, 16 }
 0x2d9   : > { %12875 = vmatprep.subr.bf16.mxu0 %v14010_v24  ;;  %v6252_v42 = vshll.u32 %v17473_v0, 16  ;;  %v6295_v32 = vrot.slane %v6293_v35, 7 }
 0x2da   : > { %v6224_v20 = vsel %vm14373_vm8, %v11181_v4, %v6223_v53  ;;  %v6233_v36 = vsel %vm14373_vm8, %v6225_v14, %v6232_v38  ;;  %v6287_v4 = vshll.u32 %v17398_v60, 16 }
 0x2db   : > { %12860 = vmatmul.mubr.bf16.gmra.mrb[52].mxu0 %v11134_v16  ;;  %v6180_v16 = vsel %vm14373_vm8, %v11179_v59, %v6179_v19  ;;  %v11173_v59 = vld [vmem:[%s14204_s25 + $0x110] sm:$0x8]  ;;  %v11189_v44 = vcombine.low %v6224_v20, %v6233_v36  ;;  %v11175_v36 = vld [vmem:[%s14204_s25 + $0x120] sm:$0x8] }
 0x2dc   : > { %12876 = vmatpush3.bf16.msra.mxu0 %v14010_v24  ;;  %12863 = vmatprep.mubr.bf16.mxu0 %v11135_v1  ;;  %v6249_v24 = vshrl.u32 %v17473_v0, 16  ;;  %v6211_v1 = vsel %vm14373_vm8, %v6203_v54, %v6210_v12  ;;  %v11187_v48 = vcombine.low %v6180_v16, %v6189_v27  ;;  %v6269_v16 = vrot.slane %v6264_v52, 4 }
 0x2dd   : > { %12877 = vmatprep.subr.bf16.mxu0 %v14011_v43  ;;  %v17514_v17 = vcombine.low %v6202_v22, %v6211_v1  ;;  %v6276_v27 = vor.u32 %v6274_v7, %v6273_v25  ;;  %v17558_v1 = vrot.slane %v6284_v13, 7 }
 0x2de   : > { %v6251_v26 = vrot.slane %v6249_v24, 7  ;;  %v6246_v24 = vsel %vm14373_vm8, %v17519_v49, %v17533_v21  ;;  %v6296_v49 = vshll.u32 %v17537_v58, 16  ;;  %v6306_v21 = vshrl.u32 %v17416_v8, 16  ;;  %v14017_v58 = vld [vmem:[%s17906_s2 + $0x448] sm:$0xff]  }
 0x2df   : > { %v6277_v20 = vsel %vm14373_vm8, %v6269_v16, %v6276_v27 }
 0x2e0   : > { %12878 = vmatpush3.bf16.msra.mxu0 %v14011_v43  ;;  %v6247_v43 = vrot.slane %v17503_v57, 4  ;;  %v6254_v40 = vor.u32 %v6252_v42, %v6251_v26  ;;  %v6298_v7 = vor.u32 %v6296_v49, %v6295_v32  ;;  %v6308_v13 = vrot.slane %v6306_v21, 7 }
 0x2e1   : > { %12879 = vmatprep.subr.bf16.mxu0 %v14012_v41 }
 0x2e3   : > { %12864 = vmatmul.mubr.bf16.gmra.mrb[56].mxu0 %v11136_v62  ;;  %v6267_v62 = vor.u32 %v6265_v18, %v6264_v52 }
 0x2e4   : > { %12880 = vmatpush3.bf16.msra.mxu0 %v14012_v41  ;;  %12867 = vmatprep.mubr.bf16.mxu0 %v11137_v11  ;;  %v13241_v28 = vpop.f32.mrb[16].mxu1  ;;  %v6279_v41 = vshrl.u32 %v11173_v59, 16  ;;  %v6291_v59 = vrot.slane %v17558_v1, 4 }
 0x2e5   : > { %12881 = vmatprep.subr.bf16.mxu0 %v14013_v3  ;;  %v9722_v37 = vmul.f32 %v13241_v28, %v17510_v45  ;;  %v9636_v50 = vpop.f32.mrb[17].mxu1  ;;  %v6268_v60 = vsel %vm14373_vm8, %v11183_v2, %v6267_v62  ;;  %v11177_v62 = vld [vmem:[%s14204_s25 + $0x130] sm:$0x8] }
 0x2e6   : > { %v9720_v19 = vmul.f32 %v17510_v45, %v9636_v50  ;;  %v13242_v47 = vpop.f32.mrb[18].mxu1  ;;  %v17566_v14 = vrot.slane %v6279_v41, 11  ;;  %v11191_v25 = vcombine.low %v6268_v60, %v6277_v20  ;;  %v6299_v27 = vsel %vm14373_vm8, %v6291_v59, %v6298_v7 }
 0x2e7   : > { %v9743_v33 = vadd.f32 %v17525_v34, %v9722_v37  ;;  %v9723_v54 = vmul.f32 %v13242_v47, %v17510_v45  ;;  %v9639_v12 = vpop.f32.mrb[19].mxu1 }
 0x2e8   : > { %12882 = vmatpush3.bf16.msra.mxu0 %v14013_v3  ;;  %v9741_v30 = vadd.f32 %v17525_v34, %v9720_v19  ;;  %v9721_v0 = vmul.f32 %v17510_v45, %v9639_v12  ;;  %v6255_v3 = vsel %vm14373_vm8, %v6247_v43, %v6254_v40 }
 0x2e9   : > { %12883 = vmatprep.subr.bf16.mxu0 %v14014_v56  ;;  %v9759_v15 = vmax.f32 %v9743_v33, 0.0  ;;  %v9744_v39 = vadd.f32 %v17525_v34, %v9723_v54  ;;  %v11190_v18 = vcombine.low %v6246_v24, %v6255_v3  ;;  %v6301_v33 = vshrl.u32 %v11175_v36, 16  ;;  %v17600_v54 = vld [vmem:[%s14204_s25 + $0x138] sm:$0xf] }
 0x2ea   : > { %v9757_v11 = vmax.f32 %v9741_v30, 0.0  ;;  %v9742_v23 = vadd.f32 %v17525_v34, %v9721_v0  ;;  %v6309_v30 = vshll.u32 %v17416_v8, 16  ;;  %v6337_v8 = vshrl.u32 %v17600_v54, 16 }
 0x2eb   : > { %12868 = vmatmul.mubr.bf16.gmra.mrb[60].mxu0 %v11138_v55  ;;  %v9760_v22 = vmax.f32 %v9744_v39, 0.0  ;;  %v17574_v55 = vld [vmem:[%s14204_s25 + $0x128] sm:$0xf] }
 0x2ec   : > { %12884 = vmatpush3.bf16.msra.mxu0 %v14014_v56  ;;  %12887 = vmatprep.mubr.bf16.mxu0 %v11187_v48  ;;  %v9758_v53 = vmax.f32 %v9742_v23, 0.0  ;;  %v13245_v5 = vpop.f32.mrb[20].mxu1  ;;  %v17585_v56 = vor.u32 %v6287_v4, %v17558_v1  ;;  %v6315_v50 = vshrl.u32 %v17574_v55, 16  ;;  %v6318_v35 = vshll.u32 %v17574_v55, 16 }
 0x2ed   : > { %12885 = vmatprep.subr.bf16.mxu0 %v14015_v31  ;;  %v17568_v38 = vpack.c.bf16 %v9760_v22, %v9759_v15  ;;  %v9726_v57 = vmul.f32 %v13245_v5, %v17510_v45  ;;  %v9652_v63 = vpop.f32.mrb[21].mxu1  ;;  %v11185_v22 = vrot.slane %v6301_v33, 11  ;;  %v6313_v5 = vrot.slane %v6308_v13, 4 }
 0x2ee   : > { %v9724_v48 = vmul.f32 %v17510_v45, %v9652_v63  ;;  %v13246_v46 = vpop.f32.mrb[22].mxu1  ;;  %v17577_v29 = vpack.c.bf16 %v9758_v53, %v9757_v11  ;;  %v6290_v40 = vsel %vm14373_vm8, %v17566_v14, %v17585_v56  ;;  %v6317_v41 = vrot.slane %v6315_v50, 7  ;;  %v14019_v14 = vld [vmem:[%s17906_s2 + $0x458] sm:$0xff]  }
 0x2ef   : > { %v9747_v26 = vadd.f32 %v17525_v34, %v9726_v57  ;;  %v9727_v42 = vmul.f32 %v13246_v46, %v17510_v45  ;;  %v9655_v28 = vpop.f32.mrb[23].mxu1  ;;  %v6328_v11 = vshrl.u32 %v17434_v51, 16  ;;  %v6311_v53 = vor.u32 %v6309_v30, %v6308_v13  ;;  %v11220_v46 = vld [vmem:[%s14204_s25 + $0xc8] sm:$0xf] }
 0x2f0   : > { %12886 = vmatpush3.bf16.msra.mxu0 %v14015_v31  ;;  %v9745_v43 = vadd.f32 %v17525_v34, %v9724_v48  ;;  %v9725_v37 = vmul.f32 %v17510_v45, %v9655_v28  ;;  %v6320_v57 = vor.u32 %v6318_v35, %v6317_v41  ;;  %v6323_v63 = vshrl.u32 %v11177_v62, 16  ;;  %v14021_v35 = vld [vmem:[%s17906_s2 + $0x468] sm:$0xff]   ;;  %v11223_v62 = vld [vmem:[%s14204_s25 + $0xd8] sm:$0xf] }
 0x2f1   : > { %12903 = vmatprep.subr.bf16.mxu0 %v14016_v9  ;;  %v9763_v61 = vmax.f32 %v9747_v26, 0.0  ;;  %v9748_v52 = vadd.f32 %v17525_v34, %v9727_v42  ;;  %v6330_v55 = vrot.slane %v6328_v11, 7  ;;  %v6331_v48 = vshll.u32 %v17434_v51, 16  ;;  %v14020_v51 = vld [vmem:[%s17906_s2 + $0x460] sm:$0xff]  }
 0x2f2   : > { %v9761_v19 = vmax.f32 %v9745_v43, 0.0  ;;  %v9746_v47 = vadd.f32 %v17525_v34, %v9725_v37  ;;  %v6339_v26 = vrot.slane %v6337_v8, 7  ;;  %v6340_v42 = vshll.u32 %v17600_v54, 16 }
 0x2f3   : > { %12888 = vmatmul.mubr.bf16.vlgmr.msra.gmra.mrb[48].mxu0 %v17514_v17  ;;  %v9764_v12 = vmax.f32 %v9748_v52, 0.0  ;;  %v14018_v17 = vld [vmem:[%s17906_s2 + $0x450] sm:$0xff]   ;;  %v11192_v56 = vcombine.low %v6290_v40, %v6299_v27  ;;  %v6312_v36 = vsel %vm14373_vm8, %v11185_v22, %v6311_v53  ;;  %v6321_v37 = vsel %vm14373_vm8, %v6313_v5, %v6320_v57 }
 0x2f4   : > { %12904 = vmatpush3.bf16.msra.mxu0 %v14016_v9  ;;  %12891 = vmatprep.mubr.bf16.mxu0 %v11189_v44  ;;  %v9762_v0 = vmax.f32 %v9746_v47, 0.0  ;;  %v13249_v31 = vpop.f32.mrb[24].mxu1  ;;  %v6604_v50 = vrot.slane %v11220_v46, 6  ;;  %v11186_v59 = vrot.slane %v6323_v63, 11  ;;  %v11221_v47 = vld [vmem:[%s14204_s25 + $0xcc] sm:$0x3] }
 0x2f5   : > { %12905 = vmatprep.subr.bf16.mxu0 %v14017_v58  ;;  %v9730_v15 = vmul.f32 %v13249_v31, %v17510_v45  ;;  %v9668_v39 = vpop.f32.mrb[25].mxu1  ;;  %v17612_v2 = vpack.c.bf16 %v9764_v12, %v9763_v61  ;;  %v6335_v54 = vrot.slane %v6330_v55, 4  ;;  %v6342_v12 = vor.u32 %v6340_v42, %v6339_v26  ;;  %v14022_v53 = vld [vmem:[%s17906_s2 + $0x470] sm:$0xff]   ;;  %v11227_v63 = vld [vmem:[%s14204_s25 + $0xec] sm:$0x3] }
 0x2f6   : > { %v9728_v23 = vmul.f32 %v17510_v45, %v9668_v39  ;;  %v13250_v44 = vpop.f32.mrb[26].mxu1  ;;  %v17618_v16 = vpack.c.bf16 %v9762_v0, %v9761_v19  ;;  %v6333_v19 = vor.u32 %v6331_v48, %v6330_v55  ;;  %v11193_v0 = vcombine.low %v6312_v36, %v6321_v37  ;;  %v11232_v36 = vld [vmem:[%s14204_s25 + $0x108] sm:$0xf] }
 0x2f7   : > { %v9751_v24 = vadd.f32 %v17525_v34, %v9730_v15  ;;  %v9731_v1 = vmul.f32 %v13250_v44, %v17510_v45  ;;  %v9671_v4 = vpop.f32.mrb[27].mxu1  ;;  %v6606_v15 = vrot.slane %v6604_v50, 4  ;;  %v6607_v39 = vrot.slane %v11221_v47, 6  ;;  %v11233_v47 = vld [vmem:[%s14204_s25 + $0x10c] sm:$0x3] }
 0x2f8   : > { %12906 = vmatpush3.bf16.msra.mxu0 %v14017_v58  ;;  %v9749_v9 = vadd.f32 %v17525_v34, %v9728_v23  ;;  %v9729_v3 = vmul.f32 %v17510_v45, %v9671_v4  ;;  %v11219_v58 = vld [vmem:[%s14204_s25 + $0xc4] sm:$0xc]  ;;  %v11226_v23 = vld [vmem:[%s14204_s25 + $0xe8] sm:$0xf]  ;;  %v6334_v22 = vsel %vm14373_vm8, %v11186_v59, %v6333_v19  ;;  %v11245_v26 = vrot.slane %v11225_v10, 10  ;;  %v14027_v10 = vld [vmem:[%s17907_s3 + $0x98] sm:$0xff]  }
 0x2f9   : > { %12907 = vmatprep.subr.bf16.mxu0 %v14018_v17  ;;  %v9767_v60 = vmax.f32 %v9751_v24, 0.0  ;;  %v9752_v32 = vadd.f32 %v17525_v34, %v9731_v1  ;;  %v11243_v31 = vrot.slane %v11219_v58, 10  ;;  %v6343_v24 = vsel %vm14373_vm8, %v6335_v54, %v6342_v12  ;;  %v14024_v59 = vld [vmem:[%s17907_s3 + $0x80] sm:$0xff]  }
 0x2fa   : > { %v9765_v20 = vmax.f32 %v9749_v9, 0.0  ;;  %v9750_v49 = vadd.f32 %v17525_v34, %v9729_v3  ;;  %v6611_v1 = vrot.slane %v11223_v62, 6  ;;  %v6608_v5 = vsel %vm14337_vm5, %v6606_v15, %v6607_v39  ;;  %v11222_v9 = vld [vmem:[%s14204_s25 + $0xd4] sm:$0xc]  ;;  %v11224_v3 = vld [vmem:[%s14204_s25 + $0xdc] sm:$0x3] }
 0x2fb   : > { %12892 = vmatmul.mubr.bf16.gmra.mrb[52].mxu0 %v11190_v18  ;;  %v9768_v28 = vmax.f32 %v9752_v32, 0.0  ;;  %v11194_v32 = vcombine.low %v6334_v22, %v6343_v24  ;;  %v11244_v48 = vrot.slane %v11222_v9, 10  ;;  %v11231_v19 = vld [vmem:[%s14204_s25 + $0x104] sm:$0xc]  ;;  %v11239_v22 = vld [vmem:[%s14204_s25 + $0x12c] sm:$0x3] }
 0x2fc   : > { %12908 = vmatpush3.bf16.msra.mxu0 %v14018_v17  ;;  %12895 = vmatprep.mubr.bf16.mxu0 %v11191_v25  ;;  %v9766_v21 = vmax.f32 %v9750_v49, 0.0  ;;  %v13253_v43 = vpop.f32.mrb[28].mxu1  ;;  %v6613_v46 = vrot.slane %v6611_v1, 4  ;;  %v14023_v49 = vld [vmem:[%s17906_s2 + $0x478] sm:$0xff]  }
 0x2fd   : > { %12909 = vmatprep.subr.bf16.mxu0 %v14019_v14  ;;  %v9734_v61 = vmul.f32 %v13253_v43, %v17510_v45  ;;  %v9684_v52 = vpop.f32.mrb[29].mxu1  ;;  %v17643_v18 = vpack.c.bf16 %v9768_v28, %v9767_v60  ;;  %v6621_v28 = vrot.slane %v11227_v63, 6 }
 0x2fe   : > { %v9732_v25 = vmul.f32 %v17510_v45, %v9684_v52  ;;  %v13254_v7 = vpop.f32.mrb[30].mxu1  ;;  %v17647_v33 = vpack.c.bf16 %v9766_v21, %v9765_v20  ;;  %v6614_v20 = vrot.slane %v11224_v3, 6  ;;  %v6612_v21 = vsel %vm14337_vm5, %v11244_v48, %v6611_v1 }
 0x2ff   : > { %v9755_v40 = vadd.f32 %v17525_v34, %v9734_v61  ;;  %v9735_v13 = vmul.f32 %v13254_v7, %v17510_v45  ;;  %v9687_v30 = vpop.f32.mrb[31].mxu1  ;;  %v11230_v61 = vld [vmem:[%s14204_s25 + $0xfc] sm:$0x3]  ;;  %v6632_v52 = vrot.slane %v11232_v36, 6  ;;  %v6649_v3 = vrot.slane %v11239_v22, 6 }
 0x300   : > { %12910 = vmatpush3.bf16.msra.mxu0 %v14019_v14  ;;  %v9753_v17 = vadd.f32 %v17525_v34, %v9732_v25  ;;  %v9733_v41 = vmul.f32 %v17510_v45, %v9687_v30  ;;  %v6618_v14 = vrot.slane %v11226_v23, 6  ;;  %v6615_v43 = vsel %vm14337_vm5, %v6613_v46, %v6614_v20  ;;  %v11236_v23 = vld [vmem:[%s14204_s25 + $0x11c] sm:$0x3]  ;;  %v11240_v20 = vld [vmem:[%s14204_s25 + $0x134] sm:$0xc] }
 0x301   : > { %12911 = vmatprep.subr.bf16.mxu0 %v14020_v51  ;;  %v9771_v11 = vmax.f32 %v9755_v40, 0.0  ;;  %v9756_v8 = vadd.f32 %v17525_v34, %v9735_v13  ;;  %v11252_v25 = vcombine.low %v6612_v21, %v6615_v43  ;;  %v6628_v40 = vrot.slane %v11230_v61, 6  ;;  %v14032_v61 = vld [vmem:[%s17907_s3 + $0xc0] sm:$0xff]  }
 0x302   : > { %v9769_v44 = vmax.f32 %v9753_v17, 0.0  ;;  %v9754_v27 = vadd.f32 %v17525_v34, %v9733_v41  ;;  %v6605_v34 = vsel %vm14337_vm5, %v11243_v31, %v6604_v50  ;;  %v6620_v42 = vrot.slane %v6618_v14, 4  ;;  %v11228_v50 = vld [vmem:[%s14204_s25 + $0xf4] sm:$0xc]  ;;  %v11235_v31 = vld [vmem:[%s14204_s25 + $0x118] sm:$0xf] }
 0x303   : > { %12896 = vmatmul.mubr.bf16.gmra.mrb[56].mxu0 %v11192_v56  ;;  %v9772_v45 = vmax.f32 %v9756_v8, 0.0  ;;  %v11251_v55 = vcombine.low %v6605_v34, %v6608_v5  ;;  %v11229_v56 = vld [vmem:[%s14204_s25 + $0xf8] sm:$0xf]  ;;  %v6619_v37 = vsel %vm14337_vm5, %v11245_v26, %v6618_v14  ;;  %v11246_v54 = vrot.slane %v11228_v50, 10  ;;  %v14025_v17 = vld [vmem:[%s17907_s3 + $0x88] sm:$0xff]   ;;  %v14028_v26 = vld [vmem:[%s17907_s3 + $0xa0] sm:$0xff]  }
 0x304   : > { %12912 = vmatpush3.bf16.msra.mxu0 %v14020_v51  ;;  %12899 = vmatprep.mubr.bf16.mxu0 %v11193_v0  ;;  %v9770_v4 = vmax.f32 %v9754_v27, 0.0  ;;  %v6625_v51 = vrot.slane %v11229_v56, 6  ;;  %v6622_v58 = vsel %vm14337_vm5, %v6620_v42, %v6621_v28  ;;  %v11247_v13 = vrot.slane %v11231_v19, 10  ;;  %v11238_v41 = vld [vmem:[%s14204_s25 + $0x128] sm:$0xf]  ;;  %v14026_v27 = vld [vmem:[%s17907_s3 + $0x90] sm:$0xff]  }
 0x305   : > { %12913 = vmatprep.subr.bf16.mxu0 %v14021_v35  ;;  %v17673_v57 = vpack.c.bf16 %v9772_v45, %v9771_v11  ;;  %v11253_v7 = vcombine.low %v6619_v37, %v6622_v58  ;;  %v6634_v30 = vrot.slane %v6632_v52, 4  ;;  %v6635_v0 = vrot.slane %v11233_v47, 6  ;;  %v11234_v8 = vld [vmem:[%s14204_s25 + $0x114] sm:$0xc]  ;;  %v11237_v45 = vld [vmem:[%s14204_s25 + $0x124] sm:$0xc] }
 0x306   : > { %v17677_v60 = vpack.c.bf16 %v9770_v4, %v9769_v44  ;;  %v6627_v12 = vrot.slane %v6625_v51, 4  ;;  %v6639_v39 = vrot.slane %v11235_v31, 6  ;;  %v6633_v62 = vsel %vm14337_vm5, %v11247_v13, %v6632_v52  ;;  %v11241_v14 = vld [vmem:[%s14204_s25 + $0x138] sm:$0xf]  ;;  %v14029_v58 = vld [vmem:[%s17907_s3 + $0xa8] sm:$0xff]   ;;  %v14030_v50 = vld [vmem:[%s17907_s3 + $0xb0] sm:$0xff]  }
 0x307   : > { %v6636_v11 = vsel %vm14337_vm5, %v6634_v30, %v6635_v0  ;;  %v6646_v44 = vrot.slane %v11238_v41, 6  ;;  %v11248_v4 = vrot.slane %v11234_v8, 10  ;;  %v6642_v34 = vrot.slane %v11236_v23, 6  ;;  %v17755_v52 = vld [vmem:[%s17908_s4 + $0x2] ss:$0 sm:$0xff] }
 0x308   : > { %12914 = vmatpush3.bf16.msra.mxu0 %v14021_v35  ;;  %v6626_v35 = vsel %vm14337_vm5, %v11246_v54, %v6625_v51  ;;  %v6629_v15 = vsel %vm14337_vm5, %v6627_v12, %v6628_v40  ;;  %v11255_v1 = vcombine.low %v6633_v62, %v6636_v11  ;;  %v11249_v5 = vrot.slane %v11237_v45, 10  ;;  %v17760_v19 = vld [vmem:[%s17909_s5 + $0x2] ss:$0 sm:$0xff] }
 0x309   : > { %12915 = vmatprep.subr.bf16.mxu0 %v14022_v53  ;;  %v11254_v24 = vcombine.low %v6626_v35, %v6629_v15  ;;  %v6648_v9 = vrot.slane %v6646_v44, 4  ;;  %v6640_v63 = vsel %vm14337_vm5, %v11248_v4, %v6639_v39  ;;  %v11250_v56 = vrot.slane %v11240_v20, 10  ;;  %v14033_v4 = vld [vmem:[%s17907_s3 + $0xc8] sm:$0xff]  }
 0x30a   : > { %v6647_v48 = vsel %vm14337_vm5, %v11249_v5, %v6646_v44 }
 0x30b   : > { %12900 = vmatmul.mubr.bf16.gmra.mrb[60].mxu0 %v11194_v32  ;;  %v6650_v46 = vsel %vm14337_vm5, %v6648_v9, %v6649_v3 }
 0x30c   : > { %12916 = vmatpush3.bf16.msra.mxu0 %v14022_v53  ;;  %12919 = vmatprep.mubr.bf16.mxu0 %v11251_v55  ;;  %v6641_v53 = vrot.slane %v6639_v39, 4  ;;  %v6653_v55 = vrot.slane %v11241_v14, 6  ;;  %v11257_v28 = vcombine.low %v6647_v48, %v6650_v46 }
 0x30d   : > { %12917 = vmatprep.subr.bf16.mxu0 %v14023_v49 }
 0x30e   : > { %v6643_v32 = vsel %vm14337_vm5, %v6641_v53, %v6642_v34  ;;  %v6655_v36 = vrot.slane %v6653_v55, 4  ;;  %v6654_v43 = vsel %vm14337_vm5, %v11250_v56, %v6653_v55 }
 0x30f   : > { %v11256_v42 = vcombine.low %v6640_v63, %v6643_v32 }
 0x310   : > { %12918 = vmatpush3.bf16.msra.mxu0 %v14023_v49  ;;  %v11242_v49 = vld [vmem:[%s14204_s25 + $0x13c] sm:$0x3] }
 0x311   : > { %12935 = vmatprep.subr.bf16.mxu0 %v14024_v59  ;;  %v6656_v21 = vrot.slane %v11242_v49, 6 }
 0x313   : > { %12920 = vmatmul.mubr.bf16.vlgmr.msra.gmra.mrb[48].mxu0 %v11252_v25  ;;  %v6657_v51 = vsel %vm14337_vm5, %v6655_v36, %v6656_v21  ;;  %v14035_v21 = vld [vmem:[%s17907_s3 + $0xd8] sm:$0xff]  }
 0x314   : > { %12923 = vmatprep.mubr.bf16.mxu0 %v11253_v7  ;;  %12936 = vmatpush3.bf16.msra.mxu0 %v14024_v59  ;;  %v11258_v37 = vcombine.low %v6654_v43, %v6657_v51 }
 0x315   : > { %12937 = vmatprep.subr.bf16.mxu0 %v14025_v17 }
 0x318   : > { %12938 = vmatpush3.bf16.msra.mxu0 %v14025_v17 }
 0x319   : > { %12939 = vmatprep.subr.bf16.mxu0 %v14026_v27 }
 0x31b   : > { %12924 = vmatmul.mubr.bf16.gmra.mrb[52].mxu0 %v11254_v24 }
 0x31c   : > { %12927 = vmatprep.mubr.bf16.mxu0 %v11255_v1  ;;  %12940 = vmatpush3.bf16.msra.mxu0 %v14026_v27 }
 0x31d   : > { %12941 = vmatprep.subr.bf16.mxu0 %v14027_v10 }
 0x320   : > { %12942 = vmatpush3.bf16.msra.mxu0 %v14027_v10  ;;  %v14034_v10 = vld [vmem:[%s17907_s3 + $0xd0] sm:$0xff]  }
 0x321   : > { %12943 = vmatprep.subr.bf16.mxu0 %v14028_v26 }
 0x323   : > { %12928 = vmatmul.mubr.bf16.gmra.mrb[56].mxu0 %v11256_v42 }
 0x324   : > { %12931 = vmatprep.mubr.bf16.mxu0 %v11257_v28  ;;  %12944 = vmatpush3.bf16.msra.mxu0 %v14028_v26 }
 0x325   : > { %12945 = vmatprep.subr.bf16.mxu0 %v14029_v58 }
 0x328   : > { %12946 = vmatpush3.bf16.msra.mxu0 %v14029_v58 }
 0x329   : > { %12947 = vmatprep.subr.bf16.mxu0 %v14030_v50 }
 0x32b   : > { %12932 = vmatmul.mubr.bf16.gmra.mrb[60].mxu0 %v11258_v37 }
 0x32c   : > { %12948 = vmatpush3.bf16.msra.mxu0 %v14030_v50 }
 0x32d   : > { %12949 = vmatprep.subr.bf16.mxu0 %v14031_v6 }
 0x330   : > { %12950 = vmatpush3.bf16.msra.mxu0 %v14031_v6 }
 0x331   : > { %13255 = vmatprep.subr.bf16.mxu0 %v14032_v61 }
 0x3e6   : > { %v12921_v59 = vpop.f32.mrb[48].mxu0 }
 0x3e7   : > { %v6858_v47 = vmul.f32 %v12921_v59, %v17755_v52  ;;  %v6772_v25 = vpop.f32.mrb[49].mxu0 }
 0x3e8   : > { %v6856_v7 = vmul.f32 %v17755_v52, %v6772_v25  ;;  %v12922_v54 = vpop.f32.mrb[50].mxu0 }
 0x3e9   : > { %v6879_v12 = vadd.f32 %v17760_v19, %v6858_v47  ;;  %v6859_v40 = vmul.f32 %v12922_v54, %v17755_v52  ;;  %v6775_v13 = vpop.f32.mrb[51].mxu0 }
 0x3ea   : > { %v6877_v30 = vadd.f32 %v17760_v19, %v6856_v7  ;;  %v6857_v0 = vmul.f32 %v17755_v52, %v6775_v13 }
 0x3eb   : > { %v6880_v31 = vadd.f32 %v17760_v19, %v6859_v40  ;;  %v6895_v41 = vmax.f32 %v6879_v12, 0.0 }
 0x3ec   : > { %v6878_v17 = vadd.f32 %v17760_v19, %v6857_v0  ;;  %v6893_v15 = vmax.f32 %v6877_v30, 0.0 }
 0x3ed   : > { %v6896_v35 = vmax.f32 %v6880_v31, 0.0 }
 0x3ee   : > { %v6894_v39 = vmax.f32 %v6878_v17, 0.0  ;;  %v12925_v62 = vpop.f32.mrb[52].mxu0 }
 0x3ef   : > { %v6910_v11 = vpack.c.bf16 %v6896_v35, %v6895_v41  ;;  %v6862_v8 = vmul.f32 %v12925_v62, %v17755_v52  ;;  %v6788_v23 = vpop.f32.mrb[53].mxu0  ;;  %v14037_v41 = vld [vmem:[%s17907_s3 + $0xe8] sm:$0xff]  }
 0x3f0   : > { %v6860_v44 = vmul.f32 %v17755_v52, %v6788_v23  ;;  %v12926_v27 = vpop.f32.mrb[54].mxu0  ;;  %v6909_v45 = vpack.c.bf16 %v6894_v39, %v6893_v15  ;;  %v14038_v23 = vld [vmem:[%s17907_s3 + $0xf0] sm:$0xff]  }
 0x3f1   : > { %v6883_v22 = vadd.f32 %v17760_v19, %v6862_v8  ;;  %v6863_v24 = vmul.f32 %v12926_v27, %v17755_v52  ;;  %v6791_v1 = vpop.f32.mrb[55].mxu0 }
 0x3f2   : > { %v6881_v53 = vadd.f32 %v17760_v19, %v6860_v44  ;;  %v6861_v34 = vmul.f32 %v17755_v52, %v6791_v1  ;;  %12951 = vmatprep.mubr.bf16.mxu0 %v6909_v45 }
 0x3f3   : > { %v6884_v5 = vadd.f32 %v17760_v19, %v6863_v24  ;;  %12952 = vmatmul.mubr.bf16.vlgmr.msra.gmra.mrb[32].mxu0 %v6910_v11  ;;  %v6899_v3 = vmax.f32 %v6883_v22, 0.0 }
 0x3f4   : > { %v6882_v9 = vadd.f32 %v17760_v19, %v6861_v34  ;;  %13256 = vmatpush3.bf16.msra.mxu0 %v14032_v61  ;;  %v6897_v63 = vmax.f32 %v6881_v53, 0.0  ;;  %v14036_v61 = vld [vmem:[%s17907_s3 + $0xe0] sm:$0xff]  }
 0x3f5   : > { %v6900_v14 = vmax.f32 %v6884_v5, 0.0  ;;  %13257 = vmatprep.subr.bf16.mxu0 %v14033_v4 }
 0x3f6   : > { %v6898_v32 = vmax.f32 %v6882_v9, 0.0  ;;  %v12929_v55 = vpop.f32.mrb[56].mxu0 }
 0x3f7   : > { %v6866_v48 = vmul.f32 %v12929_v55, %v17755_v52  ;;  %v6804_v46 = vpop.f32.mrb[57].mxu0  ;;  %v6912_v20 = vpack.c.bf16 %v6900_v14, %v6899_v3 }
 0x3f8   : > { %v6864_v49 = vmul.f32 %v17755_v52, %v6804_v46  ;;  %v12930_v26 = vpop.f32.mrb[58].mxu0  ;;  %13258 = vmatpush3.bf16.msra.mxu0 %v14033_v4  ;;  %v6911_v42 = vpack.c.bf16 %v6898_v32, %v6897_v63 }
 0x3f9   : > { %v6887_v28 = vadd.f32 %v17760_v19, %v6866_v48  ;;  %v6867_v56 = vmul.f32 %v12930_v26, %v17755_v52  ;;  %v6807_v36 = vpop.f32.mrb[59].mxu0  ;;  %13259 = vmatprep.subr.bf16.mxu0 %v14034_v10 }
 0x3fa   : > { %v6885_v43 = vadd.f32 %v17760_v19, %v6864_v49  ;;  %v6865_v51 = vmul.f32 %v17755_v52, %v6807_v36  ;;  %12955 = vmatprep.mubr.bf16.mxu0 %v6911_v42 }
 0x3fb   : > { %v6888_v37 = vadd.f32 %v17760_v19, %v6867_v56  ;;  %12956 = vmatmul.mubr.bf16.gmra.mrb[36].mxu0 %v6912_v20  ;;  %v6903_v50 = vmax.f32 %v6887_v28, 0.0 }
 0x3fc   : > { %v6886_v58 = vadd.f32 %v17760_v19, %v6865_v51  ;;  %13260 = vmatpush3.bf16.msra.mxu0 %v14034_v10  ;;  %v6901_v59 = vmax.f32 %v6885_v43, 0.0 }
 0x3fd   : > { %v6904_v6 = vmax.f32 %v6888_v37, 0.0  ;;  %13261 = vmatprep.subr.bf16.mxu0 %v14035_v21 }
 0x3fe   : > { %v6902_v47 = vmax.f32 %v6886_v58, 0.0  ;;  %v12933_v25 = vpop.f32.mrb[60].mxu0 }
 0x3ff   : > { %v6870_v7 = vmul.f32 %v12933_v25, %v17755_v52  ;;  %v6820_v54 = vpop.f32.mrb[61].mxu0  ;;  %v6914_v12 = vpack.c.bf16 %v6904_v6, %v6903_v50 }
 0x400   : > { %v6868_v40 = vmul.f32 %v17755_v52, %v6820_v54  ;;  %v12934_v13 = vpop.f32.mrb[62].mxu0  ;;  %13262 = vmatpush3.bf16.msra.mxu0 %v14035_v21  ;;  %v6913_v30 = vpack.c.bf16 %v6902_v47, %v6901_v59 }
 0x401   : > { %v6891_v0 = vadd.f32 %v17760_v19, %v6870_v7  ;;  %v6871_v31 = vmul.f32 %v12934_v13, %v17755_v52  ;;  %v6823_v17 = vpop.f32.mrb[63].mxu0  ;;  %13263 = vmatprep.subr.bf16.mxu0 %v14036_v61 }
 0x402   : > { %v6889_v35 = vadd.f32 %v17760_v19, %v6868_v40  ;;  %v6869_v15 = vmul.f32 %v17755_v52, %v6823_v17  ;;  %12959 = vmatprep.mubr.bf16.mxu0 %v6913_v30  ;;  %v14039_v52 = vld [vmem:[%s17907_s3 + $0xf8] sm:$0xff]  }
 0x403   : > { %v6892_v39 = vadd.f32 %v17760_v19, %v6871_v31  ;;  %12960 = vmatmul.mubr.bf16.gmra.mrb[40].mxu0 %v6914_v12  ;;  %v6907_v11 = vmax.f32 %v6891_v0, 0.0 }
 0x404   : > { %v6890_v62 = vadd.f32 %v17760_v19, %v6869_v15  ;;  %13264 = vmatpush3.bf16.msra.mxu0 %v14036_v61  ;;  %v6905_v44 = vmax.f32 %v6889_v35, 0.0 }
 0x405   : > { %v6908_v8 = vmax.f32 %v6892_v39, 0.0  ;;  %13265 = vmatprep.subr.bf16.mxu0 %v14037_v41 }
 0x406   : > { %v6906_v27 = vmax.f32 %v6890_v62, 0.0 }
 0x407   : > { %v6916_v45 = vpack.c.bf16 %v6908_v8, %v6907_v11 }
 0x408   : > { %13266 = vmatpush3.bf16.msra.mxu0 %v14037_v41  ;;  %v6915_v22 = vpack.c.bf16 %v6906_v27, %v6905_v44 }
 0x409   : > { %13267 = vmatprep.subr.bf16.mxu0 %v14038_v23 }
 0x40a   : > { %12963 = vmatprep.mubr.bf16.mxu0 %v6915_v22 }
 0x40b   : > { %12964 = vmatmul.mubr.bf16.gmra.mrb[44].mxu0 %v6916_v45 }
 0x40c   : > { %13268 = vmatpush3.bf16.msra.mxu0 %v14038_v23  ;;  %13271 = vmatprep.mubr.bf16.mxu0 %v17577_v29 }
 0x40d   : > { %13269 = vmatprep.subr.bf16.mxu0 %v14039_v52 }
 0x410   : > { %13270 = vmatpush3.bf16.msra.mxu0 %v14039_v52 }
 0x413   : > { %13272 = vmatmul.mubr.bf16.vlgmr.msra.gmra.mrb[32].mxu0 %v17568_v38  ;;  %v17832_v38 = vld [vmem:[%s17910_s6] ss:$0 sm:$0xff] }
 0x414   : > { %13275 = vmatprep.mubr.bf16.mxu0 %v17618_v16 }
 0x41b   : > { %13276 = vmatmul.mubr.bf16.gmra.mrb[36].mxu0 %v17612_v2  ;;  %v17834_v2 = vld [vmem:[%s333_s15] ss:$0 sm:$0xff] }
 0x41c   : > { %13279 = vmatprep.mubr.bf16.mxu0 %v17647_v33 }
 0x423   : > { %13280 = vmatmul.mubr.bf16.gmra.mrb[40].mxu0 %v17643_v18 }
 0x424   : > { %13283 = vmatprep.mubr.bf16.mxu0 %v17677_v60 }
 0x42b   : > { %13284 = vmatmul.mubr.bf16.gmra.mrb[44].mxu0 %v17673_v57 }
 0x4e6   : > { %v13273_v29 = vpop.f32.mrb[32].mxu0 }
 0x4e7   : > { %v9968_v16 = vmul.f32 %v13273_v29, %v17832_v38  ;;  %v9880_v18 = vpop.f32.mrb[33].mxu0 }
 0x4e8   : > { %v9966_v33 = vmul.f32 %v17832_v38, %v9880_v18  ;;  %v13274_v57 = vpop.f32.mrb[34].mxu0 }
 0x4e9   : > { %v9991_v60 = vadd.f32 %v17834_v2, %v9968_v16  ;;  %v9969_v19 = vmul.f32 %v13274_v57, %v17832_v38  ;;  %v9883_v24 = vpop.f32.mrb[35].mxu0 }
 0x4ea   : > { %v9989_v1 = vadd.f32 %v17834_v2, %v9966_v33  ;;  %v9967_v4 = vmul.f32 %v17832_v38, %v9883_v24 }
 0x4eb   : > { %v10007_v53 = vmax.f32 %v9991_v60, 0.0  ;;  %v9992_v34 = vadd.f32 %v17834_v2, %v9969_v19 }
 0x4ec   : > { %v10005_v5 = vmax.f32 %v9989_v1, 0.0  ;;  %v9990_v9 = vadd.f32 %v17834_v2, %v9967_v4 }
 0x4ed   : > { %10023 = vst [vmem:[%s17843_s20 + $0x10] sm:$0xff] %v10007_v53  ;;  %v10008_v3 = vmax.f32 %v9992_v34, 0.0 }
 0x4ee   : > { %10021 = vst [vmem:[%s17843_s20] sm:$0xff] %v10005_v5  ;;  %v10006_v14 = vmax.f32 %v9990_v9, 0.0  ;;  %v13277_v10 = vpop.f32.mrb[36].mxu0 }
 0x4ef   : > { %10024 = vst [vmem:[%s17843_s20 + $0x18] sm:$0xff] %v10008_v3  ;;  %v9972_v63 = vmul.f32 %v13277_v10, %v17832_v38  ;;  %v9896_v32 = vpop.f32.mrb[37].mxu0 }
 0x4f0   : > { %10022 = vst [vmem:[%s17843_s20 + $0x8] sm:$0xff] %v10006_v14  ;;  %v9970_v55 = vmul.f32 %v17832_v38, %v9896_v32  ;;  %v13278_v48 = vpop.f32.mrb[38].mxu0 }
 0x4f1   : > { %v9995_v46 = vadd.f32 %v17834_v2, %v9972_v63  ;;  %v9973_v20 = vmul.f32 %v13278_v48, %v17832_v38  ;;  %v9899_v49 = vpop.f32.mrb[39].mxu0 }
 0x4f2   : > { %v9993_v26 = vadd.f32 %v17834_v2, %v9970_v55  ;;  %v9971_v42 = vmul.f32 %v17832_v38, %v9899_v49 }
 0x4f3   : > { %v10011_v28 = vmax.f32 %v9995_v46, 0.0  ;;  %v9996_v56 = vadd.f32 %v17834_v2, %v9973_v20 }
 0x4f4   : > { %v10009_v36 = vmax.f32 %v9993_v26, 0.0  ;;  %v9994_v21 = vadd.f32 %v17834_v2, %v9971_v42 }
 0x4f5   : > { %10027 = vst [vmem:[%s17843_s20 + $0x30] sm:$0xff] %v10011_v28  ;;  %v10012_v43 = vmax.f32 %v9996_v56, 0.0 }
 0x4f6   : > { %10025 = vst [vmem:[%s17843_s20 + $0x20] sm:$0xff] %v10009_v36  ;;  %v10010_v51 = vmax.f32 %v9994_v21, 0.0  ;;  %v13281_v37 = vpop.f32.mrb[40].mxu0 }
 0x4f7   : > { %10028 = vst [vmem:[%s17843_s20 + $0x38] sm:$0xff] %v10012_v43  ;;  %v9976_v58 = vmul.f32 %v13281_v37, %v17832_v38  ;;  %v9912_v50 = vpop.f32.mrb[41].mxu0 }
 0x4f8   : > { %10026 = vst [vmem:[%s17843_s20 + $0x28] sm:$0xff] %v10010_v51  ;;  %v9974_v6 = vmul.f32 %v17832_v38, %v9912_v50  ;;  %v13282_v61 = vpop.f32.mrb[42].mxu0 }
 0x4f9   : > { %v9999_v59 = vadd.f32 %v17834_v2, %v9976_v58  ;;  %v9977_v47 = vmul.f32 %v13282_v61, %v17832_v38  ;;  %v9915_v25 = vpop.f32.mrb[43].mxu0 }
 0x4fa   : > { %v9997_v7 = vadd.f32 %v17834_v2, %v9974_v6  ;;  %v9975_v54 = vmul.f32 %v17832_v38, %v9915_v25 }
 0x4fb   : > { %v10015_v12 = vmax.f32 %v9999_v59, 0.0  ;;  %v10000_v40 = vadd.f32 %v17834_v2, %v9977_v47 }
 0x4fc   : > { %v10013_v13 = vmax.f32 %v9997_v7, 0.0  ;;  %v9998_v30 = vadd.f32 %v17834_v2, %v9975_v54 }
 0x4fd   : > { %10031 = vst [vmem:[%s17843_s20 + $0x50] sm:$0xff] %v10015_v12  ;;  %v10016_v0 = vmax.f32 %v10000_v40, 0.0 }
 0x4fe   : > { %10029 = vst [vmem:[%s17843_s20 + $0x40] sm:$0xff] %v10013_v13  ;;  %v10014_v31 = vmax.f32 %v9998_v30, 0.0  ;;  %v13285_v17 = vpop.f32.mrb[44].mxu0 }
 0x4ff   : > { %10032 = vst [vmem:[%s17843_s20 + $0x58] sm:$0xff] %v10016_v0  ;;  %v9980_v41 = vmul.f32 %v13285_v17, %v17832_v38  ;;  %v9928_v35 = vpop.f32.mrb[45].mxu0 }
 0x500   : > { %10030 = vst [vmem:[%s17843_s20 + $0x48] sm:$0xff] %v10014_v31  ;;  %v9978_v15 = vmul.f32 %v17832_v38, %v9928_v35  ;;  %v13286_v39 = vpop.f32.mrb[46].mxu0 }
 0x501   : > { %v10003_v62 = vadd.f32 %v17834_v2, %v9980_v41  ;;  %v9981_v11 = vmul.f32 %v13286_v39, %v17832_v38  ;;  %v9931_v8 = vpop.f32.mrb[47].mxu0 }
 0x502   : > { %v10001_v23 = vadd.f32 %v17834_v2, %v9978_v15  ;;  %v9979_v44 = vmul.f32 %v17832_v38, %v9931_v8 }
 0x503   : > { %v10019_v27 = vmax.f32 %v10003_v62, 0.0  ;;  %v10004_v45 = vadd.f32 %v17834_v2, %v9981_v11 }
 0x504   : > { %v10017_v22 = vmax.f32 %v10001_v23, 0.0  ;;  %v10002_v52 = vadd.f32 %v17834_v2, %v9979_v44 }
 0x505   : > { %10035 = vst [vmem:[%s17843_s20 + $0x70] sm:$0xff] %v10019_v27  ;;  %v10020_v29 = vmax.f32 %v10004_v45, 0.0 }
 0x506   : > { %10033 = vst [vmem:[%s17843_s20 + $0x60] sm:$0xff] %v10017_v22  ;;  %v10018_v16 = vmax.f32 %v10002_v52, 0.0 }
 0x507   : > { %10036 = vst [vmem:[%s17843_s20 + $0x78] sm:$0xff] %v10020_v29 }
 0x508   : > { %10034 = vst [vmem:[%s17843_s20 + $0x68] sm:$0xff] %v10018_v16 }
 0x509 PF: > { %s18_s9 = sadd.s32 1, %s14106_s9   ;;  %s18040_s27 = smov %s14098_s29 }
 0x50a   : > { %p15_p7 = scmp.ge.s32.totalorder %s18_s9, 6   ;;  %s18041_s28 = smov %s14102_s30 }
 0x50b   : > { %s18042_s29 = smov %s18045_s10  ;;  %s18043_s30 = smov %s18049_s11 }
 0x50c   :  { %17 = sbr.rel (!%p15_p7) target bundleno = 3 (0x3), region = 121 }

</bundles_post_ra>
